<compile_context>
chip_gen: v6e
topology: v6e:2x2x1
jax: 0.10.0
libtpu: 0.0.40
codegen_flags: <defaults>
</compile_context>

<pallas_src>
import functools

import jax
import jax.numpy as jnp
import numpy as np
from jax import lax
from jax.experimental import pallas as pl
from jax.experimental.pallas import tpu as pltpu

LANE = 128       # lane width; channels padded to this
XPAD_L = 16      # xpad left pad = one full bf16 sublane tile -> tile-aligned DMA dst
HPAD_L = 2       # hpad left pad (vector stores handle any offset; 2 keeps bf16 pairs aligned)
_BF16 = jnp.bfloat16


def _round_up(x, m):
    return ((x + m - 1) // m) * m


def _tpu_defaults():
    """(kw_fuse, vmem_capacity_bytes) with conservative fallbacks."""
    kind = ""
    try:
        kind = jax.devices()[0].device_kind.lower()
    except Exception:
        pass
    try:
        vmem_cap = int(pltpu.get_tpu_info().vmem_capacity_bytes)
    except Exception:
        vmem_cap = 64 * 1024 * 1024                 # v7x-conservative default
    # 128-deep MXUs (v2-v5): per-tap K=C dots already saturate the MXU and skip
    # the kw-concat copies.  256-deep MXUs (v6e/v7x): per-kh K=3*C dots.
    kw_fuse = 1 if any(s in kind for s in ("v2", "v3", "v4", "v5")) else 3
    return kw_fuse, vmem_cap


def _footprint_bytes(H, W, TH, Cip, Cop, downsampling):
    """Generous per-step VMEM estimate for tile-size / vmem-limit selection."""
    wxp = _round_up(XPAD_L + W + 1, 16)
    whp = _round_up(HPAD_L + W + 1, 16)
    th2 = TH + 2
    xpad = (H + 4) * wxp * Cip * 2
    hpad = th2 * whp * Cop * 2
    outb = 2 * TH * W * Cop * 2                              # bf16, double-buffered
    wts = 2 * 2 * (9 * Cip * Cop + 9 * Cop * Cop + (Cip * Cop if downsampling else 0))
    tmp = th2 * W * (3 * Cip * 2 + 8 * Cop) + TH * W * (3 * Cop * 2 + 12 * Cop + 4 * Cip)
    return xpad + hpad + outb + wts + tmp


def _pick_row_tile(H, W, Cip, Cop, N, downsampling, vmem_cap):
    budget = int(0.55 * vmem_cap)
    divisors = [d for d in range(H, 0, -1) if H % d == 0]
    if N == 1:
        # With a single image prefer >= 2 row blocks so the pipeline has overlap.
        divisors = sorted(divisors, key=lambda d: (d == H, -d))
    for th in divisors:
        if _footprint_bytes(H, W, th, Cip, Cop, downsampling) <= budget:
            return th
    return 1


# ------------------------------- kernel -------------------------------------

def _basic_block_kernel(*refs, H, W, TH, Cip, Cop, downsampling, kw_fuse):
    """One (batch, row-block) grid step.

    refs (downsampling=True):
      x_any    : (N, H, W, Cip)     bf16  whole batch, left in HBM (pl.ANY)
      w1_ref   : (3, 3*Cip, Cop)    bf16  conv1 weights, BN1 scale folded
      w2_ref   : (3, 3*Cop, Cop)    bf16  conv2 weights, BN2 scale folded
      wd_ref   : (Cip, Cop)         bf16  1x1 projection, BNd scale folded
      sb_ref   : (2|3, Cop)         f32   packed biases: b1, b2[, bd]
      o_ref    : (TH, W, Cop)       bf16  output row block (lane-dense)
    scratch:
      xpad_ref : (H+4, WXP, Cip)    bf16  zero-bordered copy of the input image
      hpad_ref : (TH+2, WHP, Cop)   bf16  conv1 activations (+1-row halo)
      dma_sem  : DMA semaphore for the HBM->xpad image copy
    """
    if downsampling:
        (x_any, w1_ref, w2_ref, wd_ref, sb_ref,
         o_ref, xpad_ref, hpad_ref, dma_sem) = refs
    else:
        (x_any, w1_ref, w2_ref, sb_ref,
         o_ref, xpad_ref, hpad_ref, dma_sem) = refs
        wd_ref = None

    TH2 = TH + 2
    b = pl.program_id(0)
    r = pl.program_id(1)
    row0 = pl.multiple_of(r * TH, TH)

    # ---- once per image: zero the conv halo border of xpad, then DMA the image
    #      HBM -> xpad interior (tile-aligned window; no vld/vst copy of x).
    @pl.when(r == 0)
    def _():
        zrow = jnp.zeros((2, W + 2, Cip), _BF16)
        xpad_ref[0:2, XPAD_L - 1:XPAD_L + W + 1, :] = zrow
        xpad_ref[H + 2:H + 4, XPAD_L - 1:XPAD_L + W + 1, :] = zrow
        zcol = jnp.zeros((H + 4, 1, Cip), _BF16)
        xpad_ref[:, XPAD_L - 1:XPAD_L, :] = zcol
        xpad_ref[:, XPAD_L + W:XPAD_L + W + 1, :] = zcol
        cp = pltpu.make_async_copy(
            x_any.at[b],
            xpad_ref.at[2:H + 2, XPAD_L:XPAD_L + W, :],
            dma_sem)
        cp.start()
        cp.wait()
        # hpad column borders stay zero across the row blocks of this image.
        zhc = jnp.zeros((TH2, 1, Cop), _BF16)
        hpad_ref[:, HPAD_L - 1:HPAD_L, :] = zhc
        hpad_ref[:, HPAD_L + W:HPAD_L + W + 1, :] = zhc

    def conv3x3(slab_fn, w_ref, rows, cin):
        """slab_fn(kh) -> (rows, W+2, cin) bf16 window (already includes +/-1 col halo).
        w_ref: (3, 3*cin, Cop). Returns f32 (rows*W, Cop)."""
        acc = None
        for kh in range(3):
            slab = slab_fn(kh)
            if kw_fuse == 3:                       # per-kh fused dot, K = 3*cin
                patch = jnp.concatenate(
                    [slab[:, kw:kw + W, :] for kw in range(3)],
                    axis=-1).reshape(rows * W, 3 * cin)
                part = jnp.dot(patch, w_ref[kh],
                               preferred_element_type=jnp.float32)
                acc = part if acc is None else acc + part
            else:                                  # per-tap dots, K = cin (v2-v5)
                wk = w_ref[kh]                     # (3*cin, Cop)
                for kw in range(3):
                    patch = slab[:, kw:kw + W, :].reshape(rows * W, cin)
                    part = jnp.dot(patch, wk[kw * cin:(kw + 1) * cin, :],
                                   preferred_element_type=jnp.float32)
                    acc = part if acc is None else acc + part
        return acc

    # ---- conv1 (+folded BN1 + ReLU) over TH+2 rows (1-row halo for conv2).
    acc1 = conv3x3(
        lambda kh: xpad_ref[pl.ds(row0 + kh, TH2), XPAD_L - 1:XPAD_L + W + 1, :],
        w1_ref, TH2, Cip)
    h = jnp.maximum(acc1 + sb_ref[0:1, :], 0.0)
    hpad_ref[:, HPAD_L:HPAD_L + W, :] = h.reshape(TH2, W, Cop).astype(_BF16)

    # Halo rows that fall outside the image are conv2 *padding* (zeros), not
    # conv1 evaluated over padding rows.
    @pl.when(row0 == 0)
    def _():
        hpad_ref[0:1, HPAD_L - 1:HPAD_L + W + 1, :] = jnp.zeros((1, W + 2, Cop), _BF16)

    @pl.when(row0 + TH == H)
    def _():
        hpad_ref[TH + 1:TH + 2, HPAD_L - 1:HPAD_L + W + 1, :] = (
            jnp.zeros((1, W + 2, Cop), _BF16))

    # ---- conv2 (+folded BN2)
    acc2 = conv3x3(
        lambda kh: hpad_ref[kh:kh + TH, HPAD_L - 1:HPAD_L + W + 1, :],
        w2_ref, TH, Cop)
    out = acc2 + sb_ref[1:2, :]

    # ---- residual branch (read straight from xpad; x never held twice in VMEM)
    xres = xpad_ref[pl.ds(row0 + 2, TH), XPAD_L:XPAD_L + W, :].reshape(TH * W, Cip)
    if downsampling:
        res = jnp.dot(xres, wd_ref[...], preferred_element_type=jnp.float32)
        res = res + sb_ref[2:3, :]
    else:
        res = xres.astype(jnp.float32)             # Cip == Cop (asserted in wrapper)

    o_ref[...] = jnp.maximum(out + res, 0.0).reshape(TH, W, Cop).astype(o_ref.dtype)


# ------------------------------- wrapper -------------------------------------

def _prepare_params(p, cin, cout, cip, cop, downsampling):
    """Fold BN scales into the conv weights (in f32, before the bf16 cast), pad
    channels to the lane width, reshape to the kernel's (kh, kw*Cin, Cout) layout."""
    w1f = p["w1"] * p["s1"]                        # (3,3,cin,cout) * (cout,)
    w2f = p["w2"] * p["s2"]
    w1 = jnp.zeros((3, 3, cip, cop), _BF16).at[:, :, :cin, :cout].set(
        w1f.astype(_BF16)).reshape(3, 3 * cip, cop)
    w2 = jnp.zeros((3, 3, cop, cop), _BF16).at[:, :, :cout, :cout].set(
        w2f.astype(_BF16)).reshape(3, 3 * cop, cop)

    def padvec(v):
        return jnp.zeros((cop,), jnp.float32).at[:cout].set(v)

    rows = [padvec(p["b1"]), padvec(p["b2"])]
    wd = None
    if downsampling:
        wdf = p["wd"] * p["sd"]
        wd = jnp.zeros((cip, cop), _BF16).at[:cin, :cout].set(wdf.astype(_BF16))
        rows.append(padvec(p["bd"]))
    sb = jnp.stack(rows, axis=0)                   # (2|3, Cop) f32 biases
    return w1, w2, wd, sb


def basic_block_pallas(x_nhwc, params, *, downsampling=False):
    """stride=1 BasicBlock forward. x_nhwc: (N, H, W, Cin). Returns bf16."""
    N, H, W, Cin = x_nhwc.shape
    Cout = params["w1"].shape[-1]
    if not downsampling:
        assert Cin == Cout, "identity residual requires Cin == Cout"

    Cip, Cop = _round_up(Cin, LANE), _round_up(Cout, LANE)
    kw_fuse, vmem_cap = _tpu_defaults()
    TH = _pick_row_tile(H, W, Cip, Cop, N, downsampling, vmem_cap)
    R = H // TH
    WXP = _round_up(XPAD_L + W + 1, 16)            # bf16 min sublane tile is 16
    WHP = _round_up(HPAD_L + W + 1, 16)

    # Channel pad + bf16 cast (persistent layout between blocks in a real net).
    xp = jnp.zeros((N, H, W, Cip), _BF16).at[..., :Cin].set(x_nhwc.astype(_BF16))
    w1, w2, wd, sb = _prepare_params(params, Cin, Cout, Cip, Cop, downsampling)

    kern = functools.partial(_basic_block_kernel, H=H, W=W, TH=TH, Cip=Cip,
                             Cop=Cop, downsampling=downsampling, kw_fuse=kw_fuse)

    # Weights / biases have constant index_maps (DMA'd once, reused across steps).
    in_specs = [
        pl.BlockSpec(memory_space=pl.ANY),                         # x stays in HBM
        pl.BlockSpec((3, 3 * Cip, Cop), lambda b, r: (0, 0, 0)),   # w1 (scale folded)
        pl.BlockSpec((3, 3 * Cop, Cop), lambda b, r: (0, 0, 0)),   # w2 (scale folded)
    ]
    args = [xp, w1, w2]
    if downsampling:
        in_specs.append(pl.BlockSpec((Cip, Cop), lambda b, r: (0, 0)))
        args.append(wd)
    in_specs.append(pl.BlockSpec((sb.shape[0], Cop), lambda b, r: (0, 0)))
    args.append(sb)

    est = _footprint_bytes(H, W, TH, Cip, Cop, downsampling)
    vmem_limit = int(min(0.9 * vmem_cap, max(32 * 1024 * 1024, 2 * est)))

    out = pl.pallas_call(
        kern,
        out_shape=jax.ShapeDtypeStruct((N, H, W, Cop), _BF16),     # bf16 writeback
        grid_spec=pltpu.PrefetchScalarGridSpec(
            num_scalar_prefetch=0,
            grid=(N, R),                                           # batch x row-blocks
            in_specs=in_specs,
            out_specs=pl.BlockSpec((None, TH, W, Cop), lambda b, r: (b, r, 0, 0)),
            scratch_shapes=[
                pltpu.VMEM((H + 4, WXP, Cip), _BF16),   # zero-bordered input image
                pltpu.VMEM((TH + 2, WHP, Cop), _BF16),  # conv1 activations (+halo)
                pltpu.SemaphoreType.DMA(()),            # HBM->xpad image DMA
            ],
        ),
        compiler_params=pltpu.CompilerParams(
            # Row axis is 'arbitrary': xpad is filled at r == 0 and reused across
            # the row blocks of the same image on the same core.
            dimension_semantics=("parallel", "arbitrary"),
            vmem_limit_bytes=vmem_limit,
        ),
    )(*args)

    # Slice off the channel padding (a full ResNet would keep the padded layout).
    return out[..., :Cout]


# ------------------------- parameter construction ---------------------------

def _fold_bn(key, c):
    k1, k2, k3, k4 = jax.random.split(key, 4)
    gamma = 1.0 + 0.1 * jax.random.normal(k1, (c,), jnp.float32)
    beta = 0.1 * jax.random.normal(k2, (c,), jnp.float32)
    mean = 0.1 * jax.random.normal(k3, (c,), jnp.float32)
    var = jax.nn.softplus(jax.random.normal(k4, (c,), jnp.float32)) + 0.5
    scale = gamma * lax.rsqrt(var + 1e-5)
    bias = beta - mean * scale
    return scale, bias


def init_params(key, in_places, places, downsampling):
    ks = jax.random.split(key, 6)
    p = dict(
        w1=0.1 * jax.random.normal(ks[0], (3, 3, in_places, places), jnp.float32),
        w2=0.1 * jax.random.normal(ks[1], (3, 3, places, places), jnp.float32),
    )
    p["s1"], p["b1"] = _fold_bn(ks[2], places)
    p["s2"], p["b2"] = _fold_bn(ks[3], places)
    if downsampling:
        p["wd"] = 0.1 * jax.random.normal(ks[4], (in_places, places), jnp.float32)
        p["sd"], p["bd"] = _fold_bn(ks[5], places)
    return p


# --------------------------- pure-JAX reference ------------------------------

def ref_forward(x_nhwc, p, downsampling):
    """Reference with the same numerics as the kernel: BN scales folded into the
    weights in f32, bf16 conv operands, f32 accumulation, bf16 hand-off/output."""
    dn = ("NHWC", "HWIO", "NHWC")
    xb = x_nhwc.astype(_BF16)
    w1 = (p["w1"] * p["s1"]).astype(_BF16)
    y = lax.conv_general_dilated(xb, w1, (1, 1), "SAME", dimension_numbers=dn,
                                 preferred_element_type=jnp.float32)
    y = jnp.maximum(y + p["b1"], 0.0).astype(_BF16)
    w2 = (p["w2"] * p["s2"]).astype(_BF16)
    y = lax.conv_general_dilated(y, w2, (1, 1), "SAME", dimension_numbers=dn,
                                 preferred_element_type=jnp.float32)
    y = y + p["b2"]
    if downsampling:
        wd = (p["wd"] * p["sd"]).astype(_BF16)
        r = lax.conv_general_dilated(xb, wd[None, None], (1, 1), "VALID",
                                     dimension_numbers=dn,
                                     preferred_element_type=jnp.float32)
        r = r + p["bd"]
    else:
        r = xb.astype(jnp.float32)
    return jnp.maximum(y + r, 0.0).astype(_BF16)


# ---------------------------------- main -------------------------------------

if __name__ == "__main__":
    key = jax.random.PRNGKey(0)
    kx, kp1, kp2 = jax.random.split(key, 3)

    N, C, H, W = 2, 4, 16, 16
    x_nchw = jax.random.normal(kx, (N, C, H, W), jnp.float32)   # PyTorch NCHW input
    x_nhwc = jnp.transpose(x_nchw, (0, 2, 3, 1))                # TPU-friendly NHWC

    # case 1: identity residual (in_places == places, stride=1, downsampling=False)
    p1 = init_params(kp1, in_places=C, places=C, downsampling=False)
    out1 = jax.block_until_ready(basic_block_pallas(x_nhwc, p1, downsampling=False))
    ref1 = jax.block_until_ready(ref_forward(x_nhwc, p1, False))
    np.testing.assert_allclose(np.asarray(out1.astype(jnp.float32)),
                               np.asarray(ref1.astype(jnp.float32)),
                               rtol=2e-2, atol=2e-2)

    # case 2: projection residual (downsampling=True, places=8, stride=1)
    p2 = init_params(kp2, in_places=C, places=8, downsampling=True)
    out2 = jax.block_until_ready(basic_block_pallas(x_nhwc, p2, downsampling=True))
    ref2 = jax.block_until_ready(ref_forward(x_nhwc, p2, True))
    np.testing.assert_allclose(np.asarray(out2.astype(jnp.float32)),
                               np.asarray(ref2.astype(jnp.float32)),
                               rtol=2e-2, atol=2e-2)

    print("KERNEL_OK")
</pallas_src>

<mosaic_0001>
module attributes {stable_mosaic.version = 11 : i64} {
  func.func @_basic_block_kernel(%arg0: i32, %arg1: i32, %arg2: memref<2x16x16x128xbf16, #tpu.memory_space<any>>, %arg3: memref<3x384x128xbf16, #tpu.memory_space<vmem>>, %arg4: memref<3x384x128xbf16, #tpu.memory_space<vmem>>, %arg5: memref<2x128xf32, #tpu.memory_space<vmem>>, %arg6: memref<1x16x16x128xbf16, #tpu.memory_space<vmem>>, %arg7: memref<20x48x128xbf16, #tpu.memory_space<vmem>>, %arg8: memref<18x32x128xbf16, #tpu.memory_space<vmem>>, %arg9: memref<!tpu.dma_semaphore, #tpu.memory_space<semaphore_mem>>) attributes {dimension_semantics = [#tpu.dimension_semantics<parallel>, #tpu.dimension_semantics<arbitrary>], iteration_bounds = array<i64: 2, 1>, scalar_prefetch = 0 : i64, scratch_operands = 3 : i64, tpu.core_type = #tpu.core_type<tc>, window_params = [{}, {pipeline_mode = #tpu.pipeline_mode<synchronous>, transform_indices = @transform_1, window_bounds = array<i64: 3, 384, 128>}, {pipeline_mode = #tpu.pipeline_mode<synchronous>, transform_indices = @transform_2, window_bounds = array<i64: 3, 384, 128>}, {pipeline_mode = #tpu.pipeline_mode<synchronous>, transform_indices = @transform_3, window_bounds = array<i64: 2, 128>}, {transform_indices = @transform_4, window_bounds = array<i64: 1, 16, 16, 128>}]} {
    %c16_i32 = arith.constant 16 : i32
    %0 = arith.muli %arg1, %c16_i32 : i32
    %1 = tpu.assume_multiple %0, 16 : i32
    %c0_i32 = arith.constant 0 : i32
    %2 = arith.cmpi eq, %arg1, %c0_i32 : i32
    %3 = arith.extui %2 : i1 to i32
    %c0_i32_0 = arith.constant 0 : i32
    %4 = arith.cmpi ne, %3, %c0_i32_0 : i32
    scf.if %4 {
      %cst_56 = arith.constant 0.000000e+00 : bf16
      %100 = vector.broadcast %cst_56 : bf16 to vector<2x18x128xbf16>
      %c0_57 = arith.constant 0 : index
      %c15_58 = arith.constant 15 : index
      %c0_59 = arith.constant 0 : index
      %101 = vector.load %arg7[%c0_57, %c15_58, %c0_59] : memref<20x48x128xbf16, #tpu.memory_space<vmem>>, vector<2x18x128xbf16>
      tpu.vector_store %arg7[%c0_57, %c15_58, %c0_59], %100 {strides = array<i32>} : memref<20x48x128xbf16, #tpu.memory_space<vmem>>, vector<2x18x128xbf16>,
      %c18 = arith.constant 18 : index
      %c15_60 = arith.constant 15 : index
      %c0_61 = arith.constant 0 : index
      %102 = vector.load %arg7[%c18, %c15_60, %c0_61] : memref<20x48x128xbf16, #tpu.memory_space<vmem>>, vector<2x18x128xbf16>
      tpu.vector_store %arg7[%c18, %c15_60, %c0_61], %100 {strides = array<i32>} : memref<20x48x128xbf16, #tpu.memory_space<vmem>>, vector<2x18x128xbf16>,
      %cst_62 = arith.constant 0.000000e+00 : bf16
      %103 = vector.broadcast %cst_62 : bf16 to vector<20x1x128xbf16>
      %c0_63 = arith.constant 0 : index
      %c15_64 = arith.constant 15 : index
      %c0_65 = arith.constant 0 : index
      %104 = vector.load %arg7[%c0_63, %c15_64, %c0_65] : memref<20x48x128xbf16, #tpu.memory_space<vmem>>, vector<20x1x128xbf16>
      tpu.vector_store %arg7[%c0_63, %c15_64, %c0_65], %103 {strides = array<i32>} : memref<20x48x128xbf16, #tpu.memory_space<vmem>>, vector<20x1x128xbf16>,
      %c0_66 = arith.constant 0 : index
      %c32 = arith.constant 32 : index
      %c0_67 = arith.constant 0 : index
      %105 = vector.load %arg7[%c0_66, %c32, %c0_67] : memref<20x48x128xbf16, #tpu.memory_space<vmem>>, vector<20x1x128xbf16>
      tpu.vector_store %arg7[%c0_66, %c32, %c0_67], %103 {strides = array<i32>} : memref<20x48x128xbf16, #tpu.memory_space<vmem>>, vector<20x1x128xbf16>,
      %c0_i32_68 = arith.constant 0 : i32
      %c0_i32_69 = arith.constant 0 : i32
      %c0_i32_70 = arith.constant 0 : i32
      %106 = tpu.memref_slice %arg2[%arg0, %c0_i32_68, %c0_i32_69, %c0_i32_70] : memref<2x16x16x128xbf16, #tpu.memory_space<any>> -> memref<1x16x16x128xbf16, #tpu.memory_space<any>>
      %107 = tpu.memref_squeeze %106 : memref<1x16x16x128xbf16, #tpu.memory_space<any>> -> memref<16x16x128xbf16, #tpu.memory_space<any>>
      %c2_i32_71 = arith.constant 2 : i32
      %c16_i32_72 = arith.constant 16 : i32
      %c0_i32_73 = arith.constant 0 : i32
      %108 = tpu.memref_slice %arg7[%c2_i32_71, %c16_i32_72, %c0_i32_73] : memref<20x48x128xbf16, #tpu.memory_space<vmem>> -> memref<16x16x128xbf16, #tpu.memory_space<vmem>>
      tpu.enqueue_dma source(%107 : memref<16x16x128xbf16, #tpu.memory_space<any>>) target(%108 : memref<16x16x128xbf16, #tpu.memory_space<vmem>>) target_semaphore(%arg9 : memref<!tpu.dma_semaphore, #tpu.memory_space<semaphore_mem>>)
      %c0_i32_74 = arith.constant 0 : i32
      %c0_i32_75 = arith.constant 0 : i32
      %c0_i32_76 = arith.constant 0 : i32
      %109 = tpu.memref_slice %arg2[%arg0, %c0_i32_74, %c0_i32_75, %c0_i32_76] : memref<2x16x16x128xbf16, #tpu.memory_space<any>> -> memref<1x16x16x128xbf16, #tpu.memory_space<any>>
      %110 = tpu.memref_squeeze %109 : memref<1x16x16x128xbf16, #tpu.memory_space<any>> -> memref<16x16x128xbf16, #tpu.memory_space<any>>
      %c2_i32_77 = arith.constant 2 : i32
      %c16_i32_78 = arith.constant 16 : i32
      %c0_i32_79 = arith.constant 0 : i32
      %111 = tpu.memref_slice %arg7[%c2_i32_77, %c16_i32_78, %c0_i32_79] : memref<20x48x128xbf16, #tpu.memory_space<vmem>> -> memref<16x16x128xbf16, #tpu.memory_space<vmem>>
      tpu.wait_dma2 semaphore(%arg9 : memref<!tpu.dma_semaphore, #tpu.memory_space<semaphore_mem>>) src(%110 : memref<16x16x128xbf16, #tpu.memory_space<any>>) dst(%111 : memref<16x16x128xbf16, #tpu.memory_space<vmem>>)
      %cst_80 = arith.constant 0.000000e+00 : bf16
      %112 = vector.broadcast %cst_80 : bf16 to vector<18x1x128xbf16>
      %c0_81 = arith.constant 0 : index
      %c1_82 = arith.constant 1 : index
      %c0_83 = arith.constant 0 : index
      %113 = vector.load %arg8[%c0_81, %c1_82, %c0_83] : memref<18x32x128xbf16, #tpu.memory_space<vmem>>, vector<18x1x128xbf16>
      tpu.vector_store %arg8[%c0_81, %c1_82, %c0_83], %112 {strides = array<i32>} : memref<18x32x128xbf16, #tpu.memory_space<vmem>>, vector<18x1x128xbf16>,
      %c0_84 = arith.constant 0 : index
      %c18_85 = arith.constant 18 : index
      %c0_86 = arith.constant 0 : index
      %114 = vector.load %arg8[%c0_84, %c18_85, %c0_86] : memref<18x32x128xbf16, #tpu.memory_space<vmem>>, vector<18x1x128xbf16>
      tpu.vector_store %arg8[%c0_84, %c18_85, %c0_86], %112 {strides = array<i32>} : memref<18x32x128xbf16, #tpu.memory_space<vmem>>, vector<18x1x128xbf16>,
    } else {
    }
    %c0_i32_1 = arith.constant 0 : i32
    %5 = arith.addi %1, %c0_i32_1 : i32
    %6 = arith.index_cast %5 : i32 to index
    %c15 = arith.constant 15 : index
    %c0 = arith.constant 0 : index
    %7 = vector.load %arg7[%6, %c15, %c0] : memref<20x48x128xbf16, #tpu.memory_space<vmem>>, vector<18x18x128xbf16>
    %8 = vector.extract_strided_slice %7 {offsets = [0, 0, 0], sizes = [18, 16, 128], strides = [1, 1, 1]} : vector<18x18x128xbf16> to vector<18x16x128xbf16>
    %9 = vector.extract_strided_slice %7 {offsets = [0, 1, 0], sizes = [18, 16, 128], strides = [1, 1, 1]} : vector<18x18x128xbf16> to vector<18x16x128xbf16>
    %10 = vector.extract_strided_slice %7 {offsets = [0, 2, 0], sizes = [18, 16, 128], strides = [1, 1, 1]} : vector<18x18x128xbf16> to vector<18x16x128xbf16>
    %11 = tpu.concatenate %8, %9, %10 in 2 : vector<18x16x128xbf16>, vector<18x16x128xbf16>, vector<18x16x128xbf16> -> vector<18x16x384xbf16>
    %12 = vector.shape_cast %11 : vector<18x16x384xbf16> to vector<288x384xbf16>
    %c0_2 = arith.constant 0 : index
    %c0_3 = arith.constant 0 : index
    %c0_4 = arith.constant 0 : index
    %13 = vector.load %arg3[%c0_2, %c0_3, %c0_4] : memref<3x384x128xbf16, #tpu.memory_space<vmem>>, vector<1x384x128xbf16>
    %14 = vector.shape_cast %13 : vector<1x384x128xbf16> to vector<384x128xbf16>
    %cst = arith.constant dense<0.000000e+00> : vector<288x128xf32>
    %15 = tpu.matmul %12, %14, %cst {dimension_numbers = #tpu.dot_dimension_numbers<[1], [0], [0], [1], [0, 0, 1, 1], [], []>} : vector<288x384xbf16>, vector<384x128xbf16>, vector<288x128xf32> -> vector<288x128xf32>
    %c1_i32 = arith.constant 1 : i32
    %16 = arith.addi %1, %c1_i32 : i32
    %17 = arith.index_cast %16 : i32 to index
    %c15_5 = arith.constant 15 : index
    %c0_6 = arith.constant 0 : index
    %18 = vector.load %arg7[%17, %c15_5, %c0_6] : memref<20x48x128xbf16, #tpu.memory_space<vmem>>, vector<18x18x128xbf16>
    %19 = vector.extract_strided_slice %18 {offsets = [0, 0, 0], sizes = [18, 16, 128], strides = [1, 1, 1]} : vector<18x18x128xbf16> to vector<18x16x128xbf16>
    %20 = vector.extract_strided_slice %18 {offsets = [0, 1, 0], sizes = [18, 16, 128], strides = [1, 1, 1]} : vector<18x18x128xbf16> to vector<18x16x128xbf16>
    %21 = vector.extract_strided_slice %18 {offsets = [0, 2, 0], sizes = [18, 16, 128], strides = [1, 1, 1]} : vector<18x18x128xbf16> to vector<18x16x128xbf16>
    %22 = tpu.concatenate %19, %20, %21 in 2 : vector<18x16x128xbf16>, vector<18x16x128xbf16>, vector<18x16x128xbf16> -> vector<18x16x384xbf16>
    %23 = vector.shape_cast %22 : vector<18x16x384xbf16> to vector<288x384xbf16>
    %c1 = arith.constant 1 : index
    %c0_7 = arith.constant 0 : index
    %c0_8 = arith.constant 0 : index
    %24 = vector.load %arg3[%c1, %c0_7, %c0_8] : memref<3x384x128xbf16, #tpu.memory_space<vmem>>, vector<1x384x128xbf16>
    %25 = vector.shape_cast %24 : vector<1x384x128xbf16> to vector<384x128xbf16>
    %cst_9 = arith.constant dense<0.000000e+00> : vector<288x128xf32>
    %26 = tpu.matmul %23, %25, %cst_9 {dimension_numbers = #tpu.dot_dimension_numbers<[1], [0], [0], [1], [0, 0, 1, 1], [], []>} : vector<288x384xbf16>, vector<384x128xbf16>, vector<288x128xf32> -> vector<288x128xf32>
    %27 = arith.addf %15, %26 : vector<288x128xf32>
    %c2_i32 = arith.constant 2 : i32
    %28 = arith.addi %1, %c2_i32 : i32
    %29 = arith.index_cast %28 : i32 to index
    %c15_10 = arith.constant 15 : index
    %c0_11 = arith.constant 0 : index
    %30 = vector.load %arg7[%29, %c15_10, %c0_11] : memref<20x48x128xbf16, #tpu.memory_space<vmem>>, vector<18x18x128xbf16>
    %31 = vector.extract_strided_slice %30 {offsets = [0, 0, 0], sizes = [18, 16, 128], strides = [1, 1, 1]} : vector<18x18x128xbf16> to vector<18x16x128xbf16>
    %32 = vector.extract_strided_slice %30 {offsets = [0, 1, 0], sizes = [18, 16, 128], strides = [1, 1, 1]} : vector<18x18x128xbf16> to vector<18x16x128xbf16>
    %33 = vector.extract_strided_slice %30 {offsets = [0, 2, 0], sizes = [18, 16, 128], strides = [1, 1, 1]} : vector<18x18x128xbf16> to vector<18x16x128xbf16>
    %34 = tpu.concatenate %31, %32, %33 in 2 : vector<18x16x128xbf16>, vector<18x16x128xbf16>, vector<18x16x128xbf16> -> vector<18x16x384xbf16>
    %35 = vector.shape_cast %34 : vector<18x16x384xbf16> to vector<288x384xbf16>
    %c2 = arith.constant 2 : index
    %c0_12 = arith.constant 0 : index
    %c0_13 = arith.constant 0 : index
    %36 = vector.load %arg3[%c2, %c0_12, %c0_13] : memref<3x384x128xbf16, #tpu.memory_space<vmem>>, vector<1x384x128xbf16>
    %37 = vector.shape_cast %36 : vector<1x384x128xbf16> to vector<384x128xbf16>
    %cst_14 = arith.constant dense<0.000000e+00> : vector<288x128xf32>
    %38 = tpu.matmul %35, %37, %cst_14 {dimension_numbers = #tpu.dot_dimension_numbers<[1], [0], [0], [1], [0, 0, 1, 1], [], []>} : vector<288x384xbf16>, vector<384x128xbf16>, vector<288x128xf32> -> vector<288x128xf32>
    %39 = arith.addf %27, %38 : vector<288x128xf32>
    %c0_15 = arith.constant 0 : index
    %c0_16 = arith.constant 0 : index
    %40 = vector.load %arg5[%c0_15, %c0_16] : memref<2x128xf32, #tpu.memory_space<vmem>>, vector<1x128xf32>
    %41 = vector.broadcast %40 : vector<1x128xf32> to vector<288x128xf32>
    %42 = arith.addf %39, %41 : vector<288x128xf32>
    %cst_17 = arith.constant 0.000000e+00 : f32
    %43 = vector.broadcast %cst_17 : f32 to vector<288x128xf32>
    %44 = arith.maximumf %42, %43 : vector<288x128xf32>
    %45 = vector.shape_cast %44 : vector<288x128xf32> to vector<18x16x128xf32>
    %46 = arith.truncf %45 : vector<18x16x128xf32> to vector<18x16x128xbf16>
    %c0_18 = arith.constant 0 : index
    %c2_19 = arith.constant 2 : index
    %c0_20 = arith.constant 0 : index
    %47 = vector.load %arg8[%c0_18, %c2_19, %c0_20] : memref<18x32x128xbf16, #tpu.memory_space<vmem>>, vector<18x16x128xbf16>
    tpu.vector_store %arg8[%c0_18, %c2_19, %c0_20], %46 {strides = array<i32>} : memref<18x32x128xbf16, #tpu.memory_space<vmem>>, vector<18x16x128xbf16>,
    %c0_i32_21 = arith.constant 0 : i32
    %48 = arith.cmpi eq, %1, %c0_i32_21 : i32
    %49 = arith.extui %48 : i1 to i32
    %c0_i32_22 = arith.constant 0 : i32
    %50 = arith.cmpi ne, %49, %c0_i32_22 : i32
    scf.if %50 {
      %cst_56 = arith.constant 0.000000e+00 : bf16
      %100 = vector.broadcast %cst_56 : bf16 to vector<1x18x128xbf16>
      %c0_57 = arith.constant 0 : index
      %c1_58 = arith.constant 1 : index
      %c0_59 = arith.constant 0 : index
      %101 = vector.load %arg8[%c0_57, %c1_58, %c0_59] : memref<18x32x128xbf16, #tpu.memory_space<vmem>>, vector<1x18x128xbf16>
      tpu.vector_store %arg8[%c0_57, %c1_58, %c0_59], %100 {strides = array<i32>} : memref<18x32x128xbf16, #tpu.memory_space<vmem>>, vector<1x18x128xbf16>,
    } else {
    }
    %c16_i32_23 = arith.constant 16 : i32
    %51 = arith.addi %1, %c16_i32_23 : i32
    %c16_i32_24 = arith.constant 16 : i32
    %52 = arith.cmpi eq, %51, %c16_i32_24 : i32
    %53 = arith.extui %52 : i1 to i32
    %c0_i32_25 = arith.constant 0 : i32
    %54 = arith.cmpi ne, %53, %c0_i32_25 : i32
    scf.if %54 {
      %cst_56 = arith.constant 0.000000e+00 : bf16
      %100 = vector.broadcast %cst_56 : bf16 to vector<1x18x128xbf16>
      %c17 = arith.constant 17 : index
      %c1_57 = arith.constant 1 : index
      %c0_58 = arith.constant 0 : index
      %101 = vector.load %arg8[%c17, %c1_57, %c0_58] : memref<18x32x128xbf16, #tpu.memory_space<vmem>>, vector<1x18x128xbf16>
      tpu.vector_store %arg8[%c17, %c1_57, %c0_58], %100 {strides = array<i32>} : memref<18x32x128xbf16, #tpu.memory_space<vmem>>, vector<1x18x128xbf16>,
    } else {
    }
    %c0_26 = arith.constant 0 : index
    %c1_27 = arith.constant 1 : index
    %c0_28 = arith.constant 0 : index
    %55 = vector.load %arg8[%c0_26, %c1_27, %c0_28] : memref<18x32x128xbf16, #tpu.memory_space<vmem>>, vector<16x18x128xbf16>
    %56 = vector.extract_strided_slice %55 {offsets = [0, 0, 0], sizes = [16, 16, 128], strides = [1, 1, 1]} : vector<16x18x128xbf16> to vector<16x16x128xbf16>
    %57 = vector.extract_strided_slice %55 {offsets = [0, 1, 0], sizes = [16, 16, 128], strides = [1, 1, 1]} : vector<16x18x128xbf16> to vector<16x16x128xbf16>
    %58 = vector.extract_strided_slice %55 {offsets = [0, 2, 0], sizes = [16, 16, 128], strides = [1, 1, 1]} : vector<16x18x128xbf16> to vector<16x16x128xbf16>
    %59 = tpu.concatenate %56, %57, %58 in 2 : vector<16x16x128xbf16>, vector<16x16x128xbf16>, vector<16x16x128xbf16> -> vector<16x16x384xbf16>
    %60 = vector.shape_cast %59 : vector<16x16x384xbf16> to vector<256x384xbf16>
    %c0_29 = arith.constant 0 : index
    %c0_30 = arith.constant 0 : index
    %c0_31 = arith.constant 0 : index
    %61 = vector.load %arg4[%c0_29, %c0_30, %c0_31] : memref<3x384x128xbf16, #tpu.memory_space<vmem>>, vector<1x384x128xbf16>
    %62 = vector.shape_cast %61 : vector<1x384x128xbf16> to vector<384x128xbf16>
    %cst_32 = arith.constant dense<0.000000e+00> : vector<256x128xf32>
    %63 = tpu.matmul %60, %62, %cst_32 {dimension_numbers = #tpu.dot_dimension_numbers<[1], [0], [0], [1], [0, 0, 1, 1], [], []>} : vector<256x384xbf16>, vector<384x128xbf16>, vector<256x128xf32> -> vector<256x128xf32>
    %c1_33 = arith.constant 1 : index
    %c1_34 = arith.constant 1 : index
    %c0_35 = arith.constant 0 : index
    %64 = vector.load %arg8[%c1_33, %c1_34, %c0_35] : memref<18x32x128xbf16, #tpu.memory_space<vmem>>, vector<16x18x128xbf16>
    %65 = vector.extract_strided_slice %64 {offsets = [0, 0, 0], sizes = [16, 16, 128], strides = [1, 1, 1]} : vector<16x18x128xbf16> to vector<16x16x128xbf16>
    %66 = vector.extract_strided_slice %64 {offsets = [0, 1, 0], sizes = [16, 16, 128], strides = [1, 1, 1]} : vector<16x18x128xbf16> to vector<16x16x128xbf16>
    %67 = vector.extract_strided_slice %64 {offsets = [0, 2, 0], sizes = [16, 16, 128], strides = [1, 1, 1]} : vector<16x18x128xbf16> to vector<16x16x128xbf16>
    %68 = tpu.concatenate %65, %66, %67 in 2 : vector<16x16x128xbf16>, vector<16x16x128xbf16>, vector<16x16x128xbf16> -> vector<16x16x384xbf16>
    %69 = vector.shape_cast %68 : vector<16x16x384xbf16> to vector<256x384xbf16>
    %c1_36 = arith.constant 1 : index
    %c0_37 = arith.constant 0 : index
    %c0_38 = arith.constant 0 : index
    %70 = vector.load %arg4[%c1_36, %c0_37, %c0_38] : memref<3x384x128xbf16, #tpu.memory_space<vmem>>, vector<1x384x128xbf16>
    %71 = vector.shape_cast %70 : vector<1x384x128xbf16> to vector<384x128xbf16>
    %cst_39 = arith.constant dense<0.000000e+00> : vector<256x128xf32>
    %72 = tpu.matmul %69, %71, %cst_39 {dimension_numbers = #tpu.dot_dimension_numbers<[1], [0], [0], [1], [0, 0, 1, 1], [], []>} : vector<256x384xbf16>, vector<384x128xbf16>, vector<256x128xf32> -> vector<256x128xf32>
    %73 = arith.addf %63, %72 : vector<256x128xf32>
    %c2_40 = arith.constant 2 : index
    %c1_41 = arith.constant 1 : index
    %c0_42 = arith.constant 0 : index
    %74 = vector.load %arg8[%c2_40, %c1_41, %c0_42] : memref<18x32x128xbf16, #tpu.memory_space<vmem>>, vector<16x18x128xbf16>
    %75 = vector.extract_strided_slice %74 {offsets = [0, 0, 0], sizes = [16, 16, 128], strides = [1, 1, 1]} : vector<16x18x128xbf16> to vector<16x16x128xbf16>
    %76 = vector.extract_strided_slice %74 {offsets = [0, 1, 0], sizes = [16, 16, 128], strides = [1, 1, 1]} : vector<16x18x128xbf16> to vector<16x16x128xbf16>
    %77 = vector.extract_strided_slice %74 {offsets = [0, 2, 0], sizes = [16, 16, 128], strides = [1, 1, 1]} : vector<16x18x128xbf16> to vector<16x16x128xbf16>
    %78 = tpu.concatenate %75, %76, %77 in 2 : vector<16x16x128xbf16>, vector<16x16x128xbf16>, vector<16x16x128xbf16> -> vector<16x16x384xbf16>
    %79 = vector.shape_cast %78 : vector<16x16x384xbf16> to vector<256x384xbf16>
    %c2_43 = arith.constant 2 : index
    %c0_44 = arith.constant 0 : index
    %c0_45 = arith.constant 0 : index
    %80 = vector.load %arg4[%c2_43, %c0_44, %c0_45] : memref<3x384x128xbf16, #tpu.memory_space<vmem>>, vector<1x384x128xbf16>
    %81 = vector.shape_cast %80 : vector<1x384x128xbf16> to vector<384x128xbf16>
    %cst_46 = arith.constant dense<0.000000e+00> : vector<256x128xf32>
    %82 = tpu.matmul %79, %81, %cst_46 {dimension_numbers = #tpu.dot_dimension_numbers<[1], [0], [0], [1], [0, 0, 1, 1], [], []>} : vector<256x384xbf16>, vector<384x128xbf16>, vector<256x128xf32> -> vector<256x128xf32>
    %83 = arith.addf %73, %82 : vector<256x128xf32>
    %c1_47 = arith.constant 1 : index
    %c0_48 = arith.constant 0 : index
    %84 = vector.load %arg5[%c1_47, %c0_48] : memref<2x128xf32, #tpu.memory_space<vmem>>, vector<1x128xf32>
    %85 = vector.broadcast %84 : vector<1x128xf32> to vector<256x128xf32>
    %86 = arith.addf %83, %85 : vector<256x128xf32>
    %c2_i32_49 = arith.constant 2 : i32
    %87 = arith.addi %1, %c2_i32_49 : i32
    %88 = arith.index_cast %87 : i32 to index
    %c16 = arith.constant 16 : index
    %c0_50 = arith.constant 0 : index
    %89 = vector.load %arg7[%88, %c16, %c0_50] : memref<20x48x128xbf16, #tpu.memory_space<vmem>>, vector<16x16x128xbf16>
    %90 = vector.shape_cast %89 : vector<16x16x128xbf16> to vector<256x128xbf16>
    %91 = arith.extf %90 : vector<256x128xbf16> to vector<256x128xf32>
    %92 = arith.addf %86, %91 : vector<256x128xf32>
    %cst_51 = arith.constant 0.000000e+00 : f32
    %93 = vector.broadcast %cst_51 : f32 to vector<256x128xf32>
    %94 = arith.maximumf %92, %93 : vector<256x128xf32>
    %95 = vector.shape_cast %94 : vector<256x128xf32> to vector<16x16x128xf32>
    %96 = arith.truncf %95 : vector<16x16x128xf32> to vector<16x16x128xbf16>
    %c0_52 = arith.constant 0 : index
    %c0_53 = arith.constant 0 : index
    %c0_54 = arith.constant 0 : index
    %c0_55 = arith.constant 0 : index
    %97 = vector.load %arg6[%c0_52, %c0_53, %c0_54, %c0_55] : memref<1x16x16x128xbf16, #tpu.memory_space<vmem>>, vector<1x16x16x128xbf16>
    %98 = vector.shape_cast %97 : vector<1x16x16x128xbf16> to vector<16x16x128xbf16>
    %99 = vector.shape_cast %96 : vector<16x16x128xbf16> to vector<1x16x16x128xbf16>
    tpu.vector_store %arg6[%c0_52, %c0_53, %c0_54, %c0_55], %99 {strides = array<i32>} : memref<1x16x16x128xbf16, #tpu.memory_space<vmem>>, vector<1x16x16x128xbf16>,
    return
  }
  func.func @transform_1(%arg0: i32, %arg1: i32) -> (i32, i32, i32) {
    %c0_i32 = arith.constant 0 : i32
    %c0_i32_0 = arith.constant 0 : i32
    %c0_i32_1 = arith.constant 0 : i32
    %c0_i32_2 = arith.constant 0 : i32
    return %c0_i32, %c0_i32_0, %c0_i32_1 : i32, i32, i32
  }
  func.func @transform_2(%arg0: i32, %arg1: i32) -> (i32, i32, i32) {
    %c0_i32 = arith.constant 0 : i32
    %c0_i32_0 = arith.constant 0 : i32
    %c0_i32_1 = arith.constant 0 : i32
    %c0_i32_2 = arith.constant 0 : i32
    return %c0_i32, %c0_i32_0, %c0_i32_1 : i32, i32, i32
  }
  func.func @transform_3(%arg0: i32, %arg1: i32) -> (i32, i32) {
    %c0_i32 = arith.constant 0 : i32
    %c0_i32_0 = arith.constant 0 : i32
    %c0_i32_1 = arith.constant 0 : i32
    return %c0_i32, %c0_i32_0 : i32, i32
  }
  func.func @transform_4(%arg0: i32, %arg1: i32) -> (i32, i32, i32, i32) {
    %c0_i32 = arith.constant 0 : i32
    %c0_i32_0 = arith.constant 0 : i32
    %c0_i32_1 = arith.constant 0 : i32
    return %arg0, %arg1, %c0_i32, %c0_i32_0 : i32, i32, i32, i32
  }
}

</mosaic_0001>

<bundles_post_ra>
// kernel: tpu_custom_call.1
= control target key start
LH: loop header
LB: loop body
LE: loop exit
PB: predicated region body
PF: predicated region fallthrough
CT: control target
= control target key end

     0   :  { %9 = vsyncpa [#allocation6], 0  ;;  %s16829_s0 = inlined_call_operand.hbm [shape: bf16[2,16,16,128], index: 0, kind: input, shape index: {}]   ;;  %s16830_s1 = inlined_call_operand.hbm [shape: bf16[3,384,128], index: 1, kind: input, shape index: {}]   ;;  %s16831_s2 = inlined_call_operand.hbm [shape: bf16[3,384,128], index: 2, kind: input, shape index: {}]   ;;  %s16832_s3 = inlined_call_operand.vmem [shape: f32[2,128], index: 3, kind: input, shape index: {}]   ;;  %s16833_s4 = inlined_call_operand.hbm [shape: bf16[2,16,16,128], index: 4, kind: output, shape index: {}]  }
   0x1   :  { %10 = vsyncpa [#allocation9], 0 }
   0x2   :  { %11 = vsyncpa [#allocation7], 0 }
   0x3   :  { %13 = vsyncpa [#allocation7 + $0x1], 0  ;;  %s13718_s15 = smov 0   ;;  %s13720_s16 = smov 0  }
   0x4   :  { %s13722_s17 = smov 0   ;;  %s13724_s18 = smov 0  }
   0x5   :  { %s13726_s19 = smov 0   ;;  %s13728_s20 = smov 0  }
   0x6 LB: > { %s11203_s21 = sadd.s32 4294967295, %s13678_s20   ;;  %s11204_s22 = sadd.s32 4294967294, %s13678_s20   ;;  %s13678_s20 = sphi %s13728_s20, %s19_s20   ;;  %s13674_s19 = sphi %s13726_s19, %s17096_s19   ;;  %s13670_s18 = sphi %s13724_s18, %s17095_s18   ;;  %s13666_s17 = sphi %s13722_s17, %s17094_s17   ;;  %s13662_s16 = sphi %s13720_s16, %s17093_s16   ;;  %s13658_s15 = sphi %s13718_s15, %s17092_s15  }
   0x7   : > { %s31_s23 = sadd.s32 1, %s13674_s19  ;;  %s103_s24 = sadd.s32 1, %s13666_s17 }
   0x8   : > { %p33_p0 = scmp.ge.s32.totalorder %s31_s23, 2  ;;  %p113_p1 = scmp.ne.s32.totalorder %s13666_s17, %s13662_s16 }
   0x9   : > { %p114_p2 = scmp.eq.s32.totalorder %s11203_s21, 1  ;;  %p119_p3 = scmp.ne.s32.totalorder %s13662_s16, %s13658_s15 }
   0xa   : > { %s17098_s23 = smov (%p33_p0, %s31_s23), 0  ;;  %p120_p5 = scmp.eq.s32.totalorder %s11204_s22, 1 }
   0xb   : > { %p13758_p4 = por %p114_p2, %p113_p1  ;;  %s98_s26 = ssub.s32 %s13674_s19, %s17098_s23 }
   0xc   : > { %p11205_p6 = scmp.ge.s32.totalorder %s13678_s20, 1  ;;  %p101_p7 = scmp.eq.s32.totalorder %s98_s26, 0 }
   0xd   : > { %s16838_s25 = scalar_select %p13758_p4, 1, 0 }
   0xe   : > { %p13765_p8 = por %p120_p5, %p119_p3  ;;  %p127_p9 = scmp.lt.s32.totalorder %s13678_s20, 3 }
   0xf   : > { %s13771_s28 = scalar_select %p101_p7, %s13666_s17, %s103_s24  }
  0x10   : > { %s16839_s27 = scalar_select %p13765_p8, 1, 0 }
  0x11   : > { %p13773_p10 = pnand %p11205_p6, %p127_p9  ;;  %p13777_p11 = scmp.eq.s32.totalorder %s11203_s21, 0 }
  0x12   : > { %s13680_s5 = smov [#allocation5]   ;;  %s13681_s8 = smov [#allocation8]  }
  0x13   : > { %p12963_p12 = pneg %p13773_p10  ;;  %s139_s6 = sshll.u32 %s13680_s5, 4  ;;  %s140_s6 = int_to_ptr.vmem [resolvable:$true] %s139_s6 }
  0x14   : > { %s152_s9 = sshll.u32 %s13681_s8, 4  ;;  %s13529_s10 = scalar_lea.vmem %s140_s6, 9216  ;;  %s153_s9 = int_to_ptr.vmem [resolvable:$true] %s152_s9 }
  0x15   : > { %p13785_p13 = pnand %p13777_p11, %p12963_p12  ;;  %p13530_p1 = scmp.ne.s32.totalorder %s140_s6, %s13529_s10 }
  0x16   : > { %p13537_p5 = scmp.lt.s32.totalorder %s140_s6, %s140_s6  ;;  %p13538_p6 = scmp.lt.s32.totalorder %s13529_s10, %s13529_s10 }
  0x17   : > { %p13520_p0 = pneg %p13785_p13 }
  0x18   : > { %p13539_p7 = por %p13538_p6, %p13537_p5 }
  0x19   : > { %p13532_p2 = pnand %p13530_p1, %p13520_p0 }
  0x1b   : > { %p13533_p3 = pneg %p13532_p2 }
  0x1d   : > { %p13540_p9 = pnand %p13539_p7, %p13533_p3 }
  0x1f   : > { %13543 = shalt.err (!%p13540_p9)
}
  0x20   : > { %s13682_s11 = smov 64   ;;  %s13683_s12 = smov 4  }
  0x21   : > { %12966 = dma.hbm_to_vmem [thread:$0]  (!%p13785_p13), %s16830_s1, 9216, %s140_s6, [#allocation6], %s13682_s11, %s13682_s11, %s13683_s12  }
  0x22   : > { %s13555_s21 = scalar_lea.vmem %s153_s9, 9216  ;;  %p13563_p8 = scmp.lt.s32.totalorder %s153_s9, %s153_s9 }
  0x23   : > { %p13556_p12 = scmp.ne.s32.totalorder %s153_s9, %s13555_s21  ;;  %p13564_p4 = scmp.lt.s32.totalorder %s13555_s21, %s13555_s21 }
  0x25   : > { %p13558_p1 = pnand %p13556_p12, %p13520_p0  ;;  %p13565_p5 = por %p13564_p4, %p13563_p8 }
  0x27   : > { %p13559_p2 = pneg %p13558_p1 }
  0x29   : > { %p13566_p3 = pnand %p13565_p5, %p13559_p2 }
  0x2b   : > { %13569 = shalt.err (!%p13566_p3)
}
  0x2c   : > { %12969 = dma.hbm_to_vmem [thread:$0]  (!%p13785_p13), %s16831_s2, 9216, %s153_s9, [#allocation9], %s13682_s11, %s13682_s11, %s13683_s12  }
  0x2d   : > { %171 = sbr.rel (%p13773_p10) target bundleno = 1346 (0x542), region = 32 }
  0x32   : > { %13643 = dma.done.wait (%p13777_p11), [#allocation6], 9216  }
  0x33   : > { %13645 = vsyncadd (%p13777_p11), [#allocation6], 4294958080 }
  0x34   : > { %13647 = dma.done.wait (%p13777_p11), [#allocation9], 9216  }
  0x35   : > { %13649 = vsyncadd (%p13777_p11), [#allocation9], 4294958080  ;;  %s191_s26 = sand.u32 1, %s13662_s16   ;;  %vm201_vm0 = vcmask 1043459   ;;  %vm202_vm1 = vsmask.f32 7950 }
  0x36   : > { %s13820_s5 = sshll.u32 %s191_s26, 7  ;;  %vm209_vm2 = vcmask 1040384   ;;  %vm210_vm3 = vsmask.f32 256  ;;  %v16835_v0 = vmov 0   ;;  %vm13830_vm4 = vmand %vm201_vm0, %vm202_vm1  ;;  %s11922_s29 = sshll.u32 %s13670_s18, 11 }
  0x37   : > { %207 = vst [vmem:[#allocation2 + $0x8] sm:$0xf] %v16835_v0  ;;  %208 = vst [vmem:[#allocation2 + $0xc] sm:$0xf] %v16835_v0  ;;  %s13685_s30 = smov [#allocation2 + $0x38]   ;;  %s13939_s9 = scalar_lea.hbm %s16829_s0, %s11922_s29 }
  0x38   : > { %218 = vst [vmem:[#allocation2 + $0x20] sm:$0xf] %v16835_v0  ;;  %219 = vst [vmem:[#allocation2 + $0x24] sm:$0xf] %v16835_v0  ;;  %s13840_s6 = sshll.u32 %s13685_s30, 4  ;;  %s13570_s10 = scalar_lea.hbm %s13939_s9, 2048  ;;  %s13942_s6 = int_to_ptr.vmem [resolvable:$true] %s13840_s6 }
  0x39   : > { %227 = vst [vmem:[#allocation2 + $0x1b8] sm:$0xf] %v16835_v0  ;;  %228 = vst [vmem:[#allocation2 + $0x1bc] sm:$0xf] %v16835_v0  ;;  %v204_v3 = vld [vmem:[#allocation2 + $0x4] sm:$0x8]  ;;  %p13571_p4 = scmp.ne.s32.totalorder %s13939_s9, %s13570_s10  ;;  %p13573_p8 = scmp.lt.s32.totalorder %s13939_s9, %s16829_s0 }
  0x3a   : > { %235 = vst [vmem:[#allocation2 + $0x1d0] sm:$0xf] %v16835_v0  ;;  %236 = vst [vmem:[#allocation2 + $0x1d4] sm:$0xf] %v16835_v0  ;;  %v212_v4 = vld [vmem:[#allocation2 + $0x10] sm:$0x1] }
  0x3b   : > { %vm13835_vm5 = vmand %vm209_vm2, %vm210_vm3  ;;  %v215_v5 = vld [vmem:[#allocation2 + $0x1c] sm:$0x8]  ;;  %v205_v6 = vsel %vm13830_vm4, 0, %v204_v3  ;;  %v220_v9 = vld [vmem:[#allocation2 + $0x28] sm:$0x1]  ;;  %s13572_s13 = scalar_lea.hbm %s16829_s0, 4096 }
  0x3c   : > { %v213_v7 = vsel %vm13835_vm5, 0, %v212_v4  ;;  %v216_v8 = vsel %vm13830_vm4, 0, %v215_v5  ;;  %206 = vst [vmem:[#allocation2 + $0x4] sm:$0x8] %v205_v6  ;;  %v221_v10 = vsel %vm13835_vm5, 0, %v220_v9  ;;  %p13574_p10 = scmp.lt.s32.totalorder %s13572_s13, %s13570_s10 }
  0x3d   : > { %214 = vst [vmem:[#allocation2 + $0x10] sm:$0x1] %v213_v7  ;;  %217 = vst [vmem:[#allocation2 + $0x1c] sm:$0x8] %v216_v8  ;;  %v224_v11 = vld [vmem:[#allocation2 + $0x1b4] sm:$0x8] }
  0x3e   : > { %v229_v12 = vld [vmem:[#allocation2 + $0x1c0] sm:$0x1]  ;;  %222 = vst [vmem:[#allocation2 + $0x28] sm:$0x1] %v221_v10  ;;  %v225_v13 = vsel %vm13830_vm4, 0, %v224_v11  ;;  %p13575_p11 = por %p13574_p10, %p13573_p8 }
  0x3f   : > { %v230_v14 = vsel %vm13835_vm5, 0, %v229_v12  ;;  %v232_v15 = vld [vmem:[#allocation2 + $0x1cc] sm:$0x8]  ;;  %v237_v16 = vld [vmem:[#allocation2 + $0x1d8] sm:$0x1] }
  0x40   : > { %226 = vst [vmem:[#allocation2 + $0x1b4] sm:$0x8] %v225_v13  ;;  %231 = vst [vmem:[#allocation2 + $0x1c0] sm:$0x1] %v230_v14  ;;  %v233_v17 = vsel %vm13830_vm4, 0, %v232_v15  ;;  %v238_v18 = vsel %vm13835_vm5, 0, %v237_v16  ;;  %p13576_p13 = pnand %p13575_p11, %p13571_p4 }
  0x41   : > { %v246_v19 = vld [vmem:[#allocation2 + $0x34] sm:$0x8]  ;;  %v249_v20 = vld [vmem:[#allocation2 + $0x4c] sm:$0x8]  ;;  %234 = vst [vmem:[#allocation2 + $0x1cc] sm:$0x8] %v233_v17 }
  0x42   : > { %239 = vst [vmem:[#allocation2 + $0x1d8] sm:$0x1] %v238_v18  ;;  %v247_v21 = vsel %vm13830_vm4, 0, %v246_v19  ;;  %v250_v22 = vsel %vm13830_vm4, 0, %v249_v20  ;;  %v252_v23 = vld [vmem:[#allocation2 + $0x64] sm:$0x8] }
  0x43   : > { %v255_v24 = vld [vmem:[#allocation2 + $0x7c] sm:$0x8]  ;;  %248 = vst [vmem:[#allocation2 + $0x34] sm:$0x8] %v247_v21  ;;  %251 = vst [vmem:[#allocation2 + $0x4c] sm:$0x8] %v250_v22 }
  0x44   : > { %v253_v25 = vsel %vm13830_vm4, 0, %v252_v23  ;;  %v256_v26 = vsel %vm13830_vm4, 0, %v255_v24  ;;  %v258_v27 = vld [vmem:[#allocation2 + $0x94] sm:$0x8]  ;;  %v261_v28 = vld [vmem:[#allocation2 + $0xac] sm:$0x8] }
  0x45   : > { %254 = vst [vmem:[#allocation2 + $0x64] sm:$0x8] %v253_v25  ;;  %257 = vst [vmem:[#allocation2 + $0x7c] sm:$0x8] %v256_v26  ;;  %v259_v29 = vsel %vm13830_vm4, 0, %v258_v27  ;;  %v262_v30 = vsel %vm13830_vm4, 0, %v261_v28 }
  0x46   : > { %v264_v31 = vld [vmem:[#allocation2 + $0xc4] sm:$0x8]  ;;  %v267_v32 = vld [vmem:[#allocation2 + $0xdc] sm:$0x8]  ;;  %260 = vst [vmem:[#allocation2 + $0x94] sm:$0x8] %v259_v29 }
  0x47   : > { %263 = vst [vmem:[#allocation2 + $0xac] sm:$0x8] %v262_v30  ;;  %v265_v33 = vsel %vm13830_vm4, 0, %v264_v31  ;;  %v268_v34 = vsel %vm13830_vm4, 0, %v267_v32  ;;  %v270_v35 = vld [vmem:[#allocation2 + $0xf4] sm:$0x8] }
  0x48   : > { %v273_v36 = vld [vmem:[#allocation2 + $0x10c] sm:$0x8]  ;;  %v240_v37 = vld [vmem:[#allocation2 + $0x4] sm:$0x8]  ;;  %v243_v38 = vld [vmem:[#allocation2 + $0x1c] sm:$0x8] }
  0x49   : > { %266 = vst [vmem:[#allocation2 + $0xc4] sm:$0x8] %v265_v33  ;;  %269 = vst [vmem:[#allocation2 + $0xdc] sm:$0x8] %v268_v34  ;;  %v271_v39 = vsel %vm13830_vm4, 0, %v270_v35  ;;  %v274_v40 = vsel %vm13830_vm4, 0, %v273_v36 }
  0x4a   : > { %v241_v41 = vsel %vm13830_vm4, 0, %v240_v37  ;;  %v244_v42 = vsel %vm13830_vm4, 0, %v243_v38  ;;  %272 = vst [vmem:[#allocation2 + $0xf4] sm:$0x8] %v271_v39  ;;  %275 = vst [vmem:[#allocation2 + $0x10c] sm:$0x8] %v274_v40 }
  0x4b   : > { %v276_v43 = vld [vmem:[#allocation2 + $0x124] sm:$0x8]  ;;  %v279_v44 = vld [vmem:[#allocation2 + $0x13c] sm:$0x8]  ;;  %242 = vst [vmem:[#allocation2 + $0x4] sm:$0x8] %v241_v41 }
  0x4c   : > { %245 = vst [vmem:[#allocation2 + $0x1c] sm:$0x8] %v244_v42  ;;  %v277_v45 = vsel %vm13830_vm4, 0, %v276_v43  ;;  %v280_v46 = vsel %vm13830_vm4, 0, %v279_v44  ;;  %v282_v47 = vld [vmem:[#allocation2 + $0x154] sm:$0x8] }
  0x4d   : > { %v285_v48 = vld [vmem:[#allocation2 + $0x16c] sm:$0x8]  ;;  %278 = vst [vmem:[#allocation2 + $0x124] sm:$0x8] %v277_v45  ;;  %281 = vst [vmem:[#allocation2 + $0x13c] sm:$0x8] %v280_v46 }
  0x4e   : > { %v283_v49 = vsel %vm13830_vm4, 0, %v282_v47  ;;  %v286_v50 = vsel %vm13830_vm4, 0, %v285_v48  ;;  %v288_v51 = vld [vmem:[#allocation2 + $0x184] sm:$0x8]  ;;  %v291_v52 = vld [vmem:[#allocation2 + $0x19c] sm:$0x8] }
  0x4f   : > { %284 = vst [vmem:[#allocation2 + $0x154] sm:$0x8] %v283_v49  ;;  %287 = vst [vmem:[#allocation2 + $0x16c] sm:$0x8] %v286_v50  ;;  %v289_v53 = vsel %vm13830_vm4, 0, %v288_v51  ;;  %v292_v54 = vsel %vm13830_vm4, 0, %v291_v52 }
  0x50   : > { %v294_v55 = vld [vmem:[#allocation2 + $0x1b4] sm:$0x8]  ;;  %v297_v56 = vld [vmem:[#allocation2 + $0x1cc] sm:$0x8]  ;;  %290 = vst [vmem:[#allocation2 + $0x184] sm:$0x8] %v289_v53 }
  0x51   : > { %293 = vst [vmem:[#allocation2 + $0x19c] sm:$0x8] %v292_v54  ;;  %v295_v57 = vsel %vm13830_vm4, 0, %v294_v55  ;;  %v298_v58 = vsel %vm13830_vm4, 0, %v297_v56  ;;  %v300_v59 = vld [vmem:[#allocation2 + $0x10] sm:$0x1] }
  0x52   : > { %v303_v60 = vld [vmem:[#allocation2 + $0x28] sm:$0x1]  ;;  %296 = vst [vmem:[#allocation2 + $0x1b4] sm:$0x8] %v295_v57  ;;  %299 = vst [vmem:[#allocation2 + $0x1cc] sm:$0x8] %v298_v58 }
  0x53   : > { %v301_v61 = vsel %vm13835_vm5, 0, %v300_v59  ;;  %v304_v62 = vsel %vm13835_vm5, 0, %v303_v60  ;;  %v306_v63 = vld [vmem:[#allocation2 + $0x40] sm:$0x1]  ;;  %v309_v3 = vld [vmem:[#allocation2 + $0x58] sm:$0x1] }
  0x54   : > { %302 = vst [vmem:[#allocation2 + $0x10] sm:$0x1] %v301_v61  ;;  %305 = vst [vmem:[#allocation2 + $0x28] sm:$0x1] %v304_v62  ;;  %v307_v4 = vsel %vm13835_vm5, 0, %v306_v63  ;;  %v310_v1 = vsel %vm13835_vm5, 0, %v309_v3 }
  0x55   : > { %v312_v5 = vld [vmem:[#allocation2 + $0x70] sm:$0x1]  ;;  %v315_v6 = vld [vmem:[#allocation2 + $0x88] sm:$0x1]  ;;  %308 = vst [vmem:[#allocation2 + $0x40] sm:$0x1] %v307_v4 }
  0x56   : > { %311 = vst [vmem:[#allocation2 + $0x58] sm:$0x1] %v310_v1  ;;  %v313_v7 = vsel %vm13835_vm5, 0, %v312_v5  ;;  %v316_v8 = vsel %vm13835_vm5, 0, %v315_v6  ;;  %v318_v9 = vld [vmem:[#allocation2 + $0xa0] sm:$0x1] }
  0x57   : > { %v321_v10 = vld [vmem:[#allocation2 + $0xb8] sm:$0x1]  ;;  %314 = vst [vmem:[#allocation2 + $0x70] sm:$0x1] %v313_v7  ;;  %317 = vst [vmem:[#allocation2 + $0x88] sm:$0x1] %v316_v8 }
  0x58   : > { %v319_v11 = vsel %vm13835_vm5, 0, %v318_v9  ;;  %v322_v12 = vsel %vm13835_vm5, 0, %v321_v10  ;;  %v324_v13 = vld [vmem:[#allocation2 + $0xd0] sm:$0x1]  ;;  %v327_v14 = vld [vmem:[#allocation2 + $0xe8] sm:$0x1] }
  0x59   : > { %320 = vst [vmem:[#allocation2 + $0xa0] sm:$0x1] %v319_v11  ;;  %323 = vst [vmem:[#allocation2 + $0xb8] sm:$0x1] %v322_v12  ;;  %v325_v15 = vsel %vm13835_vm5, 0, %v324_v13  ;;  %v328_v16 = vsel %vm13835_vm5, 0, %v327_v14 }
  0x5a   : > { %v330_v17 = vld [vmem:[#allocation2 + $0x100] sm:$0x1]  ;;  %v333_v18 = vld [vmem:[#allocation2 + $0x118] sm:$0x1]  ;;  %326 = vst [vmem:[#allocation2 + $0xd0] sm:$0x1] %v325_v15 }
  0x5b   : > { %329 = vst [vmem:[#allocation2 + $0xe8] sm:$0x1] %v328_v16  ;;  %v331_v19 = vsel %vm13835_vm5, 0, %v330_v17  ;;  %v334_v20 = vsel %vm13835_vm5, 0, %v333_v18  ;;  %v336_v21 = vld [vmem:[#allocation2 + $0x130] sm:$0x1] }
  0x5c   : > { %v339_v22 = vld [vmem:[#allocation2 + $0x148] sm:$0x1]  ;;  %332 = vst [vmem:[#allocation2 + $0x100] sm:$0x1] %v331_v19  ;;  %335 = vst [vmem:[#allocation2 + $0x118] sm:$0x1] %v334_v20 }
  0x5d   : > { %v337_v23 = vsel %vm13835_vm5, 0, %v336_v21  ;;  %v340_v24 = vsel %vm13835_vm5, 0, %v339_v22  ;;  %v342_v25 = vld [vmem:[#allocation2 + $0x160] sm:$0x1]  ;;  %v345_v26 = vld [vmem:[#allocation2 + $0x178] sm:$0x1] }
  0x5e   : > { %338 = vst [vmem:[#allocation2 + $0x130] sm:$0x1] %v337_v23  ;;  %341 = vst [vmem:[#allocation2 + $0x148] sm:$0x1] %v340_v24  ;;  %v343_v27 = vsel %vm13835_vm5, 0, %v342_v25  ;;  %v346_v28 = vsel %vm13835_vm5, 0, %v345_v26 }
  0x5f   : > { %v348_v29 = vld [vmem:[#allocation2 + $0x190] sm:$0x1]  ;;  %v351_v30 = vld [vmem:[#allocation2 + $0x1a8] sm:$0x1]  ;;  %344 = vst [vmem:[#allocation2 + $0x160] sm:$0x1] %v343_v27 }
  0x60   : > { %347 = vst [vmem:[#allocation2 + $0x178] sm:$0x1] %v346_v28  ;;  %v349_v31 = vsel %vm13835_vm5, 0, %v348_v29  ;;  %v352_v32 = vsel %vm13835_vm5, 0, %v351_v30  ;;  %v354_v33 = vld [vmem:[#allocation2 + $0x1c0] sm:$0x1] }
  0x61   : > { %v357_v34 = vld [vmem:[#allocation2 + $0x1d8] sm:$0x1]  ;;  %350 = vst [vmem:[#allocation2 + $0x190] sm:$0x1] %v349_v31  ;;  %353 = vst [vmem:[#allocation2 + $0x1a8] sm:$0x1] %v352_v32 }
  0x62   : > { %v355_v35 = vsel %vm13835_vm5, 0, %v354_v33  ;;  %v358_v36 = vsel %vm13835_vm5, 0, %v357_v34 }
  0x63   : > { %356 = vst [vmem:[#allocation2 + $0x1c0] sm:$0x1] %v355_v35  ;;  %359 = vst [vmem:[#allocation2 + $0x1d8] sm:$0x1] %v358_v36 }
  0x64   : > { %13579 = shalt.err (!%p13576_p13)  }
  0x65   : > { %s13580_s22 = scalar_lea.vmem %s13942_s6, 2048  ;;  %s13686_s24 = smov [#allocation2]  }
  0x66   : > { %p13581_p0 = scmp.ne.s32.totalorder %s13942_s6, %s13580_s22  ;;  %s13582_s30 = sshll.u32 %s13686_s24, 4  ;;  %s13583_s30 = int_to_ptr.vmem [resolvable:$false] %s13582_s30 }
  0x67   : > { %s13584_s7 = scalar_lea.vmem %s13583_s30, 7680  ;;  %p13585_p6 = scmp.lt.s32.totalorder %s13942_s6, %s13583_s30 }
  0x68   : > { %p13586_p7 = scmp.lt.s32.totalorder %s13584_s7, %s13580_s22 }
  0x6a   : > { %p13587_p9 = por %p13586_p7, %p13585_p6 }
  0x6c   : > { %p13588_p12 = pnand %p13587_p9, %p13581_p0 }
  0x6e   : > { %13591 = shalt.err (!%p13588_p12)  }
  0x6f   : > { %s13687_s8 = smov 128   ;;  %s13688_s10 = smov 384  }
  0x70   : > { %s13689_s11 = smov 8   ;;  %s13963_s12 = scalar_lea.vmem [#allocation10], %s13820_s5 }
  0x71   : > { %368 = dma.hbm_to_vmem [thread:$0]  %s13939_s9, 2048, %s13942_s6, [#allocation4], %s13687_s8, %s13688_s10, %s13689_s11 }
  0x72   : > { %13650 = dma.done.wait [#allocation4], 2048 }
  0x73   : > { %13651 = vsyncadd [#allocation4], 4294965248  ;;  %3365 = vmatprep.subr.bf16.mxu0 %v16835_v0  ;;  %v13038_v2 = vld [vmem:[#allocation5 + $0xf8] sm:$0xff]   ;;  %v13040_v38 = vld [vmem:[#allocation5 + $0xf0] sm:$0xff]   ;;  %vm922_vm6 = vcmask 1042432   ;;  %vm430_vm10 = vcmask 1041409   ;;  %s16777_s7 = scalar_lea.hbm %s16833_s4, %s11922_s29 }
  0x74   : > { %v13039_v37 = vld [vmem:[#allocation5 + $0x178] sm:$0xff]   ;;  %3366 = vmatpush1.bf16.msra.mxu0 %v13038_v2  ;;  %v13041_v39 = vld [vmem:[#allocation5 + $0x170] sm:$0xff]   ;;  %v13043_v40 = vld [vmem:[#allocation5 + $0x168] sm:$0xff]   ;;  %vm977_vm7 = vsmask.f32 4352  ;;  %vm6304_vm13 = vcmask 1044484  }
  0x75   : > { %12653 = vmatprep.subr.bf16.mxu1 %v13039_v37  ;;  %3367 = vmatprep.subr.bf16.mxu0 %v16835_v0  ;;  %v13042_v41 = vld [vmem:[#allocation5 + $0xe8] sm:$0xff]   ;;  %v13045_v42 = vld [vmem:[#allocation5 + $0x160] sm:$0xff]   ;;  %v13047_v44 = vld [vmem:[#allocation5 + $0x158] sm:$0xff]   ;;  %vm374_vm8 = vsmask.f32 7938  ;;  %vm6508_vm15 = vcmask 1043456  }
  0x76   : > { %12654 = vmatpush3.bf16.msra.mxu1 %v13039_v37  ;;  %v13044_v43 = vld [vmem:[#allocation5 + $0xe0] sm:$0xff]   ;;  %v13046_v45 = vld [vmem:[#allocation5 + $0xd8] sm:$0xff]   ;;  %v13048_v46 = vld [vmem:[#allocation5 + $0xd0] sm:$0xff]   ;;  %vm431_vm11 = vsmask.f32 1280  ;;  %vm6515_vm1 = vcmask 1041408  }
  0x77   : > { %12655 = vmatprep.subr.bf16.mxu1 %v13041_v39  ;;  %v13970_v47 = vld [vmem:[#allocation2 + $0x20] sm:$0xf]  ;;  %v13972_v48 = vld [vmem:[#allocation2 + $0x24] sm:$0xf]  ;;  %v13049_v49 = vld [vmem:[#allocation5 + $0x150] sm:$0xff]   ;;  %s11102_s22 = sshll.u32 %s13963_s12, 4  ;;  %s16779_s22 = int_to_ptr.vmem [resolvable:$true] %s11102_s22 }
  0x78   : > { %3368 = vmatpush1.bf16.msra.mxu0 %v13040_v38  ;;  %v13976_v50 = vcombine.low %v13970_v47, %v13972_v48  ;;  %v13055_v51 = vld [vmem:[#allocation2 + $0x28] ss:$0 sps:$4 sm:$0x11]   ;;  %v13978_v52 = vld [vmem:[#allocation2 + $0x38] sm:$0xf]  ;;  %v13053_v16 = vld [vmem:[#allocation5 + $0x140] sm:$0xff]  }
  0x79   : > { %3369 = vmatprep.subr.bf16.mxu0 %v16835_v0  ;;  %v13980_v53 = vld [vmem:[#allocation2 + $0x3c] sm:$0xf]  ;;  %v2291_v55 = vrot.slane %v13055_v51, 5  ;;  %v13058_v57 = vld [vmem:[#allocation2 + $0x40] ss:$0 sps:$4 sm:$0x11]   ;;  %vm14888_vm9 = vmand %vm209_vm2, %vm374_vm8 }
  0x7a   : > { %12656 = vmatpush3.bf16.msra.mxu1 %v13041_v39  ;;  %v2290_v54 = vrot.slane %v13976_v50, 5  ;;  %v13986_v56 = vcombine.low %v13978_v52, %v13980_v53  ;;  %v13051_v58 = vld [vmem:[#allocation5 + $0x148] sm:$0xff]   ;;  %v13990_v63 = vld [vmem:[#allocation2 + $0x50] sm:$0xf]  ;;  %v2294_v5 = vrot.slane %v13058_v57, 5  ;;  %v13052_v21 = vld [vmem:[#allocation5 + $0xc0] sm:$0xff]  }
  0x7b   : > { %12657 = vmatprep.subr.bf16.mxu1 %v13043_v40  ;;  %v13050_v3 = vld [vmem:[#allocation5 + $0xc8] sm:$0xff]   ;;  %v13992_v6 = vld [vmem:[#allocation2 + $0x54] sm:$0xf]  ;;  %v13061_v15 = vld [vmem:[#allocation2 + $0x58] ss:$0 sps:$4 sm:$0x11]  }
  0x7c   : > { %3370 = vmatpush1.bf16.msra.mxu0 %v13042_v41  ;;  %v2292_v59 = vsel %vm922_vm6, %v2290_v54, %v2291_v55  ;;  %v2371_v60 = vshrl.u32 %v2290_v54, 16  ;;  %v2374_v61 = vshll.u32 %v2290_v54, 16  ;;  %v2293_v62 = vrot.slane %v13986_v56, 5  ;;  %v14002_v28 = vld [vmem:[#allocation2 + $0x68] sm:$0xf]  ;;  %v13056_v38 = vld [vmem:[#allocation5 + $0x138] sm:$0xff]   ;;  %vm14908_vm12 = vmand %vm430_vm10, %vm431_vm11 }
  0x7d   : > { %3371 = vmatprep.subr.bf16.mxu0 %v16835_v0  ;;  %v2379_v4 = vshrl.u32 %v2292_v59, 16  ;;  %v2382_v1 = vshll.u32 %v2292_v59, 16  ;;  %v13998_v14 = vcombine.low %v13990_v63, %v13992_v6  ;;  %v2297_v25 = vrot.slane %v13061_v15, 5  ;;  %v14004_v29 = vld [vmem:[#allocation2 + $0x6c] sm:$0xf]  ;;  %vm15208_vm14 = vmor %vm209_vm2, %vm6304_vm13  ;;  %s16784_s8 = scalar_lea.sflag [#allocation7], %s191_s26 }
  0x7e   : > { %12658 = vmatpush3.bf16.msra.mxu1 %v13043_v40  ;;  %v2373_v7 = vrot.slane %v2371_v60, 3  ;;  %v2376_v8 = vrot.slane %v2374_v61, 4  ;;  %v2414_v9 = vshrl.u32 %v2293_v62, 16  ;;  %v2417_v10 = vshll.u32 %v2293_v62, 16  ;;  %v14018_v59 = vld [vmem:[#allocation2 + $0x84] sm:$0xf]  ;;  %vm15244_vm0 = vmand %vm6508_vm15, %vm374_vm8 }
  0x7f   : > { %12659 = vmatprep.subr.bf16.mxu1 %v13045_v42  ;;  %v2381_v11 = vrot.slane %v2379_v4, 3  ;;  %v2384_v12 = vrot.slane %v2382_v1, 4  ;;  %v2295_v13 = vsel %vm922_vm6, %v2293_v62, %v2294_v5  ;;  %v2296_v24 = vrot.slane %v13998_v14, 5  ;;  %v13064_v37 = vld [vmem:[#allocation2 + $0x70] ss:$0 sps:$4 sm:$0x11]   ;;  %vm15291_vm3 = vmand %vm6515_vm1, %vm431_vm11 }
  0x80   : > { %3372 = vmatpush1.bf16.msra.mxu0 %v13044_v43  ;;  %v2377_v17 = vor.u32 %v2376_v8, %v2373_v7  ;;  %v2416_v18 = vrot.slane %v2414_v9, 3  ;;  %v2419_v19 = vrot.slane %v2417_v10, 4  ;;  %v2422_v20 = vshrl.u32 %v2295_v13, 16  ;;  %v13059_v60 = vld [vmem:[#allocation5 + $0x130] sm:$0xff]   ;;  %s13592_s10 = scalar_lea.vmem %s16779_s22, 2048  ;;  %p17090_p2 = scmp.ne.s32.totalorder %s16838_s25, 0 }
  0x81   : > { %3373 = vmatprep.subr.bf16.mxu0 %v16835_v0  ;;  %v2385_v22 = vor.u32 %v2384_v12, %v2381_v11  ;;  %v2425_v23 = vshll.u32 %v2295_v13, 16  ;;  %v2298_v32 = vsel %vm922_vm6, %v2296_v24, %v2297_v25  ;;  %v2457_v33 = vshrl.u32 %v2296_v24, 16  ;;  %v13067_v9 = vld [vmem:[#allocation5 + $0x30] sm:$0xff]   ;;  %v13062_v12 = vld [vmem:[#allocation5 + $0x128] sm:$0xff]   ;;  %p13593_p1 = scmp.ne.s32.totalorder %s16779_s22, %s13592_s10  ;;  %s13690_s18 = smov [#allocation10]  }
  0x82   : > { %12660 = vmatpush3.bf16.msra.mxu1 %v13045_v42  ;;  %v2420_v26 = vor.u32 %v2419_v19, %v2416_v18  ;;  %v2424_v27 = vrot.slane %v2422_v20, 3  ;;  %v2460_v34 = vshll.u32 %v2296_v24, 16  ;;  %v2465_v35 = vshrl.u32 %v2298_v32, 16  ;;  %s13596_s11 = sshll.u32 %s13690_s18, 4  ;;  %s13597_s11 = int_to_ptr.vmem [resolvable:$false] %s13596_s11 }
  0x83   : > { %12661 = vmatprep.subr.bf16.mxu1 %v13047_v44  ;;  %v2386_v30 = vsel %vm977_vm7, %v2377_v17, %v2385_v22  ;;  %v2427_v31 = vrot.slane %v2425_v23, 4  ;;  %v2468_v36 = vshll.u32 %v2298_v32, 16  ;;  %v14010_v2 = vcombine.low %v14002_v28, %v14004_v29  ;;  %v14029_v17 = vld [vmem:[#allocation2 + $0x9c] sm:$0xf]  ;;  %v13073_v22 = vld [vmem:[#allocation5 + $0x28] sm:$0xff]   ;;  %p13594_p5 = pnand %p13593_p1, %p17090_p2  ;;  %s13598_s29 = scalar_lea.vmem %s13597_s11, 4096 }
  0x84   : > { %3374 = vmatpush1.bf16.msra.mxu0 %v13046_v45  ;;  %12669 = vmatprep.mubr.bf16.mxu1 %v2386_v30  ;;  %v2459_v40 = vrot.slane %v2457_v33, 3  ;;  %v2462_v41 = vrot.slane %v2460_v34, 4  ;;  %v2467_v42 = vrot.slane %v2465_v35, 3  ;;  %v14039_v34 = vcombine.low %v13972_v48, %v13972_v48  ;;  %p13599_p4 = scmp.lt.s32.totalorder %s16779_s22, %s13597_s11  ;;  %p13600_p8 = scmp.lt.s32.totalorder %s13598_s29, %s13592_s10 }
  0x85   : > { %3375 = vmatprep.subr.bf16.mxu0 %v16835_v0  ;;  %v2428_v39 = vor.u32 %v2427_v31, %v2424_v27  ;;  %v2470_v43 = vrot.slane %v2468_v36, 4  ;;  %v2093_v27 = vshrl.u32 %v13976_v50, 16  ;;  %v13066_v31 = vld [vmem:[#allocation5 + $0x120] sm:$0xff]   ;;  %v14050_v48 = vcombine.low %v13992_v6, %v13992_v6  ;;  %p13595_p3 = pneg %p13594_p5 }
  0x86   : > { %12662 = vmatpush3.bf16.msra.mxu1 %v13047_v44  ;;  %v2299_v44 = vrot.slane %v14010_v2, 5  ;;  %v2463_v51 = vor.u32 %v2462_v41, %v2459_v40  ;;  %v13075_v41 = vld [vmem:[#allocation5 + $0x20] sm:$0xff]   ;;  %v14058_v6 = vcombine.low %v14004_v29, %v14004_v29  ;;  %vm6941_vm2 = vcmask 1046528   ;;  %p13601_p10 = por %p13600_p8, %p13599_p4 }
  0x87   : > { %12663 = vmatprep.subr.bf16.mxu1 %v13049_v49  ;;  %v2429_v45 = vsel %vm977_vm7, %v2420_v26, %v2428_v39  ;;  %v2471_v54 = vor.u32 %v2470_v43, %v2467_v42  ;;  %v13072_v26 = vld [vmem:[#allocation2 + $0xa0] ss:$0 sps:$4 sm:$0x11]   ;;  %v14046_v42 = vcombine.low %v13980_v53, %v13980_v53  ;;  %vm6716_vm4 = vsmask.f32 7424 }
  0x88   : > { %3376 = vmatpush1.bf16.msra.mxu0 %v13048_v46  ;;  %v2300_v46 = vrot.slane %v13064_v37, 5  ;;  %v2500_v55 = vshrl.u32 %v2299_v44, 16  ;;  %v2503_v57 = vshll.u32 %v2299_v44, 16  ;;  %p13602_p11 = pnand %p13601_p10, %p13595_p3 }
  0x89   : > { %3377 = vmatprep.subr.bf16.mxu0 %v16835_v0  ;;  %v2472_v4 = vsel %vm977_vm7, %v2463_v51, %v2471_v54  ;;  %v11312_v51 = vld [vmem:[#allocation2 + $0xb4] sm:$0xf]  ;;  %v13070_v54 = vld [vmem:[#allocation5 + $0x118] sm:$0xff]  }
  0x8a   : > { %12664 = vmatpush3.bf16.msra.mxu1 %v13049_v49  ;;  %v13065_v49 = vld [vmem:[#allocation5 + $0x38] sm:$0xff]   ;;  %v2301_v61 = vsel %vm922_vm6, %v2299_v44, %v2300_v46  ;;  %v2502_v1 = vrot.slane %v2500_v55, 3  ;;  %v2505_v5 = vrot.slane %v2503_v57, 4 }
  0x8b   : > { %12665 = vmatprep.subr.bf16.mxu1 %v13051_v58  ;;  %v2508_v7 = vshrl.u32 %v2301_v61, 16  ;;  %v2511_v8 = vshll.u32 %v2301_v61, 16 }
  0x8c   : > { %3378 = vmatpush1.bf16.msra.mxu0 %v13050_v3  ;;  %v13069_v3 = vld [vmem:[#allocation2 + $0x88] ss:$0 sps:$4 sm:$0x11]   ;;  %v2506_v13 = vor.u32 %v2505_v5, %v2502_v1  ;;  %v2095_v1 = vrot.slane %v2093_v27, 4  ;;  %v13074_v27 = vld [vmem:[#allocation5 + $0x110] sm:$0xff]  }
  0x8d   : > { %3379 = vmatprep.subr.bf16.mxu0 %v16835_v0  ;;  %v2303_v11 = vrot.slane %v13069_v3, 5  ;;  %v2510_v15 = vrot.slane %v2508_v7, 3  ;;  %v2513_v18 = vrot.slane %v2511_v8, 4 }
  0x8e   : > { %12666 = vmatpush3.bf16.msra.mxu1 %v13051_v58  ;;  %v14016_v58 = vld [vmem:[#allocation2 + $0x80] sm:$0xf] }
  0x8f   : > { %12667 = vmatprep.subr.bf16.mxu1 %v13053_v16  ;;  %v14023_v62 = vcombine.low %v14016_v58, %v14018_v59  ;;  %v2514_v30 = vor.u32 %v2513_v18, %v2510_v15  ;;  %v2353_v15 = vshrl.u32 %v14039_v34, 16 }
  0x90   : > { %3380 = vmatpush1.bf16.msra.mxu0 %v13052_v21 }
  0x91   : > { %3381 = vmatprep.subr.bf16.mxu0 %v16835_v0  ;;  %v2302_v10 = vrot.slane %v14023_v62, 5  ;;  %v2515_v39 = vsel %vm977_vm7, %v2506_v13, %v2514_v30  ;;  %v11316_v13 = vld [vmem:[#allocation2 + $0xcc] sm:$0xf] }
  0x92   : > { %12668 = vmatpush3.bf16.msra.mxu1 %v13053_v16  ;;  %v11307_v16 = vld [vmem:[#allocation2 + $0x98] sm:$0xf] }
  0x93   : > { %3863 = vmatprep.subr.bf16.mxu1 %v16835_v0  ;;  %v2304_v19 = vsel %vm922_vm6, %v2302_v10, %v2303_v11  ;;  %v2543_v20 = vshrl.u32 %v2302_v10, 16  ;;  %v2546_v21 = vshll.u32 %v2302_v10, 16  ;;  %v14034_v25 = vcombine.low %v11307_v16, %v14029_v17 }
  0x94   : > { %3382 = vmatpush2.bf16.msra.mxu0 %v13056_v38  ;;  %v2551_v23 = vshrl.u32 %v2304_v19, 16  ;;  %v2554_v24 = vshll.u32 %v2304_v19, 16  ;;  %v2306_v38 = vrot.slane %v13072_v26, 5  ;;  %v2096_v10 = vshll.u32 %v13976_v50, 16 }
  0x95   : > { %12670 = vmatmul.mubr.bf16.vlgmr.msra.gmra.mxu1 %v2429_v45  ;;  %3383 = vmatprep.subr.bf16.mxu0 %v16835_v0  ;;  %v2545_v32 = vrot.slane %v2543_v20, 3  ;;  %v2548_v33 = vrot.slane %v2546_v21, 4  ;;  %v2305_v37 = vrot.slane %v14034_v25, 5  ;;  %v14068_v16 = vcombine.low %v14018_v59, %v14018_v59 }
  0x96   : > { %12673 = vmatprep.mubr.bf16.mxu1 %v2472_v4  ;;  %3864 = vmatpush1.bf16.msra.mxu1 %v13065_v49  ;;  %v2553_v35 = vrot.slane %v2551_v23, 3  ;;  %v2556_v36 = vrot.slane %v2554_v24, 4  ;;  %v11311_v49 = vld [vmem:[#allocation2 + $0xb0] sm:$0xf]  ;;  %v2098_v23 = vrot.slane %v2096_v10, 5  ;;  %v14076_v24 = vcombine.low %v14029_v17, %v14029_v17 }
  0x97   : > { %3865 = vmatprep.subr.bf16.mxu1 %v16835_v0  ;;  %v2549_v40 = vor.u32 %v2548_v33, %v2545_v32  ;;  %v2307_v44 = vsel %vm922_vm6, %v2305_v37, %v2306_v38  ;;  %v2586_v45 = vshrl.u32 %v2305_v37, 16  ;;  %v2589_v46 = vshll.u32 %v2305_v37, 16  ;;  %v13077_v4 = vld [vmem:[#allocation2 + $0xb8] ss:$0 sps:$4 sm:$0x11]   ;;  %v13083_v37 = vld [vmem:[#allocation5 + $0x10] sm:$0xff]  }
  0x98   : > { %3384 = vmatpush2.bf16.msra.mxu0 %v13059_v60  ;;  %v2557_v43 = vor.u32 %v2556_v36, %v2553_v35  ;;  %v2594_v55 = vshrl.u32 %v2307_v44, 16  ;;  %v2597_v57 = vshll.u32 %v2307_v44, 16  ;;  %v14054_v53 = vcombine.low %v11311_v49, %v11312_v51  ;;  %v13078_v44 = vld [vmem:[#allocation5 + $0x108] sm:$0xff]  }
  0x99   : > { %3385 = vmatprep.subr.bf16.mxu0 %v16835_v0  ;;  %v2588_v61 = vrot.slane %v2586_v45, 3  ;;  %v2591_v3 = vrot.slane %v2589_v46, 4  ;;  %v2309_v11 = vrot.slane %v13077_v4, 5  ;;  %v14078_v26 = vcombine.low %v11312_v51, %v11312_v51  ;;  %v11286_v51 = vld [vmem:[#allocation2 + $0x1c] sm:$0x8] }
  0x9a   : > { %3866 = vmatpush1.bf16.msra.mxu1 %v13067_v9  ;;  %v2558_v60 = vsel %vm977_vm7, %v2549_v40, %v2557_v43  ;;  %v2596_v5 = vrot.slane %v2594_v55, 3  ;;  %v2599_v7 = vrot.slane %v2597_v57, 4  ;;  %v2308_v8 = vrot.slane %v14054_v53, 5  ;;  %v13081_v9 = vld [vmem:[#allocation5 + $0x18] sm:$0xff]  }
  0x9b   : > { %3867 = vmatprep.subr.bf16.mxu1 %v16835_v0  ;;  %v2592_v29 = vor.u32 %v2591_v3, %v2588_v61  ;;  %v2099_v38 = vor.u32 %v2098_v23, %v2095_v1  ;;  %v14083_v40 = vrot.slane %v2353_v15, 3  ;;  %v11319_v61 = vld [vmem:[#allocation2 + $0xe0] sm:$0xf]  ;;  %v13091_v3 = vld [vmem:[#allocation5 + $0x8] sm:$0xff]   ;;  %v2356_v23 = vshll.u32 %v14039_v34, 16 }
  0x9c   : > { %3386 = vmatpush2.bf16.msra.mxu0 %v13062_v12  ;;  %v11315_v12 = vld [vmem:[#allocation2 + $0xc8] sm:$0xf]  ;;  %v2600_v18 = vor.u32 %v2599_v7, %v2596_v5  ;;  %v2629_v19 = vshrl.u32 %v2308_v8, 16  ;;  %v2632_v20 = vshll.u32 %v2308_v8, 16  ;;  %v2310_v50 = vsel %vm922_vm6, %v2308_v8, %v2309_v11  ;;  %v11320_v8 = vld [vmem:[#allocation2 + $0xe4] sm:$0xf] }
  0x9d   : > { %12674 = vmatmul.mubr.bf16.gmra.mxu1 %v2515_v39  ;;  %3387 = vmatprep.subr.bf16.mxu0 %v16835_v0  ;;  %v14070_v21 = vcombine.low %v11315_v12, %v11316_v13  ;;  %v2637_v32 = vshrl.u32 %v2310_v50, 16  ;;  %v2640_v33 = vshll.u32 %v2310_v50, 16  ;;  %v2362_v57 = vshrl.u32 %v2099_v38, 16  ;;  %v13088_v50 = vld [vmem:[#allocation5 + $0xb8] sm:$0xff]  }
  0x9e   : > { %3868 = vmatpush1.bf16.msra.mxu1 %v13073_v22  ;;  %12677 = vmatprep.mubr.bf16.mxu1 %v2558_v60  ;;  %v13080_v22 = vld [vmem:[#allocation2 + $0xd0] ss:$0 sps:$4 sm:$0x11]   ;;  %v2601_v59 = vsel %vm977_vm7, %v2592_v29, %v2600_v18  ;;  %v2631_v30 = vrot.slane %v2629_v19, 3  ;;  %v2365_v60 = vshll.u32 %v2099_v38, 16  ;;  %v11358_v7 = vcombine.low %v11286_v51, %v13970_v47  ;;  %v13082_v29 = vld [vmem:[#allocation5 + $0x100] sm:$0xff]  }
  0x9f   : > { %3869 = vmatprep.subr.bf16.mxu1 %v16835_v0  ;;  %v2311_v35 = vrot.slane %v14070_v21, 5  ;;  %v2312_v36 = vrot.slane %v13080_v22, 5  ;;  %v2639_v39 = vrot.slane %v2637_v32, 3  ;;  %v2642_v43 = vrot.slane %v2640_v33, 4 }
  0xa0   : > { %3388 = vmatpush2.bf16.msra.mxu0 %v13066_v31  ;;  %v2634_v31 = vrot.slane %v2632_v20, 4  ;;  %v2364_v11 = vrot.slane %v2362_v57, 3  ;;  %v2367_v12 = vrot.slane %v2365_v60, 4  ;;  %v2345_v18 = vshrl.u32 %v11358_v7, 16 }
  0xa1   : > { %3389 = vmatprep.subr.bf16.mxu0 %v16835_v0  ;;  %v2313_v45 = vsel %vm922_vm6, %v2311_v35, %v2312_v36  ;;  %v2672_v46 = vshrl.u32 %v2311_v35, 16  ;;  %v2675_v49 = vshll.u32 %v2311_v35, 16  ;;  %v2643_v4 = vor.u32 %v2642_v43, %v2639_v39  ;;  %v13087_v20 = vld [vmem:[#allocation2 + $0xe8] ss:$0 sps:$4 sm:$0x11]  }
  0xa2   : > { %3870 = vmatpush1.bf16.msra.mxu1 %v13075_v41  ;;  %v2635_v17 = vor.u32 %v2634_v31, %v2631_v30  ;;  %v14085_v41 = vcombine.low %v11316_v13, %v11316_v13  ;;  %v2683_v55 = vshll.u32 %v2313_v45, 16  ;;  %v2348_v19 = vshll.u32 %v11358_v7, 16  ;;  %v13092_v30 = vld [vmem:[#allocation5] sm:$0xff]   ;;  %v11324_v35 = vld [vmem:[#allocation2 + $0xfc] sm:$0xf] }
  0xa3   : > { %3871 = vmatprep.subr.bf16.mxu1 %v16835_v0  ;;  %v2674_v1 = vrot.slane %v2672_v46, 3  ;;  %v2677_v5 = vrot.slane %v2675_v49, 4  ;;  %v2368_v47 = vor.u32 %v2367_v12, %v2364_v11  ;;  %v2347_v31 = vrot.slane %v2345_v18, 3  ;;  %v13090_v43 = vld [vmem:[#allocation2 + $0x100] ss:$0 sps:$4 sm:$0x11]  }
  0xa4   : > { %3390 = vmatpush2.bf16.msra.mxu0 %v13070_v54  ;;  %v2680_v54 = vshrl.u32 %v2313_v45, 16  ;;  %v2685_v10 = vrot.slane %v2683_v55, 4  ;;  %v2644_v13 = vsel %vm977_vm7, %v2635_v17, %v2643_v4  ;;  %v2350_v32 = vrot.slane %v2348_v19, 4  ;;  %v13099_v4 = vld [vmem:[#allocation5 + $0x78] sm:$0xff]  }
  0xa5   : > { %12678 = vmatmul.mubr.bf16.gmra.mxu1 %v2601_v59  ;;  %3391 = vmatprep.subr.bf16.mxu0 %v16835_v0  ;;  %v2678_v15 = vor.u32 %v2677_v5, %v2674_v1  ;;  %v14094_v59 = vcombine.low %v11319_v61, %v11320_v8  ;;  %v2315_v33 = vrot.slane %v13087_v20, 5  ;;  %v2101_v36 = vshrl.u32 %v13986_v56, 16 }
  0xa6   : > { %3872 = vmatpush1.bf16.msra.mxu1 %v13081_v9  ;;  %v2682_v9 = vrot.slane %v2680_v54, 3  ;;  %12681 = vmatprep.mubr.bf16.mxu1 %v2644_v13  ;;  %v2358_v38 = vrot.slane %v2356_v23, 4  ;;  %v2351_v34 = vor.u32 %v2350_v32, %v2347_v31  ;;  %v14103_v45 = vcombine.low %v11320_v8, %v11320_v8  ;;  %v11327_v23 = vld [vmem:[#allocation2 + $0x110] sm:$0xf] }
  0xa7   : > { %3873 = vmatprep.subr.bf16.mxu1 %v16835_v0  ;;  %3397 = vmatprep.mubr.bf16.mxu0 %v2368_v47  ;;  %v2314_v17 = vrot.slane %v14094_v59, 5  ;;  %v14105_v46 = vcombine.low %v11324_v35, %v11324_v35  ;;  %v2104_v8 = vshll.u32 %v13986_v56, 16  ;;  %v13100_v31 = vld [vmem:[#allocation5 + $0x70] sm:$0xff]  }
  0xa8   : > { %3392 = vmatpush2.bf16.msra.mxu0 %v13074_v27  ;;  %v2686_v22 = vor.u32 %v2685_v10, %v2682_v9  ;;  %v11323_v27 = vld [vmem:[#allocation2 + $0xf8] sm:$0xf]  ;;  %v2359_v49 = vor.u32 %v2358_v38, %v14083_v40  ;;  %v11290_v9 = vld [vmem:[#allocation2 + $0x34] sm:$0x8] }
  0xa9   : > { %3393 = vmatprep.subr.bf16.mxu0 %v16835_v0  ;;  %v14100_v39 = vcombine.low %v11323_v27, %v11324_v35  ;;  %v2316_v51 = vsel %vm922_vm6, %v2314_v17, %v2315_v33  ;;  %v2715_v54 = vshrl.u32 %v2314_v17, 16  ;;  %v2718_v55 = vshll.u32 %v2314_v17, 16  ;;  %v13108_v40 = vld [vmem:[#allocation5 + $0xb0] sm:$0xff]  }
  0xaa   : > { %3874 = vmatpush1.bf16.msra.mxu1 %v13083_v37  ;;  %v2687_v37 = vsel %vm977_vm7, %v2678_v15, %v2686_v22  ;;  %v2723_v57 = vshrl.u32 %v2316_v51, 16  ;;  %v2726_v60 = vshll.u32 %v2316_v51, 16  ;;  %v2360_v1 = vsel %vm977_vm7, %v2351_v34, %v2359_v49  ;;  %v11328_v27 = vld [vmem:[#allocation2 + $0x114] sm:$0xf] }
  0xab   : > { %3875 = vmatprep.subr.bf16.mxu1 %v16835_v0  ;;  %v2317_v61 = vrot.slane %v14100_v39, 5  ;;  %v2717_v5 = vrot.slane %v2715_v54, 3  ;;  %v2720_v7 = vrot.slane %v2718_v55, 4  ;;  %v2106_v47 = vrot.slane %v2104_v8, 5 }
  0xac   : > { %3394 = vmatpush2.bf16.msra.mxu0 %v13078_v44  ;;  %v2103_v44 = vrot.slane %v2101_v36, 4  ;;  %v2725_v10 = vrot.slane %v2723_v57, 3  ;;  %v11360_v56 = vcombine.low %v11290_v9, %v13978_v52  ;;  %v2396_v36 = vshrl.u32 %v14046_v42, 16  ;;  %v13098_v55 = vld [vmem:[#allocation2 + $0x130] ss:$0 sps:$4 sm:$0x11]  }
  0xad   : > { %3395 = vmatprep.subr.bf16.mxu0 %v16835_v0  ;;  %12682 = vmatmul.mubr.bf16.gmra.mxu1 %v2687_v37  ;;  %v2758_v12 = vshrl.u32 %v2317_v61, 16  ;;  %v2721_v13 = vor.u32 %v2720_v7, %v2717_v5  ;;  %v2761_v15 = vshll.u32 %v2317_v61, 16  ;;  %v11331_v37 = vld [vmem:[#allocation2 + $0x128] sm:$0xf]  ;;  %v2399_v54 = vshll.u32 %v14046_v42, 16 }
  0xae   : > { %3876 = vmatpush1.bf16.msra.mxu1 %v13091_v3  ;;  %v2318_v3 = vrot.slane %v13090_v43, 5  ;;  %v2388_v17 = vshrl.u32 %v11360_v56, 16  ;;  %v2391_v34 = vshll.u32 %v11360_v56, 16  ;;  %v11332_v43 = vld [vmem:[#allocation2 + $0x12c] sm:$0xf]  ;;  %v2398_v51 = vrot.slane %v2396_v36, 3 }
  0xaf   : > { %3877 = vmatprep.subr.bf16.mxu1 %v16835_v0  ;;  %v2760_v22 = vrot.slane %v2758_v12, 3  ;;  %v2763_v32 = vrot.slane %v2761_v15, 4  ;;  %v13107_v57 = vld [vmem:[#allocation5 + $0x68] sm:$0xff]   ;;  %v14120_v5 = vcombine.low %v11327_v23, %v11328_v27  ;;  %v2324_v12 = vrot.slane %v13098_v55, 5 }
  0xb0   : > { %3396 = vmatpush2.bf16.msra.mxu0 %v13082_v29  ;;  %v2728_v29 = vrot.slane %v2726_v60, 4  ;;  %v2319_v11 = vsel %vm922_vm6, %v2317_v61, %v2318_v3  ;;  %v2390_v3 = vrot.slane %v2388_v17, 3  ;;  %v11294_v42 = vld [vmem:[#allocation2 + $0x4c] sm:$0x8] }
  0xb1   : > { %12705 = vmatprep.subr.bf16.mxu0 %v13088_v50  ;;  %v2766_v18 = vshrl.u32 %v2319_v11, 16  ;;  %v2769_v19 = vshll.u32 %v2319_v11, 16  ;;  %v2764_v52 = vor.u32 %v2763_v32, %v2760_v22  ;;  %v2320_v11 = vrot.slane %v14120_v5, 5  ;;  %v13125_v15 = vld [vmem:[#allocation5 + $0xa8] sm:$0xff]  }
  0xb2   : > { %3878 = vmatpush1.bf16.msra.mxu1 %v13092_v30  ;;  %v2729_v20 = vor.u32 %v2728_v29, %v2725_v10  ;;  %v13096_v30 = vld [vmem:[#allocation2 + $0x118] ss:$0 sps:$4 sm:$0x11]   ;;  %v14122_v29 = vcombine.low %v11331_v37, %v11332_v43  ;;  %v11362_v22 = vcombine.low %v11294_v42, %v13990_v63 }
  0xb3   : > { %3398 = vmatmul.mubr.bf16.vlgmr.msra.gmra.mxu0 %v2360_v1  ;;  %3879 = vmatprep.subr.bf16.mxu1 %v16835_v0  ;;  %v2768_v33 = vrot.slane %v2766_v18, 3  ;;  %v2771_v35 = vrot.slane %v2769_v19, 4  ;;  %v2401_v1 = vrot.slane %v2399_v54, 4  ;;  %v2321_v7 = vrot.slane %v13096_v30, 5  ;;  %v13109_v30 = vld [vmem:[#allocation5 + $0x60] sm:$0xff]  }
  0xb4   : > { %12706 = vmatpush3.bf16.msra.mxu0 %v13088_v50  ;;  %v2730_v38 = vsel %vm977_vm7, %v2721_v13, %v2729_v20  ;;  %v2107_v50 = vor.u32 %v2106_v47, %v2103_v44  ;;  %v2109_v13 = vshrl.u32 %v13998_v14, 16  ;;  %v2323_v19 = vrot.slane %v14122_v29, 5 }
  0xb5   : > { %12707 = vmatprep.subr.bf16.mxu0 %v13108_v40  ;;  %12685 = vmatprep.mubr.bf16.mxu1 %v2730_v38  ;;  %v2772_v49 = vor.u32 %v2771_v35, %v2768_v33  ;;  %v2112_v20 = vshll.u32 %v13998_v14, 16  ;;  %v2322_v56 = vsel %vm922_vm6, %v2320_v11, %v2321_v7  ;;  %v2801_v23 = vshrl.u32 %v2320_v11, 16  ;;  %v13137_v14 = vld [vmem:[#allocation5 + $0xa0] sm:$0xff]   ;;  %v11339_v7 = vld [vmem:[#allocation2 + $0x158] sm:$0xf] }
  0xb6   : > { %3880 = vmatpush2.bf16.msra.mxu1 %v13099_v4  ;;  %v2405_v60 = vshrl.u32 %v2107_v50, 16  ;;  %v2408_v61 = vshll.u32 %v2107_v50, 16  ;;  %v2393_v4 = vrot.slane %v2391_v34, 4  ;;  %v2804_v27 = vshll.u32 %v2320_v11, 16  ;;  %v13116_v50 = vld [vmem:[#allocation5 + $0x58] sm:$0xff]  }
  0xb7   : > { %3881 = vmatprep.subr.bf16.mxu1 %v16835_v0  ;;  %v2773_v44 = vsel %vm977_vm7, %v2764_v52, %v2772_v49  ;;  %v2812_v32 = vshll.u32 %v2322_v56, 16  ;;  %v2325_v33 = vsel %vm922_vm6, %v2323_v19, %v2324_v12  ;;  %v2844_v35 = vshrl.u32 %v2323_v19, 16  ;;  %v11335_v49 = vld [vmem:[#allocation2 + $0x140] sm:$0xf]  ;;  %v13152_v12 = vld [vmem:[#allocation5 + $0x98] sm:$0xff]  }
  0xb8   : > { %12708 = vmatpush3.bf16.msra.mxu0 %v13108_v40  ;;  %12686 = vmatmul.mubr.bf16.gmra.mxu1 %v2773_v44  ;;  %v2407_v8 = vrot.slane %v2405_v60, 3  ;;  %v2410_v9 = vrot.slane %v2408_v61, 4  ;;  %v2394_v10 = vor.u32 %v2393_v4, %v2390_v3  ;;  %v2402_v40 = vor.u32 %v2401_v1, %v2398_v51  ;;  %v11336_v51 = vld [vmem:[#allocation2 + $0x144] sm:$0xf] }
  0xb9   : > { %12709 = vmatprep.subr.bf16.mxu0 %v13125_v15  ;;  %v2803_v63 = vrot.slane %v2801_v23, 3  ;;  %v2806_v36 = vrot.slane %v2804_v27, 4  ;;  %v2847_v37 = vshll.u32 %v2323_v19, 16  ;;  %v2852_v38 = vshrl.u32 %v2325_v33, 16  ;;  %v13117_v27 = vld [vmem:[#allocation5 + $0x50] sm:$0xff]  }
  0xba   : > { %3882 = vmatpush2.bf16.msra.mxu1 %v13100_v31  ;;  %v2411_v18 = vor.u32 %v2410_v9, %v2407_v8  ;;  %v2403_v47 = vsel %vm977_vm7, %v2394_v10, %v2402_v40  ;;  %v2809_v31 = vshrl.u32 %v2322_v56, 16  ;;  %v2814_v34 = vrot.slane %v2812_v32, 4  ;;  %v13104_v61 = vld [vmem:[#allocation2 + $0x148] ss:$0 sps:$4 sm:$0x11]   ;;  %v13167_v32 = vld [vmem:[#allocation5 + $0x90] sm:$0xff]  }
  0xbb   : > { %3883 = vmatprep.subr.bf16.mxu1 %v16835_v0  ;;  %v2846_v43 = vrot.slane %v2844_v35, 3  ;;  %v2855_v52 = vshll.u32 %v2325_v33, 16  ;;  %v2807_v54 = vor.u32 %v2806_v36, %v2803_v63  ;;  %v2849_v55 = vrot.slane %v2847_v37, 4  ;;  %v11340_v8 = vld [vmem:[#allocation2 + $0x15c] sm:$0xf] }
  0xbc   : > { %3405 = vmatprep.mubr.bf16.mxu0 %v2411_v18  ;;  %v2811_v17 = vrot.slane %v2809_v31, 3  ;;  %12710 = vmatpush3.bf16.msra.mxu0 %v13125_v15  ;;  %v2111_v60 = vrot.slane %v2109_v13, 4  ;;  %v2114_v44 = vrot.slane %v2112_v20, 5  ;;  %v2431_v1 = vshrl.u32 %v11362_v22, 16 }
  0xbd   : > { %3406 = vmatmul.mubr.bf16.gmra.mxu0 %v2403_v47  ;;  %12711 = vmatprep.subr.bf16.mxu0 %v13137_v14  ;;  %v2857_v4 = vrot.slane %v2855_v52, 4  ;;  %v13106_v9 = vld [vmem:[#allocation2 + $0x160] ss:$0 sps:$4 sm:$0x11]   ;;  %v2850_v10 = vor.u32 %v2849_v55, %v2846_v43  ;;  %v2434_v42 = vshll.u32 %v11362_v22, 16  ;;  %v2439_v40 = vshrl.u32 %v14050_v48, 16 }
  0xbe   : > { %3884 = vmatpush2.bf16.msra.mxu1 %v13107_v57  ;;  %v2854_v57 = vrot.slane %v2852_v38, 3  ;;  %v2815_v3 = vor.u32 %v2814_v34, %v2811_v17  ;;  %v2442_v11 = vshll.u32 %v14050_v48, 16  ;;  %v2115_v18 = vor.u32 %v2114_v44, %v2111_v60  ;;  %v11298_v44 = vld [vmem:[#allocation2 + $0x64] sm:$0x8] }
  0xbf   : > { %3885 = vmatprep.subr.bf16.mxu1 %v16835_v0  ;;  %v2433_v19 = vrot.slane %v2431_v1, 3  ;;  %v2436_v20 = vrot.slane %v2434_v42, 4  ;;  %v2441_v47 = vrot.slane %v2439_v40, 3  ;;  %v14138_v23 = vcombine.low %v11335_v49, %v11336_v51  ;;  %v13124_v49 = vld [vmem:[#allocation5 + $0x48] sm:$0xff]  }
  0xc0   : > { %v2816_v13 = vsel %vm977_vm7, %v2807_v54, %v2815_v3  ;;  %v2858_v15 = vor.u32 %v2857_v4, %v2854_v57  ;;  %12712 = vmatpush3.bf16.msra.mxu0 %v13137_v14  ;;  %v2444_v56 = vrot.slane %v2442_v11, 4  ;;  %v2451_v31 = vshll.u32 %v2115_v18, 16 }
  0xc1   : > { %12689 = vmatprep.mubr.bf16.mxu1 %v2816_v13  ;;  %v2327_v48 = vrot.slane %v13104_v61, 5  ;;  %12713 = vmatprep.subr.bf16.mxu0 %v13152_v12  ;;  %v2437_v33 = vor.u32 %v2436_v20, %v2433_v19  ;;  %v2326_v14 = vrot.slane %v14138_v23, 5  ;;  %v14143_v63 = vcombine.low %v11339_v7, %v11340_v8  ;;  %v13113_v13 = vld [vmem:[#allocation2 + $0x178] ss:$0 sps:$4 sm:$0x11]  }
  0xc2   : > { %3886 = vmatpush2.bf16.msra.mxu1 %v13109_v30  ;;  %v2859_v22 = vsel %vm977_vm7, %v2850_v10, %v2858_v15  ;;  %v2448_v30 = vshrl.u32 %v2115_v18, 16  ;;  %v2445_v35 = vor.u32 %v2444_v56, %v2441_v47  ;;  %v2453_v37 = vrot.slane %v2451_v31, 4  ;;  %v13126_v10 = vld [vmem:[#allocation5 + $0x40] sm:$0xff]   ;;  %v11343_v20 = vld [vmem:[#allocation2 + $0x170] sm:$0xf] }
  0xc3   : > { %3887 = vmatprep.subr.bf16.mxu1 %v16835_v0  ;;  %12690 = vmatmul.mubr.bf16.gmra.mxu1 %v2859_v22  ;;  %v2330_v38 = vrot.slane %v13106_v9, 5  ;;  %v2328_v34 = vsel %vm922_vm6, %v2326_v14, %v2327_v48  ;;  %v2887_v43 = vshrl.u32 %v2326_v14, 16  ;;  %v2890_v52 = vshll.u32 %v2326_v14, 16  ;;  %v11344_v47 = vld [vmem:[#allocation2 + $0x174] sm:$0xf] }
  0xc4   : > { %v2450_v36 = vrot.slane %v2448_v30, 3  ;;  %12714 = vmatpush3.bf16.msra.mxu0 %v13152_v12  ;;  %v2446_v17 = vsel %vm977_vm7, %v2437_v33, %v2445_v35  ;;  %v2895_v54 = vshrl.u32 %v2328_v34, 16  ;;  %v2898_v55 = vshll.u32 %v2328_v34, 16  ;;  %v11347_v31 = vld [vmem:[#allocation2 + $0x188] sm:$0xf] }
  0xc5   : > { %12715 = vmatprep.subr.bf16.mxu0 %v13167_v32  ;;  %v2329_v57 = vrot.slane %v14143_v63, 5  ;;  %v2889_v60 = vrot.slane %v2887_v43, 3  ;;  %v2892_v61 = vrot.slane %v2890_v52, 4  ;;  %v2120_v4 = vshll.u32 %v14010_v2, 16  ;;  %v11348_v14 = vld [vmem:[#allocation2 + $0x18c] sm:$0xf] }
  0xc6   : > { %3888 = vmatpush2.bf16.msra.mxu1 %v13116_v50  ;;  %v2117_v50 = vshrl.u32 %v14010_v2, 16  ;;  %v2454_v51 = vor.u32 %v2453_v37, %v2450_v36  ;;  %v2897_v1 = vrot.slane %v2895_v54, 3  ;;  %v2900_v7 = vrot.slane %v2898_v55, 4 }
  0xc7   : > { %3889 = vmatprep.subr.bf16.mxu1 %v16835_v0  ;;  %v2331_v8 = vsel %vm922_vm6, %v2329_v57, %v2330_v38  ;;  %v2930_v9 = vshrl.u32 %v2329_v57, 16  ;;  %v2893_v42 = vor.u32 %v2892_v61, %v2889_v60  ;;  %v2933_v40 = vshll.u32 %v2329_v57, 16  ;;  %v11302_v57 = vld [vmem:[#allocation2 + $0x7c] sm:$0x8] }
  0xc8   : > { %v2119_v3 = vrot.slane %v2117_v50, 4  ;;  %3413 = vmatprep.mubr.bf16.mxu0 %v2454_v51  ;;  %12716 = vmatpush3.bf16.msra.mxu0 %v13167_v32  ;;  %v2938_v11 = vshrl.u32 %v2331_v8, 16  ;;  %v2941_v12 = vshll.u32 %v2331_v8, 16  ;;  %v2901_v15 = vor.u32 %v2900_v7, %v2897_v1  ;;  %v13115_v50 = vld [vmem:[#allocation2 + $0x190] ss:$0 sps:$4 sm:$0x11]  }
  0xc9   : > { %3414 = vmatmul.mubr.bf16.gmra.mxu0 %v2446_v17  ;;  %v2932_v18 = vrot.slane %v2930_v9, 3  ;;  %v2122_v19 = vrot.slane %v2120_v4, 5  ;;  %v11364_v2 = vcombine.low %v11298_v44, %v14002_v28  ;;  %v2935_v56 = vrot.slane %v2933_v40, 4 }
  0xca   : > { %3890 = vmatpush2.bf16.msra.mxu1 %v13117_v27  ;;  %v2940_v27 = vrot.slane %v2938_v11, 3  ;;  %v2943_v22 = vrot.slane %v2941_v12, 4  ;;  %v2482_v30 = vshrl.u32 %v14058_v6, 16  ;;  %v2902_v48 = vsel %vm977_vm7, %v2893_v42, %v2901_v15 }
  0xcb   : > { %3891 = vmatprep.subr.bf16.mxu1 %v16835_v0  ;;  %v2123_v32 = vor.u32 %v2122_v19, %v2119_v3  ;;  %v2474_v33 = vshrl.u32 %v11364_v2, 16  ;;  %v2477_v35 = vshll.u32 %v11364_v2, 16  ;;  %12693 = vmatprep.mubr.bf16.mxu1 %v2902_v48  ;;  %v2936_v36 = vor.u32 %v2935_v56, %v2932_v18  ;;  %v11351_v48 = vld [vmem:[#allocation2 + $0x1a0] sm:$0xf] }
  0xcc   : > { %v2944_v37 = vor.u32 %v2943_v22, %v2940_v27  ;;  %v2484_v28 = vrot.slane %v2482_v30, 3  ;;  %v2485_v38 = vshll.u32 %v14058_v6, 16  ;;  %v14159_v54 = vcombine.low %v11343_v20, %v11344_v47  ;;  %v13180_v20 = vld [vmem:[#allocation5 + $0x88] sm:$0xff]  }
  0xcd   : > { %v2491_v17 = vshrl.u32 %v2123_v32, 16  ;;  %v2494_v34 = vshll.u32 %v2123_v32, 16  ;;  %v2476_v43 = vrot.slane %v2474_v33, 3  ;;  %v2479_v52 = vrot.slane %v2477_v35, 4  ;;  %v11352_v32 = vld [vmem:[#allocation2 + $0x1a4] sm:$0xf]  ;;  %12717 = vmatprep.subr.bf16.mxu0 %v13180_v20 }
  0xce   : > { %3892 = vmatpush2.bf16.msra.mxu1 %v13124_v49  ;;  %v2945_v49 = vsel %vm977_vm7, %v2936_v36, %v2944_v37  ;;  %v2487_v51 = vrot.slane %v2485_v38, 4  ;;  %v2333_v55 = vrot.slane %v13113_v13, 5  ;;  %v14161_v6 = vcombine.low %v11347_v31, %v11348_v14  ;;  %12718 = vmatpush3.bf16.msra.mxu0 %v13180_v20 }
  0xcf   : > { %3893 = vmatprep.subr.bf16.mxu1 %v16835_v0  ;;  %12694 = vmatmul.mubr.bf16.gmra.mxu1 %v2945_v49  ;;  %v2493_v60 = vrot.slane %v2491_v17, 3  ;;  %v2496_v61 = vrot.slane %v2494_v34, 4  ;;  %v2480_v3 = vor.u32 %v2479_v52, %v2476_v43  ;;  %v2332_v44 = vrot.slane %v14159_v54, 5  ;;  %v13121_v17 = vld [vmem:[#allocation2 + $0x1a8] ss:$0 sps:$4 sm:$0x11]  }
  0xd0   : > { %v2488_v4 = vor.u32 %v2487_v51, %v2484_v28  ;;  %v2336_v1 = vrot.slane %v13115_v50, 5  ;;  %v2125_v7 = vshrl.u32 %v14023_v62, 16  ;;  %v2335_v9 = vrot.slane %v14161_v6, 5  ;;  %v11355_v51 = vld [vmem:[#allocation2 + $0x1b8] sm:$0xf] }
  0xd1   : > { %v2497_v8 = vor.u32 %v2496_v61, %v2493_v60  ;;  %v11366_v42 = vcombine.low %v11302_v57, %v14016_v58  ;;  %v2334_v11 = vsel %vm922_vm6, %v2332_v44, %v2333_v55  ;;  %v2973_v12 = vshrl.u32 %v2332_v44, 16 }
  0xd2   : > { %3894 = vmatpush2.bf16.msra.mxu1 %v13126_v10  ;;  %v2128_v10 = vshll.u32 %v14023_v62, 16  ;;  %v2489_v40 = vsel %vm977_vm7, %v2480_v3, %v2488_v4  ;;  %v2976_v13 = vshll.u32 %v2332_v44, 16  ;;  %v2981_v15 = vshrl.u32 %v2334_v11, 16  ;;  %v11356_v3 = vld [vmem:[#allocation2 + $0x1bc] sm:$0xf] }
  0xd3   : > { %5728 = vmatprep.subr.bf16.mxu1 %v16835_v0  ;;  %3421 = vmatprep.mubr.bf16.mxu0 %v2497_v8  ;;  %v2984_v18 = vshll.u32 %v2334_v11, 16  ;;  %v2337_v19 = vsel %vm922_vm6, %v2335_v9, %v2336_v1  ;;  %v3016_v2 = vshrl.u32 %v2335_v9, 16  ;;  %v2975_v47 = vrot.slane %v2973_v12, 3  ;;  %v13123_v4 = vld [vmem:[#allocation2 + $0x1c0] ss:$0 sps:$4 sm:$0x11]  }
  0xd4   : > { %3422 = vmatmul.mubr.bf16.gmra.mxu0 %v2489_v40  ;;  %v2978_v56 = vrot.slane %v2976_v13, 4  ;;  %v3019_v27 = vshll.u32 %v2335_v9, 16  ;;  %v3024_v62 = vshrl.u32 %v2337_v19, 16  ;;  %v2983_v22 = vrot.slane %v2981_v15, 3 }
  0xd5   : > { %v2986_v58 = vrot.slane %v2984_v18, 4  ;;  %v3018_v30 = vrot.slane %v3016_v2, 3  ;;  %v3027_v31 = vshll.u32 %v2337_v19, 16  ;;  %v2127_v36 = vrot.slane %v2125_v7, 4 }
  0xd6   : > { %v2979_v33 = vor.u32 %v2978_v56, %v2975_v47  ;;  %v3021_v35 = vrot.slane %v3019_v27, 4  ;;  %v3026_v14 = vrot.slane %v3024_v62, 3  ;;  %v2130_v38 = vrot.slane %v2128_v10, 5 }
  0xd7   : > { %v2987_v37 = vor.u32 %v2986_v58, %v2983_v22  ;;  %v3029_v28 = vrot.slane %v3027_v31, 4  ;;  %v2517_v50 = vshrl.u32 %v11366_v42, 16  ;;  %v2520_v43 = vshll.u32 %v11366_v42, 16 }
  0xd8   : > { %v3022_v34 = vor.u32 %v3021_v35, %v3018_v30  ;;  %v2525_v52 = vshrl.u32 %v14068_v16, 16  ;;  %v2528_v49 = vshll.u32 %v14068_v16, 16  ;;  %v2131_v60 = vor.u32 %v2130_v38, %v2127_v36  ;;  %v11306_v35 = vld [vmem:[#allocation2 + $0x94] sm:$0x8] }
  0xd9   : > { %v2988_v55 = vsel %vm977_vm7, %v2979_v33, %v2987_v37  ;;  %v3030_v57 = vor.u32 %v3029_v28, %v3026_v14  ;;  %v2519_v61 = vrot.slane %v2517_v50, 3  ;;  %v2522_v44 = vrot.slane %v2520_v43, 4 }
  0xda   : > { %12697 = vmatprep.mubr.bf16.mxu1 %v2988_v55  ;;  %v2527_v1 = vrot.slane %v2525_v52, 3  ;;  %v2530_v7 = vrot.slane %v2528_v49, 4  ;;  %v14174_v8 = vcombine.low %v11351_v48, %v11352_v32  ;;  %v2534_v10 = vshrl.u32 %v2131_v60, 16 }
  0xdb   : > { %v3031_v9 = vsel %vm977_vm7, %v3022_v34, %v3030_v57  ;;  %v2537_v42 = vshll.u32 %v2131_v60, 16  ;;  %v2339_v40 = vrot.slane %v13121_v17, 5  ;;  %v2523_v16 = vor.u32 %v2522_v44, %v2519_v61  ;;  %v491_v57 = vld [vmem:[#allocation2 + $0x8] sm:$0xf]  ;;  %v492_v60 = vld [vmem:[#allocation2 + $0xc] sm:$0xf] }
  0xdc   : > { %12698 = vmatmul.mubr.bf16.gmra.mxu1 %v3031_v9  ;;  %v2531_v11 = vor.u32 %v2530_v7, %v2527_v1  ;;  %v2338_v12 = vrot.slane %v14174_v8, 5  ;;  %v14178_v13 = vcombine.low %v11355_v51, %v11356_v3  ;;  %v2536_v15 = vrot.slane %v2534_v10, 3  ;;  %v13494_v51 = vld [vmem:[#allocation2 + $0x98] sm:$0xf]  ;;  %v490_v44 = vld [vmem:[#allocation2 + $0x4] sm:$0x8] }
  0xdd   : > { %v2539_v18 = vrot.slane %v2537_v42, 4  ;;  %v2342_v19 = vrot.slane %v13123_v4, 5  ;;  %v2133_v2 = vshrl.u32 %v14034_v25, 16  ;;  %v2136_v33 = vshll.u32 %v14034_v25, 16 }
  0xde   : > { %v2532_v20 = vsel %vm977_vm7, %v2523_v16, %v2531_v11  ;;  %v2340_v47 = vsel %vm922_vm6, %v2338_v12, %v2339_v40  ;;  %v3059_v56 = vshrl.u32 %v2338_v12, 16  ;;  %v3062_v27 = vshll.u32 %v2338_v12, 16 }
  0xdf   : > { %v2540_v62 = vor.u32 %v2539_v18, %v2536_v15  ;;  %v3067_v22 = vshrl.u32 %v2340_v47, 16  ;;  %v3070_v58 = vshll.u32 %v2340_v47, 16  ;;  %v2341_v30 = vrot.slane %v14178_v13, 5 }
  0xe0   : > { %v3061_v31 = vrot.slane %v3059_v56, 3  ;;  %v3064_v48 = vrot.slane %v3062_v27, 4  ;;  %v2135_v32 = vrot.slane %v2133_v2, 4  ;;  %v2138_v49 = vrot.slane %v2136_v33, 5 }
  0xe1   : > { %3429 = vmatprep.mubr.bf16.mxu0 %v2540_v62  ;;  %v3069_v14 = vrot.slane %v3067_v22, 3  ;;  %v3072_v36 = vrot.slane %v3070_v58, 4  ;;  %v2343_v37 = vsel %vm922_vm6, %v2341_v30, %v2342_v19  ;;  %v3102_v28 = vshrl.u32 %v2341_v30, 16 }
  0xe2   : > { %3430 = vmatmul.mubr.bf16.gmra.mxu0 %v2532_v20  ;;  %v3065_v38 = vor.u32 %v3064_v48, %v3061_v31  ;;  %v3105_v50 = vshll.u32 %v2341_v30, 16  ;;  %v3110_v17 = vshrl.u32 %v2343_v37, 16  ;;  %v3113_v34 = vshll.u32 %v2343_v37, 16  ;;  %v13193_v37 = vld [vmem:[#allocation5 + $0x80] sm:$0xff]  }
  0xe3   : > { %v3073_v43 = vor.u32 %v3072_v36, %v3069_v14  ;;  %v3104_v52 = vrot.slane %v3102_v28, 3  ;;  %v11368_v55 = vcombine.low %v11306_v35, %v13494_v51  ;;  %v2568_v4 = vshrl.u32 %v14076_v24, 16  ;;  %v11310_v36 = vld [vmem:[#allocation2 + $0xac] sm:$0x8]  ;;  %12719 = vmatprep.subr.bf16.mxu0 %v13193_v37 }
  0xe4   : > { %v3107_v25 = vrot.slane %v3105_v50, 4  ;;  %v3112_v61 = vrot.slane %v3110_v17, 3  ;;  %v3115_v3 = vrot.slane %v3113_v34, 4  ;;  %v2139_v7 = vor.u32 %v2138_v49, %v2135_v32  ;;  %12720 = vmatpush3.bf16.msra.mxu0 %v13193_v37 }
  0xe5   : > { %v3074_v1 = vsel %vm977_vm7, %v3065_v38, %v3073_v43  ;;  %v2560_v9 = vshrl.u32 %v11368_v55, 16  ;;  %v2563_v10 = vshll.u32 %v11368_v55, 16  ;;  %v2570_v16 = vrot.slane %v2568_v4, 3 }
  0xe6   : > { %12701 = vmatprep.mubr.bf16.mxu1 %v3074_v1  ;;  %v3108_v42 = vor.u32 %v3107_v25, %v3104_v52  ;;  %v3116_v40 = vor.u32 %v3115_v3, %v3112_v61  ;;  %v2571_v11 = vshll.u32 %v14076_v24, 16  ;;  %v2577_v12 = vshrl.u32 %v2139_v7, 16  ;;  %v495_v61 = vld [vmem:[#allocation2 + $0x20] sm:$0xf] }
  0xe7   : > { %v2580_v15 = vshll.u32 %v2139_v7, 16  ;;  %v2562_v18 = vrot.slane %v2560_v9, 3  ;;  %v2565_v19 = vrot.slane %v2563_v10, 4  ;;  %v14190_v47 = vcombine.low %v491_v57, %v492_v60  ;;  %v496_v7 = vld [vmem:[#allocation2 + $0x24] sm:$0xf] }
  0xe8   : > { %v3117_v2 = vsel %vm977_vm7, %v3108_v42, %v3116_v40  ;;  %v2573_v20 = vrot.slane %v2571_v11, 4  ;;  %v11214_v56 = vcombine.low %v490_v44, %v491_v57  ;;  %v2579_v27 = vrot.slane %v2577_v12, 3  ;;  %v13495_v57 = vld [vmem:[#allocation2 + $0xb0] sm:$0xf] }
  0xe9   : > { %12702 = vmatmul.mubr.bf16.gmra.mxu1 %v3117_v2  ;;  %v2582_v62 = vrot.slane %v2580_v15, 4  ;;  %v2566_v22 = vor.u32 %v2565_v19, %v2562_v18  ;;  %v11215_v58 = vcombine.low %v492_v60, %v492_v60  ;;  %v725_v31 = vshrl.u32 %v14190_v47, 16 }
  0xea   : > { %v2574_v30 = vor.u32 %v2573_v20, %v2570_v16  ;;  %v728_v24 = vshll.u32 %v14190_v47, 16  ;;  %v979_v48 = vshrl.u32 %v11214_v56, 16  ;;  %v982_v33 = vshll.u32 %v11214_v56, 16  ;;  %v494_v16 = vld [vmem:[#allocation2 + $0x1c] sm:$0x8] }
  0xeb   : > { %v2583_v32 = vor.u32 %v2582_v62, %v2579_v27  ;;  %v987_v35 = vshrl.u32 %v11215_v58, 16  ;;  %v990_v14 = vshll.u32 %v11215_v58, 16  ;;  %v727_v38 = vrot.slane %v725_v31, 4 }
  0xec   : > { %v2575_v28 = vsel %vm977_vm7, %v2566_v22, %v2574_v30  ;;  %v730_v50 = vrot.slane %v728_v24, 5  ;;  %v981_v17 = vrot.slane %v979_v48, 3  ;;  %v984_v34 = vrot.slane %v982_v33, 4  ;;  %v13148_v22 = vld [vmem:[#allocation5 + $0x1b8] sm:$0xff]  }
  0xed   : > { %3437 = vmatprep.mubr.bf16.mxu0 %v2583_v32  ;;  %v989_v43 = vrot.slane %v987_v35, 3  ;;  %v992_v52 = vrot.slane %v990_v14, 4  ;;  %v2141_v49 = vshrl.u32 %v14054_v53, 16  ;;  %v2144_v55 = vshll.u32 %v14054_v53, 16 }
  0xee   : > { %3438 = vmatmul.mubr.bf16.gmra.mxu0 %v2575_v28  ;;  %v731_v51 = vor.u32 %v730_v50, %v727_v38  ;;  %v11370_v60 = vcombine.low %v11310_v36, %v13495_v57  ;;  %v2611_v25 = vshrl.u32 %v14078_v26, 16  ;;  %v985_v3 = vor.u32 %v984_v34, %v981_v17  ;;  %v11314_v38 = vld [vmem:[#allocation2 + $0xc4] sm:$0x8]  ;;  %v13155_v57 = vld [vmem:[#allocation5 + $0x1b0] sm:$0xff]  }
  0xef   : > { %v993_v4 = vor.u32 %v992_v52, %v989_v43  ;;  %v2143_v44 = vrot.slane %v2141_v49, 4  ;;  %v2614_v1 = vshll.u32 %v14078_v26, 16  ;;  %v2146_v42 = vrot.slane %v2144_v55, 5 }
  0xf0   : > { %v996_v9 = vshrl.u32 %v731_v51, 16  ;;  %v999_v10 = vshll.u32 %v731_v51, 16  ;;  %v2603_v40 = vshrl.u32 %v11370_v60, 16  ;;  %v2606_v53 = vshll.u32 %v11370_v60, 16 }
  0xf1   : > { %v994_v11 = vsel %vm977_vm7, %v985_v3, %v993_v4  ;;  %v2613_v12 = vrot.slane %v2611_v25, 3  ;;  %v2616_v15 = vrot.slane %v2614_v1, 4  ;;  %v2147_v2 = vor.u32 %v2146_v42, %v2143_v44  ;;  %v13496_v3 = vld [vmem:[#allocation2 + $0xc8] sm:$0xf] }
  0xf2   : > { %v998_v18 = vrot.slane %v996_v9, 3  ;;  %v1001_v19 = vrot.slane %v999_v10, 4  ;;  %v2605_v20 = vrot.slane %v2603_v40, 3  ;;  %v2608_v56 = vrot.slane %v2606_v53, 4  ;;  %v499_v10 = vld [vmem:[#allocation2 + $0x38] sm:$0xf] }
  0xf3   : > { %v2617_v27 = vor.u32 %v2616_v15, %v2613_v12  ;;  %v14200_v62 = vcombine.low %v495_v61, %v496_v7  ;;  %v11216_v26 = vcombine.low %v494_v16, %v495_v61  ;;  %v2620_v30 = vshrl.u32 %v2147_v2, 16  ;;  %v500_v53 = vld [vmem:[#allocation2 + $0x3c] sm:$0xf] }
  0xf4   : > { %v1002_v58 = vor.u32 %v1001_v19, %v998_v18  ;;  %v2623_v31 = vshll.u32 %v2147_v2, 16  ;;  %v11217_v24 = vcombine.low %v496_v7, %v496_v7  ;;  %v2609_v48 = vor.u32 %v2608_v56, %v2605_v20  ;;  %v13161_v19 = vld [vmem:[#allocation5 + $0x1a8] sm:$0xff]  }
  0xf5   : > { %v733_v32 = vshrl.u32 %v14200_v62, 16  ;;  %v736_v33 = vshll.u32 %v14200_v62, 16  ;;  %v1022_v35 = vshrl.u32 %v11216_v26, 16  ;;  %v2622_v14 = vrot.slane %v2620_v30, 3 }
  0xf6   : > { %3895 = vmatprep.mubr.bf16.mxu1 %v1002_v58  ;;  %v2625_v36 = vrot.slane %v2623_v31, 4  ;;  %v1025_v37 = vshll.u32 %v11216_v26, 16  ;;  %v1030_v28 = vshrl.u32 %v11217_v24, 16  ;;  %v2618_v50 = vsel %vm977_vm7, %v2609_v48, %v2617_v27  ;;  %v498_v26 = vld [vmem:[#allocation2 + $0x34] sm:$0x8] }
  0xf7   : > { %3896 = vmatmul.mubr.bf16.vlgmr.msra.gmra.mxu1 %v994_v11  ;;  %v735_v17 = vrot.slane %v733_v32, 4  ;;  %v738_v34 = vrot.slane %v736_v33, 5  ;;  %v1024_v43 = vrot.slane %v1022_v35, 3  ;;  %v1033_v55 = vshll.u32 %v11217_v24, 16 }
  0xf8   : > { %v2626_v52 = vor.u32 %v2625_v36, %v2622_v14  ;;  %v1027_v49 = vrot.slane %v1025_v37, 4  ;;  %v1032_v51 = vrot.slane %v1030_v28, 3  ;;  %5729 = vmatpush1.bf16.msra.mxu1 %v13148_v22  ;;  %v2149_v25 = vshrl.u32 %v14070_v21, 16  ;;  %v13168_v37 = vld [vmem:[#allocation5 + $0x1a0] sm:$0xff]  }
  0xf9   : > { %v739_v60 = vor.u32 %v738_v34, %v735_v17  ;;  %v2152_v61 = vshll.u32 %v14070_v21, 16  ;;  %v11372_v4 = vcombine.low %v11314_v38, %v13496_v3  ;;  %5730 = vmatprep.subr.bf16.mxu1 %v16835_v0  ;;  %v1035_v1 = vrot.slane %v1033_v55, 4 }
  0xfa   : > { %3445 = vmatprep.mubr.bf16.mxu0 %v2626_v52  ;;  %v1028_v44 = vor.u32 %v1027_v49, %v1024_v43  ;;  %v2654_v7 = vshrl.u32 %v14085_v41, 16  ;;  %v2657_v9 = vshll.u32 %v14085_v41, 16  ;;  %v2151_v16 = vrot.slane %v2149_v25, 4 }
  0xfb   : > { %3446 = vmatmul.mubr.bf16.gmra.mxu0 %v2618_v50  ;;  %v1039_v42 = vshrl.u32 %v739_v60, 16  ;;  %v1042_v40 = vshll.u32 %v739_v60, 16  ;;  %v2154_v11 = vrot.slane %v2152_v61, 5  ;;  %v1036_v12 = vor.u32 %v1035_v1, %v1032_v51  ;;  %v11318_v51 = vld [vmem:[#allocation2 + $0xdc] sm:$0x8] }
  0xfc   : > { %v2646_v21 = vshrl.u32 %v11372_v4, 16  ;;  %v2649_v15 = vshll.u32 %v11372_v4, 16  ;;  %v2656_v18 = vrot.slane %v2654_v7, 3  ;;  %5731 = vmatpush1.bf16.msra.mxu1 %v13155_v57  ;;  %v2659_v27 = vrot.slane %v2657_v9, 4  ;;  %v13174_v1 = vld [vmem:[#allocation5 + $0x198] sm:$0xff]  }
  0xfd   : > { %v1041_v2 = vrot.slane %v1039_v42, 3  ;;  %v1044_v20 = vrot.slane %v1042_v40, 4  ;;  %v2155_v56 = vor.u32 %v2154_v11, %v2151_v16  ;;  %5732 = vmatprep.subr.bf16.mxu1 %v16835_v0  ;;  %v1037_v41 = vsel %vm977_vm7, %v1028_v44, %v1036_v12  ;;  %v13497_v42 = vld [vmem:[#allocation2 + $0xe0] sm:$0xf]  ;;  %v503_v16 = vld [vmem:[#allocation2 + $0x50] sm:$0xf] }
  0xfe   : > { %v2648_v22 = vrot.slane %v2646_v21, 3  ;;  %v2651_v58 = vrot.slane %v2649_v15, 4  ;;  %v14212_v30 = vcombine.low %v499_v10, %v500_v53  ;;  %v2660_v32 = vor.u32 %v2659_v27, %v2656_v18  ;;  %v504_v11 = vld [vmem:[#allocation2 + $0x54] sm:$0xf]  ;;  %v502_v18 = vld [vmem:[#allocation2 + $0x4c] sm:$0x8] }
  0xff   : > { %v1045_v31 = vor.u32 %v1044_v20, %v1041_v2  ;;  %v2663_v24 = vshrl.u32 %v2155_v56, 16  ;;  %v2666_v48 = vshll.u32 %v2155_v56, 16  ;;  %v11218_v36 = vcombine.low %v498_v26, %v499_v10 }
 0x100   : > { %v2652_v33 = vor.u32 %v2651_v58, %v2648_v22  ;;  %v741_v35 = vshrl.u32 %v14212_v30, 16  ;;  %v744_v14 = vshll.u32 %v14212_v30, 16  ;;  %5733 = vmatpush1.bf16.msra.mxu1 %v13161_v19  ;;  %v11219_v50 = vcombine.low %v500_v53, %v500_v53  ;;  %v13184_v22 = vld [vmem:[#allocation5 + $0x190] sm:$0xff]  }
 0x101   : > { %3903 = vmatprep.mubr.bf16.mxu1 %v1045_v31  ;;  %v2665_v28 = vrot.slane %v2663_v24, 3  ;;  %v2668_v38 = vrot.slane %v2666_v48, 4  ;;  %v2157_v17 = vshrl.u32 %v14094_v59, 16  ;;  %5734 = vmatprep.subr.bf16.mxu1 %v16835_v0  ;;  %v1065_v49 = vshrl.u32 %v11218_v36, 16 }
 0x102   : > { %3904 = vmatmul.mubr.bf16.gmra.mxu1 %v1037_v41  ;;  %v2661_v34 = vsel %vm977_vm7, %v2652_v33, %v2660_v32  ;;  %v743_v43 = vrot.slane %v741_v35, 4  ;;  %v746_v52 = vrot.slane %v744_v14, 5  ;;  %v1068_v57 = vshll.u32 %v11218_v36, 16 }
 0x103   : > { %v2669_v55 = vor.u32 %v2668_v38, %v2665_v28  ;;  %v1073_v60 = vshrl.u32 %v11219_v50, 16  ;;  %v1076_v25 = vshll.u32 %v11219_v50, 16  ;;  %v1067_v3 = vrot.slane %v1065_v49, 3  ;;  %v13192_v50 = vld [vmem:[#allocation5 + $0x188] sm:$0xff]  }
 0x104   : > { %v747_v61 = vor.u32 %v746_v52, %v743_v43  ;;  %v2159_v4 = vrot.slane %v2157_v17, 4  ;;  %v2160_v44 = vshll.u32 %v14094_v59, 16  ;;  %5735 = vmatpush1.bf16.msra.mxu1 %v13168_v37  ;;  %v1070_v7 = vrot.slane %v1068_v57, 4  ;;  %v13209_v57 = vld [vmem:[#allocation5 + $0x238] sm:$0xff]  }
 0x105   : > { %3453 = vmatprep.mubr.bf16.mxu0 %v2669_v55  ;;  %v1075_v9 = vrot.slane %v1073_v60, 3  ;;  %v1078_v10 = vrot.slane %v1076_v25, 4  ;;  %v11374_v40 = vcombine.low %v11318_v51, %v13497_v42  ;;  %5736 = vmatprep.subr.bf16.mxu1 %v16835_v0  ;;  %v2697_v15 = vshrl.u32 %v14103_v45, 16 }
 0x106   : > { %3454 = vmatmul.mubr.bf16.gmra.mxu0 %v2661_v34  ;;  %v1082_v53 = vshrl.u32 %v747_v61, 16  ;;  %v1085_v12 = vshll.u32 %v747_v61, 16  ;;  %v2162_v21 = vrot.slane %v2160_v44, 5  ;;  %v1071_v59 = vor.u32 %v1070_v7, %v1067_v3  ;;  %12757 = vmatprep.subr.bf16.mxu0 %v13209_v57 }
 0x107   : > { %v1079_v19 = vor.u32 %v1078_v10, %v1075_v9  ;;  %v2689_v2 = vshrl.u32 %v11374_v40, 16  ;;  %v2692_v20 = vshll.u32 %v11374_v40, 16  ;;  %v2699_v41 = vrot.slane %v2697_v15, 3  ;;  %v13498_v15 = vld [vmem:[#allocation2 + $0xf8] sm:$0xf] }
 0x108   : > { %v1084_v56 = vrot.slane %v1082_v53, 3  ;;  %v1087_v27 = vrot.slane %v1085_v12, 4  ;;  %v2163_v26 = vor.u32 %v2162_v21, %v2159_v4  ;;  %5737 = vmatpush1.bf16.msra.mxu1 %v13174_v1  ;;  %v2700_v48 = vshll.u32 %v14103_v45, 16  ;;  %v11322_v4 = vld [vmem:[#allocation2 + $0xf4] sm:$0x8]  ;;  %v13199_v12 = vld [vmem:[#allocation5 + $0x180] sm:$0xff]  }
 0x109   : > { %v1080_v58 = vsel %vm977_vm7, %v1071_v59, %v1079_v19  ;;  %v2691_v31 = vrot.slane %v2689_v2, 3  ;;  %v2694_v24 = vrot.slane %v2692_v20, 4  ;;  %5738 = vmatprep.subr.bf16.mxu1 %v16835_v0  ;;  %v14225_v14 = vcombine.low %v503_v16, %v504_v11  ;;  %v508_v53 = vld [vmem:[#allocation2 + $0x6c] sm:$0xf]  ;;  %v506_v2 = vld [vmem:[#allocation2 + $0x64] sm:$0x8] }
 0x10a   : > { %v1088_v32 = vor.u32 %v1087_v27, %v1084_v56  ;;  %v2706_v33 = vshrl.u32 %v2163_v26, 16  ;;  %v2709_v35 = vshll.u32 %v2163_v26, 16  ;;  %v2702_v37 = vrot.slane %v2700_v48, 4 }
 0x10b   : > { %v2695_v36 = vor.u32 %v2694_v24, %v2691_v31  ;;  %v11220_v28 = vcombine.low %v502_v18, %v503_v16  ;;  %v11221_v38 = vcombine.low %v504_v11, %v504_v11  ;;  %v749_v43 = vshrl.u32 %v14225_v14, 16  ;;  %v507_v11 = vld [vmem:[#allocation2 + $0x68] sm:$0xf] }
 0x10c   : > { %3911 = vmatprep.mubr.bf16.mxu1 %v1088_v32  ;;  %v2708_v17 = vrot.slane %v2706_v33, 3  ;;  %v2711_v34 = vrot.slane %v2709_v35, 4  ;;  %v752_v52 = vshll.u32 %v14225_v14, 16  ;;  %5739 = vmatpush1.bf16.msra.mxu1 %v13184_v22  ;;  %v2703_v45 = vor.u32 %v2702_v37, %v2699_v41  ;;  %v13205_v33 = vld [vmem:[#allocation5 + $0x1f8] sm:$0xff]  }
 0x10d   : > { %3912 = vmatmul.mubr.bf16.gmra.mxu1 %v1080_v58  ;;  %v1108_v49 = vshrl.u32 %v11220_v28, 16  ;;  %v1111_v51 = vshll.u32 %v11220_v28, 16  ;;  %v1116_v55 = vshrl.u32 %v11221_v38, 16  ;;  %5740 = vmatprep.subr.bf16.mxu1 %v16835_v0  ;;  %v751_v25 = vrot.slane %v749_v43, 4 }
 0x10e   : > { %v2712_v60 = vor.u32 %v2711_v34, %v2708_v17  ;;  %v754_v61 = vrot.slane %v752_v52, 5  ;;  %v1119_v3 = vshll.u32 %v11221_v38, 16  ;;  %v2704_v44 = vsel %vm977_vm7, %v2695_v36, %v2703_v45 }
 0x10f   : > { %v1110_v1 = vrot.slane %v1108_v49, 3  ;;  %v1113_v7 = vrot.slane %v1111_v51, 4  ;;  %v1118_v9 = vrot.slane %v1116_v55, 3  ;;  %v2165_v40 = vshrl.u32 %v14100_v39, 16  ;;  %v11326_v49 = vld [vmem:[#allocation2 + $0x10c] sm:$0x8] }
 0x110   : > { %3461 = vmatprep.mubr.bf16.mxu0 %v2712_v60  ;;  %v755_v10 = vor.u32 %v754_v61, %v751_v25  ;;  %v1121_v42 = vrot.slane %v1119_v3, 4  ;;  %v2168_v16 = vshll.u32 %v14100_v39, 16  ;;  %5741 = vmatpush1.bf16.msra.mxu1 %v13192_v50  ;;  %v11376_v18 = vcombine.low %v11322_v4, %v13498_v15  ;;  %v13212_v51 = vld [vmem:[#allocation5 + $0x1f0] sm:$0xff]   ;;  %v511_v61 = vld [vmem:[#allocation2 + $0x80] sm:$0xf] }
 0x111   : > { %3462 = vmatmul.mubr.bf16.gmra.mxu0 %v2704_v44  ;;  %v1114_v21 = vor.u32 %v1113_v7, %v1110_v1  ;;  %v2740_v59 = vshrl.u32 %v14105_v46, 16  ;;  %v2743_v19 = vshll.u32 %v14105_v46, 16  ;;  %5742 = vmatprep.subr.bf16.mxu1 %v16835_v0  ;;  %v2167_v26 = vrot.slane %v2165_v40, 4  ;;  %v512_v7 = vld [vmem:[#allocation2 + $0x84] sm:$0xf] }
 0x112   : > { %v1125_v20 = vshrl.u32 %v755_v10, 16  ;;  %v1128_v56 = vshll.u32 %v755_v10, 16  ;;  %v1122_v27 = vor.u32 %v1121_v42, %v1118_v9  ;;  %v2170_v39 = vrot.slane %v2168_v16, 5 }
 0x113   : > { %v2732_v41 = vshrl.u32 %v11376_v18, 16  ;;  %v2735_v22 = vshll.u32 %v11376_v18, 16  ;;  %v2742_v58 = vrot.slane %v2740_v59, 3  ;;  %v2745_v32 = vrot.slane %v2743_v19, 4  ;;  %v13499_v18 = vld [vmem:[#allocation2 + $0x110] sm:$0xf] }
 0x114   : > { %v1127_v31 = vrot.slane %v1125_v20, 3  ;;  %v1130_v24 = vrot.slane %v1128_v56, 4  ;;  %v1123_v48 = vsel %vm977_vm7, %v1114_v21, %v1122_v27  ;;  %5743 = vmatpush1.bf16.msra.mxu1 %v13199_v12  ;;  %v2171_v35 = vor.u32 %v2170_v39, %v2167_v26  ;;  %v13500_v19 = vld [vmem:[#allocation2 + $0x114] sm:$0xf]  ;;  %v13219_v20 = vld [vmem:[#allocation5 + $0x1e8] sm:$0xff]  }
 0x115   : > { %v2734_v46 = vrot.slane %v2732_v41, 3  ;;  %v2737_v36 = vrot.slane %v2735_v22, 4  ;;  %v14237_v37 = vcombine.low %v507_v11, %v508_v53  ;;  %5744 = vmatprep.subr.bf16.mxu1 %v16835_v0  ;;  %v2746_v38 = vor.u32 %v2745_v32, %v2742_v58 }
 0x116   : > { %v1131_v28 = vor.u32 %v1130_v24, %v1127_v31  ;;  %v11222_v50 = vcombine.low %v506_v2, %v507_v11  ;;  %v11223_v17 = vcombine.low %v508_v53, %v508_v53  ;;  %v2749_v34 = vshrl.u32 %v2171_v35, 16 }
 0x117   : > { %v2752_v43 = vshll.u32 %v2171_v35, 16  ;;  %v2738_v52 = vor.u32 %v2737_v36, %v2734_v46  ;;  %v757_v45 = vshrl.u32 %v14237_v37, 16  ;;  %v760_v55 = vshll.u32 %v14237_v37, 16 }
 0x118   : > { %3919 = vmatprep.mubr.bf16.mxu1 %v1131_v28  ;;  %v1151_v57 = vshrl.u32 %v11222_v50, 16  ;;  %v1154_v60 = vshll.u32 %v11222_v50, 16  ;;  %v1159_v25 = vshrl.u32 %v11223_v17, 16  ;;  %5745 = vmatpush2.bf16.msra.mxu1 %v13205_v33  ;;  %v2751_v3 = vrot.slane %v2749_v34, 3  ;;  %v510_v33 = vld [vmem:[#allocation2 + $0x7c] sm:$0x8] }
 0x119   : > { %3920 = vmatmul.mubr.bf16.gmra.mxu1 %v1123_v48  ;;  %v2754_v4 = vrot.slane %v2752_v43, 4  ;;  %v2747_v44 = vsel %vm977_vm7, %v2738_v52, %v2746_v38  ;;  %v759_v1 = vrot.slane %v757_v45, 4  ;;  %5746 = vmatprep.subr.bf16.mxu1 %v16835_v0  ;;  %v762_v9 = vrot.slane %v760_v55, 5 }
 0x11a   : > { %v1153_v10 = vrot.slane %v1151_v57, 3  ;;  %v1156_v42 = vrot.slane %v1154_v60, 4  ;;  %v1161_v40 = vrot.slane %v1159_v25, 3  ;;  %v1162_v11 = vshll.u32 %v11223_v17, 16 }
 0x11b   : > { %v2755_v16 = vor.u32 %v2754_v4, %v2751_v3  ;;  %v2173_v53 = vshrl.u32 %v14120_v5, 16  ;;  %v2176_v12 = vshll.u32 %v14120_v5, 16  ;;  %v763_v21 = vor.u32 %v762_v9, %v759_v1 }
 0x11c   : > { %v1157_v15 = vor.u32 %v1156_v42, %v1153_v10  ;;  %v11378_v59 = vcombine.low %v11326_v49, %v13499_v18  ;;  %v11379_v2 = vcombine.low %v13500_v19, %v13500_v19  ;;  %5747 = vmatpush2.bf16.msra.mxu1 %v13212_v51  ;;  %v1164_v56 = vrot.slane %v1162_v11, 4  ;;  %v13501_v19 = vld [vmem:[#allocation2 + $0x128] sm:$0xf] }
 0x11d   : > { %3469 = vmatprep.mubr.bf16.mxu0 %v2755_v16  ;;  %v2175_v27 = vrot.slane %v2173_v53, 4  ;;  %v2178_v26 = vrot.slane %v2176_v12, 5  ;;  %v14246_v39 = vcombine.low %v511_v61, %v512_v7  ;;  %5748 = vmatprep.subr.bf16.mxu1 %v16835_v0  ;;  %v1168_v41 = vshrl.u32 %v763_v21, 16 }
 0x11e   : > { %3470 = vmatmul.mubr.bf16.gmra.mxu0 %v2747_v44  ;;  %v1171_v22 = vshll.u32 %v763_v21, 16  ;;  %v2775_v5 = vshrl.u32 %v11378_v59, 16  ;;  %v2778_v58 = vshll.u32 %v11378_v59, 16  ;;  %v1165_v31 = vor.u32 %v1164_v56, %v1161_v40  ;;  %v11330_v40 = vld [vmem:[#allocation2 + $0x124] sm:$0x8] }
 0x11f   : > { %v2179_v24 = vor.u32 %v2178_v26, %v2175_v27  ;;  %v2783_v48 = vshrl.u32 %v11379_v2, 16  ;;  %v2786_v32 = vshll.u32 %v11379_v2, 16  ;;  %v1170_v35 = vrot.slane %v1168_v41, 3 }
 0x120   : > { %v1173_v46 = vrot.slane %v1171_v22, 4  ;;  %v2777_v36 = vrot.slane %v2775_v5, 3  ;;  %v2780_v28 = vrot.slane %v2778_v58, 4  ;;  %5749 = vmatpush2.bf16.msra.mxu1 %v13219_v20  ;;  %v1166_v38 = vsel %vm977_vm7, %v1157_v15, %v1165_v31  ;;  %v13502_v20 = vld [vmem:[#allocation2 + $0x12c] sm:$0xf] }
 0x121   : > { %v2792_v50 = vshrl.u32 %v2179_v24, 16  ;;  %v2795_v17 = vshll.u32 %v2179_v24, 16  ;;  %v2785_v34 = vrot.slane %v2783_v48, 3  ;;  %5750 = vmatprep.subr.bf16.mxu1 %v16835_v0  ;;  %v2788_v45 = vrot.slane %v2786_v32, 4  ;;  %v515_v5 = vld [vmem:[#allocation2 + $0x98] sm:$0xf] }
 0x122   : > { %v1174_v43 = vor.u32 %v1173_v46, %v1170_v35  ;;  %v2781_v52 = vor.u32 %v2780_v28, %v2777_v36  ;;  %v765_v49 = vshrl.u32 %v14246_v39, 16  ;;  %v768_v57 = vshll.u32 %v14246_v39, 16  ;;  %v516_v58 = vld [vmem:[#allocation2 + $0x9c] sm:$0xf]  ;;  %v514_v31 = vld [vmem:[#allocation2 + $0x94] sm:$0x8] }
 0x123   : > { %v2794_v51 = vrot.slane %v2792_v50, 3  ;;  %v2797_v55 = vrot.slane %v2795_v17, 4  ;;  %v11224_v60 = vcombine.low %v510_v33, %v511_v61  ;;  %v2789_v25 = vor.u32 %v2788_v45, %v2785_v34  ;;  %v13226_v24 = vld [vmem:[#allocation5 + $0x1e0] sm:$0xff]  }
 0x124   : > { %3927 = vmatprep.mubr.bf16.mxu1 %v1174_v43  ;;  %v767_v3 = vrot.slane %v765_v49, 4  ;;  %v11225_v4 = vcombine.low %v512_v7, %v512_v7  ;;  %v2181_v44 = vshrl.u32 %v14122_v29, 16  ;;  %v770_v9 = vrot.slane %v768_v57, 5  ;;  %5751 = vmatpush2.bf16.msra.mxu1 %v13226_v24  ;;  %v13232_v24 = vld [vmem:[#allocation5 + $0x1d8] sm:$0xff]  }
 0x125   : > { %3928 = vmatmul.mubr.bf16.gmra.mxu1 %v1166_v38  ;;  %v2798_v1 = vor.u32 %v2797_v55, %v2794_v51  ;;  %v1194_v10 = vshrl.u32 %v11224_v60, 16  ;;  %v1197_v42 = vshll.u32 %v11224_v60, 16  ;;  %v2790_v16 = vsel %vm977_vm7, %v2781_v52, %v2789_v25  ;;  %5752 = vmatprep.subr.bf16.mxu1 %v16835_v0 }
 0x126   : > { %v1202_v11 = vshrl.u32 %v11225_v4, 16  ;;  %v1205_v53 = vshll.u32 %v11225_v4, 16  ;;  %v2183_v12 = vrot.slane %v2181_v44, 4  ;;  %v771_v21 = vor.u32 %v770_v9, %v767_v3 }
 0x127   : > { %3477 = vmatprep.mubr.bf16.mxu0 %v2798_v1  ;;  %v1196_v61 = vrot.slane %v1194_v10, 3  ;;  %v1199_v15 = vrot.slane %v1197_v42, 4  ;;  %v2184_v18 = vshll.u32 %v14122_v29, 16  ;;  %v11380_v2 = vcombine.low %v11330_v40, %v13501_v19  ;;  %v11334_v1 = vld [vmem:[#allocation2 + $0x13c] sm:$0x8] }
 0x128   : > { %3478 = vmatmul.mubr.bf16.gmra.mxu0 %v2790_v16  ;;  %v1204_v7 = vrot.slane %v1202_v11, 3  ;;  %v1207_v59 = vrot.slane %v1205_v53, 4  ;;  %v11381_v56 = vcombine.low %v13502_v20, %v13502_v20  ;;  %v1211_v27 = vshrl.u32 %v771_v21, 16  ;;  %v519_v16 = vld [vmem:[#allocation2 + $0xb0] sm:$0xf]  ;;  %5753 = vmatpush2.bf16.msra.mxu1 %v13232_v24 }
 0x129   : > { %v1214_v26 = vshll.u32 %v771_v21, 16  ;;  %v1200_v41 = vor.u32 %v1199_v15, %v1196_v61  ;;  %v2186_v22 = vrot.slane %v2184_v18, 5  ;;  %v2818_v32 = vshrl.u32 %v11380_v2, 16  ;;  %v520_v11 = vld [vmem:[#allocation2 + $0xb4] sm:$0xf]  ;;  %5754 = vmatprep.subr.bf16.mxu1 %v16835_v0 }
 0x12a   : > { %v1208_v48 = vor.u32 %v1207_v59, %v1204_v7  ;;  %v2821_v33 = vshll.u32 %v11380_v2, 16  ;;  %v2826_v35 = vshrl.u32 %v11381_v56, 16  ;;  %v1213_v29 = vrot.slane %v1211_v27, 3  ;;  %v518_v15 = vld [vmem:[#allocation2 + $0xac] sm:$0x8] }
 0x12b   : > { %v1216_v46 = vrot.slane %v1214_v26, 4  ;;  %v2187_v36 = vor.u32 %v2186_v22, %v2183_v12  ;;  %v2829_v28 = vshll.u32 %v11381_v56, 16  ;;  %v2820_v50 = vrot.slane %v2818_v32, 3  ;;  %v13503_v22 = vld [vmem:[#allocation2 + $0x140] sm:$0xf] }
 0x12c   : > { %v1209_v38 = vsel %vm977_vm7, %v1200_v41, %v1208_v48  ;;  %v2823_v17 = vrot.slane %v2821_v33, 4  ;;  %v2828_v34 = vrot.slane %v2826_v35, 3  ;;  %v14258_v55 = vcombine.low %v515_v5, %v516_v58 }
 0x12d   : > { %v1217_v43 = vor.u32 %v1216_v46, %v1213_v29  ;;  %v2835_v52 = vshrl.u32 %v2187_v36, 16  ;;  %v2838_v45 = vshll.u32 %v2187_v36, 16  ;;  %v2831_v49 = vrot.slane %v2829_v28, 4 }
 0x12e   : > { %v2824_v51 = vor.u32 %v2823_v17, %v2820_v50  ;;  %v11226_v57 = vcombine.low %v514_v31, %v515_v5  ;;  %v11227_v60 = vcombine.low %v516_v58, %v516_v58  ;;  %v2189_v44 = vshrl.u32 %v14138_v23, 16  ;;  %v13504_v58 = vld [vmem:[#allocation2 + $0x144] sm:$0xf] }
 0x12f   : > { %3935 = vmatprep.mubr.bf16.mxu1 %v1217_v43  ;;  %v2837_v25 = vrot.slane %v2835_v52, 3  ;;  %v2840_v3 = vrot.slane %v2838_v45, 4  ;;  %v2832_v4 = vor.u32 %v2831_v49, %v2828_v34  ;;  %v773_v9 = vshrl.u32 %v14258_v55, 16  ;;  %v13234_v34 = vld [vmem:[#allocation5 + $0x1d0] sm:$0xff]  }
 0x130   : > { %3936 = vmatmul.mubr.bf16.gmra.mxu1 %v1209_v38  ;;  %v776_v10 = vshll.u32 %v14258_v55, 16  ;;  %v1237_v42 = vshrl.u32 %v11226_v57, 16  ;;  %v1240_v40 = vshll.u32 %v11226_v57, 16  ;;  %v1245_v21 = vshrl.u32 %v11227_v60, 16 }
 0x131   : > { %v2841_v53 = vor.u32 %v2840_v3, %v2837_v25  ;;  %v2833_v12 = vsel %vm977_vm7, %v2824_v51, %v2832_v4  ;;  %v1248_v61 = vshll.u32 %v11227_v60, 16  ;;  %v775_v18 = vrot.slane %v773_v9, 4  ;;  %5755 = vmatpush2.bf16.msra.mxu1 %v13234_v34 }
 0x132   : > { %v778_v7 = vrot.slane %v776_v10, 5  ;;  %v1239_v59 = vrot.slane %v1237_v42, 3  ;;  %v1242_v19 = vrot.slane %v1240_v40, 4  ;;  %v1247_v2 = vrot.slane %v1245_v21, 3  ;;  %5756 = vmatprep.subr.bf16.mxu1 %v16835_v0 }
 0x133   : > { %3485 = vmatprep.mubr.bf16.mxu0 %v2841_v53  ;;  %v1250_v20 = vrot.slane %v1248_v61, 4  ;;  %v2191_v56 = vrot.slane %v2189_v44, 4  ;;  %v2192_v27 = vshll.u32 %v14138_v23, 16  ;;  %v11382_v5 = vcombine.low %v11334_v1, %v13503_v22 }
 0x134   : > { %3486 = vmatmul.mubr.bf16.gmra.mxu0 %v2833_v12  ;;  %v779_v26 = vor.u32 %v778_v7, %v775_v18  ;;  %v1243_v41 = vor.u32 %v1242_v19, %v1239_v59  ;;  %v11383_v31 = vcombine.low %v13504_v58, %v13504_v58  ;;  %v14265_v33 = vcombine.low %v519_v16, %v520_v11  ;;  %v523_v19 = vld [vmem:[#allocation2 + $0xc8] sm:$0xf] }
 0x135   : > { %v1251_v48 = vor.u32 %v1250_v20, %v1247_v2  ;;  %v2194_v32 = vrot.slane %v2192_v27, 5  ;;  %v11228_v35 = vcombine.low %v518_v15, %v519_v16  ;;  %v2861_v36 = vshrl.u32 %v11382_v5, 16  ;;  %v11338_v16 = vld [vmem:[#allocation2 + $0x154] sm:$0x8]  ;;  %v524_v2 = vld [vmem:[#allocation2 + $0xcc] sm:$0xf] }
 0x136   : > { %v1254_v29 = vshrl.u32 %v779_v26, 16  ;;  %v1257_v46 = vshll.u32 %v779_v26, 16  ;;  %v2864_v28 = vshll.u32 %v11382_v5, 16  ;;  %v2869_v50 = vshrl.u32 %v11383_v31, 16  ;;  %v13505_v5 = vld [vmem:[#allocation2 + $0x158] sm:$0xf] }
 0x137   : > { %v1252_v23 = vsel %vm977_vm7, %v1243_v41, %v1251_v48  ;;  %v2195_v38 = vor.u32 %v2194_v32, %v2191_v56  ;;  %v2872_v17 = vshll.u32 %v11383_v31, 16  ;;  %v2863_v45 = vrot.slane %v2861_v36, 3 }
 0x138   : > { %v1256_v43 = vrot.slane %v1254_v29, 3  ;;  %v1259_v52 = vrot.slane %v1257_v46, 4  ;;  %v2866_v49 = vrot.slane %v2864_v28, 4  ;;  %v2871_v60 = vrot.slane %v2869_v50, 3  ;;  %v13506_v46 = vld [vmem:[#allocation2 + $0x15c] sm:$0xf] }
 0x139   : > { %v2878_v51 = vshrl.u32 %v2195_v38, 16  ;;  %v2881_v57 = vshll.u32 %v2195_v38, 16  ;;  %v2874_v25 = vrot.slane %v2872_v17, 4  ;;  %v781_v44 = vshrl.u32 %v14265_v33, 16 }
 0x13a   : > { %v1260_v3 = vor.u32 %v1259_v52, %v1256_v43  ;;  %v2867_v4 = vor.u32 %v2866_v49, %v2863_v45  ;;  %v784_v1 = vshll.u32 %v14265_v33, 16  ;;  %v11229_v40 = vcombine.low %v520_v11, %v520_v11  ;;  %v522_v49 = vld [vmem:[#allocation2 + $0xc4] sm:$0x8] }
 0x13b   : > { %v2880_v9 = vrot.slane %v2878_v51, 3  ;;  %v2883_v10 = vrot.slane %v2881_v57, 4  ;;  %v2875_v42 = vor.u32 %v2874_v25, %v2871_v60  ;;  %v783_v53 = vrot.slane %v781_v44, 4 }
 0x13c   : > { %3943 = vmatprep.mubr.bf16.mxu1 %v1260_v3  ;;  %v786_v12 = vrot.slane %v784_v1, 5  ;;  %v1280_v21 = vshrl.u32 %v11228_v35, 16  ;;  %v1283_v61 = vshll.u32 %v11228_v35, 16  ;;  %v1288_v7 = vshrl.u32 %v11229_v40, 16  ;;  %v13242_v3 = vld [vmem:[#allocation5 + $0x1c0] sm:$0xff]  }
 0x13d   : > { %3944 = vmatmul.mubr.bf16.gmra.mxu1 %v1252_v23  ;;  %v2884_v15 = vor.u32 %v2883_v10, %v2880_v9  ;;  %v2876_v18 = vsel %vm977_vm7, %v2867_v4, %v2875_v42  ;;  %v1291_v59 = vshll.u32 %v11229_v40, 16  ;;  %v2197_v11 = vshrl.u32 %v14143_v63, 16  ;;  %v13240_v23 = vld [vmem:[#allocation5 + $0x1c8] sm:$0xff]  }
 0x13e   : > { %v787_v20 = vor.u32 %v786_v12, %v783_v53  ;;  %v1282_v56 = vrot.slane %v1280_v21, 3  ;;  %v1285_v27 = vrot.slane %v1283_v61, 4  ;;  %v1290_v26 = vrot.slane %v1288_v7, 3  ;;  %5757 = vmatpush2.bf16.msra.mxu1 %v13240_v23 }
 0x13f   : > { %3493 = vmatprep.mubr.bf16.mxu0 %v2884_v15  ;;  %v1293_v41 = vrot.slane %v1291_v59, 4  ;;  %v2200_v22 = vshll.u32 %v14143_v63, 16  ;;  %v11384_v58 = vcombine.low %v11338_v16, %v13505_v5  ;;  %v2199_v32 = vrot.slane %v2197_v11, 4  ;;  %5758 = vmatprep.subr.bf16.mxu1 %v16835_v0  ;;  %v11342_v15 = vld [vmem:[#allocation2 + $0x16c] sm:$0x8] }
 0x140   : > { %3494 = vmatmul.mubr.bf16.gmra.mxu0 %v2876_v18  ;;  %v1297_v31 = vshrl.u32 %v787_v20, 16  ;;  %v1300_v24 = vshll.u32 %v787_v20, 16  ;;  %v1286_v48 = vor.u32 %v1285_v27, %v1282_v56  ;;  %v11385_v36 = vcombine.low %v13506_v46, %v13506_v46  ;;  %v527_v56 = vld [vmem:[#allocation2 + $0xe0] sm:$0xf]  ;;  %v13507_v46 = vld [vmem:[#allocation2 + $0x170] sm:$0xf] }
 0x141   : > { %v1294_v35 = vor.u32 %v1293_v41, %v1290_v26  ;;  %v2202_v29 = vrot.slane %v2200_v22, 5  ;;  %v2904_v28 = vshrl.u32 %v11384_v58, 16  ;;  %v2907_v17 = vshll.u32 %v11384_v58, 16  ;;  %v528_v22 = vld [vmem:[#allocation2 + $0xe4] sm:$0xf] }
 0x142   : > { %v1299_v38 = vrot.slane %v1297_v31, 3  ;;  %v1302_v50 = vrot.slane %v1300_v24, 4  ;;  %v14275_v34 = vcombine.low %v523_v19, %v524_v2  ;;  %v2912_v45 = vshrl.u32 %v11385_v36, 16  ;;  %5759 = vmatpush2.bf16.msra.mxu1 %v13242_v3 }
 0x143   : > { %v1295_v63 = vsel %vm977_vm7, %v1286_v48, %v1294_v35  ;;  %v2203_v43 = vor.u32 %v2202_v29, %v2199_v32  ;;  %v2906_v52 = vrot.slane %v2904_v28, 3  ;;  %v2909_v57 = vrot.slane %v2907_v17, 4  ;;  %v13508_v28 = vld [vmem:[#allocation2 + $0x174] sm:$0xf] }
 0x144   : > { %v1303_v51 = vor.u32 %v1302_v50, %v1299_v38  ;;  %v2915_v60 = vshll.u32 %v11385_v36, 16  ;;  %v789_v25 = vshrl.u32 %v14275_v34, 16  ;;  %v2914_v1 = vrot.slane %v2912_v45, 3 }
 0x145   : > { %v2921_v4 = vshrl.u32 %v2203_v43, 16  ;;  %v2924_v44 = vshll.u32 %v2203_v43, 16  ;;  %v792_v9 = vshll.u32 %v14275_v34, 16  ;;  %v2910_v10 = vor.u32 %v2909_v57, %v2906_v52 }
 0x146   : > { %3951 = vmatprep.mubr.bf16.mxu1 %v1303_v51  ;;  %v2917_v42 = vrot.slane %v2915_v60, 4  ;;  %v791_v40 = vrot.slane %v789_v25, 4  ;;  %v11230_v16 = vcombine.low %v522_v49, %v523_v19  ;;  %v11231_v61 = vcombine.low %v524_v2, %v524_v2  ;;  %v526_v51 = vld [vmem:[#allocation2 + $0xdc] sm:$0x8] }
 0x147   : > { %3952 = vmatmul.mubr.bf16.gmra.mxu1 %v1295_v63  ;;  %v2923_v53 = vrot.slane %v2921_v4, 3  ;;  %v2926_v12 = vrot.slane %v2924_v44, 4  ;;  %v794_v21 = vrot.slane %v792_v9, 5  ;;  %v2205_v20 = vshrl.u32 %v14159_v54, 16 }
 0x148   : > { %v2918_v18 = vor.u32 %v2917_v42, %v2914_v1  ;;  %v1323_v7 = vshrl.u32 %v11230_v16, 16  ;;  %v1326_v59 = vshll.u32 %v11230_v16, 16  ;;  %v1331_v26 = vshrl.u32 %v11231_v61, 16 }
 0x149   : > { %v2927_v27 = vor.u32 %v2926_v12, %v2923_v53  ;;  %v795_v11 = vor.u32 %v794_v21, %v791_v40  ;;  %v1334_v41 = vshll.u32 %v11231_v61, 16  ;;  %v2207_v31 = vrot.slane %v2205_v20, 4 }
 0x14a   : > { %v2919_v19 = vsel %vm977_vm7, %v2910_v10, %v2918_v18  ;;  %v1325_v5 = vrot.slane %v1323_v7, 3  ;;  %v1328_v58 = vrot.slane %v1326_v59, 4  ;;  %v1333_v48 = vrot.slane %v1331_v26, 3 }
 0x14b   : > { %3501 = vmatprep.mubr.bf16.mxu0 %v2927_v27  ;;  %v1340_v2 = vshrl.u32 %v795_v11, 16  ;;  %v1343_v24 = vshll.u32 %v795_v11, 16  ;;  %v1336_v32 = vrot.slane %v1334_v41, 4  ;;  %v2208_v29 = vshll.u32 %v14159_v54, 16 }
 0x14c   : > { %3502 = vmatmul.mubr.bf16.gmra.mxu0 %v2919_v19  ;;  %v1329_v35 = vor.u32 %v1328_v58, %v1325_v5  ;;  %v11386_v36 = vcombine.low %v11342_v15, %v13507_v46  ;;  %v11387_v23 = vcombine.low %v13508_v28, %v13508_v28  ;;  %v14284_v63 = vcombine.low %v527_v56, %v528_v22  ;;  %v532_v46 = vld [vmem:[#allocation2 + $0xfc] sm:$0xf] }
 0x14d   : > { %v1342_v38 = vrot.slane %v1340_v2, 3  ;;  %v1345_v50 = vrot.slane %v1343_v24, 4  ;;  %v1337_v17 = vor.u32 %v1336_v32, %v1333_v48  ;;  %v2210_v43 = vrot.slane %v2208_v29, 5  ;;  %v11346_v2 = vld [vmem:[#allocation2 + $0x184] sm:$0x8] }
 0x14e   : > { %v2947_v52 = vshrl.u32 %v11386_v36, 16  ;;  %v2950_v45 = vshll.u32 %v11386_v36, 16  ;;  %v2955_v49 = vshrl.u32 %v11387_v23, 16  ;;  %v2958_v25 = vshll.u32 %v11387_v23, 16  ;;  %v531_v24 = vld [vmem:[#allocation2 + $0xf8] sm:$0xf] }
 0x14f   : > { %v1346_v57 = vor.u32 %v1345_v50, %v1342_v38  ;;  %v1338_v60 = vsel %vm977_vm7, %v1329_v35, %v1337_v17  ;;  %v797_v54 = vshrl.u32 %v14284_v63, 16  ;;  %v2211_v4 = vor.u32 %v2210_v43, %v2207_v31 }
 0x150   : > { %v2949_v44 = vrot.slane %v2947_v52, 3  ;;  %v2952_v1 = vrot.slane %v2950_v45, 4  ;;  %v2957_v9 = vrot.slane %v2955_v49, 3  ;;  %v2960_v10 = vrot.slane %v2958_v25, 4  ;;  %v13509_v52 = vld [vmem:[#allocation2 + $0x188] sm:$0xf] }
 0x151   : > { %3959 = vmatprep.mubr.bf16.mxu1 %v1346_v57  ;;  %v799_v42 = vrot.slane %v797_v54, 4  ;;  %v800_v40 = vshll.u32 %v14284_v63, 16  ;;  %v11232_v16 = vcombine.low %v526_v51, %v527_v56  ;;  %v2964_v12 = vshrl.u32 %v2211_v4, 16  ;;  %v13510_v49 = vld [vmem:[#allocation2 + $0x18c] sm:$0xf] }
 0x152   : > { %3960 = vmatmul.mubr.bf16.gmra.mxu1 %v1338_v60  ;;  %v2967_v21 = vshll.u32 %v2211_v4, 16  ;;  %v2953_v61 = vor.u32 %v2952_v1, %v2949_v44  ;;  %v11233_v15 = vcombine.low %v528_v22, %v528_v22  ;;  %v2961_v18 = vor.u32 %v2960_v10, %v2957_v9  ;;  %v530_v4 = vld [vmem:[#allocation2 + $0xf4] sm:$0x8] }
 0x153   : > { %v802_v7 = vrot.slane %v800_v40, 5  ;;  %v1366_v59 = vshrl.u32 %v11232_v16, 16  ;;  %v1369_v20 = vshll.u32 %v11232_v16, 16  ;;  %v2966_v11 = vrot.slane %v2964_v12, 3 }
 0x154   : > { %v2969_v26 = vrot.slane %v2967_v21, 4  ;;  %v1374_v41 = vshrl.u32 %v11233_v15, 16  ;;  %v1377_v19 = vshll.u32 %v11233_v15, 16  ;;  %v2962_v5 = vsel %vm977_vm7, %v2953_v61, %v2961_v18 }
 0x155   : > { %v14288_v3 = vpop.f32.mrf.mxu1  ;;  %v803_v56 = vor.u32 %v802_v7, %v799_v42  ;;  %v1368_v58 = vrot.slane %v1366_v59, 3  ;;  %v1371_v31 = vrot.slane %v1369_v20, 4  ;;  %v2213_v29 = vshrl.u32 %v14161_v6, 16 }
 0x156   : > { %v2970_v22 = vor.u32 %v2969_v26, %v2966_v11  ;;  %v1376_v32 = vrot.slane %v1374_v41, 3  ;;  %v1379_v35 = vrot.slane %v1377_v19, 4  ;;  %v2216_v38 = vshll.u32 %v14161_v6, 16 }
 0x157   : > { %v14291_v53 = vpop.f32.mrf.mxu1  ;;  %v1383_v36 = vshrl.u32 %v803_v56, 16  ;;  %v1386_v28 = vshll.u32 %v803_v56, 16  ;;  %v1372_v23 = vor.u32 %v1371_v31, %v1368_v58  ;;  %v2215_v43 = vrot.slane %v2213_v29, 4 }
 0x158   : > { %3509 = vmatprep.mubr.bf16.mxu0 %v2970_v22  ;;  %v1380_v17 = vor.u32 %v1379_v35, %v1376_v32  ;;  %v11388_v45 = vcombine.low %v11346_v2, %v13509_v52  ;;  %v11389_v51 = vcombine.low %v13510_v49, %v13510_v49  ;;  %v2218_v25 = vrot.slane %v2216_v38, 5  ;;  %v11350_v38 = vld [vmem:[#allocation2 + $0x19c] sm:$0x8]  ;;  %v535_v49 = vld [vmem:[#allocation2 + $0x110] sm:$0xf] }
 0x159   : > { %v14293_v27 = vpop.f32.mrf.mxu1  ;;  %3510 = vmatmul.mubr.bf16.gmra.mxu0 %v2962_v5  ;;  %v1385_v57 = vrot.slane %v1383_v36, 3  ;;  %v1388_v60 = vrot.slane %v1386_v28, 4  ;;  %v14302_v54 = vcombine.low %v531_v24, %v532_v46  ;;  %v11234_v56 = vcombine.low %v530_v4, %v531_v24 }
 0x15a   : > { %v1381_v6 = vsel %vm977_vm7, %v1372_v23, %v1380_v17  ;;  %v2990_v1 = vshrl.u32 %v11388_v45, 16  ;;  %v2993_v9 = vshll.u32 %v11388_v45, 16  ;;  %v2998_v10 = vshrl.u32 %v11389_v51, 16 }
 0x15b   : > { %v14296_v48 = vpop.f32.mrf.mxu1  ;;  %v1389_v42 = vor.u32 %v1388_v60, %v1385_v57  ;;  %v2219_v40 = vor.u32 %v2218_v25, %v2215_v43  ;;  %v3001_v16 = vshll.u32 %v11389_v51, 16  ;;  %v805_v12 = vshrl.u32 %v14302_v54, 16 }
 0x15c   : > { %v2992_v61 = vrot.slane %v2990_v1, 3  ;;  %v2995_v15 = vrot.slane %v2993_v9, 4  ;;  %v3000_v18 = vrot.slane %v2998_v10, 3  ;;  %v808_v7 = vshll.u32 %v14302_v54, 16  ;;  %v13511_v1 = vld [vmem:[#allocation2 + $0x1a0] sm:$0xf] }
 0x15d   : > { %v14300_v50 = vpop.f32.mrf.mxu1  ;;  %3967 = vmatprep.mubr.bf16.mxu1 %v1389_v42  ;;  %v3007_v59 = vshrl.u32 %v2219_v40, 16  ;;  %v3010_v20 = vshll.u32 %v2219_v40, 16  ;;  %v3003_v11 = vrot.slane %v3001_v16, 4  ;;  %v807_v26 = vrot.slane %v805_v12, 4  ;;  %v536_v10 = vld [vmem:[#allocation2 + $0x114] sm:$0xf] }
 0x15e   : > { %3968 = vmatmul.mubr.bf16.gmra.mxu1 %v1381_v6  ;;  %v2996_v19 = vor.u32 %v2995_v15, %v2992_v61  ;;  %v810_v5 = vrot.slane %v808_v7, 5  ;;  %v11235_v58 = vcombine.low %v532_v46, %v532_v46  ;;  %v2221_v32 = vshrl.u32 %v14174_v8, 16  ;;  %v13512_v61 = vld [vmem:[#allocation2 + $0x1a4] sm:$0xf] }
 0x15f   : > { %v14304_v44 = vpop.f32.mrf.mxu1  ;;  %v3009_v31 = vrot.slane %v3007_v59, 3  ;;  %v3012_v2 = vrot.slane %v3010_v20, 4  ;;  %v3004_v22 = vor.u32 %v3003_v11, %v3000_v18  ;;  %v1409_v36 = vshrl.u32 %v11234_v56, 16 }
 0x160   : > { %v811_v29 = vor.u32 %v810_v5, %v807_v26  ;;  %v1412_v28 = vshll.u32 %v11234_v56, 16  ;;  %v1417_v23 = vshrl.u32 %v11235_v58, 16  ;;  %v1420_v52 = vshll.u32 %v11235_v58, 16  ;;  %v534_v56 = vld [vmem:[#allocation2 + $0x10c] sm:$0x8] }
 0x161   : > { %v14308_v21 = vpop.f32.mrf.mxu1  ;;  %v3013_v17 = vor.u32 %v3012_v2, %v3009_v31  ;;  %v3005_v43 = vsel %vm977_vm7, %v2996_v19, %v3004_v22  ;;  %v2223_v45 = vrot.slane %v2221_v32, 4  ;;  %v1411_v57 = vrot.slane %v1409_v36, 3 }
 0x162   : > { %v1426_v46 = vshrl.u32 %v811_v29, 16  ;;  %v1429_v51 = vshll.u32 %v811_v29, 16  ;;  %v1414_v60 = vrot.slane %v1412_v28, 4  ;;  %v1419_v25 = vrot.slane %v1417_v23, 3 }
 0x163   : > { %v14311_v41 = vpop.f32.mrf.mxu1  ;;  %3517 = vmatprep.mubr.bf16.mxu0 %v3013_v17  ;;  %v1422_v4 = vrot.slane %v1420_v52, 4  ;;  %v2224_v6 = vshll.u32 %v14174_v8, 16  ;;  %v11390_v9 = vcombine.low %v11350_v38, %v13511_v1  ;;  %v11391_v15 = vcombine.low %v13512_v61, %v13512_v61 }
 0x164   : > { %3518 = vmatmul.mubr.bf16.gmra.mxu0 %v3005_v43  ;;  %v1428_v40 = vrot.slane %v1426_v46, 3  ;;  %v1431_v16 = vrot.slane %v1429_v51, 4  ;;  %v1415_v12 = vor.u32 %v1414_v60, %v1411_v57  ;;  %v14324_v5 = vcombine.low %v535_v49, %v536_v10  ;;  %v11354_v60 = vld [vmem:[#allocation2 + $0x1b4] sm:$0x8] }
 0x165   : > { %v14314_v35 = vpop.f32.mrf.mxu1  ;;  %v1423_v18 = vor.u32 %v1422_v4, %v1419_v25  ;;  %v2226_v7 = vrot.slane %v2224_v6, 5  ;;  %v3033_v59 = vshrl.u32 %v11390_v9, 16  ;;  %v3036_v20 = vshll.u32 %v11390_v9, 16 }
 0x166   : > { %16847 = vst [vmem:[#allocation16_spill] sm:$0xff] %v14314_v35  ;;  %v1432_v26 = vor.u32 %v1431_v16, %v1428_v40  ;;  %v3041_v19 = vshrl.u32 %v11391_v15, 16  ;;  %v3044_v8 = vshll.u32 %v11391_v15, 16  ;;  %v813_v36 = vshrl.u32 %v14324_v5, 16  ;;  %v539_v15 = vld [vmem:[#allocation2 + $0x128] sm:$0xf] }
 0x167   : > { %v14317_v24 = vpop.f32.mrf.mxu1  ;;  %v1424_v58 = vsel %vm977_vm7, %v1415_v12, %v1423_v18  ;;  %v2227_v31 = vor.u32 %v2226_v7, %v2223_v45  ;;  %v3035_v2 = vrot.slane %v3033_v59, 3  ;;  %v3038_v22 = vrot.slane %v3036_v20, 4  ;;  %v540_v20 = vld [vmem:[#allocation2 + $0x12c] sm:$0xf] }
 0x168   : > { %16848 = vst [vmem:[#allocation17_spill] sm:$0xff] %v14317_v24  ;;  %3975 = vmatprep.mubr.bf16.mxu1 %v1432_v26  ;;  %v3043_v32 = vrot.slane %v3041_v19, 3  ;;  %v3046_v29 = vrot.slane %v3044_v8, 4  ;;  %v816_v28 = vshll.u32 %v14324_v5, 16  ;;  %v11236_v43 = vcombine.low %v534_v56, %v535_v49 }
 0x169   : > { %v14320_v42 = vpop.f32.mrf.mxu1  ;;  %3976 = vmatmul.mubr.bf16.gmra.mxu1 %v1424_v58  ;;  %v3050_v23 = vshrl.u32 %v2227_v31, 16  ;;  %v3053_v38 = vshll.u32 %v2227_v31, 16  ;;  %v3039_v17 = vor.u32 %v3038_v22, %v3035_v2  ;;  %v815_v51 = vrot.slane %v813_v36, 4 }
 0x16a   : > { %16849 = vst [vmem:[#allocation18_spill] sm:$0xff] %v14320_v42  ;;  %v3047_v46 = vor.u32 %v3046_v29, %v3043_v32  ;;  %v818_v57 = vrot.slane %v816_v28, 5  ;;  %v11237_v45 = vcombine.low %v536_v10, %v536_v10  ;;  %v1452_v6 = vshrl.u32 %v11236_v43, 16  ;;  %v13513_v32 = vld [vmem:[#allocation2 + $0x1b8] sm:$0xf] }
 0x16b   : > { %v14322_v11 = vpop.f32.mrf.mxu1  ;;  %v3052_v25 = vrot.slane %v3050_v23, 3  ;;  %v3055_v4 = vrot.slane %v3053_v38, 4  ;;  %v1455_v1 = vshll.u32 %v11236_v43, 16  ;;  %v2229_v59 = vshrl.u32 %v14178_v13, 16 }
 0x16c   : > { %16850 = vst [vmem:[#allocation19_spill] sm:$0xff] %v14322_v11  ;;  %v3048_v40 = vsel %vm977_vm7, %v3039_v17, %v3047_v46  ;;  %v819_v16 = vor.u32 %v818_v57, %v815_v51  ;;  %v1460_v12 = vshrl.u32 %v11237_v45, 16  ;;  %v1463_v61 = vshll.u32 %v11237_v45, 16  ;;  %v13514_v17 = vld [vmem:[#allocation2 + $0x1bc] sm:$0xf] }
 0x16d   : > { %v14329_v52 = vpop.f32.mrf.mxu1  ;;  %v3056_v49 = vor.u32 %v3055_v4, %v3052_v25  ;;  %v1454_v18 = vrot.slane %v1452_v6, 3  ;;  %v1457_v7 = vrot.slane %v1455_v1, 4  ;;  %v2231_v2 = vrot.slane %v2229_v59, 4  ;;  %v538_v25 = vld [vmem:[#allocation2 + $0x124] sm:$0x8] }
 0x16e   : > { %16851 = vst [vmem:[#allocation20_spill] sm:$0xff] %v14329_v52  ;;  %v1469_v19 = vshrl.u32 %v819_v16, 16  ;;  %v1472_v8 = vshll.u32 %v819_v16, 16  ;;  %v1462_v56 = vrot.slane %v1460_v12, 3  ;;  %v1465_v58 = vrot.slane %v1463_v61, 4 }
 0x16f   : > { %v14331_v9 = vpop.f32.mrf.mxu1  ;;  %3525 = vmatprep.mubr.bf16.mxu0 %v3056_v49  ;;  %v1458_v31 = vor.u32 %v1457_v7, %v1454_v18  ;;  %v2232_v22 = vshll.u32 %v14178_v13, 16  ;;  %v11392_v29 = vcombine.low %v11354_v60, %v13513_v32  ;;  %v11393_v43 = vcombine.low %v13514_v17, %v13514_v17  ;;  %v11534_v11 = vld [vmem:[#allocation2 + $0x184] sm:$0x8] }
 0x170   : > { %16852 = vst [vmem:[#allocation21_spill] sm:$0xff] %v14331_v9  ;;  %3526 = vmatmul.mubr.bf16.gmra.mxu0 %v3048_v40  ;;  %v1471_v28 = vrot.slane %v1469_v19, 3  ;;  %v1474_v23 = vrot.slane %v1472_v8, 4  ;;  %v1466_v38 = vor.u32 %v1465_v58, %v1462_v56  ;;  %v14340_v45 = vcombine.low %v539_v15, %v540_v20  ;;  %v13237_v9 = vld [vmem:[#allocation2 + $0xe8] ss:$0 sps:$4 sm:$0x11]  }
 0x171   : > { %v14335_v10 = vpop.f32.mrf.mxu1  ;;  %v2234_v46 = vrot.slane %v2232_v22, 5  ;;  %v3076_v51 = vshrl.u32 %v11392_v29, 16  ;;  %v3079_v57 = vshll.u32 %v11392_v29, 16  ;;  %v3084_v1 = vshrl.u32 %v11393_v43, 16 }
 0x172   : > { %16853 = vst [vmem:[#allocation22_spill] sm:$0xff] %v14335_v10  ;;  %v1475_v13 = vor.u32 %v1474_v23, %v1471_v28  ;;  %v1467_v60 = vsel %vm977_vm7, %v1458_v31, %v1466_v38  ;;  %v3087_v40 = vshll.u32 %v11393_v43, 16  ;;  %v821_v49 = vshrl.u32 %v14340_v45, 16  ;;  %v13206_v31 = vld [vmem:[#allocation2 + $0x10] ss:$0 sps:$4 sm:$0x11]  }
 0x173   : > { %v14337_v26 = vpop.f32.mrf.mxu0  ;;  %v14342_v4 = vpop.f32.mrf.mxu1  ;;  %v2235_v16 = vor.u32 %v2234_v46, %v2231_v2  ;;  %v3078_v12 = vrot.slane %v3076_v51, 3  ;;  %v3081_v61 = vrot.slane %v3079_v57, 4  ;;  %v3086_v7 = vrot.slane %v3084_v1, 3  ;;  %v544_v1 = vld [vmem:[#allocation2 + $0x144] sm:$0xf] }
 0x174   : > { %16854 = vst [vmem:[#allocation23_spill] sm:$0xff] %v14342_v4  ;;  %3983 = vmatprep.mubr.bf16.mxu1 %v1475_v13  ;;  %v3089_v59 = vrot.slane %v3087_v40, 4  ;;  %v824_v19 = vshll.u32 %v14340_v45, 16  ;;  %v11238_v8 = vcombine.low %v538_v25, %v539_v15  ;;  %v823_v32 = vrot.slane %v821_v49, 4 }
 0x175   : > { %v3401_v36 = vpop.f32.mrf.mxu0  ;;  %3984 = vmatmul.mubr.bf16.gmra.mxu1 %v1467_v60  ;;  %v3093_v56 = vshrl.u32 %v2235_v16, 16  ;;  %v3096_v58 = vshll.u32 %v2235_v16, 16  ;;  %v3082_v22 = vor.u32 %v3081_v61, %v3078_v12  ;;  %v11239_v28 = vcombine.low %v540_v20, %v540_v20  ;;  %v543_v60 = vld [vmem:[#allocation2 + $0x140] sm:$0xf] }
 0x176   : > { %v3090_v2 = vor.u32 %v3089_v59, %v3086_v7  ;;  %v826_v36 = vrot.slane %v824_v19, 5  ;;  %v1495_v23 = vshrl.u32 %v11238_v8, 16  ;;  %v1498_v43 = vshll.u32 %v11238_v8, 16  ;;  %v13208_v40 = vld [vmem:[#allocation2 + $0x28] ss:$0 sps:$4 sm:$0x11]  }
 0x177   : > { %v14344_v6 = vpop.f32.mrf.mxu0  ;;  %v3095_v38 = vrot.slane %v3093_v56, 3  ;;  %v3098_v17 = vrot.slane %v3096_v58, 4  ;;  %v923_v46 = vrot.slane %v14190_v47, 5  ;;  %v1503_v13 = vshrl.u32 %v11239_v28, 16 }
 0x178   : > { %v14349_v29 = vpop.f32.mrf.mxu1  ;;  %v3091_v15 = vsel %vm977_vm7, %v3082_v22, %v3090_v2  ;;  %v827_v57 = vor.u32 %v826_v36, %v823_v32  ;;  %v1497_v25 = vrot.slane %v1495_v23, 3  ;;  %v1500_v12 = vrot.slane %v1498_v43, 4 }
 0x179   : > { %v3404_v18 = vpop.f32.mrf.mxu0  ;;  %16855 = vst [vmem:[#allocation24_spill] sm:$0xff] %v14349_v29  ;;  %v3099_v16 = vor.u32 %v3098_v17, %v3095_v38  ;;  %v1506_v61 = vshll.u32 %v11239_v28, 16  ;;  %v924_v20 = vrot.slane %v13206_v31, 5  ;;  %v1505_v7 = vrot.slane %v1503_v13, 3 }
 0x17a   : > { %v14352_v51 = vpop.f32.mrf.mxu1  ;;  %v1512_v49 = vshrl.u32 %v827_v57, 16  ;;  %v1515_v18 = vshll.u32 %v827_v57, 16  ;;  %v1005_v59 = vshrl.u32 %v923_v46, 16  ;;  %v1501_v8 = vor.u32 %v1500_v12, %v1497_v25  ;;  %v542_v12 = vld [vmem:[#allocation2 + $0x13c] sm:$0x8] }
 0x17b   : > { %16856 = vst [vmem:[#allocation25_spill] sm:$0xff] %v14352_v51  ;;  %3533 = vmatprep.mubr.bf16.mxu0 %v3099_v16  ;;  %v1508_v56 = vrot.slane %v1506_v61, 4  ;;  %v925_v58 = vsel %vm922_vm6, %v923_v46, %v924_v20  ;;  %v1008_v22 = vshll.u32 %v923_v46, 16  ;;  %v14360_v43 = vcombine.low %v543_v60, %v544_v1  ;;  %v13220_v29 = vld [vmem:[#allocation2 + $0x70] ss:$0 sps:$4 sm:$0x11]  }
 0x17c   : > { %v14355_v19 = vpop.f32.mrf.mxu1  ;;  %3534 = vmatmul.mubr.bf16.gmra.mxu0 %v3091_v15  ;;  %v1514_v32 = vrot.slane %v1512_v49, 3  ;;  %v1517_v2 = vrot.slane %v1515_v18, 4  ;;  %v1007_v36 = vrot.slane %v1005_v59, 3  ;;  %v1013_v28 = vshrl.u32 %v925_v58, 16 }
 0x17d   : > { %16857 = vst [vmem:[#allocation26_spill] sm:$0xff] %v14355_v19  ;;  %v14357_v47 = vpop.f32.mrf.mxu0  ;;  %v1509_v23 = vor.u32 %v1508_v56, %v1505_v7  ;;  %v1010_v38 = vrot.slane %v1008_v22, 4  ;;  %v1016_v17 = vshll.u32 %v925_v58, 16  ;;  %v926_v16 = vrot.slane %v14200_v62, 5 }
 0x17e   : > { %v1518_v57 = vor.u32 %v1517_v2, %v1514_v32  ;;  %v1015_v13 = vrot.slane %v1013_v28, 3  ;;  %v927_v25 = vrot.slane %v13208_v40, 5  ;;  %v14363_v61 = vpop.f32.mrf.mxu1  ;;  %v829_v18 = vshrl.u32 %v14360_v43, 16  ;;  %v13227_v51 = vld [vmem:[#allocation2 + $0xa0] ss:$0 sps:$4 sm:$0x11]  }
 0x17f   : > { %v3409_v31 = vpop.f32.mrf.mxu0  ;;  %16858 = vst [vmem:[#allocation27_spill] sm:$0xff] %v14363_v61  ;;  %v1510_v15 = vsel %vm977_vm7, %v1501_v8, %v1509_v23  ;;  %v1011_v20 = vor.u32 %v1010_v38, %v1007_v36  ;;  %v1018_v49 = vrot.slane %v1016_v17, 4  ;;  %v832_v7 = vshll.u32 %v14360_v43, 16 }
 0x180   : > { %3991 = vmatprep.mubr.bf16.mxu1 %v1518_v57  ;;  %v928_v59 = vsel %vm922_vm6, %v926_v16, %v927_v25  ;;  %v1048_v56 = vshrl.u32 %v926_v16, 16  ;;  %v1051_v58 = vshll.u32 %v926_v16, 16  ;;  %v831_v22 = vrot.slane %v829_v18, 4  ;;  %v13213_v25 = vld [vmem:[#allocation2 + $0x40] ss:$0 sps:$4 sm:$0x11]  }
 0x181   : > { %v14365_v46 = vpop.f32.mrf.mxu0  ;;  %3992 = vmatmul.mubr.bf16.gmra.mxu1 %v1510_v15  ;;  %v1019_v40 = vor.u32 %v1018_v49, %v1015_v13  ;;  %v1056_v32 = vshrl.u32 %v928_v59, 16  ;;  %v1059_v2 = vshll.u32 %v928_v59, 16  ;;  %v834_v28 = vrot.slane %v832_v7, 5  ;;  %v547_v49 = vld [vmem:[#allocation2 + $0x158] sm:$0xf] }
 0x182   : > { %v1050_v31 = vrot.slane %v1048_v56, 3  ;;  %v1053_v8 = vrot.slane %v1051_v58, 4  ;;  %v11240_v36 = vcombine.low %v542_v12, %v543_v60  ;;  %v11241_v0 = vcombine.low %v544_v1, %v544_v1  ;;  %v13218_v12 = vld [vmem:[#allocation5 + $0x230] sm:$0xff]   ;;  %v548_v1 = vld [vmem:[#allocation2 + $0x15c] sm:$0xf] }
 0x183   : > { %v3412_v62 = vpop.f32.mrf.mxu0  ;;  %v14371_v23 = vpop.f32.mrf.mxu1  ;;  %v1020_v38 = vsel %vm977_vm7, %v1011_v20, %v1019_v40  ;;  %v1058_v17 = vrot.slane %v1056_v32, 3  ;;  %v1061_v57 = vrot.slane %v1059_v2, 4  ;;  %v835_v16 = vor.u32 %v834_v28, %v831_v22  ;;  %v13215_v2 = vld [vmem:[#allocation2 + $0x58] ss:$0 sps:$4 sm:$0x11]  }
 0x184   : > { %16859 = vst [vmem:[#allocation28_spill] sm:$0xff] %v14371_v23  ;;  %12721 = vmatprep.mubr.bf16.mxu0 %v1020_v38  ;;  %v1054_v62 = vor.u32 %v1053_v8, %v1050_v31  ;;  %v1538_v15 = vshrl.u32 %v11240_v36, 16  ;;  %v1541_v13 = vshll.u32 %v11240_v36, 16  ;;  %v1546_v59 = vshrl.u32 %v11241_v0, 16 }
 0x185   : > { %v14374_v18 = vpop.f32.mrf.mxu1  ;;  %v1062_v7 = vor.u32 %v1061_v57, %v1058_v17  ;;  %v1549_v56 = vshll.u32 %v11241_v0, 16  ;;  %v929_v60 = vrot.slane %v14212_v30, 5  ;;  %v1555_v58 = vshrl.u32 %v835_v16, 16 }
 0x186   : > { %16860 = vst [vmem:[#allocation29_spill] sm:$0xff] %v14374_v18  ;;  %v1558_v20 = vshll.u32 %v835_v16, 16  ;;  %v1540_v40 = vrot.slane %v1538_v15, 3  ;;  %v1543_v32 = vrot.slane %v1541_v13, 4  ;;  %v1548_v28 = vrot.slane %v1546_v59, 3  ;;  %v13515_v16 = vld [vmem:[#allocation5 + $0x238] sm:$0xff]  }
 0x187   : > { %v1063_v22 = vsel %vm977_vm7, %v1054_v62, %v1062_v7  ;;  %v1551_v31 = vrot.slane %v1549_v56, 4  ;;  %v930_v8 = vrot.slane %v13213_v25, 5  ;;  %v14378_v36 = vpop.f32.mrf.mxu1  ;;  %v1557_v38 = vrot.slane %v1555_v58, 3  ;;  %v546_v56 = vld [vmem:[#allocation2 + $0x154] sm:$0x8]  ;;  %v13225_v58 = vld [vmem:[#allocation5 + $0x228] sm:$0xff]  }
 0x188   : > { %16861 = vst [vmem:[#allocation30_spill] sm:$0xff] %v14378_v36  ;;  %v1560_v17 = vrot.slane %v1558_v20, 4  ;;  %12722 = vmatmul.mubr.bf16.vlgmr.msra.gmra.mxu0 %v1063_v22  ;;  %v1544_v0 = vor.u32 %v1543_v32, %v1540_v40  ;;  %v1091_v57 = vshrl.u32 %v929_v60, 16  ;;  %v1094_v13 = vshll.u32 %v929_v60, 16 }
 0x189   : > { %v14380_v30 = vpop.f32.mrf.mxu0  ;;  %v1552_v23 = vor.u32 %v1551_v31, %v1548_v28  ;;  %12758 = vmatpush3.bf16.msra.mxu0 %v13515_v16  ;;  %v931_v15 = vsel %vm922_vm6, %v929_v60, %v930_v8  ;;  %v14383_v18 = vcombine.low %v547_v49, %v548_v1  ;;  %v14388_v31 = vpop.f32.mrf.mxu1 }
 0x18a   : > { %v1561_v62 = vor.u32 %v1560_v17, %v1557_v38  ;;  %v1093_v7 = vrot.slane %v1091_v57, 3  ;;  %v1099_v25 = vshrl.u32 %v931_v15, 16  ;;  %v1102_v59 = vshll.u32 %v931_v15, 16  ;;  %12759 = vmatprep.subr.bf16.mxu0 %v13218_v12  ;;  %16862 = vst [vmem:[#allocation31_spill] sm:$0xff] %v14388_v31  ;;  %v13233_v57 = vld [vmem:[#allocation5 + $0x220] sm:$0xff]  }
 0x18b   : > { %v3417_v20 = vpop.f32.mrf.mxu0  ;;  %v1553_v40 = vsel %vm977_vm7, %v1544_v0, %v1552_v23  ;;  %v1096_v32 = vrot.slane %v1094_v13, 4  ;;  %v837_v22 = vshrl.u32 %v14383_v18, 16  ;;  %v840_v28 = vshll.u32 %v14383_v18, 16 }
 0x18c   : > { %3999 = vmatprep.mubr.bf16.mxu1 %v1561_v62  ;;  %v1101_v60 = vrot.slane %v1099_v25, 3  ;;  %v1104_v8 = vrot.slane %v1102_v59, 4  ;;  %v932_v38 = vrot.slane %v14225_v14, 5  ;;  %v933_v17 = vrot.slane %v13215_v2, 5 }
 0x18d   : > { %v14391_v16 = vpop.f32.mrf.mxu0  ;;  %4000 = vmatmul.mubr.bf16.gmra.mxu1 %v1553_v40  ;;  %v1097_v15 = vor.u32 %v1096_v32, %v1093_v7  ;;  %v839_v20 = vrot.slane %v837_v22, 4  ;;  %v842_v23 = vrot.slane %v840_v28, 5  ;;  %v11242_v0 = vcombine.low %v546_v56, %v547_v49  ;;  %12760 = vmatpush3.bf16.msra.mxu0 %v13218_v12  ;;  %v14397_v12 = vld [vmem:[#allocation2 + $0x170] sm:$0xf] }
 0x18e   : > { %v1105_v13 = vor.u32 %v1104_v8, %v1101_v60  ;;  %v934_v36 = vsel %vm922_vm6, %v932_v38, %v933_v17  ;;  %v1134_v19 = vshrl.u32 %v932_v38, 16  ;;  %v1137_v31 = vshll.u32 %v932_v38, 16  ;;  %12761 = vmatprep.subr.bf16.mxu0 %v13225_v58 }
 0x18f   : > { %v3420_v62 = vpop.f32.mrf.mxu0  ;;  %v843_v25 = vor.u32 %v842_v23, %v839_v20  ;;  %v1142_v59 = vshrl.u32 %v934_v36, 16  ;;  %v1145_v14 = vshll.u32 %v934_v36, 16  ;;  %v11243_v2 = vcombine.low %v548_v1, %v548_v1  ;;  %v14394_v61 = vpop.f32.mrf.mxu1  ;;  %v552_v20 = vld [vmem:[#allocation2 + $0x174] sm:$0xf] }
 0x190   : > { %16863 = vst [vmem:[#allocation32_spill] sm:$0xff] %v14394_v61  ;;  %v1106_v7 = vsel %vm977_vm7, %v1097_v15, %v1105_v13  ;;  %v1136_v40 = vrot.slane %v1134_v19, 3  ;;  %v1139_v32 = vrot.slane %v1137_v31, 4  ;;  %v1581_v49 = vshrl.u32 %v11242_v0, 16  ;;  %v13241_v15 = vld [vmem:[#allocation5 + $0x218] sm:$0xff]  }
 0x191   : > { %12725 = vmatprep.mubr.bf16.mxu0 %v1106_v7  ;;  %v1598_v56 = vshrl.u32 %v843_v25, 16  ;;  %v1601_v22 = vshll.u32 %v843_v25, 16  ;;  %v1144_v28 = vrot.slane %v1142_v59, 3  ;;  %v1147_v60 = vrot.slane %v1145_v14, 4  ;;  %12762 = vmatpush3.bf16.msra.mxu0 %v13225_v58  ;;  %v14399_v8 = vpop.f32.mrf.mxu1 }
 0x192   : > { %16864 = vst [vmem:[#allocation33_spill] sm:$0xff] %v14399_v8  ;;  %v1140_v36 = vor.u32 %v1139_v32, %v1136_v40  ;;  %v1583_v1 = vrot.slane %v1581_v49, 3  ;;  %v1584_v38 = vshll.u32 %v11242_v0, 16  ;;  %v1589_v17 = vshrl.u32 %v11243_v2, 16  ;;  %12763 = vmatprep.subr.bf16.mxu0 %v13233_v57 }
 0x193   : > { %v1600_v19 = vrot.slane %v1598_v56, 3  ;;  %v1603_v31 = vrot.slane %v1601_v22, 4  ;;  %v1148_v23 = vor.u32 %v1147_v60, %v1144_v28  ;;  %v1592_v13 = vshll.u32 %v11243_v2, 16  ;;  %v13222_v14 = vld [vmem:[#allocation2 + $0x88] ss:$0 sps:$4 sm:$0x11]   ;;  %v14402_v58 = vpop.f32.mrf.mxu1 }
 0x194   : > { %v1586_v62 = vrot.slane %v1584_v38, 4  ;;  %v1591_v7 = vrot.slane %v1589_v17, 3  ;;  %v935_v25 = vrot.slane %v14237_v37, 5  ;;  %v936_v59 = vrot.slane %v13220_v29, 5  ;;  %16865 = vst [vmem:[#allocation34_spill] sm:$0xff] %v14402_v58  ;;  %v14404_v61 = vpop.f32.mrf.mxu0  ;;  %v13248_v56 = vld [vmem:[#allocation5 + $0x210] sm:$0xff]  }
 0x195   : > { %v1604_v40 = vor.u32 %v1603_v31, %v1600_v19  ;;  %v1149_v0 = vsel %vm977_vm7, %v1140_v36, %v1148_v23  ;;  %v1594_v32 = vrot.slane %v1592_v13, 4  ;;  %v14408_v49 = vcombine.low %v14397_v12, %v552_v20  ;;  %12764 = vmatpush3.bf16.msra.mxu0 %v13233_v57  ;;  %v550_v13 = vld [vmem:[#allocation2 + $0x16c] sm:$0x8] }
 0x196   : > { %12726 = vmatmul.mubr.bf16.gmra.mxu0 %v1149_v0  ;;  %v1587_v2 = vor.u32 %v1586_v62, %v1583_v1  ;;  %v937_v22 = vsel %vm922_vm6, %v935_v25, %v936_v59  ;;  %v1177_v37 = vshrl.u32 %v935_v25, 16  ;;  %v1180_v29 = vshll.u32 %v935_v25, 16  ;;  %12765 = vmatprep.subr.bf16.mxu0 %v13241_v15  ;;  %v3425_v28 = vpop.f32.mrf.mxu0  ;;  %v14414_v1 = vpop.f32.mrf.mxu1 }
 0x197   : > { %4007 = vmatprep.mubr.bf16.mxu1 %v1604_v40  ;;  %v1595_v60 = vor.u32 %v1594_v32, %v1591_v7  ;;  %v1185_v38 = vshrl.u32 %v937_v22, 16  ;;  %v1188_v17 = vshll.u32 %v937_v22, 16  ;;  %v845_v36 = vshrl.u32 %v14408_v49, 16  ;;  %16866 = vst [vmem:[#allocation35_spill] sm:$0xff] %v14414_v1 }
 0x198   : > { %v1179_v19 = vrot.slane %v1177_v37, 3  ;;  %v1182_v31 = vrot.slane %v1180_v29, 4  ;;  %v848_v23 = vshll.u32 %v14408_v49, 16  ;;  %v938_v57 = vrot.slane %v14246_v39, 5  ;;  %v14416_v62 = vpop.f32.mrf.mxu0  ;;  %v13254_v29 = vld [vmem:[#allocation5 + $0x208] sm:$0xff]  }
 0x199   : > { %v1596_v25 = vsel %vm977_vm7, %v1587_v2, %v1595_v60  ;;  %v1187_v59 = vrot.slane %v1185_v38, 3  ;;  %v1190_v40 = vrot.slane %v1188_v17, 4  ;;  %v847_v7 = vrot.slane %v845_v36, 4  ;;  %12766 = vmatpush3.bf16.msra.mxu0 %v13241_v15 }
 0x19a   : > { %4008 = vmatmul.mubr.bf16.gmra.mxu1 %v1596_v25  ;;  %v1183_v0 = vor.u32 %v1182_v31, %v1179_v19  ;;  %v850_v32 = vrot.slane %v848_v23, 5  ;;  %v939_v22 = vrot.slane %v13222_v14, 5  ;;  %v1220_v37 = vshrl.u32 %v938_v57, 16  ;;  %12767 = vmatprep.subr.bf16.mxu0 %v13248_v56  ;;  %v3428_v28 = vpop.f32.mrf.mxu0  ;;  %v13261_v31 = vld [vmem:[#allocation5 + $0x200] sm:$0xff]   ;;  %v555_v25 = vld [vmem:[#allocation2 + $0x188] sm:$0xf] }
 0x19b   : > { %v1191_v39 = vor.u32 %v1190_v40, %v1187_v59  ;;  %v1223_v58 = vshll.u32 %v938_v57, 16  ;;  %v11244_v1 = vcombine.low %v550_v13, %v14397_v12  ;;  %v11245_v8 = vcombine.low %v552_v20, %v552_v20 }
 0x19c   : > { %v851_v10 = vor.u32 %v850_v32, %v847_v7  ;;  %v940_v2 = vsel %vm922_vm6, %v938_v57, %v939_v22  ;;  %v1222_v60 = vrot.slane %v1220_v37, 3  ;;  %v941_v15 = vrot.slane %v14258_v55, 5  ;;  %v14422_v38 = vpop.f32.mrf.mxu1  ;;  %v556_v37 = vld [vmem:[#allocation2 + $0x18c] sm:$0xf] }
 0x19d   : > { %v1192_v14 = vsel %vm977_vm7, %v1183_v0, %v1191_v39  ;;  %v1225_v17 = vrot.slane %v1223_v58, 4  ;;  %v1228_v36 = vshrl.u32 %v940_v2, 16  ;;  %v1231_v19 = vshll.u32 %v940_v2, 16  ;;  %12768 = vmatpush3.bf16.msra.mxu0 %v13248_v56  ;;  %v13229_v56 = vld [vmem:[#allocation2 + $0xb8] ss:$0 sps:$4 sm:$0x11]  }
 0x19e   : > { %12729 = vmatprep.mubr.bf16.mxu0 %v1192_v14  ;;  %v1641_v23 = vshrl.u32 %v851_v10, 16  ;;  %v1644_v12 = vshll.u32 %v851_v10, 16  ;;  %v1624_v20 = vshrl.u32 %v11244_v1, 16  ;;  %v1627_v13 = vshll.u32 %v11244_v1, 16  ;;  %12769 = vmatprep.subr.bf16.mxu0 %v13254_v29  ;;  %v14425_v57 = vpop.f32.mrf.mxu1 }
 0x19f   : > { %v1226_v59 = vor.u32 %v1225_v17, %v1222_v60  ;;  %v1230_v55 = vrot.slane %v1228_v36, 3  ;;  %v1233_v40 = vrot.slane %v1231_v19, 4  ;;  %v1632_v7 = vshrl.u32 %v11245_v8, 16 }
 0x1a0   : > { %v1643_v32 = vrot.slane %v1641_v23, 3  ;;  %v1646_v0 = vrot.slane %v1644_v12, 4  ;;  %v1626_v58 = vrot.slane %v1624_v20, 3  ;;  %v1629_v22 = vrot.slane %v1627_v13, 4  ;;  %v14427_v1 = vpop.f32.mrf.mxu1 }
 0x1a1   : > { %v1234_v28 = vor.u32 %v1233_v40, %v1230_v55  ;;  %v1634_v39 = vrot.slane %v1632_v7, 3  ;;  %v1635_v2 = vshll.u32 %v11245_v8, 16  ;;  %v942_v10 = vrot.slane %v13227_v51, 5  ;;  %12770 = vmatpush3.bf16.msra.mxu0 %v13254_v29 }
 0x1a2   : > { %v1647_v14 = vor.u32 %v1646_v0, %v1643_v32  ;;  %v1630_v52 = vor.u32 %v1629_v22, %v1626_v58  ;;  %v1263_v4 = vshrl.u32 %v941_v15, 16  ;;  %v1266_v60 = vshll.u32 %v941_v15, 16  ;;  %12771 = vmatprep.subr.bf16.mxu0 %v13261_v31  ;;  %v14429_v17 = vpop.f32.mrf.mxu0  ;;  %v14438_v0 = vpop.f32.mrf.mxu1 }
 0x1a3   : > { %v1235_v36 = vsel %vm977_vm7, %v1226_v59, %v1234_v28  ;;  %v1637_v19 = vrot.slane %v1635_v2, 4  ;;  %v943_v23 = vsel %vm922_vm6, %v941_v15, %v942_v10  ;;  %v14433_v12 = vcombine.low %v555_v25, %v556_v37  ;;  %v554_v59 = vld [vmem:[#allocation2 + $0x184] sm:$0x8]  ;;  %16867 = vst [vmem:[#allocation36_spill] sm:$0xff] %v14438_v0 }
 0x1a4   : > { %4015 = vmatprep.mubr.bf16.mxu1 %v1647_v14  ;;  %12730 = vmatmul.mubr.bf16.gmra.mxu0 %v1235_v36  ;;  %v1265_v51 = vrot.slane %v1263_v4, 3  ;;  %v1268_v8 = vrot.slane %v1266_v60, 4  ;;  %v1271_v29 = vshrl.u32 %v943_v23, 16  ;;  %v1274_v20 = vshll.u32 %v943_v23, 16  ;;  %v3433_v13 = vpop.f32.mrf.mxu0 }
 0x1a5   : > { %v1638_v55 = vor.u32 %v1637_v19, %v1634_v39  ;;  %v853_v40 = vshrl.u32 %v14433_v12, 16  ;;  %v856_v7 = vshll.u32 %v14433_v12, 16  ;;  %v944_v32 = vrot.slane %v14265_v33, 5  ;;  %12772 = vmatpush3.bf16.msra.mxu0 %v13261_v31 }
 0x1a6   : > { %v1269_v15 = vor.u32 %v1268_v8, %v1265_v51  ;;  %v1273_v58 = vrot.slane %v1271_v29, 3  ;;  %v1276_v22 = vrot.slane %v1274_v20, 4  ;;  %v945_v28 = vrot.slane %v13229_v56, 5  ;;  %v14440_v4 = vpop.f32.mrf.mxu0 }
 0x1a7   : > { %16868 = vst [vmem:[#allocation37_spill] sm:$0xff] %v14440_v4  ;;  %v1639_v2 = vsel %vm977_vm7, %v1630_v52, %v1638_v55  ;;  %v855_v10 = vrot.slane %v853_v40, 4  ;;  %v858_v39 = vrot.slane %v856_v7, 5  ;;  %v1306_v14 = vshrl.u32 %v944_v32, 16  ;;  %v559_v7 = vld [vmem:[#allocation2 + $0x1a0] sm:$0xf] }
 0x1a8   : > { %4016 = vmatmul.mubr.bf16.gmra.mxu1 %v1639_v2  ;;  %v1277_v60 = vor.u32 %v1276_v22, %v1273_v58  ;;  %v946_v36 = vsel %vm922_vm6, %v944_v32, %v945_v28  ;;  %v1309_v33 = vshll.u32 %v944_v32, 16  ;;  %v11246_v19 = vcombine.low %v554_v59, %v555_v25  ;;  %v3436_v31 = vpop.f32.mrf.mxu0  ;;  %v13235_v40 = vld [vmem:[#allocation2 + $0xd0] ss:$0 sps:$4 sm:$0x11]   ;;  %v13341_v4 = vld [vmem:[#allocation8 + $0x160] sm:$0xff]  }
 0x1a9   : > { %v859_v23 = vor.u32 %v858_v39, %v855_v10  ;;  %v1308_v13 = vrot.slane %v1306_v14, 3  ;;  %v1314_v51 = vshrl.u32 %v946_v36, 16  ;;  %v1317_v8 = vshll.u32 %v946_v36, 16  ;;  %v14444_v29 = vpop.f32.mrf.mxu1  ;;  %v560_v14 = vld [vmem:[#allocation2 + $0x1a4] sm:$0xf] }
 0x1aa   : > { %v1278_v56 = vsel %vm977_vm7, %v1269_v15, %v1277_v60  ;;  %v1311_v20 = vrot.slane %v1309_v33, 4  ;;  %v11247_v52 = vcombine.low %v556_v37, %v556_v37  ;;  %v1667_v55 = vshrl.u32 %v11246_v19, 16 }
 0x1ab   : > { %12733 = vmatprep.mubr.bf16.mxu0 %v1278_v56  ;;  %v1684_v58 = vshrl.u32 %v859_v23, 16  ;;  %v1687_v22 = vshll.u32 %v859_v23, 16  ;;  %v1316_v28 = vrot.slane %v1314_v51, 3  ;;  %v1319_v32 = vrot.slane %v1317_v8, 4  ;;  %v14447_v25 = vpop.f32.mrf.mxu1 }
 0x1ac   : > { %v1312_v59 = vor.u32 %v1311_v20, %v1308_v13  ;;  %v1669_v2 = vrot.slane %v1667_v55, 3  ;;  %v1670_v10 = vshll.u32 %v11246_v19, 16  ;;  %v1675_v39 = vshrl.u32 %v11247_v52, 16 }
 0x1ad   : > { %v1686_v36 = vrot.slane %v1684_v58, 3  ;;  %v1689_v31 = vrot.slane %v1687_v22, 4  ;;  %v1320_v15 = vor.u32 %v1319_v32, %v1316_v28  ;;  %v1678_v60 = vshll.u32 %v11247_v52, 16  ;;  %v14455_v19 = vpop.f32.mrf.mxu1  ;;  %v558_v28 = vld [vmem:[#allocation2 + $0x19c] sm:$0x8] }
 0x1ae   : > { %v1672_v37 = vrot.slane %v1670_v10, 4  ;;  %v1677_v33 = vrot.slane %v1675_v39, 3  ;;  %v947_v0 = vrot.slane %v14275_v34, 5  ;;  %v948_v56 = vrot.slane %v13235_v40, 5  ;;  %v14450_v23 = vpop.f32.mrf.mxu0 }
 0x1af   : > { %16869 = vst [vmem:[#allocation38_spill] sm:$0xff] %v14450_v23  ;;  %v1690_v51 = vor.u32 %v1689_v31, %v1686_v36  ;;  %v1321_v8 = vsel %vm977_vm7, %v1312_v59, %v1320_v15  ;;  %v1680_v13 = vrot.slane %v1678_v60, 4  ;;  %v14453_v20 = vcombine.low %v559_v7, %v560_v14 }
 0x1b0   : > { %12734 = vmatmul.mubr.bf16.gmra.mxu0 %v1321_v8  ;;  %v1673_v55 = vor.u32 %v1672_v37, %v1669_v2  ;;  %v949_v52 = vsel %vm922_vm6, %v947_v0, %v948_v56  ;;  %v1349_v58 = vshrl.u32 %v947_v0, 16  ;;  %v1352_v22 = vshll.u32 %v947_v0, 16  ;;  %v3441_v34 = vpop.f32.mrf.mxu0  ;;  %v14464_v8 = vpop.f32.mrf.mxu1 }
 0x1b1   : > { %4023 = vmatprep.mubr.bf16.mxu1 %v1690_v51  ;;  %v1681_v40 = vor.u32 %v1680_v13, %v1677_v33  ;;  %v1357_v32 = vshrl.u32 %v949_v52, 16  ;;  %v1360_v10 = vshll.u32 %v949_v52, 16  ;;  %v861_v39 = vshrl.u32 %v14453_v20, 16  ;;  %16871 = vst [vmem:[#allocation40_spill] sm:$0xff] %v14464_v8 }
 0x1b2   : > { %v1351_v59 = vrot.slane %v1349_v58, 3  ;;  %v1354_v36 = vrot.slane %v1352_v22, 4  ;;  %v864_v31 = vshll.u32 %v14453_v20, 16  ;;  %v950_v15 = vrot.slane %v14284_v63, 5  ;;  %v14461_v60 = vpop.f32.mrf.mxu0 }
 0x1b3   : > { %16870 = vst [vmem:[#allocation39_spill] sm:$0xff] %v14461_v60  ;;  %v1682_v2 = vsel %vm977_vm7, %v1673_v55, %v1681_v40  ;;  %v1359_v37 = vrot.slane %v1357_v32, 3  ;;  %v1362_v0 = vrot.slane %v1360_v10, 4  ;;  %v863_v56 = vrot.slane %v861_v39, 4 }
 0x1b4   : > { %4024 = vmatmul.mubr.bf16.gmra.mxu1 %v1682_v2  ;;  %v1355_v33 = vor.u32 %v1354_v36, %v1351_v59  ;;  %v866_v51 = vrot.slane %v864_v31, 5  ;;  %v951_v13 = vrot.slane %v13237_v9, 5  ;;  %v1392_v52 = vshrl.u32 %v950_v15, 16  ;;  %v3444_v58 = vpop.f32.mrf.mxu0  ;;  %v13243_v63 = vld [vmem:[#allocation2 + $0x100] ss:$0 sps:$4 sm:$0x11]  }
 0x1b5   : > { %v1363_v22 = vor.u32 %v1362_v0, %v1359_v37  ;;  %v1395_v34 = vshll.u32 %v950_v15, 16  ;;  %v11248_v42 = vcombine.low %v558_v28, %v559_v7  ;;  %v11249_v35 = vcombine.low %v560_v14, %v560_v14 }
 0x1b6   : > { %v867_v23 = vor.u32 %v866_v51, %v863_v56  ;;  %v952_v60 = vsel %vm922_vm6, %v950_v15, %v951_v13  ;;  %v1394_v55 = vrot.slane %v1392_v52, 3  ;;  %v953_v40 = vrot.slane %v14302_v54, 5  ;;  %v13244_v15 = vld [vmem:[#allocation2 + $0x118] ss:$0 sps:$4 sm:$0x11]  }
 0x1b7   : > { %v1364_v32 = vsel %vm977_vm7, %v1355_v33, %v1363_v22  ;;  %v1397_v10 = vrot.slane %v1395_v34, 4  ;;  %v1400_v39 = vshrl.u32 %v952_v60, 16  ;;  %v1403_v59 = vshll.u32 %v952_v60, 16  ;;  %v14469_v36 = vpop.f32.mrf.mxu1 }
 0x1b8   : > { %16872 = vst [vmem:[#allocation41_spill] sm:$0xff] %v14469_v36  ;;  %12737 = vmatprep.mubr.bf16.mxu0 %v1364_v32  ;;  %v1727_v9 = vshrl.u32 %v867_v23, 16  ;;  %v1730_v31 = vshll.u32 %v867_v23, 16  ;;  %v1710_v2 = vshrl.u32 %v11248_v42, 16  ;;  %v1713_v7 = vshll.u32 %v11248_v42, 16 }
 0x1b9   : > { %v1398_v14 = vor.u32 %v1397_v10, %v1394_v55  ;;  %v1402_v28 = vrot.slane %v1400_v39, 3  ;;  %v1405_v37 = vrot.slane %v1403_v59, 4  ;;  %v1718_v0 = vshrl.u32 %v11249_v35, 16  ;;  %v3899_v56 = vpop.f32.mrf.mxu1 }
 0x1ba   : > { %v1729_v51 = vrot.slane %v1727_v9, 3  ;;  %v1732_v54 = vrot.slane %v1730_v31, 4  ;;  %v1712_v13 = vrot.slane %v1710_v2, 3  ;;  %v1715_v33 = vrot.slane %v1713_v7, 4  ;;  %v11479_v2 = vld [vmem:[#allocation2 + $0x38] sm:$0xf] }
 0x1bb   : > { %v1406_v52 = vor.u32 %v1405_v37, %v1402_v28  ;;  %v1720_v58 = vrot.slane %v1718_v0, 3  ;;  %v1721_v60 = vshll.u32 %v11249_v35, 16  ;;  %v954_v22 = vrot.slane %v13243_v63, 5  ;;  %v14471_v34 = vpop.f32.mrf.mxu1  ;;  %v14473_v32 = vpop.f32.mrf.mxu0  ;;  %v11480_v7 = vld [vmem:[#allocation2 + $0x3c] sm:$0xf] }
 0x1bc   : > { %16873 = vst [vmem:[#allocation42_spill] sm:$0xff] %v14471_v34  ;;  %16874 = vst [vmem:[#allocation43_spill] sm:$0xff] %v14473_v32  ;;  %v1733_v23 = vor.u32 %v1732_v54, %v1729_v51  ;;  %v1716_v42 = vor.u32 %v1715_v33, %v1712_v13  ;;  %v1435_v55 = vshrl.u32 %v953_v40, 16  ;;  %v1438_v10 = vshll.u32 %v953_v40, 16 }
 0x1bd   : > { %v1407_v39 = vsel %vm977_vm7, %v1398_v14, %v1406_v52  ;;  %v1723_v59 = vrot.slane %v1721_v60, 4  ;;  %v955_v9 = vsel %vm922_vm6, %v953_v40, %v954_v22  ;;  %v956_v31 = vrot.slane %v14324_v5, 5  ;;  %v3902_v28 = vpop.f32.mrf.mxu1  ;;  %v3449_v35 = vpop.f32.mrf.mxu0  ;;  %v11478_v14 = vld [vmem:[#allocation2 + $0x34] sm:$0x8] }
 0x1be   : > { %4031 = vmatprep.mubr.bf16.mxu1 %v1733_v23  ;;  %12738 = vmatmul.mubr.bf16.gmra.mxu0 %v1407_v39  ;;  %v1437_v63 = vrot.slane %v1435_v55, 3  ;;  %v1440_v37 = vrot.slane %v1438_v10, 4  ;;  %v1443_v0 = vshrl.u32 %v955_v9, 16  ;;  %v1446_v56 = vshll.u32 %v955_v9, 16 }
 0x1bf   : > { %v1724_v51 = vor.u32 %v1723_v59, %v1720_v58  ;;  %v957_v54 = vrot.slane %v13244_v15, 5  ;;  %v1478_v13 = vshrl.u32 %v956_v31, 16  ;;  %v1481_v33 = vshll.u32 %v956_v31, 16  ;;  %v14478_v52 = vpop.f32.mrf.mxu0  ;;  %v13249_v28 = vld [vmem:[#allocation2 + $0x130] ss:$0 sps:$4 sm:$0x11]  }
 0x1c0   : > { %16875 = vst [vmem:[#allocation44_spill] sm:$0xff] %v14478_v52  ;;  %v1441_v40 = vor.u32 %v1440_v37, %v1437_v63  ;;  %v1445_v60 = vrot.slane %v1443_v0, 3  ;;  %v1448_v5 = vrot.slane %v1446_v56, 4  ;;  %v14480_v22 = vcombine.low %v11479_v2, %v11480_v7 }
 0x1c1   : > { %v1725_v23 = vsel %vm977_vm7, %v1716_v42, %v1724_v51  ;;  %v958_v55 = vsel %vm922_vm6, %v956_v31, %v957_v54  ;;  %v1480_v10 = vrot.slane %v1478_v13, 3  ;;  %v1483_v39 = vrot.slane %v1481_v33, 4  ;;  %v3452_v9 = vpop.f32.mrf.mxu0 }
 0x1c2   : > { %4032 = vmatmul.mubr.bf16.gmra.mxu1 %v1725_v23  ;;  %v1449_v15 = vor.u32 %v1448_v5, %v1445_v60  ;;  %v1486_v58 = vshrl.u32 %v958_v55, 16  ;;  %v1489_v59 = vshll.u32 %v958_v55, 16  ;;  %v4456_v35 = vshrl.u32 %v14480_v22, 16  ;;  %v14485_v8 = vpop.f32.mrf.mxu1 }
 0x1c3   : > { %16876 = vst [vmem:[#allocation45_spill] sm:$0xff] %v14485_v8  ;;  %v1484_v63 = vor.u32 %v1483_v39, %v1480_v10  ;;  %v4459_v37 = vshll.u32 %v14480_v22, 16  ;;  %v11550_v0 = vcombine.low %v11478_v14, %v11479_v2  ;;  %v11551_v56 = vcombine.low %v11480_v7, %v11480_v7 }
 0x1c4   : > { %v1450_v42 = vsel %vm977_vm7, %v1441_v40, %v1449_v15  ;;  %v1488_v51 = vrot.slane %v1486_v58, 3  ;;  %v1491_v31 = vrot.slane %v1489_v59, 4  ;;  %v4458_v54 = vrot.slane %v4456_v35, 4  ;;  %v3907_v13 = vpop.f32.mrf.mxu1  ;;  %v13250_v58 = vld [vmem:[#allocation2 + $0x148] ss:$0 sps:$4 sm:$0x11]  }
 0x1c5   : > { %12741 = vmatprep.mubr.bf16.mxu0 %v1450_v42  ;;  %v4461_v33 = vrot.slane %v4459_v37, 5  ;;  %v4708_v60 = vshrl.u32 %v11550_v0, 16  ;;  %v4711_v5 = vshll.u32 %v11550_v0, 16  ;;  %v4716_v23 = vshrl.u32 %v11551_v56, 16  ;;  %v11483_v42 = vld [vmem:[#allocation2 + $0x50] sm:$0xf] }
 0x1c6   : > { %v1492_v55 = vor.u32 %v1491_v31, %v1488_v51  ;;  %v4719_v9 = vshll.u32 %v11551_v56, 16  ;;  %v959_v52 = vrot.slane %v14340_v45, 5  ;;  %v960_v10 = vrot.slane %v13249_v28, 5  ;;  %v14490_v39 = vpop.f32.mrf.mxu1  ;;  %v14492_v2 = vpop.f32.mrf.mxu0  ;;  %v11484_v56 = vld [vmem:[#allocation2 + $0x54] sm:$0xf] }
 0x1c7   : > { %16877 = vst [vmem:[#allocation46_spill] sm:$0xff] %v14490_v39  ;;  %16878 = vst [vmem:[#allocation47_spill] sm:$0xff] %v14492_v2  ;;  %v4462_v7 = vor.u32 %v4461_v33, %v4458_v54  ;;  %v4710_v14 = vrot.slane %v4708_v60, 3  ;;  %v4713_v40 = vrot.slane %v4711_v5, 4  ;;  %v4718_v15 = vrot.slane %v4716_v23, 3 }
 0x1c8   : > { %v1493_v59 = vsel %vm977_vm7, %v1484_v63, %v1492_v55  ;;  %v4721_v35 = vrot.slane %v4719_v9, 4  ;;  %v961_v37 = vsel %vm922_vm6, %v959_v52, %v960_v10  ;;  %v1521_v0 = vshrl.u32 %v959_v52, 16  ;;  %v3910_v51 = vpop.f32.mrf.mxu1  ;;  %v3457_v45 = vpop.f32.mrf.mxu0  ;;  %v11482_v54 = vld [vmem:[#allocation2 + $0x4c] sm:$0x8] }
 0x1c9   : > { %12742 = vmatmul.mubr.bf16.gmra.mxu0 %v1493_v59  ;;  %v4725_v28 = vshrl.u32 %v4462_v7, 16  ;;  %v4728_v31 = vshll.u32 %v4462_v7, 16  ;;  %v4714_v13 = vor.u32 %v4713_v40, %v4710_v14  ;;  %v1524_v2 = vshll.u32 %v959_v52, 16 }
 0x1ca   : > { %v4722_v33 = vor.u32 %v4721_v35, %v4718_v15  ;;  %v1523_v60 = vrot.slane %v1521_v0, 3  ;;  %v1529_v5 = vshrl.u32 %v961_v37, 16  ;;  %v1532_v23 = vshll.u32 %v961_v37, 16  ;;  %v14496_v39 = vpop.f32.mrf.mxu0 }
 0x1cb   : > { %16879 = vst [vmem:[#allocation48_spill] sm:$0xff] %v14496_v39  ;;  %v4727_v63 = vrot.slane %v4725_v28, 3  ;;  %v4730_v55 = vrot.slane %v4728_v31, 4  ;;  %v1526_v9 = vrot.slane %v1524_v2, 4  ;;  %v962_v59 = vrot.slane %v14360_v43, 5 }
 0x1cc   : > { %v4723_v10 = vsel %vm977_vm7, %v4714_v13, %v4722_v33  ;;  %v1531_v8 = vrot.slane %v1529_v5, 3  ;;  %v1534_v51 = vrot.slane %v1532_v23, 4  ;;  %v3460_v45 = vpop.f32.mrf.mxu0  ;;  %v963_v52 = vrot.slane %v13250_v58, 5 }
 0x1cd   : > { %v4731_v7 = vor.u32 %v4730_v55, %v4727_v63  ;;  %v1527_v14 = vor.u32 %v1526_v9, %v1523_v60  ;;  %v14500_v40 = vcombine.low %v11483_v42, %v11484_v56  ;;  %v14502_v15 = vpop.f32.mrf.mxu1  ;;  %v1564_v37 = vshrl.u32 %v962_v59, 16 }
 0x1ce   : > { %16880 = vst [vmem:[#allocation49_spill] sm:$0xff] %v14502_v15  ;;  %v1535_v35 = vor.u32 %v1534_v51, %v1531_v8  ;;  %v1567_v0 = vshll.u32 %v962_v59, 16  ;;  %v11552_v28 = vcombine.low %v11482_v54, %v11483_v42  ;;  %v964_v2 = vsel %vm922_vm6, %v962_v59, %v963_v52 }
 0x1cf   : > { %5760 = vmatprep.mubr.bf16.mxu1 %v4731_v7  ;;  %v4464_v31 = vshrl.u32 %v14500_v40, 16  ;;  %v4467_v13 = vshll.u32 %v14500_v40, 16  ;;  %v11553_v43 = vcombine.low %v11484_v56, %v11484_v56  ;;  %v3915_v33 = vpop.f32.mrf.mxu1  ;;  %v1566_v60 = vrot.slane %v1564_v37, 3  ;;  %v13255_v7 = vld [vmem:[#allocation2 + $0x160] ss:$0 sps:$4 sm:$0x11]  }
 0x1d0   : > { %5761 = vmatmul.mubr.bf16.vlgmr.msra.gmra.mxu1 %v4723_v10  ;;  %v1536_v58 = vsel %vm977_vm7, %v1527_v14, %v1535_v35  ;;  %v1569_v5 = vrot.slane %v1567_v0, 4  ;;  %v1572_v23 = vshrl.u32 %v964_v2, 16  ;;  %v1575_v8 = vshll.u32 %v964_v2, 16 }
 0x1d1   : > { %12745 = vmatprep.mubr.bf16.mxu0 %v1536_v58  ;;  %v4466_v63 = vrot.slane %v4464_v31, 4  ;;  %v4469_v55 = vrot.slane %v4467_v13, 5  ;;  %v4751_v42 = vshrl.u32 %v11552_v28, 16  ;;  %v14508_v54 = vpop.f32.mrf.mxu1  ;;  %v14510_v9 = vpop.f32.mrf.mxu0  ;;  %v4754_v45 = vshll.u32 %v11552_v28, 16 }
 0x1d2   : > { %16881 = vst [vmem:[#allocation50_spill] sm:$0xff] %v14508_v54  ;;  %16882 = vst [vmem:[#allocation51_spill] sm:$0xff] %v14510_v9  ;;  %v1570_v51 = vor.u32 %v1569_v5, %v1566_v60  ;;  %v1574_v59 = vrot.slane %v1572_v23, 3  ;;  %v4759_v56 = vshrl.u32 %v11553_v43, 16  ;;  %v1577_v10 = vrot.slane %v1575_v8, 4 }
 0x1d3   : > { %v4470_v52 = vor.u32 %v4469_v55, %v4466_v63  ;;  %v4753_v14 = vrot.slane %v4751_v42, 3  ;;  %v4762_v35 = vshll.u32 %v11553_v43, 16  ;;  %v3918_v37 = vpop.f32.mrf.mxu1  ;;  %v3465_v0 = vpop.f32.mrf.mxu0  ;;  %v4756_v33 = vrot.slane %v4754_v45, 4  ;;  %v13256_v9 = vld [vmem:[#allocation2 + $0x178] ss:$0 sps:$4 sm:$0x11]  }
 0x1d4   : > { %v4761_v2 = vrot.slane %v4759_v56, 3  ;;  %v965_v31 = vrot.slane %v14383_v18, 5  ;;  %v1578_v13 = vor.u32 %v1577_v10, %v1574_v59  ;;  %v11487_v60 = vld [vmem:[#allocation2 + $0x68] sm:$0xf]  ;;  %v11488_v5 = vld [vmem:[#allocation2 + $0x6c] sm:$0xf] }
 0x1d5   : > { %v4768_v58 = vshrl.u32 %v4470_v52, 16  ;;  %v4771_v54 = vshll.u32 %v4470_v52, 16  ;;  %v4764_v39 = vrot.slane %v4762_v35, 4  ;;  %v14513_v28 = vpop.f32.mrf.mxu0  ;;  %v4757_v23 = vor.u32 %v4756_v33, %v4753_v14  ;;  %v11486_v43 = vld [vmem:[#allocation2 + $0x64] sm:$0x8] }
 0x1d6   : > { %16883 = vst [vmem:[#allocation52_spill] sm:$0xff] %v14513_v28  ;;  %v966_v8 = vrot.slane %v13255_v7, 5  ;;  %v1607_v63 = vshrl.u32 %v965_v31, 16  ;;  %v1610_v55 = vshll.u32 %v965_v31, 16  ;;  %v1579_v42 = vsel %vm977_vm7, %v1570_v51, %v1578_v13 }
 0x1d7   : > { %v4770_v45 = vrot.slane %v4768_v58, 3  ;;  %v4773_v56 = vrot.slane %v4771_v54, 4  ;;  %v4765_v37 = vor.u32 %v4764_v39, %v4761_v2  ;;  %v3468_v18 = vpop.f32.mrf.mxu0  ;;  %12746 = vmatmul.mubr.bf16.gmra.mxu0 %v1579_v42  ;;  %v968_v15 = vrot.slane %v14408_v49, 5  ;;  %v13260_v42 = vld [vmem:[#allocation2 + $0x190] ss:$0 sps:$4 sm:$0x11]  }
 0x1d8   : > { %v967_v59 = vsel %vm922_vm6, %v965_v31, %v966_v8  ;;  %v1609_v10 = vrot.slane %v1607_v63, 3  ;;  %v1612_v52 = vrot.slane %v1610_v55, 4  ;;  %v969_v51 = vrot.slane %v13256_v9, 5 }
 0x1d9   : > { %v4774_v35 = vor.u32 %v4773_v56, %v4770_v45  ;;  %v4766_v0 = vsel %vm977_vm7, %v4757_v23, %v4765_v37  ;;  %v1615_v28 = vshrl.u32 %v967_v59, 16  ;;  %v1618_v14 = vshll.u32 %v967_v59, 16  ;;  %v14518_v7 = vpop.f32.mrf.mxu1 }
 0x1da   : > { %16884 = vst [vmem:[#allocation53_spill] sm:$0xff] %v14518_v7  ;;  %v1613_v33 = vor.u32 %v1612_v52, %v1609_v10  ;;  %v14521_v13 = vcombine.low %v11487_v60, %v11488_v5  ;;  %v11554_v2 = vcombine.low %v11486_v43, %v11487_v60  ;;  %v11555_v31 = vcombine.low %v11488_v5, %v11488_v5  ;;  %v13262_v7 = vld [vmem:[#allocation2 + $0x1a8] ss:$0 sps:$4 sm:$0x11]  }
 0x1db   : > { %5768 = vmatprep.mubr.bf16.mxu1 %v4774_v35  ;;  %v1617_v39 = vrot.slane %v1615_v28, 3  ;;  %v1620_v54 = vrot.slane %v1618_v14, 4  ;;  %v3923_v58 = vpop.f32.mrf.mxu1  ;;  %v970_v8 = vsel %vm922_vm6, %v968_v15, %v969_v51  ;;  %v1650_v23 = vshrl.u32 %v968_v15, 16 }
 0x1dc   : > { %5769 = vmatmul.mubr.bf16.gmra.mxu1 %v4766_v0  ;;  %v1653_v63 = vshll.u32 %v968_v15, 16  ;;  %v4472_v55 = vshrl.u32 %v14521_v13, 16  ;;  %v1658_v56 = vshrl.u32 %v970_v8, 16  ;;  %v1661_v49 = vshll.u32 %v970_v8, 16 }
 0x1dd   : > { %v1621_v45 = vor.u32 %v1620_v54, %v1617_v39  ;;  %v4475_v9 = vshll.u32 %v14521_v13, 16  ;;  %v14526_v37 = vpop.f32.mrf.mxu1  ;;  %v1652_v28 = vrot.slane %v1650_v23, 3  ;;  %v4794_v5 = vshrl.u32 %v11554_v2, 16 }
 0x1de   : > { %16885 = vst [vmem:[#allocation54_spill] sm:$0xff] %v14526_v37  ;;  %v1655_v18 = vrot.slane %v1653_v63, 4  ;;  %v4474_v60 = vrot.slane %v4472_v55, 4  ;;  %v14528_v43 = vpop.f32.mrf.mxu0  ;;  %v1660_v10 = vrot.slane %v1658_v56, 3  ;;  %v1663_v15 = vrot.slane %v1661_v49, 4 }
 0x1df   : > { %16886 = vst [vmem:[#allocation55_spill] sm:$0xff] %v14528_v43  ;;  %v1622_v59 = vsel %vm977_vm7, %v1613_v33, %v1621_v45  ;;  %v4477_v52 = vrot.slane %v4475_v9, 5  ;;  %v3926_v35 = vpop.f32.mrf.mxu1  ;;  %v4796_v14 = vrot.slane %v4794_v5, 3  ;;  %v4797_v51 = vshll.u32 %v11554_v2, 16  ;;  %v11492_v5 = vld [vmem:[#allocation2 + $0x84] sm:$0xf] }
 0x1e0   : > { %12749 = vmatprep.mubr.bf16.mxu0 %v1622_v59  ;;  %v1656_v0 = vor.u32 %v1655_v18, %v1652_v28  ;;  %v4802_v39 = vshrl.u32 %v11555_v31, 16  ;;  %v3473_v54 = vpop.f32.mrf.mxu0  ;;  %v1664_v58 = vor.u32 %v1663_v15, %v1660_v10  ;;  %v4805_v23 = vshll.u32 %v11555_v31, 16  ;;  %v11491_v28 = vld [vmem:[#allocation2 + $0x80] sm:$0xf] }
 0x1e1   : > { %v4478_v8 = vor.u32 %v4477_v52, %v4474_v60  ;;  %v4799_v63 = vrot.slane %v4797_v51, 4  ;;  %v971_v37 = vrot.slane %v14433_v12, 5  ;;  %v972_v43 = vrot.slane %v13260_v42, 5 }
 0x1e2   : > { %v4804_v55 = vrot.slane %v4802_v39, 3  ;;  %v14532_v33 = vpop.f32.mrf.mxu0  ;;  %v1665_v45 = vsel %vm977_vm7, %v1656_v0, %v1664_v58  ;;  %v4807_v9 = vrot.slane %v4805_v23, 4  ;;  %v11490_v39 = vld [vmem:[#allocation2 + $0x7c] sm:$0x8] }
 0x1e3   : > { %16887 = vst [vmem:[#allocation56_spill] sm:$0xff] %v14532_v33  ;;  %v4811_v56 = vshrl.u32 %v4478_v8, 16  ;;  %v4814_v49 = vshll.u32 %v4478_v8, 16  ;;  %12750 = vmatmul.mubr.bf16.gmra.mxu0 %v1665_v45  ;;  %v4800_v2 = vor.u32 %v4799_v63, %v4796_v14  ;;  %v973_v18 = vsel %vm922_vm6, %v971_v37, %v972_v43 }
 0x1e4   : > { %v1693_v60 = vshrl.u32 %v971_v37, 16  ;;  %v1696_v31 = vshll.u32 %v971_v37, 16  ;;  %v3476_v59 = vpop.f32.mrf.mxu0  ;;  %v4808_v42 = vor.u32 %v4807_v9, %v4804_v55  ;;  %v1701_v15 = vshrl.u32 %v973_v18, 16 }
 0x1e5   : > { %v4813_v10 = vrot.slane %v4811_v56, 3  ;;  %v4816_v12 = vrot.slane %v4814_v49, 4  ;;  %v14536_v52 = vpop.f32.mrf.mxu1  ;;  %v1704_v51 = vshll.u32 %v973_v18, 16  ;;  %v974_v43 = vrot.slane %v14453_v20, 5 }
 0x1e6   : > { %16888 = vst [vmem:[#allocation57_spill] sm:$0xff] %v14536_v52  ;;  %v1695_v35 = vrot.slane %v1693_v60, 3  ;;  %v1698_v0 = vrot.slane %v1696_v31, 4  ;;  %v4809_v58 = vsel %vm977_vm7, %v4800_v2, %v4808_v42  ;;  %v1703_v14 = vrot.slane %v1701_v15, 3 }
 0x1e7   : > { %v4817_v54 = vor.u32 %v4816_v12, %v4813_v10  ;;  %v3931_v8 = vpop.f32.mrf.mxu1  ;;  %v1706_v23 = vrot.slane %v1704_v51, 4  ;;  %v975_v63 = vrot.slane %v13262_v7, 5  ;;  %v14540_v45 = vcombine.low %v11491_v28, %v11492_v5 }
 0x1e8   : > { %v1699_v37 = vor.u32 %v1698_v0, %v1695_v35  ;;  %v14542_v55 = vpop.f32.mrf.mxu0  ;;  %v1736_v56 = vshrl.u32 %v974_v43, 16  ;;  %v1739_v49 = vshll.u32 %v974_v43, 16  ;;  %v11556_v9 = vcombine.low %v11490_v39, %v11491_v28  ;;  %v13266_v35 = vld [vmem:[#allocation2 + $0x40] ss:$0 sps:$4 sm:$0x11]  }
 0x1e9   : > { %16889 = vst [vmem:[#allocation58_spill] sm:$0xff] %v14542_v55  ;;  %5776 = vmatprep.mubr.bf16.mxu1 %v4817_v54  ;;  %v11557_v18 = vcombine.low %v11492_v5, %v11492_v5  ;;  %v14544_v60 = vpop.f32.mrf.mxu1  ;;  %v1707_v2 = vor.u32 %v1706_v23, %v1703_v14  ;;  %v976_v31 = vsel %vm922_vm6, %v974_v43, %v975_v63  ;;  %v4480_v20 = vshrl.u32 %v14540_v45, 16 }
 0x1ea   : > { %16890 = vst [vmem:[#allocation59_spill] sm:$0xff] %v14544_v60  ;;  %5777 = vmatmul.mubr.bf16.gmra.mxu1 %v4809_v58  ;;  %v4483_v59 = vshll.u32 %v14540_v45, 16  ;;  %v3481_v7 = vpop.f32.mrf.mxu0  ;;  %v1738_v10 = vrot.slane %v1736_v56, 3  ;;  %v1741_v12 = vrot.slane %v1739_v49, 4  ;;  %v1744_v42 = vshrl.u32 %v976_v31, 16 }
 0x1eb   : > { %v1747_v15 = vshll.u32 %v976_v31, 16  ;;  %v3934_v0 = vpop.f32.mrf.mxu1  ;;  %v1708_v28 = vsel %vm977_vm7, %v1699_v37, %v1707_v2  ;;  %v4482_v5 = vrot.slane %v4480_v20, 4  ;;  %v4837_v39 = vshrl.u32 %v11556_v9, 16  ;;  %v11495_v7 = vld [vmem:[#allocation2 + $0x98] sm:$0xf] }
 0x1ec   : > { %v4485_v51 = vrot.slane %v4483_v59, 5  ;;  %v14550_v54 = vpop.f32.mrf.mxu0  ;;  %12753 = vmatprep.mubr.bf16.mxu0 %v1708_v28  ;;  %v1742_v58 = vor.u32 %v1741_v12, %v1738_v10  ;;  %v1746_v14 = vrot.slane %v1744_v42, 3  ;;  %v4840_v8 = vshll.u32 %v11556_v9, 16  ;;  %v11496_v31 = vld [vmem:[#allocation2 + $0x9c] sm:$0xf] }
 0x1ed   : > { %16891 = vst [vmem:[#allocation60_spill] sm:$0xff] %v14550_v54  ;;  %v1749_v43 = vrot.slane %v1747_v15, 4  ;;  %v4839_v63 = vrot.slane %v4837_v39, 3  ;;  %v4845_v56 = vshrl.u32 %v11557_v18, 16  ;;  %v4848_v49 = vshll.u32 %v11557_v18, 16 }
 0x1ee   : > { %v4486_v23 = vor.u32 %v4485_v51, %v4482_v5  ;;  %v3484_v55 = vpop.f32.mrf.mxu0  ;;  %v4842_v60 = vrot.slane %v4840_v8, 4  ;;  %v4653_v37 = vrot.slane %v14480_v22, 5  ;;  %v13268_v28 = vld [vmem:[#allocation2 + $0x58] ss:$0 sps:$4 sm:$0x11]   ;;  %v4654_v42 = vrot.slane %v13266_v35, 5 }
 0x1ef   : > { %v1750_v0 = vor.u32 %v1749_v43, %v1746_v14  ;;  %v4847_v59 = vrot.slane %v4845_v56, 3  ;;  %v4850_v54 = vrot.slane %v4848_v49, 4  ;;  %v11494_v18 = vld [vmem:[#allocation2 + $0x94] sm:$0x8]  ;;  %v14557_v8 = vcombine.low %v11495_v7, %v11496_v31 }
 0x1f0   : > { %v4854_v2 = vshrl.u32 %v4486_v23, 16  ;;  %v4857_v20 = vshll.u32 %v4486_v23, 16  ;;  %v14553_v10 = vpop.f32.mrf.mxu1  ;;  %v4843_v12 = vor.u32 %v4842_v60, %v4839_v63  ;;  %v4734_v15 = vshrl.u32 %v4653_v37, 16 }
 0x1f1   : > { %16892 = vst [vmem:[#allocation61_spill] sm:$0xff] %v14553_v10  ;;  %v1751_v9 = vsel %vm977_vm7, %v1742_v58, %v1750_v0  ;;  %v4851_v51 = vor.u32 %v4850_v54, %v4847_v59  ;;  %v4737_v39 = vshll.u32 %v4653_v37, 16  ;;  %v4655_v22 = vsel %vm922_vm6, %v4653_v37, %v4654_v42 }
 0x1f2   : > { %12754 = vmatmul.mubr.bf16.gmra.mxu0 %v1751_v9  ;;  %v4856_v5 = vrot.slane %v4854_v2, 3  ;;  %v4859_v55 = vrot.slane %v4857_v20, 4  ;;  %v3939_v14 = vpop.f32.mrf.mxu1  ;;  %v4736_v43 = vrot.slane %v4734_v15, 3  ;;  %v4742_v58 = vshrl.u32 %v4655_v22, 16 }
 0x1f3   : > { %v4852_v56 = vsel %vm977_vm7, %v4843_v12, %v4851_v51  ;;  %v4739_v49 = vrot.slane %v4737_v39, 4  ;;  %v4745_v63 = vshll.u32 %v4655_v22, 16  ;;  %v4488_v0 = vshrl.u32 %v14557_v8, 16 }
 0x1f4   : > { %v4860_v23 = vor.u32 %v4859_v55, %v4856_v5  ;;  %v14560_v60 = vpop.f32.mrf.mxu1  ;;  %v14562_v35 = vpop.f32.mrf.mxu0  ;;  %v4491_v54 = vshll.u32 %v14557_v8, 16  ;;  %v4656_v2 = vrot.slane %v14500_v40, 5  ;;  %v4744_v20 = vrot.slane %v4742_v58, 3 }
 0x1f5   : > { %16893 = vst [vmem:[#allocation62_spill] sm:$0xff] %v14560_v60  ;;  %16894 = vst [vmem:[#allocation63_spill] sm:$0xff] %v14562_v35  ;;  %v4740_v37 = vor.u32 %v4739_v49, %v4736_v43  ;;  %v4657_v59 = vrot.slane %v13268_v28, 5  ;;  %v11558_v9 = vcombine.low %v11494_v18, %v11495_v7  ;;  %v4747_v15 = vrot.slane %v4745_v63, 4 }
 0x1f6   : > { %5784 = vmatprep.mubr.bf16.mxu1 %v4860_v23  ;;  %v3942_v42 = vpop.f32.mrf.mxu1  ;;  %v3489_v12 = vpop.f32.mrf.mxu0  ;;  %v4490_v5 = vrot.slane %v4488_v0, 4  ;;  %v4493_v55 = vrot.slane %v4491_v54, 5  ;;  %v4777_v51 = vshrl.u32 %v4656_v2, 16  ;;  %v4780_v14 = vshll.u32 %v4656_v2, 16 }
 0x1f7   : > { %5785 = vmatmul.mubr.bf16.gmra.mxu1 %v4852_v56  ;;  %v4658_v39 = vsel %vm922_vm6, %v4656_v2, %v4657_v59  ;;  %v11559_v22 = vcombine.low %v11496_v31, %v11496_v31  ;;  %v4880_v35 = vshrl.u32 %v11558_v9, 16  ;;  %v4748_v40 = vor.u32 %v4747_v15, %v4744_v20  ;;  %v13271_v59 = vld [vmem:[#allocation2 + $0x70] ss:$0 sps:$4 sm:$0x11]   ;;  %v11500_v15 = vld [vmem:[#allocation2 + $0xb4] sm:$0xf] }
 0x1f8   : > { %v14568_v60 = vpop.f32.mrf.mxu0  ;;  %v4494_v23 = vor.u32 %v4493_v55, %v4490_v5  ;;  %v4779_v43 = vrot.slane %v4777_v51, 3  ;;  %v4785_v49 = vshrl.u32 %v4658_v39, 16  ;;  %v4782_v28 = vrot.slane %v4780_v14, 4  ;;  %v11499_v2 = vld [vmem:[#allocation2 + $0xb0] sm:$0xf] }
 0x1f9   : > { %16895 = vst [vmem:[#allocation64_spill] sm:$0xff] %v14568_v60  ;;  %v4788_v7 = vshll.u32 %v4658_v39, 16  ;;  %v4882_v18 = vrot.slane %v4880_v35, 3  ;;  %v4883_v58 = vshll.u32 %v11558_v9, 16  ;;  %v4749_v63 = vsel %vm977_vm7, %v4740_v37, %v4748_v40 }
 0x1fa   : > { %v3492_v56 = vpop.f32.mrf.mxu0  ;;  %v4897_v0 = vshrl.u32 %v4494_v23, 16  ;;  %v4900_v54 = vshll.u32 %v4494_v23, 16  ;;  %v4787_v42 = vrot.slane %v4785_v49, 3  ;;  %12773 = vmatprep.mubr.bf16.mxu0 %v4749_v63  ;;  %v4783_v31 = vor.u32 %v4782_v28, %v4779_v43  ;;  %v13273_v39 = vld [vmem:[#allocation2 + $0x88] ss:$0 sps:$4 sm:$0x11]  }
 0x1fb   : > { %v4790_v12 = vrot.slane %v4788_v7, 4  ;;  %v4885_v60 = vrot.slane %v4883_v58, 4  ;;  %v4888_v20 = vshrl.u32 %v11559_v22, 16  ;;  %v4891_v51 = vshll.u32 %v11559_v22, 16 }
 0x1fc   : > { %v4899_v5 = vrot.slane %v4897_v0, 3  ;;  %v4902_v55 = vrot.slane %v4900_v54, 4  ;;  %v4659_v37 = vrot.slane %v14521_v13, 5  ;;  %v4660_v56 = vrot.slane %v13271_v59, 5 }
 0x1fd   : > { %v14571_v35 = vpop.f32.mrf.mxu1  ;;  %v4791_v9 = vor.u32 %v4790_v12, %v4787_v42  ;;  %v4890_v14 = vrot.slane %v4888_v20, 3  ;;  %v4886_v23 = vor.u32 %v4885_v60, %v4882_v18  ;;  %v4893_v49 = vrot.slane %v4891_v51, 4 }
 0x1fe   : > { %16896 = vst [vmem:[#allocation65_spill] sm:$0xff] %v14571_v35  ;;  %v4903_v40 = vor.u32 %v4902_v55, %v4899_v5  ;;  %v4820_v28 = vshrl.u32 %v4659_v37, 16  ;;  %v4823_v7 = vshll.u32 %v4659_v37, 16  ;;  %v14575_v58 = vcombine.low %v11499_v2, %v11500_v15 }
 0x1ff   : > { %v3947_v63 = vpop.f32.mrf.mxu1  ;;  %v4792_v43 = vsel %vm977_vm7, %v4783_v31, %v4791_v9  ;;  %v4894_v22 = vor.u32 %v4893_v49, %v4890_v14  ;;  %v4661_v54 = vsel %vm922_vm6, %v4659_v37, %v4660_v56  ;;  %v4662_v13 = vrot.slane %v14540_v45, 5  ;;  %v11498_v14 = vld [vmem:[#allocation2 + $0xac] sm:$0x8] }
 0x200   : > { %v14577_v0 = vpop.f32.mrf.mxu0  ;;  %5792 = vmatprep.mubr.bf16.mxu1 %v4903_v40  ;;  %12774 = vmatmul.mubr.bf16.vlgmr.msra.gmra.mxu0 %v4792_v43  ;;  %v4663_v42 = vrot.slane %v13273_v39, 5  ;;  %v4822_v18 = vrot.slane %v4820_v28, 3  ;;  %v4825_v59 = vrot.slane %v4823_v7, 4  ;;  %v4828_v12 = vshrl.u32 %v4661_v54, 16 }
 0x201   : > { %16897 = vst [vmem:[#allocation66_spill] sm:$0xff] %v14577_v0  ;;  %v14581_v60 = vpop.f32.mrf.mxu1  ;;  %v4831_v31 = vshll.u32 %v4661_v54, 16  ;;  %v4895_v5 = vsel %vm977_vm7, %v4886_v23, %v4894_v22  ;;  %v4496_v55 = vshrl.u32 %v14575_v58, 16  ;;  %v4499_v51 = vshll.u32 %v14575_v58, 16 }
 0x202   : > { %16898 = vst [vmem:[#allocation67_spill] sm:$0xff] %v14581_v60  ;;  %v3497_v20 = vpop.f32.mrf.mxu0  ;;  %v4664_v9 = vsel %vm922_vm6, %v4662_v13, %v4663_v42  ;;  %5793 = vmatmul.mubr.bf16.gmra.mxu1 %v4895_v5  ;;  %v4826_v45 = vor.u32 %v4825_v59, %v4822_v18  ;;  %v4830_v39 = vrot.slane %v4828_v12, 3  ;;  %v4863_v49 = vshrl.u32 %v4662_v13, 16 }
 0x203   : > { %v3950_v37 = vpop.f32.mrf.mxu1  ;;  %v4833_v40 = vrot.slane %v4831_v31, 4  ;;  %v4498_v63 = vrot.slane %v4496_v55, 4  ;;  %v4501_v43 = vrot.slane %v4499_v51, 5  ;;  %v4866_v28 = vshll.u32 %v4662_v13, 16  ;;  %v11503_v55 = vld [vmem:[#allocation2 + $0xc8] sm:$0xf] }
 0x204   : > { %v14587_v56 = vpop.f32.mrf.mxu0  ;;  %v4871_v7 = vshrl.u32 %v4664_v9, 16  ;;  %v4865_v22 = vrot.slane %v4863_v49, 3  ;;  %v4874_v54 = vshll.u32 %v4664_v9, 16  ;;  %v11560_v20 = vcombine.low %v11498_v14, %v11499_v2  ;;  %v13276_v9 = vld [vmem:[#allocation2 + $0xa0] ss:$0 sps:$4 sm:$0x11]  }
 0x205   : > { %16899 = vst [vmem:[#allocation68_spill] sm:$0xff] %v14587_v56  ;;  %v4834_v23 = vor.u32 %v4833_v40, %v4830_v39  ;;  %v4502_v60 = vor.u32 %v4501_v43, %v4498_v63  ;;  %v4868_v42 = vrot.slane %v4866_v28, 4  ;;  %v11561_v37 = vcombine.low %v11500_v15, %v11500_v15  ;;  %v11504_v15 = vld [vmem:[#allocation2 + $0xcc] sm:$0xf] }
 0x206   : > { %v3500_v0 = vpop.f32.mrf.mxu0  ;;  %v4873_v35 = vrot.slane %v4871_v7, 3  ;;  %v4876_v59 = vrot.slane %v4874_v54, 4  ;;  %v4923_v12 = vshrl.u32 %v11560_v20, 16  ;;  %v4926_v31 = vshll.u32 %v11560_v20, 16 }
 0x207   : > { %v14589_v5 = vpop.f32.mrf.mxu1  ;;  %v4835_v18 = vsel %vm977_vm7, %v4826_v45, %v4834_v23  ;;  %v4940_v13 = vshrl.u32 %v4502_v60, 16  ;;  %v4943_v51 = vshll.u32 %v4502_v60, 16  ;;  %v4869_v39 = vor.u32 %v4868_v42, %v4865_v22  ;;  %v13278_v45 = vld [vmem:[#allocation2 + $0xb8] ss:$0 sps:$4 sm:$0x11]  }
 0x208   : > { %16900 = vst [vmem:[#allocation69_spill] sm:$0xff] %v14589_v5  ;;  %12777 = vmatprep.mubr.bf16.mxu0 %v4835_v18  ;;  %v4931_v40 = vshrl.u32 %v11561_v37, 16  ;;  %v4877_v0 = vor.u32 %v4876_v59, %v4873_v35  ;;  %v4925_v14 = vrot.slane %v4923_v12, 3  ;;  %v4928_v49 = vrot.slane %v4926_v31, 4  ;;  %v14610_v5 = vld [vmem:[#allocation2 + $0xe0] sm:$0xf] }
 0x209   : > { %v3955_v2 = vpop.f32.mrf.mxu1  ;;  %v4934_v63 = vshll.u32 %v11561_v37, 16  ;;  %v4942_v43 = vrot.slane %v4940_v13, 3  ;;  %v4945_v28 = vrot.slane %v4943_v51, 4  ;;  %v4665_v60 = vrot.slane %v14557_v8, 5 }
 0x20a   : > { %v4933_v7 = vrot.slane %v4931_v40, 3  ;;  %v4878_v54 = vsel %vm977_vm7, %v4869_v39, %v4877_v0  ;;  %v4929_v20 = vor.u32 %v4928_v49, %v4925_v14  ;;  %v4666_v35 = vrot.slane %v13276_v9, 5 }
 0x20b   : > { %v14592_v23 = vpop.f32.mrf.mxu1  ;;  %v4936_v18 = vrot.slane %v4934_v63, 4  ;;  %v4946_v42 = vor.u32 %v4945_v28, %v4942_v43  ;;  %12778 = vmatmul.mubr.bf16.gmra.mxu0 %v4878_v54  ;;  %v14598_v59 = vcombine.low %v11503_v55, %v11504_v15  ;;  %v4906_v31 = vshrl.u32 %v4665_v60, 16 }
 0x20c   : > { %16901 = vst [vmem:[#allocation70_spill] sm:$0xff] %v14592_v23  ;;  %v14596_v22 = vpop.f32.mrf.mxu0  ;;  %v4909_v13 = vshll.u32 %v4665_v60, 16  ;;  %v4668_v51 = vrot.slane %v14575_v58, 5  ;;  %v4667_v39 = vsel %vm922_vm6, %v4665_v60, %v4666_v35  ;;  %v4669_v0 = vrot.slane %v13278_v45, 5 }
 0x20d   : > { %16902 = vst [vmem:[#allocation71_spill] sm:$0xff] %v14596_v22  ;;  %v3958_v37 = vpop.f32.mrf.mxu1  ;;  %v4937_v12 = vor.u32 %v4936_v18, %v4933_v7  ;;  %5800 = vmatprep.mubr.bf16.mxu1 %v4946_v42  ;;  %v4504_v2 = vshrl.u32 %v14598_v59, 16  ;;  %v4507_v8 = vshll.u32 %v14598_v59, 16  ;;  %v4908_v9 = vrot.slane %v4906_v31, 3  ;;  %v11502_v18 = vld [vmem:[#allocation2 + $0xc4] sm:$0x8] }
 0x20e   : > { %v3505_v40 = vpop.f32.mrf.mxu0  ;;  %v4911_v49 = vrot.slane %v4909_v13, 4  ;;  %v4914_v63 = vshrl.u32 %v4667_v39, 16  ;;  %v4917_v28 = vshll.u32 %v4667_v39, 16  ;;  %v4670_v54 = vsel %vm922_vm6, %v4668_v51, %v4669_v0 }
 0x20f   : > { %v4938_v14 = vsel %vm977_vm7, %v4929_v20, %v4937_v12  ;;  %v4506_v7 = vrot.slane %v4504_v2, 4  ;;  %v4509_v58 = vrot.slane %v4507_v8, 5  ;;  %v4949_v35 = vshrl.u32 %v4668_v51, 16 }
 0x210   : > { %v14605_v43 = vpop.f32.mrf.mxu0  ;;  %5801 = vmatmul.mubr.bf16.gmra.mxu1 %v4938_v14  ;;  %v4912_v60 = vor.u32 %v4911_v49, %v4908_v9  ;;  %v4916_v42 = vrot.slane %v4914_v63, 3  ;;  %v4952_v37 = vshll.u32 %v4668_v51, 16  ;;  %v4919_v20 = vrot.slane %v4917_v28, 4  ;;  %v13281_v51 = vld [vmem:[#allocation2 + $0xd0] ss:$0 sps:$4 sm:$0x11]  }
 0x211   : > { %16903 = vst [vmem:[#allocation72_spill] sm:$0xff] %v14605_v43  ;;  %v4510_v12 = vor.u32 %v4509_v58, %v4506_v7  ;;  %v4957_v31 = vshrl.u32 %v4670_v54, 16  ;;  %v4960_v13 = vshll.u32 %v4670_v54, 16  ;;  %v4951_v22 = vrot.slane %v4949_v35, 3 }
 0x212   : > { %v14608_v40 = vpop.f32.mrf.mxu1  ;;  %v3508_v45 = vpop.f32.mrf.mxu0  ;;  %v4954_v43 = vrot.slane %v4952_v37, 4  ;;  %v11562_v14 = vcombine.low %v11502_v18, %v11503_v55  ;;  %v4920_v2 = vor.u32 %v4919_v20, %v4916_v42  ;;  %v11563_v49 = vcombine.low %v11504_v15, %v11504_v15  ;;  %v14615_v55 = vld [vmem:[#allocation2 + $0xe4] sm:$0xf] }
 0x213   : > { %16904 = vst [vmem:[#allocation73_spill] sm:$0xff] %v14608_v40  ;;  %v4983_v8 = vshrl.u32 %v4510_v12, 16  ;;  %v4986_v23 = vshll.u32 %v4510_v12, 16  ;;  %v4959_v0 = vrot.slane %v4957_v31, 3  ;;  %v4962_v9 = vrot.slane %v4960_v13, 4 }
 0x214   : > { %v3963_v39 = vpop.f32.mrf.mxu1  ;;  %v4955_v56 = vor.u32 %v4954_v43, %v4951_v22  ;;  %v4966_v63 = vshrl.u32 %v11562_v14, 16  ;;  %v4921_v28 = vsel %vm977_vm7, %v4912_v60, %v4920_v2  ;;  %v4969_v54 = vshll.u32 %v11562_v14, 16  ;;  %v13283_v43 = vld [vmem:[#allocation2 + $0xe8] ss:$0 sps:$4 sm:$0x11]   ;;  %v13326_v14 = vld [vmem:[#allocation8 + $0x178] sm:$0xff]  }
 0x215   : > { %v4985_v7 = vrot.slane %v4983_v8, 3  ;;  %v4988_v58 = vrot.slane %v4986_v23, 4  ;;  %12781 = vmatprep.mubr.bf16.mxu0 %v4921_v28  ;;  %v4963_v18 = vor.u32 %v4962_v9, %v4959_v0  ;;  %v4974_v35 = vshrl.u32 %v11563_v49, 16  ;;  %v13327_v9 = vld [vmem:[#allocation8 + $0x138] sm:$0xff]   ;;  %12809 = vmatprep.subr.bf16.mxu1 %v13326_v14 }
 0x216   : > { %v14612_v45 = vpop.f32.mrf.mxu1  ;;  %v4968_v42 = vrot.slane %v4966_v63, 3  ;;  %v4977_v22 = vshll.u32 %v11563_v49, 16  ;;  %v4971_v20 = vrot.slane %v4969_v54, 4  ;;  %v4671_v23 = vrot.slane %v14598_v59, 5  ;;  %v13328_v49 = vld [vmem:[#allocation8 + $0xf8] sm:$0xff]   ;;  %12810 = vmatpush3.bf16.msra.mxu1 %v13326_v14  ;;  %12245 = vmatprep.subr.bf16.mxu0 %v13327_v9 }
 0x217   : > { %16905 = vst [vmem:[#allocation74_spill] sm:$0xff] %v14612_v45  ;;  %v4989_v37 = vor.u32 %v4988_v58, %v4985_v7  ;;  %v4964_v31 = vsel %vm977_vm7, %v4955_v56, %v4963_v18  ;;  %v4976_v13 = vrot.slane %v4974_v35, 3  ;;  %v4672_v2 = vrot.slane %v13281_v51, 5  ;;  %12246 = vmatpush3.bf16.msra.mxu0 %v13328_v49 }
 0x218   : > { %v3966_v15 = vpop.f32.mrf.mxu1  ;;  %v4979_v60 = vrot.slane %v4977_v22, 4  ;;  %12782 = vmatmul.mubr.bf16.gmra.mxu0 %v4964_v31  ;;  %v4972_v39 = vor.u32 %v4971_v20, %v4968_v42  ;;  %v11593_v8 = vcombine.low %v14610_v5, %v14615_v55  ;;  %v4992_v28 = vshrl.u32 %v4671_v23, 16 }
 0x219   : > { %v14617_v12 = vpop.f32.mrf.mxu0  ;;  %5808 = vmatprep.mubr.bf16.mxu1 %v4989_v37  ;;  %v4995_v7 = vshll.u32 %v4671_v23, 16  ;;  %v4675_v58 = vrot.slane %v13283_v43, 5  ;;  %v4673_v56 = vsel %vm922_vm6, %v4671_v23, %v4672_v2 }
 0x21a   : > { %v4980_v63 = vor.u32 %v4979_v60, %v4976_v13  ;;  %v4512_v54 = vshrl.u32 %v11593_v8, 16  ;;  %v4515_v59 = vshll.u32 %v11593_v8, 16  ;;  %v4674_v18 = vrot.slane %v11593_v8, 5  ;;  %v11506_v60 = vld [vmem:[#allocation2 + $0xdc] sm:$0x8] }
 0x21b   : > { %v3513_v0 = vpop.f32.mrf.mxu0  ;;  %v4994_v42 = vrot.slane %v4992_v28, 3  ;;  %v4997_v22 = vrot.slane %v4995_v7, 4  ;;  %v5000_v15 = vshrl.u32 %v4673_v56, 16  ;;  %v5003_v43 = vshll.u32 %v4673_v56, 16 }
 0x21c   : > { %v4981_v51 = vsel %vm977_vm7, %v4972_v39, %v4980_v63  ;;  %v4514_v20 = vrot.slane %v4512_v54, 4  ;;  %v4517_v31 = vrot.slane %v4515_v59, 5  ;;  %v4676_v13 = vsel %vm922_vm6, %v4674_v18, %v4675_v58  ;;  %v13329_v39 = vld [vmem:[#allocation8 + $0x130] sm:$0xff]  }
 0x21d   : > { %v14624_v35 = vpop.f32.mrf.mxu0  ;;  %5809 = vmatmul.mubr.bf16.gmra.mxu1 %v4981_v51  ;;  %v4998_v2 = vor.u32 %v4997_v22, %v4994_v42  ;;  %v5002_v8 = vrot.slane %v5000_v15, 3  ;;  %v5035_v14 = vshrl.u32 %v4674_v18, 16  ;;  %v5038_v0 = vshll.u32 %v4674_v18, 16  ;;  %12247 = vmatprep.subr.bf16.mxu0 %v13329_v39  ;;  %v13330_v58 = vld [vmem:[#allocation8 + $0xf0] sm:$0xff]   ;;  %v11511_v15 = vld [vmem:[#allocation2 + $0xf8] sm:$0xf] }
 0x21e   : > { %16906 = vst [vmem:[#allocation75_spill] sm:$0xff] %v14624_v35  ;;  %v14627_v37 = vpop.f32.mrf.mxu1  ;;  %v5005_v63 = vrot.slane %v5003_v43, 4  ;;  %v4518_v28 = vor.u32 %v4517_v31, %v4514_v20  ;;  %v5043_v7 = vshrl.u32 %v4676_v13, 16  ;;  %v5046_v35 = vshll.u32 %v4676_v13, 16  ;;  %v14633_v18 = vld [vmem:[#allocation2 + $0xfc] sm:$0xf]  ;;  %12248 = vmatpush3.bf16.msra.mxu0 %v13330_v58 }
 0x21f   : > { %16907 = vst [vmem:[#allocation76_spill] sm:$0xff] %v14627_v37  ;;  %v3516_v23 = vpop.f32.mrf.mxu0  ;;  %v5037_v37 = vrot.slane %v5035_v14, 3  ;;  %v5040_v49 = vrot.slane %v5038_v0, 4  ;;  %v11564_v56 = vcombine.low %v11506_v60, %v14610_v5  ;;  %v11565_v20 = vcombine.low %v14615_v55, %v14615_v55  ;;  %v13287_v13 = vld [vmem:[#allocation2 + $0x100] ss:$0 sps:$4 sm:$0x11]  }
 0x220   : > { %v3971_v9 = vpop.f32.mrf.mxu1  ;;  %v5006_v59 = vor.u32 %v5005_v63, %v5002_v8  ;;  %v5026_v51 = vshrl.u32 %v4518_v28, 16  ;;  %v5029_v42 = vshll.u32 %v4518_v28, 16  ;;  %v5045_v22 = vrot.slane %v5043_v7, 3  ;;  %v14640_v39 = vld [vmem:[#allocation2 + $0x110] sm:$0xf] }
 0x221   : > { %v5041_v23 = vor.u32 %v5040_v49, %v5037_v37  ;;  %v5048_v43 = vrot.slane %v5046_v35, 4  ;;  %v5009_v31 = vshrl.u32 %v11564_v56, 16  ;;  %v5012_v9 = vshll.u32 %v11564_v56, 16  ;;  %v14642_v7 = vld [vmem:[#allocation2 + $0x114] sm:$0xf] }
 0x222   : > { %v14631_v54 = vpop.f32.mrf.mxu1  ;;  %v5007_v60 = vsel %vm977_vm7, %v4998_v2, %v5006_v59  ;;  %v5028_v8 = vrot.slane %v5026_v51, 3  ;;  %v5031_v0 = vrot.slane %v5029_v42, 4  ;;  %v5017_v35 = vshrl.u32 %v11565_v20, 16  ;;  %v11510_v56 = vld [vmem:[#allocation2 + $0xf4] sm:$0x8] }
 0x223   : > { %16908 = vst [vmem:[#allocation77_spill] sm:$0xff] %v14631_v54  ;;  %12785 = vmatprep.mubr.bf16.mxu0 %v5007_v60  ;;  %v5049_v63 = vor.u32 %v5048_v43, %v5045_v22  ;;  %v5011_v37 = vrot.slane %v5009_v31, 3  ;;  %v5020_v28 = vshll.u32 %v11565_v20, 16  ;;  %v13289_v54 = vld [vmem:[#allocation2 + $0x118] ss:$0 sps:$4 sm:$0x11]   ;;  %v11594_v59 = vcombine.low %v11511_v15, %v14633_v18 }
 0x224   : > { %v3974_v14 = vpop.f32.mrf.mxu1  ;;  %v14637_v5 = vpop.f32.mrf.mxu0  ;;  %v5032_v49 = vor.u32 %v5031_v0, %v5028_v8  ;;  %v5019_v45 = vrot.slane %v5017_v35, 3  ;;  %v4678_v22 = vrot.slane %v13287_v13, 5  ;;  %v14650_v43 = vcombine.low %v14640_v39, %v14642_v7 }
 0x225   : > { %v5014_v14 = vrot.slane %v5012_v9, 4  ;;  %v5050_v58 = vsel %vm977_vm7, %v5041_v23, %v5049_v63  ;;  %v5022_v2 = vrot.slane %v5020_v28, 4  ;;  %v4677_v60 = vrot.slane %v11594_v59, 5  ;;  %v13331_v9 = vld [vmem:[#allocation8 + $0x170] sm:$0xff]  }
 0x226   : > { %v3521_v55 = vpop.f32.mrf.mxu0  ;;  %5816 = vmatprep.mubr.bf16.mxu1 %v5032_v49  ;;  %12786 = vmatmul.mubr.bf16.gmra.mxu0 %v5050_v58  ;;  %v4520_v23 = vshrl.u32 %v11594_v59, 16  ;;  %v4523_v8 = vshll.u32 %v11594_v59, 16  ;;  %v4680_v63 = vrot.slane %v14650_v43, 5  ;;  %v4681_v35 = vrot.slane %v13289_v54, 5 }
 0x227   : > { %v5015_v42 = vor.u32 %v5014_v14, %v5011_v37  ;;  %v5023_v31 = vor.u32 %v5022_v2, %v5019_v45  ;;  %v11566_v28 = vcombine.low %v11510_v56, %v11511_v15  ;;  %v4679_v13 = vsel %vm922_vm6, %v4677_v60, %v4678_v22  ;;  %12811 = vmatprep.subr.bf16.mxu1 %v13331_v9 }
 0x228   : > { %v14646_v51 = vpop.f32.mrf.mxu0  ;;  %v5078_v49 = vshrl.u32 %v4677_v60, 16  ;;  %v5081_v14 = vshll.u32 %v4677_v60, 16  ;;  %v5086_v58 = vshrl.u32 %v4679_v13, 16  ;;  %v5089_v45 = vshll.u32 %v4679_v13, 16  ;;  %12812 = vmatpush3.bf16.msra.mxu1 %v13331_v9 }
 0x229   : > { %v14652_v20 = vpop.f32.mrf.mxu1  ;;  %v5024_v37 = vsel %vm977_vm7, %v5015_v42, %v5023_v31  ;;  %v4522_v2 = vrot.slane %v4520_v23, 4  ;;  %v4682_v54 = vsel %vm922_vm6, %v4680_v63, %v4681_v35  ;;  %v5121_v15 = vshrl.u32 %v4680_v63, 16  ;;  %v13332_v23 = vld [vmem:[#allocation8 + $0x128] sm:$0xff]  }
 0x22a   : > { %16909 = vst [vmem:[#allocation78_spill] sm:$0xff] %v14652_v20  ;;  %v3524_v0 = vpop.f32.mrf.mxu0  ;;  %5817 = vmatmul.mubr.bf16.gmra.mxu1 %v5024_v37  ;;  %v4525_v20 = vrot.slane %v4523_v8, 5  ;;  %v5083_v40 = vrot.slane %v5081_v14, 4  ;;  %v5088_v56 = vrot.slane %v5086_v58, 3  ;;  %v5091_v42 = vrot.slane %v5089_v45, 4  ;;  %12249 = vmatprep.subr.bf16.mxu0 %v13332_v23 }
 0x22b   : > { %v3979_v55 = vpop.f32.mrf.mxu1  ;;  %v5080_v0 = vrot.slane %v5078_v49, 3  ;;  %v5124_v22 = vshll.u32 %v4680_v63, 16  ;;  %v5123_v10 = vrot.slane %v5121_v15, 3  ;;  %v5129_v37 = vshrl.u32 %v4682_v54, 16 }
 0x22c   : > { %v4526_v31 = vor.u32 %v4525_v20, %v4522_v2  ;;  %v5132_v33 = vshll.u32 %v4682_v54, 16  ;;  %v5092_v8 = vor.u32 %v5091_v42, %v5088_v56  ;;  %v11567_v9 = vcombine.low %v14633_v18, %v14633_v18 }
 0x22d   : > { %v14657_v59 = vpop.f32.mrf.mxu1  ;;  %v5084_v60 = vor.u32 %v5083_v40, %v5080_v0  ;;  %v5126_v14 = vrot.slane %v5124_v22, 4  ;;  %v5131_v52 = vrot.slane %v5129_v37, 3  ;;  %v5052_v58 = vshrl.u32 %v11566_v28, 16  ;;  %v13333_v0 = vld [vmem:[#allocation8 + $0xe8] sm:$0xff]  }
 0x22e   : > { %16910 = vst [vmem:[#allocation79_spill] sm:$0xff] %v14657_v59  ;;  %v5069_v59 = vshrl.u32 %v4526_v31, 16  ;;  %v5072_v49 = vshll.u32 %v4526_v31, 16  ;;  %v5134_v35 = vrot.slane %v5132_v33, 4  ;;  %v5055_v56 = vshll.u32 %v11566_v28, 16  ;;  %12250 = vmatpush3.bf16.msra.mxu0 %v13333_v0 }
 0x22f   : > { %v3982_v55 = vpop.f32.mrf.mxu1  ;;  %v5093_v40 = vsel %vm977_vm7, %v5084_v60, %v5092_v8  ;;  %v5127_v2 = vor.u32 %v5126_v14, %v5123_v10  ;;  %v5054_v15 = vrot.slane %v5052_v58, 3  ;;  %v5060_v42 = vshrl.u32 %v11567_v9, 16  ;;  %v13295_v8 = vld [vmem:[#allocation2 + $0x130] ss:$0 sps:$4 sm:$0x11]  }
 0x230   : > { %v14660_v13 = vpop.f32.mrf.mxu0  ;;  %v5071_v63 = vrot.slane %v5069_v59, 3  ;;  %v5074_v45 = vrot.slane %v5072_v49, 4  ;;  %12789 = vmatprep.mubr.bf16.mxu0 %v5093_v40  ;;  %v5135_v54 = vor.u32 %v5134_v35, %v5131_v52  ;;  %v5063_v22 = vshll.u32 %v11567_v9, 16  ;;  %v11514_v55 = vld [vmem:[#allocation2 + $0x10c] sm:$0x8] }
 0x231   : > { %v5057_v60 = vrot.slane %v5055_v56, 4  ;;  %v5062_v59 = vrot.slane %v5060_v42, 3  ;;  %v4528_v52 = vshrl.u32 %v14650_v43, 16  ;;  %v4531_v28 = vshll.u32 %v14650_v43, 16  ;;  %v14675_v58 = vld [vmem:[#allocation2 + $0x128] sm:$0xf] }
 0x232   : > { %v3529_v20 = vpop.f32.mrf.mxu0  ;;  %v5075_v33 = vor.u32 %v5074_v45, %v5071_v63  ;;  %v5136_v37 = vsel %vm977_vm7, %v5127_v2, %v5135_v54  ;;  %v5065_v10 = vrot.slane %v5063_v22, 4  ;;  %v11568_v35 = vcombine.low %v11514_v55, %v14640_v39  ;;  %v14679_v40 = vld [vmem:[#allocation2 + $0x140] sm:$0xf]  ;;  %v13297_v0 = vld [vmem:[#allocation2 + $0x148] ss:$0 sps:$4 sm:$0x11]  }
 0x233   : > { %12790 = vmatmul.mubr.bf16.gmra.mxu0 %v5136_v37  ;;  %v5058_v14 = vor.u32 %v5057_v60, %v5054_v15  ;;  %v11569_v9 = vcombine.low %v14642_v7, %v14642_v7  ;;  %v14677_v20 = vld [vmem:[#allocation2 + $0x12c] sm:$0xf]  ;;  %v4530_v45 = vrot.slane %v4528_v52, 4  ;;  %v4533_v2 = vrot.slane %v4531_v28, 5  ;;  %v14683_v39 = vld [vmem:[#allocation2 + $0x144] sm:$0xf] }
 0x234   : > { %v14665_v31 = vpop.f32.mrf.mxu0  ;;  %5824 = vmatprep.mubr.bf16.mxu1 %v5075_v33  ;;  %v5066_v63 = vor.u32 %v5065_v10, %v5062_v59  ;;  %v5095_v43 = vshrl.u32 %v11568_v35, 16  ;;  %v5098_v56 = vshll.u32 %v11568_v35, 16  ;;  %v11596_v22 = vcombine.low %v14675_v58, %v14677_v20 }
 0x235   : > { %16911 = vst [vmem:[#allocation80_spill] sm:$0xff] %v14665_v31  ;;  %v14667_v18 = vpop.f32.mrf.mxu1  ;;  %v5103_v15 = vshrl.u32 %v11569_v9, 16  ;;  %v5106_v42 = vshll.u32 %v11569_v9, 16  ;;  %v4534_v33 = vor.u32 %v4533_v2, %v4530_v45  ;;  %v4684_v55 = vrot.slane %v13295_v8, 5 }
 0x236   : > { %16912 = vst [vmem:[#allocation81_spill] sm:$0xff] %v14667_v18  ;;  %v3532_v23 = vpop.f32.mrf.mxu0  ;;  %v5067_v7 = vsel %vm977_vm7, %v5058_v14, %v5066_v63  ;;  %v5097_v60 = vrot.slane %v5095_v43, 3  ;;  %v5100_v59 = vrot.slane %v5098_v56, 4  ;;  %v4683_v35 = vrot.slane %v11596_v22, 5 }
 0x237   : > { %v3987_v49 = vpop.f32.mrf.mxu1  ;;  %5825 = vmatmul.mubr.bf16.gmra.mxu1 %v5067_v7  ;;  %v5105_v23 = vrot.slane %v5103_v15, 3  ;;  %v5108_v10 = vrot.slane %v5106_v42, 4  ;;  %v5112_v28 = vshrl.u32 %v4534_v33, 16  ;;  %v14692_v9 = vcombine.low %v14679_v40, %v14683_v39 }
 0x238   : > { %v5115_v49 = vshll.u32 %v4534_v33, 16  ;;  %v5101_v14 = vor.u32 %v5100_v59, %v5097_v60  ;;  %v4687_v45 = vrot.slane %v13297_v0, 5  ;;  %v4685_v43 = vsel %vm922_vm6, %v4683_v35, %v4684_v55 }
 0x239   : > { %v14681_v54 = vpop.f32.mrf.mxu1  ;;  %v5109_v63 = vor.u32 %v5108_v10, %v5105_v23  ;;  %v5114_v8 = vrot.slane %v5112_v28, 3  ;;  %v5164_v56 = vshrl.u32 %v4683_v35, 16  ;;  %v5167_v42 = vshll.u32 %v4683_v35, 16 }
 0x23a   : > { %16913 = vst [vmem:[#allocation82_spill] sm:$0xff] %v14681_v54  ;;  %v5172_v7 = vshrl.u32 %v4685_v43, 16  ;;  %v5175_v54 = vshll.u32 %v4685_v43, 16  ;;  %v4686_v32 = vrot.slane %v14692_v9, 5  ;;  %v4536_v60 = vshrl.u32 %v11596_v22, 16 }
 0x23b   : > { %v3990_v37 = vpop.f32.mrf.mxu1  ;;  %v5110_v15 = vsel %vm977_vm7, %v5101_v14, %v5109_v63  ;;  %v5166_v18 = vrot.slane %v5164_v56, 3  ;;  %v5169_v0 = vrot.slane %v5167_v42, 4  ;;  %v4539_v28 = vshll.u32 %v11596_v22, 16 }
 0x23c   : > { %v14688_v52 = vpop.f32.mrf.mxu0  ;;  %v5117_v37 = vrot.slane %v5115_v49, 4  ;;  %v5174_v23 = vrot.slane %v5172_v7, 3  ;;  %v5177_v10 = vrot.slane %v5175_v54, 4  ;;  %v4688_v49 = vsel %vm922_vm6, %v4686_v32, %v4687_v45 }
 0x23d   : > { %v5207_v35 = vshrl.u32 %v4686_v32, 16  ;;  %v5210_v14 = vshll.u32 %v4686_v32, 16  ;;  %v4538_v63 = vrot.slane %v4536_v60, 4  ;;  %v5215_v56 = vshrl.u32 %v4688_v49, 16 }
 0x23e   : > { %v3537_v2 = vpop.f32.mrf.mxu0  ;;  %v5118_v31 = vor.u32 %v5117_v37, %v5114_v8  ;;  %v5170_v8 = vor.u32 %v5169_v0, %v5166_v18  ;;  %v5178_v37 = vor.u32 %v5177_v10, %v5174_v23  ;;  %v5218_v34 = vshll.u32 %v4688_v49, 16 }
 0x23f   : > { %v11518_v2 = vld [vmem:[#allocation2 + $0x124] sm:$0x8]  ;;  %v5209_v36 = vrot.slane %v5207_v35, 3  ;;  %v4541_v42 = vrot.slane %v4539_v28, 5  ;;  %v11571_v18 = vcombine.low %v14677_v20, %v14677_v20 }
 0x240   : > { %v14696_v33 = vpop.f32.mrf.mxu0  ;;  %5832 = vmatprep.mubr.bf16.mxu1 %v5118_v31  ;;  %v5179_v54 = vsel %vm977_vm7, %v5170_v8, %v5178_v37  ;;  %v5217_v31 = vrot.slane %v5215_v56, 3  ;;  %v5220_v22 = vrot.slane %v5218_v34, 4  ;;  %v11570_v45 = vcombine.low %v11518_v2, %v14675_v58  ;;  %v11522_v2 = vld [vmem:[#allocation2 + $0x13c] sm:$0x8] }
 0x241   : > { %v14699_v59 = vpop.f32.mrf.mxu1  ;;  %5833 = vmatmul.mubr.bf16.gmra.mxu1 %v5110_v15  ;;  %12793 = vmatprep.mubr.bf16.mxu0 %v5179_v54  ;;  %v4542_v60 = vor.u32 %v4541_v42, %v4538_v63  ;;  %v5146_v35 = vshrl.u32 %v11571_v18, 16  ;;  %v4544_v56 = vshrl.u32 %v14692_v9, 16  ;;  %v4547_v42 = vshll.u32 %v14692_v9, 16  ;;  %v13303_v54 = vld [vmem:[#allocation2 + $0x160] ss:$0 sps:$4 sm:$0x11]  }
 0x242   : > { %16914 = vst [vmem:[#allocation83_spill] sm:$0xff] %v14699_v59  ;;  %v3540_v55 = vpop.f32.mrf.mxu0  ;;  %v5212_v59 = vrot.slane %v5210_v14, 4  ;;  %v5221_v0 = vor.u32 %v5220_v22, %v5217_v31  ;;  %v5138_v23 = vshrl.u32 %v11570_v45, 16  ;;  %v5141_v10 = vshll.u32 %v11570_v45, 16 }
 0x243   : > { %v3995_v43 = vpop.f32.mrf.mxu1  ;;  %v5155_v28 = vshrl.u32 %v4542_v60, 16  ;;  %v5158_v49 = vshll.u32 %v4542_v60, 16  ;;  %v5149_v14 = vshll.u32 %v11571_v18, 16  ;;  %v5148_v63 = vrot.slane %v5146_v35, 3  ;;  %v14718_v60 = vld [vmem:[#allocation2 + $0x158] sm:$0xf] }
 0x244   : > { %v5213_v32 = vor.u32 %v5212_v59, %v5209_v36  ;;  %v5140_v43 = vrot.slane %v5138_v23, 3  ;;  %v5143_v58 = vrot.slane %v5141_v10, 4  ;;  %v11572_v45 = vcombine.low %v11522_v2, %v14679_v40  ;;  %v14720_v18 = vld [vmem:[#allocation2 + $0x15c] sm:$0xf]  ;;  %v13335_v35 = vld [vmem:[#allocation8 + $0xe0] sm:$0xff]  }
 0x245   : > { %v14702_v7 = vpop.f32.mrf.mxu1  ;;  %v5157_v59 = vrot.slane %v5155_v28, 3  ;;  %v5160_v20 = vrot.slane %v5158_v49, 4  ;;  %v5151_v8 = vrot.slane %v5149_v14, 4  ;;  %v4546_v23 = vrot.slane %v4544_v56, 4  ;;  %v14726_v28 = vld [vmem:[#allocation2 + $0x174] sm:$0xf] }
 0x246   : > { %16915 = vst [vmem:[#allocation84_spill] sm:$0xff] %v14702_v7  ;;  %v5222_v34 = vsel %vm977_vm7, %v5213_v32, %v5221_v0  ;;  %v5144_v37 = vor.u32 %v5143_v58, %v5140_v43  ;;  %v11573_v32 = vcombine.low %v14683_v39, %v14683_v39  ;;  %v4549_v10 = vrot.slane %v4547_v42, 5  ;;  %v13334_v49 = vld [vmem:[#allocation8 + $0x120] sm:$0xff]   ;;  %v13305_v43 = vld [vmem:[#allocation2 + $0x178] ss:$0 sps:$4 sm:$0x11]  }
 0x247   : > { %v3998_v15 = vpop.f32.mrf.mxu1  ;;  %12794 = vmatmul.mubr.bf16.gmra.mxu0 %v5222_v34  ;;  %v5161_v31 = vor.u32 %v5160_v20, %v5157_v59  ;;  %v5152_v22 = vor.u32 %v5151_v8, %v5148_v63  ;;  %v5181_v39 = vshrl.u32 %v11572_v45, 16  ;;  %v5184_v14 = vshll.u32 %v11572_v45, 16  ;;  %12251 = vmatprep.subr.bf16.mxu0 %v13334_v49 }
 0x248   : > { %v14708_v55 = vpop.f32.mrf.mxu0  ;;  %v14722_v15 = vld [vmem:[#allocation2 + $0x170] sm:$0xf]  ;;  %v5189_v34 = vshrl.u32 %v11573_v32, 16  ;;  %v4550_v2 = vor.u32 %v4549_v10, %v4546_v23  ;;  %v5192_v59 = vshll.u32 %v11573_v32, 16  ;;  %v11598_v20 = vcombine.low %v14718_v60, %v14720_v18  ;;  %12252 = vmatpush3.bf16.msra.mxu0 %v13335_v35 }
 0x249   : > { %16916 = vst [vmem:[#allocation85_spill] sm:$0xff] %v14708_v55  ;;  %5840 = vmatprep.mubr.bf16.mxu1 %v5161_v31  ;;  %v5153_v40 = vsel %vm977_vm7, %v5144_v37, %v5152_v22  ;;  %v4690_v63 = vrot.slane %v13303_v54, 5  ;;  %v5183_v8 = vrot.slane %v5181_v39, 3  ;;  %v5186_v56 = vrot.slane %v5184_v14, 4 }
 0x24a   : > { %v14711_v36 = vpop.f32.mrf.mxu0  ;;  %5841 = vmatmul.mubr.bf16.gmra.mxu1 %v5153_v40  ;;  %v5191_v42 = vrot.slane %v5189_v34, 3  ;;  %v14735_v31 = vcombine.low %v14722_v15, %v14726_v28  ;;  %v5198_v22 = vshrl.u32 %v4550_v2, 16  ;;  %v5201_v45 = vshll.u32 %v4550_v2, 16 }
 0x24b   : > { %16917 = vst [vmem:[#allocation86_spill] sm:$0xff] %v14711_v36  ;;  %v5194_v40 = vrot.slane %v5192_v59, 4  ;;  %v4689_v23 = vrot.slane %v11598_v20, 5  ;;  %v5187_v10 = vor.u32 %v5186_v56, %v5183_v8  ;;  %v4693_v49 = vrot.slane %v13305_v43, 5 }
 0x24c   : > { %v14728_v9 = vpop.f32.mrf.mxu0  ;;  %v4692_v54 = vrot.slane %v14735_v31, 5  ;;  %v5200_v14 = vrot.slane %v5198_v22, 3  ;;  %v5203_v34 = vrot.slane %v5201_v45, 4 }
 0x24d   : > { %v14724_v0 = vpop.f32.mrf.mxu1  ;;  %16919 = vst [vmem:[#allocation88_spill] sm:$0xff] %v14728_v9  ;;  %v5250_v9 = vshrl.u32 %v4689_v23, 16  ;;  %v5253_v7 = vshll.u32 %v4689_v23, 16 }
 0x24e   : > { %16918 = vst [vmem:[#allocation87_spill] sm:$0xff] %v14724_v0  ;;  %v14739_v32 = vpop.f32.mrf.mxu0  ;;  %v4691_v0 = vsel %vm922_vm6, %v4689_v23, %v4690_v63  ;;  %v5204_v36 = vor.u32 %v5203_v34, %v5200_v14  ;;  %v4694_v59 = vsel %vm922_vm6, %v4692_v54, %v4693_v49  ;;  %v5296_v45 = vshll.u32 %v4692_v54, 16  ;;  %v11526_v23 = vld [vmem:[#allocation2 + $0x154] sm:$0x8]  ;;  %v13336_v34 = vld [vmem:[#allocation8 + $0x168] sm:$0xff]  }
 0x24f   : > { %v4003_v58 = vpop.f32.mrf.mxu1  ;;  %16921 = vst [vmem:[#allocation90_spill] sm:$0xff] %v14739_v32  ;;  %v5261_v35 = vshll.u32 %v4691_v0, 16  ;;  %v5293_v32 = vshrl.u32 %v4692_v54, 16  ;;  %v5252_v56 = vrot.slane %v5250_v9, 3  ;;  %v5255_v43 = vrot.slane %v5253_v7, 4  ;;  %12813 = vmatprep.subr.bf16.mxu1 %v13336_v34 }
 0x250   : > { %v5195_v58 = vor.u32 %v5194_v40, %v5191_v42  ;;  %5848 = vmatprep.mubr.bf16.mxu1 %v5204_v36  ;;  %v5301_v63 = vshrl.u32 %v4694_v59, 16  ;;  %v5304_v40 = vshll.u32 %v4694_v59, 16  ;;  %v4552_v14 = vshrl.u32 %v11598_v20, 16  ;;  %12814 = vmatpush3.bf16.msra.mxu1 %v13336_v34 }
 0x251   : > { %v14737_v37 = vpop.f32.mrf.mxu1  ;;  %v5263_v22 = vrot.slane %v5261_v35, 4  ;;  %v5295_v42 = vrot.slane %v5293_v32, 3  ;;  %v4555_v49 = vshll.u32 %v11598_v20, 16  ;;  %v11574_v54 = vcombine.low %v11526_v23, %v14718_v60  ;;  %12815 = vmatprep.subr.bf16.mxu1 %v13341_v4 }
 0x252   : > { %16920 = vst [vmem:[#allocation89_spill] sm:$0xff] %v14737_v37  ;;  %v5258_v37 = vshrl.u32 %v4691_v0, 16  ;;  %v5196_v2 = vsel %vm977_vm7, %v5187_v10, %v5195_v58  ;;  %v5256_v0 = vor.u32 %v5255_v43, %v5252_v56  ;;  %v5298_v58 = vrot.slane %v5296_v45, 4 }
 0x253   : > { %v4006_v39 = vpop.f32.mrf.mxu1  ;;  %5849 = vmatmul.mubr.bf16.gmra.mxu1 %v5196_v2  ;;  %v5306_v9 = vrot.slane %v5304_v40, 4  ;;  %v4557_v32 = vrot.slane %v4555_v49, 5  ;;  %v11575_v59 = vcombine.low %v14720_v18, %v14720_v18  ;;  %v13337_v18 = vld [vmem:[#allocation8 + $0x118] sm:$0xff]   ;;  %v4563_v34 = vshll.u32 %v14735_v31, 16 }
 0x254   : > { %v5260_v39 = vrot.slane %v5258_v37, 3  ;;  %v4554_v37 = vrot.slane %v4552_v14, 4  ;;  %v5299_v35 = vor.u32 %v5298_v58, %v5295_v42  ;;  %v13338_v14 = vld [vmem:[#allocation8 + $0xd8] sm:$0xff]   ;;  %12253 = vmatprep.subr.bf16.mxu0 %v13337_v18  ;;  %12816 = vmatpush3.bf16.msra.mxu1 %v13341_v4 }
 0x255   : > { %v5235_v40 = vshll.u32 %v11575_v59, 16  ;;  %12254 = vmatpush3.bf16.msra.mxu0 %v13338_v14 }
 0x256   : > { %v14745_v8 = vpop.f32.mrf.mxu0  ;;  %v5264_v10 = vor.u32 %v5263_v22, %v5260_v39  ;;  %v4558_v43 = vor.u32 %v4557_v32, %v4554_v37  ;;  %v5224_v39 = vshrl.u32 %v11574_v54, 16  ;;  %v5227_v22 = vshll.u32 %v11574_v54, 16 }
 0x257   : > { %16922 = vst [vmem:[#allocation91_spill] sm:$0xff] %v14745_v8  ;;  %v5303_v8 = vrot.slane %v5301_v63, 3  ;;  %v5232_v63 = vshrl.u32 %v11575_v59, 16  ;;  %v5237_v58 = vrot.slane %v5235_v40, 4  ;;  %v14771_v40 = vld [vmem:[#allocation2 + $0x1a0] sm:$0xf] }
 0x258   : > { %v14747_v55 = vpop.f32.mrf.mxu0  ;;  %v5265_v36 = vsel %vm977_vm7, %v5256_v0, %v5264_v10  ;;  %v11530_v0 = vld [vmem:[#allocation2 + $0x16c] sm:$0x8]  ;;  %v5241_v42 = vshrl.u32 %v4558_v43, 16  ;;  %v5226_v23 = vrot.slane %v5224_v39, 3  ;;  %v5229_v10 = vrot.slane %v5227_v22, 4 }
 0x259   : > { %16923 = vst [vmem:[#allocation92_spill] sm:$0xff] %v14747_v55  ;;  %12797 = vmatprep.mubr.bf16.mxu0 %v5265_v36  ;;  %v5307_v2 = vor.u32 %v5306_v9, %v5303_v8  ;;  %v5244_v8 = vshll.u32 %v4558_v43, 16  ;;  %v5234_v49 = vrot.slane %v5232_v63, 3  ;;  %v4560_v9 = vshrl.u32 %v14735_v31, 16  ;;  %v14765_v22 = vld [vmem:[#allocation2 + $0x188] sm:$0xf] }
 0x25a   : > { %v14749_v7 = vpop.f32.mrf.mxu1  ;;  %v14755_v56 = vpop.f32.mrf.mxu0  ;;  %v5243_v32 = vrot.slane %v5241_v42, 3  ;;  %v4565_v43 = vrot.slane %v4563_v34, 5  ;;  %v11576_v39 = vcombine.low %v11530_v0, %v14722_v15  ;;  %v11577_v31 = vcombine.low %v14726_v28, %v14726_v28  ;;  %v14773_v42 = vld [vmem:[#allocation2 + $0x1a4] sm:$0xf]  ;;  %v13339_v55 = vld [vmem:[#allocation8 + $0x110] sm:$0xff]  }
 0x25b   : > { %16924 = vst [vmem:[#allocation93_spill] sm:$0xff] %v14755_v56  ;;  %v5308_v45 = vsel %vm977_vm7, %v5299_v35, %v5307_v2  ;;  %v5246_v54 = vrot.slane %v5244_v8, 4  ;;  %v5230_v35 = vor.u32 %v5229_v10, %v5226_v23  ;;  %v13311_v2 = vld [vmem:[#allocation2 + $0x190] ss:$0 sps:$4 sm:$0x11]   ;;  %v5238_v59 = vor.u32 %v5237_v58, %v5234_v49  ;;  %12255 = vmatprep.subr.bf16.mxu0 %v13339_v55 }
 0x25c   : > { %v4011_v20 = vpop.f32.mrf.mxu1  ;;  %12798 = vmatmul.mubr.bf16.gmra.mxu0 %v5308_v45  ;;  %v14762_v36 = vpop.f32.mrf.mxu0  ;;  %v14767_v45 = vld [vmem:[#allocation2 + $0x18c] sm:$0xf]  ;;  %v5267_v10 = vshrl.u32 %v11576_v39, 16  ;;  %v5270_v18 = vshll.u32 %v11576_v39, 16  ;;  %v5275_v0 = vshrl.u32 %v11577_v31, 16  ;;  %v5278_v58 = vshll.u32 %v11577_v31, 16 }
 0x25d   : > { %16926 = vst [vmem:[#allocation95_spill] sm:$0xff] %v14762_v36  ;;  %v4562_v20 = vrot.slane %v4560_v9, 4  ;;  %v5247_v63 = vor.u32 %v5246_v54, %v5243_v32  ;;  %v5239_v8 = vsel %vm977_vm7, %v5230_v35, %v5238_v59  ;;  %v13313_v49 = vld [vmem:[#allocation2 + $0x1a8] ss:$0 sps:$4 sm:$0x11]   ;;  %v11600_v14 = vcombine.low %v14765_v22, %v14767_v45 }
 0x25e   : > { %v14758_v60 = vpop.f32.mrf.mxu1  ;;  %v4696_v9 = vrot.slane %v13311_v2, 5  ;;  %v5272_v32 = vrot.slane %v5270_v18, 4  ;;  %v5277_v35 = vrot.slane %v5275_v0, 3  ;;  %v5280_v59 = vrot.slane %v5278_v58, 4 }
 0x25f   : > { %16925 = vst [vmem:[#allocation94_spill] sm:$0xff] %v14758_v60  ;;  %v4566_v23 = vor.u32 %v4565_v43, %v4562_v20  ;;  %5856 = vmatprep.mubr.bf16.mxu1 %v5247_v63  ;;  %v4695_v20 = vrot.slane %v11600_v14, 5  ;;  %v14784_v43 = vcombine.low %v14771_v40, %v14773_v42 }
 0x260   : > { %v4014_v37 = vpop.f32.mrf.mxu1  ;;  %5857 = vmatmul.mubr.bf16.gmra.mxu1 %v5239_v8  ;;  %v5281_v8 = vor.u32 %v5280_v59, %v5277_v35 }
 0x261   : > { %v5284_v28 = vshrl.u32 %v4566_v23, 16  ;;  %v5287_v34 = vshll.u32 %v4566_v23, 16  ;;  %v5269_v37 = vrot.slane %v5267_v10, 3  ;;  %v4697_v23 = vsel %vm922_vm6, %v4695_v20, %v4696_v9 }
 0x262   : > { %v5336_v10 = vshrl.u32 %v4695_v20, 16  ;;  %v5339_v18 = vshll.u32 %v4695_v20, 16  ;;  %v5344_v58 = vshrl.u32 %v4697_v23, 16  ;;  %v4698_v60 = vrot.slane %v14784_v43, 5 }
 0x263   : > { %v5286_v39 = vrot.slane %v5284_v28, 3  ;;  %v5289_v63 = vrot.slane %v5287_v34, 4  ;;  %v5273_v31 = vor.u32 %v5272_v32, %v5269_v37  ;;  %v13340_v28 = vld [vmem:[#allocation8 + $0xd0] sm:$0xff]  }
 0x264   : > { %v14776_v15 = vpop.f32.mrf.mxu0  ;;  %v5341_v37 = vrot.slane %v5339_v18, 4  ;;  %v5346_v32 = vrot.slane %v5344_v58, 3  ;;  %v5379_v9 = vshrl.u32 %v4698_v60, 16  ;;  %12256 = vmatpush3.bf16.msra.mxu0 %v13340_v28  ;;  %v4571_v18 = vshll.u32 %v11600_v14, 16 }
 0x265   : > { %16927 = vst [vmem:[#allocation96_spill] sm:$0xff] %v14776_v15  ;;  %v4699_v15 = vrot.slane %v13313_v49, 5  ;;  %v5290_v0 = vor.u32 %v5289_v63, %v5286_v39  ;;  %v5282_v34 = vsel %vm977_vm7, %v5273_v31, %v5281_v8  ;;  %v5338_v49 = vrot.slane %v5336_v10, 3 }
 0x266   : > { %v14780_v54 = vpop.f32.mrf.mxu0  ;;  %v5382_v63 = vshll.u32 %v4698_v60, 16  ;;  %v5381_v8 = vrot.slane %v5379_v9, 3  ;;  %v4568_v10 = vshrl.u32 %v11600_v14, 16  ;;  %v4573_v55 = vrot.slane %v4571_v18, 5 }
 0x267   : > { %16928 = vst [vmem:[#allocation97_spill] sm:$0xff] %v14780_v54  ;;  %v5347_v54 = vshll.u32 %v4697_v23, 16  ;;  %5864 = vmatprep.mubr.bf16.mxu1 %v5290_v0  ;;  %v4700_v35 = vsel %vm922_vm6, %v4698_v60, %v4699_v15  ;;  %v5342_v39 = vor.u32 %v5341_v37, %v5338_v49  ;;  %v11578_v60 = vcombine.low %v11534_v11, %v14765_v22 }
 0x268   : > { %v14786_v36 = vpop.f32.mrf.mxu1  ;;  %v14788_v2 = vpop.f32.mrf.mxu0  ;;  %v5390_v23 = vshll.u32 %v4700_v35, 16  ;;  %5865 = vmatmul.mubr.bf16.gmra.mxu1 %v5282_v34  ;;  %v5384_v0 = vrot.slane %v5382_v63, 4 }
 0x269   : > { %16929 = vst [vmem:[#allocation98_spill] sm:$0xff] %v14788_v2  ;;  %v5349_v2 = vrot.slane %v5347_v54, 4  ;;  %v5310_v37 = vshrl.u32 %v11578_v60, 16 }
 0x26a   : > { %v4019_v56 = vpop.f32.mrf.mxu1  ;;  %v14796_v20 = vpop.f32.mrf.mxu0  ;;  %v5392_v58 = vrot.slane %v5390_v23, 4  ;;  %v5385_v28 = vor.u32 %v5384_v0, %v5381_v8  ;;  %v11538_v23 = vld [vmem:[#allocation2 + $0x19c] sm:$0x8]  ;;  %v4576_v8 = vshrl.u32 %v14784_v43, 16 }
 0x26b   : > { %16930 = vst [vmem:[#allocation99_spill] sm:$0xff] %v14796_v20  ;;  %v5387_v56 = vshrl.u32 %v4700_v35, 16  ;;  %v5350_v31 = vor.u32 %v5349_v2, %v5346_v32  ;;  %v4570_v20 = vrot.slane %v4568_v10, 4  ;;  %v11579_v2 = vcombine.low %v14767_v45, %v14767_v45 }
 0x26c   : > { %v14794_v59 = vpop.f32.mrf.mxu1  ;;  %v5313_v32 = vshll.u32 %v11578_v60, 16  ;;  %v4579_v10 = vshll.u32 %v14784_v43, 16  ;;  %v4578_v60 = vrot.slane %v4576_v8, 4  ;;  %v11581_v43 = vcombine.low %v14773_v42, %v14773_v42 }
 0x26d   : > { %v5389_v15 = vrot.slane %v5387_v56, 3  ;;  %v5351_v24 = vsel %vm977_vm7, %v5342_v39, %v5350_v31  ;;  %v4574_v14 = vor.u32 %v4573_v55, %v4570_v20  ;;  %v5318_v39 = vshrl.u32 %v11579_v2, 16 }
 0x26e   : > { %v4022_v54 = vpop.f32.mrf.mxu1  ;;  %12801 = vmatprep.mubr.bf16.mxu0 %v5351_v24  ;;  %v5321_v63 = vshll.u32 %v11579_v2, 16  ;;  %v5312_v24 = vrot.slane %v5310_v37, 3  ;;  %v5315_v56 = vrot.slane %v5313_v32, 4  ;;  %v14814_v2 = vld [vmem:[#allocation2 + $0x1b8] sm:$0xf] }
 0x26f   : > { %v5393_v34 = vor.u32 %v5392_v58, %v5389_v15  ;;  %v5327_v11 = vshrl.u32 %v4574_v14, 16  ;;  %v5330_v22 = vshll.u32 %v4574_v14, 16  ;;  %v5320_v45 = vrot.slane %v5318_v39, 3  ;;  %v13319_v15 = vld [vmem:[#allocation2 + $0x1c0] ss:$0 sps:$4 sm:$0x11]  }
 0x270   : > { %v14800_v49 = vpop.f32.mrf.mxu0  ;;  %v5323_v20 = vrot.slane %v5321_v63, 4  ;;  %v5316_v0 = vor.u32 %v5315_v56, %v5312_v24  ;;  %v14816_v14 = vld [vmem:[#allocation2 + $0x1bc] sm:$0xf]  ;;  %v14820_v32 = vld [vmem:[#allocation2 + $0x1d0] sm:$0xf]  ;;  %v5361_v56 = vshrl.u32 %v11581_v43, 16 }
 0x271   : > { %16931 = vst [vmem:[#allocation100_spill] sm:$0xff] %v14800_v49  ;;  %v5394_v9 = vsel %vm977_vm7, %v5385_v28, %v5393_v34  ;;  %v5329_v18 = vrot.slane %v5327_v11, 3  ;;  %v5332_v54 = vrot.slane %v5330_v22, 4  ;;  %v4581_v28 = vrot.slane %v4579_v10, 5  ;;  %v13342_v10 = vld [vmem:[#allocation8 + $0x108] sm:$0xff]  }
 0x272   : > { %v14804_v35 = vpop.f32.mrf.mxu0  ;;  %12802 = vmatmul.mubr.bf16.gmra.mxu0 %v5394_v9  ;;  %v5324_v55 = vor.u32 %v5323_v20, %v5320_v45  ;;  %v11580_v34 = vcombine.low %v11538_v23, %v14771_v40  ;;  %v14822_v9 = vld [vmem:[#allocation2 + $0x1d4] sm:$0xf]  ;;  %v13321_v40 = vld [vmem:[#allocation2 + $0x1d8] ss:$0 sps:$4 sm:$0x11]   ;;  %v5364_v23 = vshll.u32 %v11581_v43, 16  ;;  %v11602_v45 = vcombine.low %v14814_v2, %v14816_v14  ;;  %12257 = vmatprep.subr.bf16.mxu0 %v13342_v10 }
 0x273   : > { %16932 = vst [vmem:[#allocation101_spill] sm:$0xff] %v14804_v35  ;;  %v5333_v37 = vor.u32 %v5332_v54, %v5329_v18  ;;  %v4582_v11 = vor.u32 %v4581_v28, %v4578_v60  ;;  %v4702_v20 = vrot.slane %v13319_v15, 5  ;;  %v13343_v18 = vld [vmem:[#allocation8 + $0xc8] sm:$0xff]   ;;  %v5363_v60 = vrot.slane %v5361_v56, 3 }
 0x274   : > { %v14807_v31 = vpop.f32.mrf.mxu1  ;;  %v14811_v4 = vpop.f32.mrf.mxu0  ;;  %v5325_v63 = vsel %vm977_vm7, %v5316_v0, %v5324_v55  ;;  %v5353_v22 = vshrl.u32 %v11580_v34, 16  ;;  %v5356_v24 = vshll.u32 %v11580_v34, 16  ;;  %v5366_v28 = vrot.slane %v5364_v23, 4  ;;  %12258 = vmatpush3.bf16.msra.mxu0 %v13343_v18 }
 0x275   : > { %16933 = vst [vmem:[#allocation102_spill] sm:$0xff] %v14811_v4  ;;  %5872 = vmatprep.mubr.bf16.mxu1 %v5333_v37  ;;  %v5370_v54 = vshrl.u32 %v4582_v11, 16  ;;  %v4701_v34 = vrot.slane %v11602_v45, 5  ;;  %v14833_v37 = vcombine.low %v14820_v32, %v14822_v9 }
 0x276   : > { %v4027_v58 = vpop.f32.mrf.mxu1  ;;  %v14829_v42 = vpop.f32.mrf.mxu0  ;;  %5873 = vmatmul.mubr.bf16.gmra.mxu1 %v5325_v63  ;;  %v5355_v0 = vrot.slane %v5353_v22, 3  ;;  %v5358_v55 = vrot.slane %v5356_v24, 4 }
 0x277   : > { %16935 = vst [vmem:[#allocation104_spill] sm:$0xff] %v14829_v42  ;;  %v5373_v58 = vshll.u32 %v4582_v11, 16  ;;  %v5372_v43 = vrot.slane %v5370_v54, 3  ;;  %v4705_v42 = vrot.slane %v13321_v40, 5  ;;  %v4703_v63 = vsel %vm922_vm6, %v4701_v34, %v4702_v20  ;;  %v13344_v40 = vld [vmem:[#allocation8 + $0x158] sm:$0xff]  }
 0x278   : > { %v14824_v39 = vpop.f32.mrf.mxu1  ;;  %v5422_v4 = vshrl.u32 %v4701_v34, 16  ;;  %v5425_v11 = vshll.u32 %v4701_v34, 16  ;;  %v5430_v56 = vshrl.u32 %v4703_v63, 16  ;;  %v5433_v23 = vshll.u32 %v4703_v63, 16  ;;  %12817 = vmatprep.subr.bf16.mxu1 %v13344_v40 }
 0x279   : > { %16934 = vst [vmem:[#allocation103_spill] sm:$0xff] %v14824_v39  ;;  %v5375_v15 = vrot.slane %v5373_v58, 4  ;;  %v5359_v39 = vor.u32 %v5358_v55, %v5355_v0  ;;  %v4704_v35 = vrot.slane %v14833_v37, 5  ;;  %12818 = vmatpush3.bf16.msra.mxu1 %v13344_v40 }
 0x27a   : > { %v4030_v8 = vpop.f32.mrf.mxu1  ;;  %v5424_v10 = vrot.slane %v5422_v4, 3  ;;  %v5427_v54 = vrot.slane %v5425_v11, 4  ;;  %v5432_v18 = vrot.slane %v5430_v56, 3  ;;  %v5435_v0 = vrot.slane %v5433_v23, 4 }
 0x27b   : > { %v5367_v8 = vor.u32 %v5366_v28, %v5363_v60  ;;  %v5376_v24 = vor.u32 %v5375_v15, %v5372_v43  ;;  %v4706_v20 = vsel %vm922_vm6, %v4704_v35, %v4705_v42  ;;  %v5465_v55 = vshrl.u32 %v4704_v35, 16  ;;  %v11542_v15 = vld [vmem:[#allocation2 + $0x1b4] sm:$0x8] }
 0x27c   : > { %v5428_v60 = vor.u32 %v5427_v54, %v5424_v10  ;;  %v5468_v28 = vshll.u32 %v4704_v35, 16  ;;  %v5473_v34 = vshrl.u32 %v4706_v20, 16  ;;  %v5476_v43 = vshll.u32 %v4706_v20, 16 }
 0x27d   : > { %v5368_v49 = vsel %vm977_vm7, %v5359_v39, %v5367_v8  ;;  %5880 = vmatprep.mubr.bf16.mxu1 %v5376_v24  ;;  %v5436_v4 = vor.u32 %v5435_v0, %v5432_v18  ;;  %v5467_v39 = vrot.slane %v5465_v55, 3  ;;  %v4584_v8 = vshrl.u32 %v11602_v45, 16 }
 0x27e   : > { %v14836_v22 = vpop.f32.mrf.mxu0  ;;  %5881 = vmatmul.mubr.bf16.gmra.mxu1 %v5368_v49  ;;  %v4587_v11 = vshll.u32 %v11602_v45, 16  ;;  %v5470_v24 = vrot.slane %v5468_v28, 4  ;;  %v5475_v56 = vrot.slane %v5473_v34, 3  ;;  %v5478_v23 = vrot.slane %v5476_v43, 4  ;;  %v11546_v43 = vld [vmem:[#allocation2 + $0x1cc] sm:$0x8] }
 0x27f   : > { %16936 = vst [vmem:[#allocation105_spill] sm:$0xff] %v14836_v22  ;;  %v5437_v35 = vsel %vm977_vm7, %v5428_v60, %v5436_v4  ;;  %v4586_v10 = vrot.slane %v4584_v8, 4  ;;  %v11582_v20 = vcombine.low %v11542_v15, %v14814_v2  ;;  %v11583_v18 = vcombine.low %v14816_v14, %v14816_v14  ;;  %v13346_v14 = vld [vmem:[#allocation8 + $0xc0] sm:$0xff]  }
 0x280   : > { %v14840_v58 = vpop.f32.mrf.mxu0  ;;  %v4589_v54 = vrot.slane %v4587_v11, 5  ;;  %12805 = vmatprep.mubr.bf16.mxu0 %v5437_v35  ;;  %v5479_v49 = vor.u32 %v5478_v23, %v5475_v56  ;;  %v4595_v35 = vshll.u32 %v14833_v37, 16 }
 0x281   : > { %16937 = vst [vmem:[#allocation106_spill] sm:$0xff] %v14840_v58  ;;  %v5396_v55 = vshrl.u32 %v11582_v20, 16  ;;  %v5399_v28 = vshll.u32 %v11582_v20, 16  ;;  %v5404_v60 = vshrl.u32 %v11583_v18, 16  ;;  %v5407_v34 = vshll.u32 %v11583_v18, 16 }
 0x282   : > { %v14843_v63 = vpop.f32.mrf.mxu1  ;;  %v14845_v22 = vpop.f32.mrf.mxu0  ;;  %v4590_v0 = vor.u32 %v4589_v54, %v4586_v10 }
 0x283   : > { %16938 = vst [vmem:[#allocation107_spill] sm:$0xff] %v14845_v22  ;;  %v5471_v22 = vor.u32 %v5470_v24, %v5467_v39  ;;  %v5398_v8 = vrot.slane %v5396_v55, 3  ;;  %v5401_v39 = vrot.slane %v5399_v28, 4  ;;  %v13345_v24 = vld [vmem:[#allocation8 + $0x100] sm:$0xff]   ;;  %v5406_v56 = vrot.slane %v5404_v60, 3 }
 0x284   : > { %v4035_v42 = vpop.f32.mrf.mxu1  ;;  %v14849_v58 = vpop.f32.mrf.mxu0  ;;  %v5413_v2 = vshrl.u32 %v4590_v0, 16  ;;  %v5416_v15 = vshll.u32 %v4590_v0, 16  ;;  %v5409_v23 = vrot.slane %v5407_v34, 4  ;;  %12259 = vmatprep.subr.bf16.mxu0 %v13345_v24  ;;  %v4597_v0 = vrot.slane %v4595_v35, 5 }
 0x285   : > { %v5480_v40 = vsel %vm977_vm7, %v5471_v22, %v5479_v49  ;;  %v4592_v42 = vshrl.u32 %v14833_v37, 16  ;;  %v13347_v22 = vld [vmem:[#allocation8 + $0x150] sm:$0xff]   ;;  %v5402_v20 = vor.u32 %v5401_v39, %v5398_v8  ;;  %v11584_v55 = vcombine.low %v11546_v43, %v14820_v32  ;;  %12260 = vmatpush3.bf16.msra.mxu0 %v13346_v14 }
 0x286   : > { %v14853_v45 = vpop.f32.mrf.mxu1  ;;  %12806 = vmatmul.mubr.bf16.gmra.mxu0 %v5480_v40  ;;  %v5415_v10 = vrot.slane %v5413_v2, 3  ;;  %v5418_v54 = vrot.slane %v5416_v15, 4  ;;  %v5410_v49 = vor.u32 %v5409_v23, %v5406_v56  ;;  %12819 = vmatprep.subr.bf16.mxu1 %v13347_v22  ;;  %v11585_v60 = vcombine.low %v14822_v9, %v14822_v9 }
 0x287   : > { %v4594_v18 = vrot.slane %v4592_v42, 4  ;;  %12820 = vmatpush3.bf16.msra.mxu1 %v13347_v22  ;;  %v5442_v2 = vshll.u32 %v11584_v55, 16  ;;  %v13350_v42 = vld [vmem:[#allocation8 + $0x148] sm:$0xff]  }
 0x288   : > { %v4038_v4 = vpop.f32.mrf.mxu1  ;;  %v5419_v40 = vor.u32 %v5418_v54, %v5415_v10  ;;  %v5411_v37 = vsel %vm977_vm7, %v5402_v20, %v5410_v49  ;;  %v5447_v15 = vshrl.u32 %v11585_v60, 16  ;;  %v5450_v8 = vshll.u32 %v11585_v60, 16  ;;  %12821 = vmatprep.subr.bf16.mxu1 %v13350_v42  ;;  %v13351_v60 = vld [vmem:[#allocation8 + $0x140] sm:$0xff]  }
 0x289   : > { %v14856_v11 = vpop.f32.mrf.mxu0  ;;  %v4598_v34 = vor.u32 %v4597_v0, %v4594_v18  ;;  %v5439_v4 = vshrl.u32 %v11584_v55, 16  ;;  %v5444_v24 = vrot.slane %v5442_v2, 4  ;;  %v376_v2 = vld [vmem:[#allocation3] sm:$0x1] }
 0x28a   : > { %5888 = vmatprep.mubr.bf16.mxu1 %v5419_v40  ;;  %v5449_v23 = vrot.slane %v5447_v15, 3  ;;  %v5452_v9 = vrot.slane %v5450_v8, 4  ;;  %v379_v15 = vld [vmem:[#allocation3 + $0x10] sm:$0x1]  ;;  %v382_v8 = vld [vmem:[#allocation3 + $0x20] sm:$0x1] }
 0x28b   : > { %v14861_v28 = vpop.f32.mrf.mxu0  ;;  %5889 = vmatmul.mubr.bf16.gmra.mxu1 %v5411_v37  ;;  %v5456_v39 = vshrl.u32 %v4598_v34, 16  ;;  %v5459_v32 = vshll.u32 %v4598_v34, 16  ;;  %v5441_v43 = vrot.slane %v5439_v4, 3  ;;  %v14875_v37 = vld [vmem:[#allocation8 + $0xb8] sm:$0xff]  }
 0x28c   : > { %v5453_v20 = vor.u32 %v5452_v9, %v5449_v23  ;;  %12822 = vmatpush3.bf16.msra.mxu1 %v13350_v42  ;;  %16941 = vst [vmem:[#allocation110_spill] sm:$0xff] %v14875_v37  ;;  %12857 = vmatprep.subr.bf16.mxu0 %v14875_v37  ;;  %v433_v23 = vld [vmem:[#allocation3 + $0x8] sm:$0x2]  ;;  %v436_v9 = vld [vmem:[#allocation3 + $0x18] sm:$0x2] }
 0x28d   : > { %v14868_v56 = vpop.f32.mrf.mxu0  ;;  %v5458_v35 = vrot.slane %v5456_v39, 3  ;;  %v5461_v22 = vrot.slane %v5459_v32, 4  ;;  %v5445_v10 = vor.u32 %v5444_v24, %v5441_v43  ;;  %12823 = vmatprep.subr.bf16.mxu1 %v13351_v60  ;;  %v385_v39 = vld [vmem:[#allocation3 + $0x30] sm:$0x1]  ;;  %v439_v42 = vld [vmem:[#allocation3 + $0x28] sm:$0x2] }
 0x28e   : > { %16939 = vst [vmem:[#allocation108_spill] sm:$0xff] %v14868_v56  ;;  %v391_v32 = vld [vmem:[#allocation3 + $0x50] sm:$0x1]  ;;  %v448_v37 = vld [vmem:[#allocation3 + $0x58] sm:$0x2] }
 0x28f   : > { %v5462_v49 = vor.u32 %v5461_v22, %v5458_v35  ;;  %v14872_v0 = vpop.f32.mrf.mxu0  ;;  %v5454_v55 = vsel %vm977_vm7, %v5445_v10, %v5453_v20  ;;  %v442_v35 = vld [vmem:[#allocation3 + $0x38] sm:$0x2]  ;;  %v388_v22 = vld [vmem:[#allocation3 + $0x40] sm:$0x1]  ;;  %v397_v10 = vld [vmem:[#allocation3 + $0x70] sm:$0x1] }
 0x290   : > { %v14866_v14 = vpop.f32.mrf.mxu1  ;;  %16940 = vst [vmem:[#allocation109_spill] sm:$0xff] %v14872_v0  ;;  %12824 = vmatpush3.bf16.msra.mxu1 %v13351_v60  ;;  %v394_v20 = vld [vmem:[#allocation3 + $0x60] sm:$0x1]  ;;  %v445_v60 = vld [vmem:[#allocation3 + $0x48] sm:$0x2] }
 0x291   : > { %5896 = vmatprep.mubr.bf16.mxu1 %v5462_v49  ;;  %v454_v0 = vld [vmem:[#allocation3 + $0x78] sm:$0x2] }
 0x292   : > { %v5764_v54 = vpop.f32.mrf.mxu1 }
 0x293   : > { %5897 = vmatmul.mubr.bf16.gmra.mxu1 %v5454_v55  ;;  %v377_v55 = vsel %vm14888_vm9, 0, %v376_v2 }
 0x294   : > { %v14870_v18 = vpop.f32.mrf.mxu1  ;;  %378 = vst [vmem:[#allocation3] sm:$0x1] %v377_v55  ;;  %v400_v55 = vld [vmem:[#allocation3 + $0x80] sm:$0x1] }
 0x296   : > { %v5767_v40 = vpop.f32.mrf.mxu1 }
 0x297   : > { %v14877_v34 = vpop.f32.mrf.mxu0  ;;  %v380_v40 = vsel %vm14888_vm9, 0, %v379_v15 }
 0x298   : > { %16942 = vst [vmem:[#allocation111_spill] sm:$0xff] %v14877_v34  ;;  %381 = vst [vmem:[#allocation3 + $0x10] sm:$0x1] %v380_v40  ;;  %v386_v34 = vsel %vm14888_vm9, 0, %v385_v39  ;;  %v398_v39 = vsel %vm14888_vm9, 0, %v397_v10  ;;  %v434_v40 = vsel %vm14908_vm12, 0, %v433_v23 }
 0x299   : > { %v14879_v4 = vpop.f32.mrf.mxu0  ;;  %387 = vst [vmem:[#allocation3 + $0x30] sm:$0x1] %v386_v34  ;;  %v440_v34 = vsel %vm14908_vm12, 0, %v439_v42  ;;  %399 = vst [vmem:[#allocation3 + $0x70] sm:$0x1] %v398_v39  ;;  %v446_v23 = vsel %vm14908_vm12, 0, %v445_v60 }
 0x29a   : > { %16943 = vst [vmem:[#allocation112_spill] sm:$0xff] %v14879_v4  ;;  %v383_v4 = vsel %vm14888_vm9, 0, %v382_v8  ;;  %v395_v8 = vsel %vm14888_vm9, 0, %v394_v20  ;;  %435 = vst [vmem:[#allocation3 + $0x8] sm:$0x2] %v434_v40  ;;  %v3689_v20 = vadd.f32 %v14425_v57, %v14617_v12  ;;  %v401_v60 = vsel %vm14888_vm9, 0, %v400_v55 }
 0x29b   : > { %v14884_v24 = vpop.f32.mrf.mxu0  ;;  %384 = vst [vmem:[#allocation3 + $0x20] sm:$0x1] %v383_v4  ;;  %v437_v4 = vsel %vm14908_vm12, 0, %v436_v9  ;;  %396 = vst [vmem:[#allocation3 + $0x60] sm:$0x1] %v395_v8  ;;  %v449_v9 = vsel %vm14908_vm12, 0, %v448_v37  ;;  %v3700_v57 = vadd.f32 %v14427_v1, %v14646_v51 }
 0x29c   : > { %v14882_v43 = vpop.f32.mrf.mxu1  ;;  %16944 = vst [vmem:[#allocation113_spill] sm:$0xff] %v14884_v24  ;;  %v3697_v24 = vadd.f32 %v14422_v38, %v14637_v5  ;;  %v389_v38 = vsel %vm14888_vm9, 0, %v388_v22  ;;  %v392_v5 = vsel %vm14888_vm9, 0, %v391_v32  ;;  %v443_v22 = vsel %vm14908_vm12, 0, %v442_v35  ;;  %438 = vst [vmem:[#allocation3 + $0x18] sm:$0x2] %v437_v4 }
 0x29d   : > { %v14904_v2 = vpop.f32.mrf.mxu0  ;;  %390 = vst [vmem:[#allocation3 + $0x40] sm:$0x1] %v389_v38  ;;  %393 = vst [vmem:[#allocation3 + $0x50] sm:$0x1] %v392_v5  ;;  %v455_v35 = vsel %vm14908_vm12, 0, %v454_v0  ;;  %v4010_v12 = vadd.f32 %v14749_v7, %v3689_v20  ;;  %v4021_v8 = vadd.f32 %v14794_v59, %v3700_v57  ;;  %v3713_v59 = vadd.f32 %v14444_v29, %v14688_v52  ;;  %v16962_v57 = vld [vmem:[#allocation42_spill] sm:$0xff] }
 0x29e   : > { %v5772_v49 = vpop.f32.mrf.mxu1  ;;  %441 = vst [vmem:[#allocation3 + $0x28] sm:$0x2] %v440_v34  ;;  %444 = vst [vmem:[#allocation3 + $0x38] sm:$0x2] %v443_v22  ;;  %v457_v10 = vld [vmem:[#allocation3 + $0x88] sm:$0x2]  ;;  %v4018_v38 = vadd.f32 %v14786_v36, %v3697_v24  ;;  %v3577_v29 = vadd.f32 %v14291_v53, %v14337_v26  ;;  %v3585_v52 = vadd.f32 %v14288_v3, %v14357_v47 }
 0x29f   : > { %v451_v49 = vld [vmem:[#allocation3 + $0x68] sm:$0x2]  ;;  %447 = vst [vmem:[#allocation3 + $0x48] sm:$0x2] %v446_v23  ;;  %450 = vst [vmem:[#allocation3 + $0x58] sm:$0x2] %v449_v9  ;;  %v3705_v23 = vadd.f32 %v14447_v25, %v14660_v13  ;;  %v4034_v9 = vadd.f32 %v14843_v63, %v3713_v59  ;;  %v3596_v53 = vadd.f32 %v14311_v41, %v14391_v16 }
 0x2a0   : > { %v14902_v56 = vpop.f32.mrf.mxu1  ;;  %v452_v42 = vsel %vm14908_vm12, 0, %v451_v49  ;;  %456 = vst [vmem:[#allocation3 + $0x78] sm:$0x2] %v455_v35  ;;  %v458_v37 = vsel %vm14908_vm12, 0, %v457_v10  ;;  %v403_v49 = vld [vmem:[#allocation3 + $0x90] sm:$0x1]  ;;  %v3716_v35 = vadd.f32 %v14455_v19, %v14696_v33  ;;  %v3580_v19 = vadd.f32 %v14296_v48, %v14344_v6 }
 0x2a1   : > { %453 = vst [vmem:[#allocation3 + $0x68] sm:$0x2] %v452_v42  ;;  %402 = vst [vmem:[#allocation3 + $0x80] sm:$0x1] %v401_v60  ;;  %v404_v0 = vsel %vm14888_vm9, 0, %v403_v49  ;;  %v4026_v10 = vadd.f32 %v14807_v31, %v3705_v23  ;;  %v3588_v33 = vadd.f32 %v14293_v27, %v14365_v46  ;;  %v3593_v31 = vadd.f32 %v14304_v44, %v14380_v30  ;;  %v16954_v3 = vld [vmem:[#allocation17_spill] sm:$0xff] }
 0x2a2   : > { %v5775_v32 = vpop.f32.mrf.mxu1  ;;  %459 = vst [vmem:[#allocation3 + $0x88] sm:$0x2] %v458_v37  ;;  %405 = vst [vmem:[#allocation3 + $0x90] sm:$0x1] %v404_v0  ;;  %v460_v4 = vld [vmem:[#allocation3 + $0x98] sm:$0x2]  ;;  %v4037_v25 = vadd.f32 %v14853_v45, %v3716_v35  ;;  %v3601_v26 = vadd.f32 %v14300_v50, %v14404_v61  ;;  %v3604_v45 = vadd.f32 %v14308_v21, %v14416_v62 }
 0x2a3   : > { %v12751_v5 = vpop.f32.mrf.mxu0  ;;  %v461_v22 = vsel %vm14908_vm12, 0, %v460_v4  ;;  %v3609_v27 = vadd.f32 %v16954_v3, %v14429_v17  ;;  %v16955_v47 = vld [vmem:[#allocation37_spill] sm:$0xff]  ;;  %v16956_v46 = vld [vmem:[#allocation19_spill] sm:$0xff]  ;;  %v16957_v30 = vld [vmem:[#allocation38_spill] sm:$0xff]  ;;  %v15008_v21 = vadd.f32 %v16962_v57, %v3580_v19 }
 0x2a4   : > { %v14948_v36 = vadd.f32 %v12751_v5, %v4018_v38  ;;  %462 = vst [vmem:[#allocation3 + $0x98] sm:$0x2] %v461_v22  ;;  %v406_v38 = vld [vmem:[#allocation3 + $0xa0] sm:$0x1]  ;;  %v3612_v44 = vadd.f32 %v16956_v46, %v16955_v47  ;;  %v16959_v41 = vld [vmem:[#allocation41_spill] sm:$0xff]  ;;  %v16960_v0 = vld [vmem:[#allocation39_spill] sm:$0xff] }
 0x2a5   : > { %v4186_v24 = vpop.f32.mrf.mxu0  ;;  %v407_v37 = vsel %vm14888_vm9, 0, %v406_v38  ;;  %v16958_v49 = vld [vmem:[#allocation16_spill] sm:$0xff]  ;;  %v3898_v16 = vadd.f32 %v16959_v41, %v3577_v29  ;;  %v16961_v50 = vld [vmem:[#allocation18_spill] sm:$0xff]  ;;  %v16963_v62 = vld [vmem:[#allocation43_spill] sm:$0xff] }
 0x2a6   : > { %16949 = vst [vmem:[#allocation114_spill] sm:$0xff] %v14948_v36  ;;  %v14951_v39 = vadd.f32 %v4186_v24, %v4010_v12  ;;  %408 = vst [vmem:[#allocation3 + $0xa0] sm:$0x1] %v407_v37  ;;  %v3617_v5 = vadd.f32 %v16958_v49, %v16957_v30  ;;  %v3620_v61 = vadd.f32 %v16961_v50, %v16960_v0  ;;  %v16964_v12 = vld [vmem:[#allocation21_spill] sm:$0xff]  ;;  %v16966_v22 = vld [vmem:[#allocation44_spill] sm:$0xff] }
 0x2a7   : > { %v12752_v55 = vpop.f32.mrf.mxu0  ;;  %v3625_v24 = vadd.f32 %v16964_v12, %v16963_v62  ;;  %v463_v4 = vld [vmem:[#allocation3 + $0xa8] sm:$0x2]  ;;  %v16972_v37 = vld [vmem:[#allocation48_spill] sm:$0xff]  ;;  %v16973_v29 = vld [vmem:[#allocation22_spill] sm:$0xff] }
 0x2a8   : > { %v14953_v40 = vadd.f32 %v12752_v55, %v4021_v8  ;;  %v16965_v8 = vld [vmem:[#allocation45_spill] sm:$0xff]  ;;  %v16974_v19 = vld [vmem:[#allocation50_spill] sm:$0xff]  ;;  %v16978_v49 = vld [vmem:[#allocation52_spill] sm:$0xff] }
 0x2a9   : > { %v14961_v7 = vpop.f32.mrf.mxu0  ;;  %v3906_v55 = vadd.f32 %v16965_v8, %v3585_v52  ;;  %v16971_v38 = vld [vmem:[#allocation49_spill] sm:$0xff]  ;;  %v15026_v52 = vadd.f32 %v16974_v19, %v3596_v53  ;;  %v16979_v41 = vld [vmem:[#allocation27_spill] sm:$0xff]  ;;  %v16982_v62 = vld [vmem:[#allocation24_spill] sm:$0xff] }
 0x2aa   : > { %16950 = vst [vmem:[#allocation115_spill] sm:$0xff] %v14953_v40  ;;  %v14955_v34 = vpop.f32.mrf.mxu1  ;;  %v16976_v3 = vld [vmem:[#allocation25_spill] sm:$0xff]  ;;  %v3644_v0 = vadd.f32 %v16979_v41, %v16978_v49  ;;  %v16981_v57 = vld [vmem:[#allocation55_spill] sm:$0xff]  ;;  %v409_v53 = vld [vmem:[#allocation3 + $0xb0] sm:$0x1] }
 0x2ab   : > { %v3649_v12 = vadd.f32 %v16982_v62, %v16981_v57  ;;  %v16983_v8 = vld [vmem:[#allocation57_spill] sm:$0xff]  ;;  %v16994_v41 = vld [vmem:[#allocation28_spill] sm:$0xff]  ;;  %v17023_v40 = vld [vmem:[#allocation83_spill] sm:$0xff] }
 0x2ac   : > { %v5780_v1 = vpop.f32.mrf.mxu1  ;;  %v16995_v57 = vld [vmem:[#allocation65_spill] sm:$0xff] }
 0x2ad   : > { %v16967_v1 = vld [vmem:[#allocation23_spill] sm:$0xff]  ;;  %v15067_v62 = vadd.f32 %v16995_v57, %v3625_v24  ;;  %v17007_v57 = vld [vmem:[#allocation73_spill] sm:$0xff] }
 0x2ae   : > { %v14959_v51 = vpop.f32.mrf.mxu1  ;;  %v3628_v59 = vadd.f32 %v16967_v1, %v16966_v22  ;;  %v16985_v22 = vld [vmem:[#allocation26_spill] sm:$0xff]  ;;  %v17005_v24 = vld [vmem:[#allocation71_spill] sm:$0xff] }
 0x2b0   : > { %v5783_v32 = vpop.f32.mrf.mxu1 }
 0x2b1   : > { %v16968_v32 = vld [vmem:[#allocation46_spill] sm:$0xff] }
 0x2b2   : > { %v12755_v42 = vpop.f32.mrf.mxu0  ;;  %v3909_v23 = vadd.f32 %v16968_v32, %v3588_v33  ;;  %v16977_v33 = vld [vmem:[#allocation53_spill] sm:$0xff]  ;;  %v16986_v32 = vld [vmem:[#allocation59_spill] sm:$0xff] }
 0x2b3   : > { %v14971_v20 = vadd.f32 %v12755_v42, %v4034_v9  ;;  %v16969_v9 = vld [vmem:[#allocation47_spill] sm:$0xff]  ;;  %v16970_v42 = vld [vmem:[#allocation20_spill] sm:$0xff]  ;;  %v15033_v30 = vadd.f32 %v16977_v33, %v3601_v26  ;;  %v16992_v33 = vld [vmem:[#allocation62_spill] sm:$0xff] }
 0x2b4   : > { %v4202_v60 = vpop.f32.mrf.mxu0  ;;  %v3633_v35 = vadd.f32 %v16970_v42, %v16969_v9  ;;  %v15048_v9 = vadd.f32 %v16986_v32, %v3612_v44  ;;  %v15062_v49 = vadd.f32 %v16992_v33, %v3620_v61  ;;  %v16993_v44 = vld [vmem:[#allocation63_spill] sm:$0xff]  ;;  %v17002_v61 = vld [vmem:[#allocation68_spill] sm:$0xff] }
 0x2b5   : > { %16951 = vst [vmem:[#allocation116_spill] sm:$0xff] %v14971_v20  ;;  %v14978_v13 = vadd.f32 %v4202_v60, %v4026_v10  ;;  %v464_v10 = vsel %vm14908_vm12, 0, %v463_v4  ;;  %v15021_v60 = vadd.f32 %v16971_v38, %v3593_v31  ;;  %v16980_v31 = vld [vmem:[#allocation54_spill] sm:$0xff]  ;;  %v16984_v4 = vld [vmem:[#allocation56_spill] sm:$0xff]  ;;  %v16988_v38 = vld [vmem:[#allocation29_spill] sm:$0xff] }
 0x2b6   : > { %v12756_v63 = vpop.f32.mrf.mxu0  ;;  %465 = vst [vmem:[#allocation3 + $0xa8] sm:$0x2] %v464_v10  ;;  %v15038_v50 = vadd.f32 %v16980_v31, %v3604_v45  ;;  %v3652_v1 = vadd.f32 %v16985_v22, %v16984_v4  ;;  %v410_v45 = vsel %vm14888_vm9, 0, %v409_v53  ;;  %v16987_v10 = vld [vmem:[#allocation58_spill] sm:$0xff]  ;;  %v3665_v31 = vadd.f32 %v16994_v41, %v16993_v44  ;;  %v16996_v53 = vld [vmem:[#allocation64_spill] sm:$0xff]  ;;  %v16998_v22 = vld [vmem:[#allocation67_spill] sm:$0xff] }
 0x2b7   : > { %16952 = vst [vmem:[#allocation117_spill] sm:$0xff] %v14978_v13  ;;  %v14994_v48 = vpop.f32.mrf.mxu1  ;;  %v14996_v6 = vadd.f32 %v12756_v63, %v4037_v25  ;;  %v3636_v25 = vadd.f32 %v16973_v29, %v16972_v37  ;;  %v16975_v63 = vld [vmem:[#allocation51_spill] sm:$0xff]  ;;  %v3657_v37 = vadd.f32 %v16988_v38, %v16987_v10  ;;  %v16989_v29 = vld [vmem:[#allocation61_spill] sm:$0xff]  ;;  %411 = vst [vmem:[#allocation3 + $0xb0] sm:$0x1] %v410_v45 }
 0x2b8   : > { %v3641_v47 = vadd.f32 %v16976_v3, %v16975_v63  ;;  %v15050_v26 = vpop.f32.mrf.mxu0  ;;  %v15057_v19 = vadd.f32 %v16989_v29, %v3617_v5  ;;  %v16991_v63 = vld [vmem:[#allocation31_spill] sm:$0xff]  ;;  %v15072_v32 = vadd.f32 %v16998_v22, %v3628_v59  ;;  %v16999_v5 = vld [vmem:[#allocation66_spill] sm:$0xff]  ;;  %v17001_v38 = vld [vmem:[#allocation69_spill] sm:$0xff] }
 0x2b9   : > { %16953 = vst [vmem:[#allocation118_spill] sm:$0xff] %v14996_v6  ;;  %v5788_v17 = vpop.f32.mrf.mxu1  ;;  %v15077_v29 = vadd.f32 %v17001_v38, %v3633_v35  ;;  %v17003_v45 = vld [vmem:[#allocation35_spill] sm:$0xff]  ;;  %v17006_v44 = vld [vmem:[#allocation32_spill] sm:$0xff]  ;;  %v17010_v6 = vld [vmem:[#allocation74_spill] sm:$0xff] }
 0x2ba   : > { %v15043_v17 = vadd.f32 %v16983_v8, %v3609_v27  ;;  %v16990_v27 = vld [vmem:[#allocation60_spill] sm:$0xff]  ;;  %v16997_v8 = vld [vmem:[#allocation30_spill] sm:$0xff]  ;;  %v3681_v41 = vadd.f32 %v17006_v44, %v17005_v24  ;;  %v466_v44 = vld [vmem:[#allocation3 + $0xb8] sm:$0x2] }
 0x2bb   : > { %v15030_v46 = vpop.f32.mrf.mxu1  ;;  %v3660_v3 = vadd.f32 %v16991_v63, %v16990_v27  ;;  %v3668_v4 = vadd.f32 %v16997_v8, %v16996_v53  ;;  %v3676_v27 = vadd.f32 %v17003_v45, %v17002_v61  ;;  %v17004_v63 = vld [vmem:[#allocation70_spill] sm:$0xff]  ;;  %v15087_v53 = vadd.f32 %v17007_v57, %v3641_v47  ;;  %v17008_v59 = vld [vmem:[#allocation72_spill] sm:$0xff]  ;;  %v17012_v61 = vld [vmem:[#allocation75_spill] sm:$0xff] }
 0x2bc   : > { %v15082_v33 = vadd.f32 %v17004_v63, %v3636_v25  ;;  %v17009_v8 = vld [vmem:[#allocation34_spill] sm:$0xff]  ;;  %v17013_v45 = vld [vmem:[#allocation36_spill] sm:$0xff]  ;;  %v17014_v63 = vld [vmem:[#allocation85_spill] sm:$0xff] }
 0x2bd   : > { %v5791_v42 = vpop.f32.mrf.mxu1  ;;  %v3684_v22 = vadd.f32 %v17009_v8, %v17008_v59  ;;  %v3692_v25 = vadd.f32 %v17013_v45, %v17012_v61  ;;  %v4083_v20 = vadd.f32 %v17014_v63, %v3906_v55  ;;  %v17015_v47 = vld [vmem:[#allocation77_spill] sm:$0xff]  ;;  %v17016_v13 = vld [vmem:[#allocation78_spill] sm:$0xff]  ;;  %v467_v55 = vsel %vm14908_vm12, 0, %v466_v44  ;;  %v17021_v45 = vld [vmem:[#allocation40_spill] sm:$0xff] }
 0x2be   : > { %v17000_v42 = vld [vmem:[#allocation33_spill] sm:$0xff]  ;;  %v15102_v57 = vadd.f32 %v17015_v47, %v3652_v1  ;;  %v15105_v59 = vadd.f32 %v17016_v13, %v3657_v37  ;;  %v17019_v1 = vld [vmem:[#allocation86_spill] sm:$0xff]  ;;  %468 = vst [vmem:[#allocation3 + $0xb8] sm:$0x2] %v467_v55  ;;  %v17024_v44 = vld [vmem:[#allocation84_spill] sm:$0xff] }
 0x2bf   : > { %v3673_v10 = vadd.f32 %v17000_v42, %v16999_v5  ;;  %v15092_v5 = vadd.f32 %v17010_v6, %v3644_v0  ;;  %v17011_v42 = vld [vmem:[#allocation76_spill] sm:$0xff]  ;;  %v17017_v6 = vld [vmem:[#allocation79_spill] sm:$0xff]  ;;  %v17022_v47 = vld [vmem:[#allocation82_spill] sm:$0xff] }
 0x2c0   : > { %v12775_v35 = vpop.f32.mrf.mxu0  ;;  %v15095_v38 = vadd.f32 %v17011_v42, %v3649_v12  ;;  %v15108_v0 = vadd.f32 %v17017_v6, %v3660_v3  ;;  %v15113_v12 = vld [vmem:[%s16832_s3] ss:$0 sm:$0xff]  ;;  %v4075_v42 = vadd.f32 %v17019_v1, %v3898_v16  ;;  %v15127_v6 = vadd.f32 %v17022_v47, %v3668_v4  ;;  %v17027_v4 = vld [vmem:[#allocation89_spill] sm:$0xff] }
 0x2c1   : > { %v5948_v24 = vadd.f32 %v12775_v35, %v14882_v43  ;;  %v17018_v43 = vld [vmem:[#allocation81_spill] sm:$0xff]  ;;  %v17020_v3 = vld [vmem:[#allocation80_spill] sm:$0xff]  ;;  %v15130_v36 = vadd.f32 %v17023_v40, %v3673_v10  ;;  %v15142_v47 = vadd.f32 %v17027_v4, %v3684_v22  ;;  %v17028_v40 = vld [vmem:[#allocation90_spill] sm:$0xff] }
 0x2c2   : > { %v5939_v8 = vpop.f32.mrf.mxu0  ;;  %v15118_v35 = vadd.f32 %v17018_v43, %v3665_v31  ;;  %v15121_v13 = vpop.f32.mrf.mxu1  ;;  %v3708_v63 = vadd.f32 %v17021_v45, %v17020_v3  ;;  %v15133_v31 = vadd.f32 %v17024_v44, %v3676_v27  ;;  %v17025_v16 = vld [vmem:[#allocation88_spill] sm:$0xff]  ;;  %v17026_v3 = vld [vmem:[#allocation87_spill] sm:$0xff]  ;;  %v4078_v10 = vadd.f32 %v17028_v40, %v15008_v21  ;;  %v17031_v21 = vld [vmem:[#allocation93_spill] sm:$0xff] }
 0x2c3   : > { %v6084_v61 = vadd.f32 %v5948_v24, %v4083_v20  ;;  %v5940_v37 = vadd.f32 %v5939_v8, %v14866_v14  ;;  %v4086_v20 = vadd.f32 %v17025_v16, %v3909_v23  ;;  %v412_v55 = vld [vmem:[#allocation3 + $0xc0] sm:$0x1]  ;;  %v15139_v45 = vadd.f32 %v17026_v3, %v3681_v41  ;;  %v17029_v41 = vld [vmem:[#allocation91_spill] sm:$0xff] }
 0x2c4   : > { %v12776_v43 = vpop.f32.mrf.mxu0  ;;  %v5796_v14 = vpop.f32.mrf.mxu1  ;;  %v413_v23 = vsel %vm14888_vm9, 0, %v412_v55  ;;  %v4099_v22 = vadd.f32 %v17029_v41, %v15033_v30  ;;  %v17032_v55 = vld [vmem:[#allocation94_spill] sm:$0xff]  ;;  %v17033_v4 = vld [vmem:[#allocation95_spill] sm:$0xff]  ;;  %v17034_v30 = vld [vmem:[#allocation96_spill] sm:$0xff] }
 0x2c5   : > { %v6125_v24 = vadd.f32 %v15113_v12, %v6084_v61  ;;  %v6082_v1 = vadd.f32 %v5940_v37, %v4075_v42  ;;  %v5951_v8 = vadd.f32 %v12776_v43, %v14902_v56  ;;  %414 = vst [vmem:[#allocation3 + $0xc0] sm:$0x1] %v413_v23  ;;  %v17030_v43 = vld [vmem:[#allocation92_spill] sm:$0xff]  ;;  %v15158_v14 = vadd.f32 %v17031_v21, %v15038_v50  ;;  %v17035_v50 = vld [vmem:[#allocation97_spill] sm:$0xff] }
 0x2c6   : > { %v5942_v27 = vpop.f32.mrf.mxu0  ;;  %v15149_v37 = vpop.f32.mrf.mxu1  ;;  %v4091_v16 = vadd.f32 %v17030_v43, %v15021_v60  ;;  %v15166_v40 = vadd.f32 %v17033_v4, %v15026_v52  ;;  %v15170_v60 = vadd.f32 %v17034_v30, %v15057_v19  ;;  %v17037_v52 = vld [vmem:[#allocation99_spill] sm:$0xff]  ;;  %v17038_v19 = vld [vmem:[#allocation100_spill] sm:$0xff] }
 0x2c7   : > { %v6161_v44 = vmax.f32 %v6125_v24, 0.0  ;;  %v6123_v42 = vadd.f32 %v15113_v12, %v6082_v1  ;;  %v6085_v61 = vadd.f32 %v5951_v8, %v4086_v20  ;;  %v5943_v56 = vadd.f32 %v5942_v27, %v14870_v18  ;;  %v17042_v4 = vld [vmem:[#allocation104_spill] sm:$0xff] }
 0x2c8   : > { %v15161_v24 = vadd.f32 %v17032_v55, %v3692_v25  ;;  %v5799_v18 = vpop.f32.mrf.mxu1  ;;  %v15174_v27 = vadd.f32 %v17035_v50, %v15043_v17  ;;  %v15183_v41 = vadd.f32 %v17037_v52, %v15048_v9  ;;  %v15187_v43 = vadd.f32 %v17038_v19, %v15077_v29  ;;  %v17039_v55 = vld [vmem:[#allocation101_spill] sm:$0xff]  ;;  %v17040_v9 = vld [vmem:[#allocation102_spill] sm:$0xff] }
 0x2c9   : > { %v11925_v1 = vpack.c.bf16 %v6161_v44, %v6161_v44  ;;  %v6159_v20 = vmax.f32 %v6123_v42, 0.0  ;;  %v6126_v8 = vadd.f32 %v15113_v12, %v6085_v61  ;;  %v6083_v3 = vadd.f32 %v5943_v56, %v4078_v10  ;;  %v469_v10 = vld [vmem:[#allocation3 + $0xc8] sm:$0x2]  ;;  %v17036_v61 = vld [vmem:[#allocation98_spill] sm:$0xff]  ;;  %v17041_v18 = vld [vmem:[#allocation103_spill] sm:$0xff] }
 0x2ca   : > { %v15179_v56 = vadd.f32 %v17036_v61, %v15062_v49  ;;  %v470_v21 = vsel %vm14908_vm12, 0, %v469_v10  ;;  %v15200_v29 = vadd.f32 %v17041_v18, %v3708_v63  ;;  %v15204_v30 = vadd.f32 %v17042_v4, %v15072_v32  ;;  %v415_v10 = vld [vmem:[#allocation3 + $0xd0] sm:$0x1] }
 0x2cb   : > { %v6311_v25 = vrot.slane %v11925_v1, 7  ;;  %v11923_v23 = vpack.c.bf16 %v6159_v20, %v6159_v20  ;;  %v6162_v44 = vmax.f32 %v6126_v8, 0.0  ;;  %v6124_v42 = vadd.f32 %v15113_v12, %v6083_v3  ;;  %v12779_v17 = vpop.f32.mrf.mxu0  ;;  %471 = vst [vmem:[#allocation3 + $0xc8] sm:$0x2] %v470_v21 }
 0x2cc   : > { %v15193_v1 = vadd.f32 %v17039_v55, %v15067_v62  ;;  %v15197_v3 = vadd.f32 %v17040_v9, %v15082_v33  ;;  %v5964_v50 = vadd.f32 %v12779_v17, %v14994_v48  ;;  %v416_v21 = vsel %vm14888_vm9, 0, %v415_v10 }
 0x2cd   : > { %6453 = vst [vmem:[#allocation3 + $0x10] sm:$0xe] %v6311_v25  ;;  %v6306_v20 = vrot.slane %v11923_v23, 7  ;;  %v11926_v49 = vpack.c.bf16 %v6162_v44, %v6162_v44  ;;  %v6160_v8 = vmax.f32 %v6124_v42, 0.0  ;;  %v5955_v23 = vpop.f32.mrf.mxu0  ;;  %v6312_v44 = vrot.slane %v6311_v25, 4 }
 0x2ce   : > { %v5956_v63 = vadd.f32 %v5955_v23, %v14955_v34  ;;  %v6088_v32 = vadd.f32 %v5964_v50, %v4099_v22  ;;  %417 = vst [vmem:[#allocation3 + $0xd0] sm:$0x1] %v416_v21 }
 0x2cf   : > { %6450 = vst [vmem:[#allocation3] sm:$0xe] %v6306_v20  ;;  %v6313_v33 = vrot.slane %v11926_v49, 7  ;;  %v11924_v42 = vpack.c.bf16 %v6160_v8, %v6160_v8  ;;  %v6307_v61 = vrot.slane %v6306_v20, 4  ;;  %v12780_v19 = vpop.f32.mrf.mxu0  ;;  %v17045_v49 = vld [vmem:[#allocation105_spill] sm:$0xff]  ;;  %v17046_v20 = vld [vmem:[#allocation106_spill] sm:$0xff] }
 0x2d0   : > { %v15214_v52 = vpop.f32.mrf.mxu1  ;;  %v6086_v55 = vadd.f32 %v5956_v63, %v4091_v16  ;;  %v15222_v34 = vadd.f32 %v17045_v49, %v15095_v38  ;;  %v15226_v22 = vadd.f32 %v17046_v20, %v15087_v53  ;;  %v6129_v8 = vadd.f32 %v15113_v12, %v6088_v32  ;;  %v472_v32 = vld [vmem:[#allocation3 + $0xd8] sm:$0x2]  ;;  %v418_v20 = vld [vmem:[#allocation3 + $0xe0] sm:$0x1] }
 0x2d1   : > { %v6314_v48 = vsel %vm15208_vm14, %v6312_v44, %v6313_v33  ;;  %v6315_v17 = vrot.slane %v6313_v33, 4  ;;  %v6308_v25 = vrot.slane %v11924_v42, 7  ;;  %v5967_v18 = vadd.f32 %v12780_v19, %v15030_v46  ;;  %v5958_v4 = vpop.f32.mrf.mxu0  ;;  %v17047_v44 = vld [vmem:[#allocation107_spill] sm:$0xff]  ;;  %v17051_v19 = vld [vmem:[#allocation108_spill] sm:$0xff] }
 0x2d2   : > { %6454 = vst [vmem:[#allocation3 + $0x14] sm:$0xf] %v6314_v48  ;;  %v5804_v9 = vpop.f32.mrf.mxu1  ;;  %v6127_v23 = vadd.f32 %v15113_v12, %v6086_v55  ;;  %v5959_v38 = vadd.f32 %v5958_v4, %v14959_v51  ;;  %v15236_v53 = vadd.f32 %v17047_v44, %v15102_v57  ;;  %v15240_v33 = vadd.f32 %v14849_v58, %v15092_v5 }
 0x2d3   : > { %6455 = vst [vmem:[#allocation3 + $0x18] sm:$0x1] %v6315_v17  ;;  %v6309_v16 = vsel %vm15208_vm14, %v6307_v61, %v6308_v25  ;;  %v6310_v50 = vrot.slane %v6308_v25, 4  ;;  %v6165_v42 = vmax.f32 %v6129_v8, 0.0  ;;  %v6089_v63 = vadd.f32 %v5967_v18, %v15158_v14  ;;  %v17052_v25 = vld [vmem:[#allocation109_spill] sm:$0xff]  ;;  %v17053_v8 = vld [vmem:[#allocation111_spill] sm:$0xff] }
 0x2d4   : > { %6451 = vst [vmem:[#allocation3 + $0x4] sm:$0xf] %v6309_v16  ;;  %v15249_v10 = vpop.f32.mrf.mxu1  ;;  %v15253_v51 = vadd.f32 %v14856_v11, %v15118_v35  ;;  %v15257_v58 = vadd.f32 %v14861_v28, %v15105_v59  ;;  %v17050_v5 = vmov 0   ;;  %v6163_v57 = vmax.f32 %v6127_v23, 0.0  ;;  %v17054_v23 = vld [vmem:[#allocation112_spill] sm:$0xff] }
 0x2d5   : > { %6452 = vst [vmem:[#allocation3 + $0x8] sm:$0x1] %v6310_v50  ;;  %6514 = vst [vmem:[#allocation3 + $0x4] sm:$0xf] %v17050_v5  ;;  %v6087_v61 = vadd.f32 %v5959_v38, %v15166_v40  ;;  %v15263_v14 = vadd.f32 %v17051_v19, %v15127_v6  ;;  %v11929_v48 = vpack.c.bf16 %v6165_v42, %v6165_v42  ;;  %v473_v28 = vsel %vm14908_vm12, 0, %v472_v32 }
 0x2d6   : > { %v6511_v21 = vld [vmem:[#allocation3] sm:$0xf]  ;;  %v6130_v11 = vadd.f32 %v15113_v12, %v6089_v63  ;;  %v5807_v35 = vpop.f32.mrf.mxu1  ;;  %v11927_v17 = vpack.c.bf16 %v6163_v57, %v6163_v57  ;;  %474 = vst [vmem:[#allocation3 + $0xd8] sm:$0x2] %v473_v28  ;;  %v15273_v6 = vadd.f32 %v17052_v25, %v15108_v0  ;;  %v15277_v9 = vadd.f32 %v17053_v8, %v15139_v45  ;;  %v17055_v0 = vld [vmem:[#allocation113_spill] sm:$0xff] }
 0x2d7   : > { %v6512_v59 = vsel %vm15244_vm0, 0, %v6511_v21  ;;  %v6128_v40 = vadd.f32 %v15113_v12, %v6087_v61  ;;  %v6321_v55 = vrot.slane %v11929_v48, 7  ;;  %v419_v50 = vsel %vm14888_vm9, 0, %v418_v20 }
 0x2d8   : > { %6513 = vst [vmem:[#allocation3] sm:$0xf] %v6512_v59  ;;  %v6166_v49 = vmax.f32 %v6130_v11, 0.0  ;;  %v6316_v18 = vrot.slane %v11927_v17, 7  ;;  %v15283_v38 = vadd.f32 %v17054_v23, %v15130_v36  ;;  %v15287_v44 = vadd.f32 %v17055_v0, %v15142_v47  ;;  %v12783_v57 = vpop.f32.mrf.mxu0  ;;  %420 = vst [vmem:[#allocation3 + $0xe0] sm:$0x1] %v419_v50 }
 0x2d9   : > { %v6164_v4 = vmax.f32 %v6128_v40, 0.0  ;;  %v13348_v16 = vld [vmem:[#allocation3 + $0x10] sm:$0xff]   ;;  %v6322_v45 = vrot.slane %v6321_v55, 4  ;;  %6459 = vst [vmem:[#allocation3 + $0x30] sm:$0xe] %v6321_v55  ;;  %v5980_v19 = vadd.f32 %v12783_v57, %v15214_v52 }
 0x2da   : > { %v11930_v63 = vpack.c.bf16 %v6166_v49, %v6166_v49  ;;  %v13349_v61 = vld [vmem:[#allocation3 + $0x18] ss:$0 sps:$4 sm:$0x33]   ;;  %v6317_v32 = vrot.slane %v6316_v18, 4  ;;  %6456 = vst [vmem:[#allocation3 + $0x20] sm:$0xe] %v6316_v18  ;;  %v5971_v11 = vpop.f32.mrf.mxu0 }
 0x2db   : > { %v11928_v36 = vpack.c.bf16 %v6164_v4, %v6164_v4  ;;  %v7871_v47 = vrot.slane %v13348_v16, 1  ;;  %v7872_v35 = vrot.slane %v13349_v61, 1  ;;  %v7648_v28 = vshrl.u32 %v13348_v16, 16 }
 0x2dc   : > { %v6518_v21 = vld [vmem:[#allocation3 + $0x8] sm:$0x3]  ;;  %v6323_v48 = vrot.slane %v11930_v63, 7  ;;  %v7650_v59 = vshll.u32 %v13348_v16, 16  ;;  %v6092_v25 = vadd.f32 %v5980_v19, %v15170_v60  ;;  %v5972_v55 = vadd.f32 %v5971_v11, %v15121_v13  ;;  %v12784_v8 = vpop.f32.mrf.mxu0 }
 0x2dd   : > { %v6519_v17 = vsel %vm15291_vm3, 0, %v6518_v21  ;;  %v6318_v40 = vrot.slane %v11928_v36, 7  ;;  %v15302_v20 = vpop.f32.mrf.mxu1  ;;  %v7873_v18 = vsel %vm6941_vm2, %v7871_v47, %v7872_v35  ;;  %v7939_v4 = vshll.u32 %v7872_v35, 16 }
 0x2de   : > { %6520 = vst [vmem:[#allocation3 + $0x8] sm:$0x3] %v6519_v17  ;;  %v6324_v52 = vsel %vm15208_vm14, %v6322_v45, %v6323_v48  ;;  %v6325_v49 = vrot.slane %v6323_v48, 4  ;;  %v6133_v60 = vadd.f32 %v15113_v12, %v6092_v25  ;;  %v6090_v13 = vadd.f32 %v5972_v55, %v15174_v27  ;;  %v5974_v45 = vpop.f32.mrf.mxu0 }
 0x2df   : > { %6460 = vst [vmem:[#allocation3 + $0x34] sm:$0xf] %v6324_v52  ;;  %v6319_v16 = vsel %vm15208_vm14, %v6317_v32, %v6318_v40  ;;  %v6320_v50 = vrot.slane %v6318_v40, 4  ;;  %v5812_v23 = vpop.f32.mrf.mxu1  ;;  %v5983_v0 = vadd.f32 %v12784_v8, %v15249_v10  ;;  %v7932_v63 = vshrl.u32 %v7873_v18, 16  ;;  %v427_v52 = vld [vmem:[#allocation3 + $0x110] sm:$0x1] }
 0x2e0   : > { %6461 = vst [vmem:[#allocation3 + $0x38] sm:$0x1] %v6325_v49  ;;  %6457 = vst [vmem:[#allocation3 + $0x24] sm:$0xf] %v6319_v16  ;;  %v7934_v57 = vshll.u32 %v7873_v18, 16  ;;  %v7941_v36 = vrot.slane %v7939_v4, 1  ;;  %v6131_v47 = vadd.f32 %v15113_v12, %v6090_v13  ;;  %v5975_v32 = vadd.f32 %v5974_v45, %v15149_v37 }
 0x2e1   : > { %6458 = vst [vmem:[#allocation3 + $0x28] sm:$0x1] %v6320_v50  ;;  %v6169_v19 = vmax.f32 %v6133_v60, 0.0  ;;  %v7652_v21 = vrot.slane %v7650_v59, 1  ;;  %v6093_v48 = vadd.f32 %v5983_v0, %v15179_v56  ;;  %v15313_v11 = vpop.f32.mrf.mxu1  ;;  %v7655_v35 = vshll.u32 %v13349_v61, 16 }
 0x2e2   : > { %v7936_v27 = vrot.slane %v7934_v57, 1  ;;  %v7659_v17 = vshrl.u32 %v13349_v61, 16  ;;  %v6167_v10 = vmax.f32 %v6131_v47, 0.0  ;;  %v6091_v25 = vadd.f32 %v5975_v32, %v15183_v41 }
 0x2e3   : > { %v11933_v40 = vpack.c.bf16 %v6169_v19, %v6169_v19  ;;  %v7653_v55 = vor.u32 %v7652_v21, %v7648_v28  ;;  %v6134_v49 = vadd.f32 %v15113_v12, %v6093_v48  ;;  %v5815_v8 = vpop.f32.mrf.mxu1  ;;  %v7657_v4 = vrot.slane %v7655_v35, 1 }
 0x2e4   : > { %v7937_v18 = vor.u32 %v7936_v27, %v7932_v63  ;;  %v7927_v37 = vshll.u32 %v7659_v17, 16  ;;  %v11931_v16 = vpack.c.bf16 %v6167_v10, %v6167_v10  ;;  %v6132_v56 = vadd.f32 %v15113_v12, %v6091_v25 }
 0x2e5   : > { %v6331_v59 = vrot.slane %v11933_v40, 7  ;;  %v428_v50 = vsel %vm14888_vm9, 0, %v427_v52  ;;  %v6170_v61 = vmax.f32 %v6134_v49, 0.0  ;;  %v7658_v41 = vsel %vm6716_vm4, %v7653_v55, %v7657_v4 }
 0x2e6   : > { %v7942_v60 = vsel %vm6716_vm4, %v7937_v18, %v7941_v36  ;;  %v7929_v28 = vrot.slane %v7927_v37, 1  ;;  %v15322_v13 = vld [vmem:[#allocation3 + $0x30] sm:$0xff]   ;;  %429 = vst [vmem:[#allocation3 + $0x110] sm:$0x1] %v428_v50  ;;  %v6326_v0 = vrot.slane %v11931_v16, 7  ;;  %v6168_v45 = vmax.f32 %v6132_v56, 0.0  ;;  %v12787_v47 = vpop.f32.mrf.mxu0 }
 0x2e7   : > { %v6332_v23 = vrot.slane %v6331_v59, 4  ;;  %6465 = vst [vmem:[#allocation3 + $0x50] sm:$0xe] %v6331_v59  ;;  %12825 = vmatprep.mubr.bf16.mxu1 %v7942_v60  ;;  %v7920_v63 = vshrl.u32 %v7658_v41, 16  ;;  %v15326_v57 = vadd.f32 %v14904_v2, %v15133_v31  ;;  %v15330_v19 = vadd.f32 %v14961_v7, %v15161_v24  ;;  %v15332_v21 = vld [vmem:[#allocation3 + $0x20] sm:$0xff]   ;;  %v13379_v18 = vld [vmem:[#allocation8 + $0x78] sm:$0xff]  }
 0x2e8   : > { %v11934_v36 = vpack.c.bf16 %v6170_v61, %v6170_v61  ;;  %v7922_v32 = vshll.u32 %v7658_v41, 16  ;;  %v6327_v48 = vrot.slane %v6326_v0, 4  ;;  %6462 = vst [vmem:[#allocation3 + $0x40] sm:$0xe] %v6326_v0  ;;  %v11932_v27 = vpack.c.bf16 %v6168_v45, %v6168_v45  ;;  %v5987_v31 = vpop.f32.mrf.mxu0  ;;  %12381 = vmatprep.subr.bf16.mxu1 %v13379_v18  ;;  %v17058_v18 = vld [vmem:[#allocation110_spill] sm:$0xff] }
 0x2e9   : > { %v15334_v35 = vld [vmem:[#allocation3 + $0x28] ss:$0 sps:$4 sm:$0x33]   ;;  %v7877_v17 = vrot.slane %v15322_v13, 1  ;;  %v7676_v40 = vshrl.u32 %v15322_v13, 16  ;;  %v15340_v2 = vadd.f32 %v15050_v26, %v15200_v29  ;;  %v7874_v10 = vrot.slane %v15332_v21, 1 }
 0x2ea   : > { %v6333_v7 = vrot.slane %v11934_v36, 7  ;;  %v7924_v24 = vrot.slane %v7922_v32, 1  ;;  %v15343_v25 = vld [vmem:[#allocation3 + $0x38] ss:$0 sps:$4 sm:$0x33]   ;;  %v6328_v55 = vrot.slane %v11932_v27, 7  ;;  %v5988_v52 = vadd.f32 %v5987_v31, %v15302_v20  ;;  %v5818_v29 = vpop.f32.mrf.mxu1  ;;  %v12788_v37 = vpop.f32.mrf.mxu0 }
 0x2eb   : > { %v7875_v49 = vrot.slane %v15334_v35, 1  ;;  %v7662_v8 = vshrl.u32 %v15332_v21, 16  ;;  %v7878_v16 = vrot.slane %v15343_v25, 1  ;;  %v5996_v20 = vadd.f32 %v12787_v47, %v5818_v29  ;;  %v13361_v32 = vld [vmem:[#allocation8 + $0xb0] sm:$0xff]  }
 0x2ec   : > { %v6334_v4 = vsel %vm15208_vm14, %v6332_v23, %v6333_v7  ;;  %v6335_v26 = vrot.slane %v6333_v7, 4  ;;  %v7925_v59 = vor.u32 %v7924_v24, %v7920_v63  ;;  %v6329_v56 = vsel %vm15208_vm14, %v6327_v48, %v6328_v55  ;;  %v5820_v60 = vpop.f32.mrf.mxu1  ;;  %v5990_v0 = vpop.f32.mrf.mxu0 }
 0x2ed   : > { %6466 = vst [vmem:[#allocation3 + $0x54] sm:$0xf] %v6334_v4  ;;  %v6330_v50 = vrot.slane %v6328_v55, 4  ;;  %v6094_v61 = vadd.f32 %v5988_v52, %v15193_v1  ;;  %6463 = vst [vmem:[#allocation3 + $0x44] sm:$0xf] %v6329_v56  ;;  %v7876_v45 = vsel %vm6941_vm2, %v7874_v10, %v7875_v49  ;;  %v7963_v63 = vshll.u32 %v7875_v49, 16 }
 0x2ee   : > { %6467 = vst [vmem:[#allocation3 + $0x58] sm:$0x1] %v6335_v26  ;;  %v7930_v23 = vsel %vm6716_vm4, %v7925_v59, %v7929_v28  ;;  %v7879_v36 = vsel %vm6941_vm2, %v7877_v17, %v7878_v16  ;;  %v6096_v48 = vadd.f32 %v5996_v20, %v15187_v43  ;;  %v5991_v1 = vadd.f32 %v5990_v0, %v15313_v11  ;;  %v5821_v7 = vpop.f32.mrf.mxu1  ;;  %v13382_v0 = vld [vmem:[#allocation8 + $0x38] sm:$0xff]  }
 0x2ef   : > { %6464 = vst [vmem:[#allocation3 + $0x48] sm:$0x1] %v6330_v50  ;;  %v6135_v47 = vadd.f32 %v15113_v12, %v6094_v61  ;;  %8576 = vmatprep.mubr.bf16.mxu0 %v7930_v23  ;;  %v7956_v27 = vshrl.u32 %v7876_v45, 16  ;;  %v7958_v31 = vshll.u32 %v7876_v45, 16  ;;  %v7965_v24 = vrot.slane %v7963_v63, 1 }
 0x2f0   : > { %8577 = vmatmul.mubr.bf16.vlgmr.msra.gmra.mxu0 %v7658_v41  ;;  %v7980_v28 = vshrl.u32 %v7879_v36, 16  ;;  %v7982_v55 = vshll.u32 %v7879_v36, 16  ;;  %v6137_v10 = vadd.f32 %v15113_v12, %v6096_v48  ;;  %v5999_v17 = vadd.f32 %v12788_v37, %v5821_v7  ;;  %v5823_v43 = vpop.f32.mrf.mxu1  ;;  %v13368_v41 = vld [vmem:[#allocation8 + $0xa8] sm:$0xff]   ;;  %v13383_v36 = vld [vmem:[#allocation8 + $0x70] sm:$0xff]   ;;  %v13373_v7 = vld [vmem:[#allocation8 + $0xa0] sm:$0xff]  }
 0x2f1   : > { %v6171_v52 = vmax.f32 %v6135_v47, 0.0  ;;  %v6095_v49 = vadd.f32 %v5991_v1, %v15204_v30  ;;  %12858 = vmatpush3.bf16.msra.mxu0 %v17058_v18  ;;  %v7960_v4 = vrot.slane %v7958_v31, 1  ;;  %v7987_v11 = vshll.u32 %v7878_v16, 16 }
 0x2f2   : > { %v7984_v26 = vrot.slane %v7982_v55, 1  ;;  %v7664_v29 = vshll.u32 %v15332_v21, 16  ;;  %12859 = vmatprep.subr.bf16.mxu0 %v13361_v32  ;;  %v6173_v59 = vmax.f32 %v6137_v10, 0.0  ;;  %v6097_v50 = vadd.f32 %v5999_v17, %v15197_v3 }
 0x2f3   : > { %v11935_v56 = vpack.c.bf16 %v6171_v52, %v6171_v52  ;;  %v6136_v20 = vadd.f32 %v15113_v12, %v6095_v49  ;;  %v7961_v61 = vor.u32 %v7960_v4, %v7956_v27  ;;  %v7989_v60 = vrot.slane %v7987_v11, 1  ;;  %v15367_v48 = vpop.f32.mrf.mxu0  ;;  %v13378_v11 = vld [vmem:[#allocation8 + $0x98] sm:$0xff]  }
 0x2f4   : > { %v7985_v37 = vor.u32 %v7984_v26, %v7980_v28  ;;  %v7666_v30 = vrot.slane %v7664_v29, 1  ;;  %v11937_v23 = vpack.c.bf16 %v6173_v59, %v6173_v59  ;;  %v6138_v63 = vadd.f32 %v15113_v12, %v6097_v50  ;;  %v15378_v26 = vld [vmem:[#allocation3 + $0x40] sm:$0xff]   ;;  %v13387_v29 = vld [vmem:[#allocation8 + $0x68] sm:$0xff]  }
 0x2f5   : > { %v6336_v45 = vrot.slane %v11935_v56, 7  ;;  %v6172_v16 = vmax.f32 %v6136_v20, 0.0  ;;  %12860 = vmatpush3.bf16.msra.mxu0 %v13361_v32  ;;  %v7966_v47 = vsel %vm6716_vm4, %v7961_v61, %v7965_v24  ;;  %v7669_v27 = vshll.u32 %v15334_v35, 16  ;;  %v6003_v32 = vpop.f32.mrf.mxu0 }
 0x2f6   : > { %v7990_v3 = vsel %vm6716_vm4, %v7985_v37, %v7989_v60  ;;  %v7667_v1 = vor.u32 %v7666_v30, %v7662_v8  ;;  %12861 = vmatprep.subr.bf16.mxu0 %v13368_v41  ;;  %v6341_v31 = vrot.slane %v11937_v23, 7  ;;  %v6174_v55 = vmax.f32 %v6138_v63, 0.0  ;;  %12826 = vmatmul.mubr.bf16.vlgmr.msra.gmra.mxu1 %v7966_v47  ;;  %v13384_v8 = vld [vmem:[#allocation8 + $0x30] sm:$0xff]   ;;  %v15385_v61 = vld [vmem:[#allocation3 + $0x48] ss:$0 sps:$4 sm:$0x33]  }
 0x2f7   : > { %v6337_v28 = vrot.slane %v6336_v45, 4  ;;  %6468 = vst [vmem:[#allocation3 + $0x60] sm:$0xe] %v6336_v45  ;;  %v11936_v10 = vpack.c.bf16 %v6172_v16, %v6172_v16  ;;  %12829 = vmatprep.mubr.bf16.mxu1 %v7990_v3  ;;  %v7671_v52 = vrot.slane %v7669_v27, 1  ;;  %v7673_v24 = vshrl.u32 %v15334_v35, 16  ;;  %12382 = vmatpush3.bf16.msra.mxu1 %v13382_v0  ;;  %v15380_v59 = vpop.f32.mrf.mxu0  ;;  %v15390_v0 = vld [vmem:[#allocation3 + $0x50] sm:$0xff]  }
 0x2f8   : > { %v7678_v17 = vshll.u32 %v15322_v13, 16  ;;  %v7683_v21 = vshll.u32 %v15343_v25, 16  ;;  %v6342_v49 = vrot.slane %v6341_v31, 4  ;;  %6471 = vst [vmem:[#allocation3 + $0x70] sm:$0xe] %v6341_v31  ;;  %v11938_v18 = vpack.c.bf16 %v6174_v55, %v6174_v55  ;;  %12383 = vmatprep.subr.bf16.mxu1 %v13383_v36  ;;  %v13388_v23 = vld [vmem:[#allocation8 + $0x28] sm:$0xff]  }
 0x2f9   : > { %v6338_v43 = vrot.slane %v11936_v10, 7  ;;  %v7687_v4 = vshrl.u32 %v15343_v25, 16  ;;  %12862 = vmatpush3.bf16.msra.mxu0 %v13368_v41  ;;  %v15383_v35 = vsel %vm6716_vm4, %v7667_v1, %v7671_v52  ;;  %v7951_v56 = vshll.u32 %v7673_v24, 16  ;;  %v5826_v41 = vpop.f32.mrf.mxu1  ;;  %v15395_v47 = vld [vmem:[#allocation3 + $0x58] ss:$0 sps:$4 sm:$0x33]  }
 0x2fa   : > { %v7680_v50 = vrot.slane %v7678_v17, 1  ;;  %v7685_v20 = vrot.slane %v7683_v21, 1  ;;  %12863 = vmatprep.subr.bf16.mxu0 %v13373_v7  ;;  %v6343_v37 = vrot.slane %v11938_v18, 7  ;;  %v7944_v30 = vshrl.u32 %v15383_v35, 16  ;;  %v13389_v3 = vld [vmem:[#allocation8 + $0x60] sm:$0xff]  }
 0x2fb   : > { %v6339_v25 = vsel %vm15208_vm14, %v6337_v28, %v6338_v43  ;;  %v6340_v60 = vrot.slane %v6338_v43, 4  ;;  %v6004_v45 = vadd.f32 %v6003_v32, %v5826_v41  ;;  %v7946_v63 = vshll.u32 %v15383_v35, 16  ;;  %12384 = vmatpush3.bf16.msra.mxu1 %v13384_v8  ;;  %v5828_v31 = vpop.f32.mrf.mxu1  ;;  %v6006_v28 = vpop.f32.mrf.mxu0  ;;  %v13391_v32 = vld [vmem:[#allocation8 + $0x90] sm:$0xff]  }
 0x2fc   : > { %6469 = vst [vmem:[#allocation3 + $0x64] sm:$0xf] %v6339_v25  ;;  %v7953_v16 = vrot.slane %v7951_v56, 1  ;;  %v7681_v36 = vor.u32 %v7680_v50, %v7676_v40  ;;  %v6344_v1 = vsel %vm15208_vm14, %v6342_v49, %v6343_v37  ;;  %v6345_v27 = vrot.slane %v6343_v37, 4  ;;  %12385 = vmatprep.subr.bf16.mxu1 %v13387_v29  ;;  %v13390_v29 = vld [vmem:[#allocation8 + $0x20] sm:$0xff]  }
 0x2fd   : > { %6470 = vst [vmem:[#allocation3 + $0x68] sm:$0x1] %v6340_v60  ;;  %v7975_v55 = vshll.u32 %v7687_v4, 16  ;;  %v7880_v10 = vrot.slane %v15378_v26, 1  ;;  %12864 = vmatpush3.bf16.msra.mxu0 %v13373_v7  ;;  %6472 = vst [vmem:[#allocation3 + $0x74] sm:$0xf] %v6344_v1  ;;  %v6098_v13 = vadd.f32 %v6004_v45, %v15226_v22  ;;  %v5829_v17 = vpop.f32.mrf.mxu1 }
 0x2fe   : > { %v7948_v40 = vrot.slane %v7946_v63, 1  ;;  %v15402_v52 = vsel %vm6716_vm4, %v7681_v36, %v7685_v20  ;;  %v7881_v24 = vrot.slane %v15385_v61, 1  ;;  %12865 = vmatprep.subr.bf16.mxu0 %v13378_v11  ;;  %6473 = vst [vmem:[#allocation3 + $0x78] sm:$0x1] %v6345_v27  ;;  %v7883_v7 = vrot.slane %v15390_v0, 1 }
 0x2ff   : > { %v7968_v21 = vshrl.u32 %v15402_v52, 16  ;;  %v7970_v8 = vshll.u32 %v15402_v52, 16  ;;  %v7977_v49 = vrot.slane %v7975_v55, 1  ;;  %v6139_v18 = vadd.f32 %v15113_v12, %v6098_v13  ;;  %12386 = vmatpush3.bf16.msra.mxu1 %v13388_v23  ;;  %v5831_v56 = vpop.f32.mrf.mxu1 }
 0x300   : > { %v6007_v43 = vadd.f32 %v6006_v28, %v5829_v17  ;;  %v7949_v22 = vor.u32 %v7948_v40, %v7944_v30  ;;  %v7882_v4 = vsel %vm6941_vm2, %v7880_v10, %v7881_v24  ;;  %v8011_v25 = vshll.u32 %v7881_v24, 16  ;;  %12387 = vmatprep.subr.bf16.mxu1 %v13389_v3  ;;  %v13394_v30 = vld [vmem:[#allocation8 + $0x58] sm:$0xff]   ;;  %v13406_v28 = vld [vmem:[#allocation8 + $0x88] sm:$0xff]  }
 0x301   : > { %v7972_v50 = vrot.slane %v7970_v8, 1  ;;  %v8004_v20 = vshrl.u32 %v7882_v4, 16  ;;  %v8006_v37 = vshll.u32 %v7882_v4, 16  ;;  %12866 = vmatpush3.bf16.msra.mxu0 %v13378_v11  ;;  %v6175_v60 = vmax.f32 %v6139_v18, 0.0  ;;  %v5834_v36 = vpop.f32.mrf.mxu1  ;;  %v13395_v17 = vld [vmem:[#allocation8 + $0x18] sm:$0xff]  }
 0x302   : > { %v6099_v41 = vadd.f32 %v6007_v43, %v15240_v33  ;;  %v7954_v45 = vsel %vm6716_vm4, %v7949_v22, %v7953_v16  ;;  %v7884_v63 = vrot.slane %v15395_v47, 1  ;;  %12867 = vmatprep.subr.bf16.mxu0 %v13391_v32  ;;  %v8013_v27 = vrot.slane %v8011_v25, 1 }
 0x303   : > { %8584 = vmatprep.mubr.bf16.mxu0 %v7954_v45  ;;  %v7973_v23 = vor.u32 %v7972_v50, %v7968_v21  ;;  %v8008_v1 = vrot.slane %v8006_v37, 1  ;;  %v7690_v31 = vshrl.u32 %v15378_v26, 16  ;;  %v11939_v55 = vpack.c.bf16 %v6175_v60, %v6175_v60  ;;  %v5836_v16 = vpop.f32.mrf.mxu1  ;;  %12388 = vmatpush3.bf16.msra.mxu1 %v13390_v29  ;;  %v13396_v21 = vld [vmem:[#allocation8 + $0x50] sm:$0xff]   ;;  %v15420_v22 = vld [vmem:[#allocation3 + $0x60] sm:$0xff]  }
 0x304   : > { %v6140_v11 = vadd.f32 %v15113_v12, %v6099_v41  ;;  %v6012_v3 = vadd.f32 %v15367_v48, %v5834_v36  ;;  %8585 = vmatmul.mubr.bf16.gmra.mxu0 %v15383_v35  ;;  %v7885_v33 = vsel %vm6941_vm2, %v7883_v7, %v7884_v63  ;;  %v8035_v48 = vshll.u32 %v7884_v63, 16  ;;  %12389 = vmatprep.subr.bf16.mxu1 %v13394_v30  ;;  %v13401_v16 = vld [vmem:[#allocation8 + $0x8] sm:$0xff]  }
 0x305   : > { %v7978_v10 = vsel %vm6716_vm4, %v7973_v23, %v7977_v49  ;;  %v8009_v13 = vor.u32 %v8008_v1, %v8004_v20  ;;  %v8028_v40 = vshrl.u32 %v7885_v33, 16  ;;  %v8030_v24 = vshll.u32 %v7885_v33, 16  ;;  %12868 = vmatpush3.bf16.msra.mxu0 %v13391_v32  ;;  %v5837_v35 = vpop.f32.mrf.mxu1  ;;  %v15425_v32 = vld [vmem:[#allocation3 + $0x68] ss:$0 sps:$4 sm:$0x33]   ;;  %v15436_v33 = vld [vmem:[#allocation3 + $0x70] sm:$0xff]  }
 0x306   : > { %v6346_v8 = vrot.slane %v11939_v55, 7  ;;  %v6176_v18 = vmax.f32 %v6140_v11, 0.0  ;;  %v6100_v43 = vadd.f32 %v6012_v3, %v15222_v34  ;;  %8592 = vmatprep.mubr.bf16.mxu0 %v7978_v10  ;;  %v7692_v4 = vshll.u32 %v15378_v26, 16  ;;  %12869 = vmatprep.subr.bf16.mxu0 %v13406_v28  ;;  %v13397_v26 = vld [vmem:[#allocation8 + $0x10] sm:$0xff]  }
 0x307   : > { %v8014_v7 = vsel %vm6716_vm4, %v8009_v13, %v8013_v27  ;;  %v8032_v49 = vrot.slane %v8030_v24, 1  ;;  %v7697_v29 = vshll.u32 %v15385_v61, 16  ;;  %v6015_v20 = vadd.f32 %v15380_v59, %v5837_v35  ;;  %v5839_v37 = vpop.f32.mrf.mxu1  ;;  %12390 = vmatpush3.bf16.msra.mxu1 %v13395_v17  ;;  %v15430_v23 = vpop.f32.mrf.mxu0  ;;  %v13400_v27 = vld [vmem:[#allocation8 + $0x48] sm:$0xff]   ;;  %v13411_v24 = vld [vmem:[#allocation8 + $0x80] sm:$0xff]  }
 0x308   : > { %v6347_v56 = vrot.slane %v6346_v8, 4  ;;  %6474 = vst [vmem:[#allocation3 + $0x80] sm:$0xe] %v6346_v8  ;;  %v11940_v50 = vpack.c.bf16 %v6176_v18, %v6176_v18  ;;  %v6141_v34 = vadd.f32 %v15113_v12, %v6100_v43  ;;  %12830 = vmatmul.mubr.bf16.gmra.mxu1 %v8014_v7  ;;  %v8037_v60 = vrot.slane %v8035_v48, 1  ;;  %12391 = vmatprep.subr.bf16.mxu1 %v13396_v21 }
 0x309   : > { %v8033_v25 = vor.u32 %v8032_v49, %v8028_v40  ;;  %v7694_v41 = vrot.slane %v7692_v4, 1  ;;  %v7699_v45 = vrot.slane %v7697_v29, 1  ;;  %12870 = vmatpush3.bf16.msra.mxu0 %v13406_v28  ;;  %v6101_v36 = vadd.f32 %v6015_v20, %v15236_v53  ;;  %v15438_v28 = vld [vmem:[#allocation3 + $0x78] ss:$0 sps:$4 sm:$0x33]   ;;  %v6019_v40 = vpop.f32.mrf.mxu0 }
 0x30a   : > { %v6348_v63 = vrot.slane %v11940_v50, 7  ;;  %v6177_v30 = vmax.f32 %v6141_v34, 0.0  ;;  %v7701_v1 = vshrl.u32 %v15385_v61, 16  ;;  %v7886_v11 = vrot.slane %v15420_v22, 1  ;;  %12871 = vmatprep.subr.bf16.mxu0 %v13411_v24  ;;  %v5842_v7 = vpop.f32.mrf.mxu1 }
 0x30b   : > { %v8038_v59 = vsel %vm6716_vm4, %v8033_v25, %v8037_v60  ;;  %v7695_v55 = vor.u32 %v7694_v41, %v7690_v31  ;;  %v7887_v3 = vrot.slane %v15425_v32, 1  ;;  %v6142_v61 = vadd.f32 %v15113_v12, %v6101_v36  ;;  %v13404_v31 = vld [vmem:[#allocation8 + $0x40] sm:$0xff]   ;;  %12392 = vmatpush3.bf16.msra.mxu1 %v13397_v26  ;;  %v15448_v35 = vpop.f32.mrf.mxu0 }
 0x30c   : > { %v6349_v53 = vsel %vm15208_vm14, %v6347_v56, %v6348_v63  ;;  %v6350_v10 = vrot.slane %v6348_v63, 4  ;;  %v11941_v13 = vpack.c.bf16 %v6177_v30, %v6177_v30  ;;  %12833 = vmatprep.mubr.bf16.mxu1 %v8038_v59  ;;  %8593 = vmatmul.mubr.bf16.gmra.mxu0 %v15402_v52  ;;  %v7999_v21 = vshll.u32 %v7701_v1, 16  ;;  %v13405_v25 = vld [vmem:[#allocation8] sm:$0xff]   ;;  %v5844_v60 = vpop.f32.mrf.mxu1 }
 0x30d   : > { %6475 = vst [vmem:[#allocation3 + $0x84] sm:$0xf] %v6349_v53  ;;  %v15445_v17 = vsel %vm6716_vm4, %v7695_v55, %v7699_v45  ;;  %v7888_v8 = vsel %vm6941_vm2, %v7886_v11, %v7887_v3  ;;  %v8059_v18 = vshll.u32 %v7887_v3, 16  ;;  %v6178_v48 = vmax.f32 %v6142_v61, 0.0  ;;  %12393 = vmatprep.subr.bf16.mxu1 %v13400_v27  ;;  %12872 = vmatpush3.bf16.msra.mxu0 %v13411_v24  ;;  %v6022_v41 = vpop.f32.mrf.mxu0 }
 0x30e   : > { %6476 = vst [vmem:[#allocation3 + $0x88] sm:$0x1] %v6350_v10  ;;  %v6351_v43 = vrot.slane %v11941_v13, 7  ;;  %v7992_v12 = vshrl.u32 %v15445_v17, 16  ;;  %v7994_v52 = vshll.u32 %v15445_v17, 16  ;;  %v8001_v49 = vrot.slane %v7999_v21, 1  ;;  %v5845_v55 = vpop.f32.mrf.mxu1 }
 0x30f   : > { %v8052_v4 = vshrl.u32 %v7888_v8, 16  ;;  %v8054_v29 = vshll.u32 %v7888_v8, 16  ;;  %v8061_v56 = vrot.slane %v8059_v18, 1  ;;  %v11942_v34 = vpack.c.bf16 %v6178_v48, %v6178_v48  ;;  %12394 = vmatpush3.bf16.msra.mxu1 %v13401_v16  ;;  %v15464_v16 = vld [vmem:[%s16832_s3] ss:$0 sm:$0xff] }
 0x310   : > { %v6352_v50 = vrot.slane %v6351_v43, 4  ;;  %6477 = vst [vmem:[#allocation3 + $0x90] sm:$0xe] %v6351_v43  ;;  %v6020_v20 = vadd.f32 %v6019_v40, %v5842_v7  ;;  %v7996_v37 = vrot.slane %v7994_v52, 1  ;;  %v7889_v26 = vrot.slane %v15436_v33, 1  ;;  %12395 = vmatprep.subr.bf16.mxu1 %v13404_v31  ;;  %v5847_v31 = vpop.f32.mrf.mxu1 }
 0x311   : > { %v8056_v45 = vrot.slane %v8054_v29, 1  ;;  %v7890_v63 = vrot.slane %v15438_v28, 1  ;;  %v7704_v30 = vshrl.u32 %v15390_v0, 16  ;;  %v6353_v36 = vrot.slane %v11942_v34, 7 }
 0x312   : > { %v6102_v1 = vadd.f32 %v6020_v20, %v15257_v58  ;;  %v7997_v27 = vor.u32 %v7996_v37, %v7992_v12  ;;  %v7706_v59 = vshll.u32 %v15390_v0, 16  ;;  %v7711_v10 = vshll.u32 %v15395_v47, 16 }
 0x313   : > { %v8057_v11 = vor.u32 %v8056_v45, %v8052_v4  ;;  %v7891_v3 = vsel %vm6941_vm2, %v7889_v26, %v7890_v63  ;;  %v8083_v53 = vshll.u32 %v7890_v63, 16  ;;  %v6354_v13 = vsel %vm15208_vm14, %v6352_v50, %v6353_v36  ;;  %12396 = vmatpush3.bf16.msra.mxu1 %v13405_v25  ;;  %v5850_v20 = vpop.f32.mrf.mxu1 }
 0x314   : > { %v6355_v61 = vrot.slane %v6353_v36, 4  ;;  %v6143_v58 = vadd.f32 %v15464_v16, %v6102_v1  ;;  %v6023_v0 = vadd.f32 %v6022_v41, %v5845_v55  ;;  %v15467_v40 = vld [vmem:[#allocation3 + $0x80] sm:$0xff]   ;;  %6478 = vst [vmem:[#allocation3 + $0x94] sm:$0xf] %v6354_v13  ;;  %v8002_v24 = vsel %vm6716_vm4, %v7997_v27, %v8001_v49 }
 0x315   : > { %v8062_v21 = vsel %vm6716_vm4, %v8057_v11, %v8061_v56  ;;  %v8076_v8 = vshrl.u32 %v7891_v3, 16  ;;  %v8078_v18 = vshll.u32 %v7891_v3, 16  ;;  %8600 = vmatprep.mubr.bf16.mxu0 %v8002_v24  ;;  %v8085_v12 = vrot.slane %v8083_v53, 1  ;;  %v15472_v7 = vld [vmem:[#allocation3 + $0x88] ss:$0 sps:$4 sm:$0x33]   ;;  %v5852_v63 = vpop.f32.mrf.mxu1 }
 0x316   : > { %6479 = vst [vmem:[#allocation3 + $0x98] sm:$0x1] %v6355_v61  ;;  %v6179_v43 = vmax.f32 %v6143_v58, 0.0  ;;  %v6103_v48 = vadd.f32 %v6023_v0, %v15273_v6  ;;  %12834 = vmatmul.mubr.bf16.gmra.mxu1 %v8062_v21  ;;  %v7708_v52 = vrot.slane %v7706_v59, 1  ;;  %8601 = vmatmul.mubr.bf16.gmra.mxu0 %v15445_v17  ;;  %v7713_v29 = vrot.slane %v7711_v10, 1  ;;  %v13416_v0 = vld [vmem:[#allocation8 + $0x1f8] sm:$0xff]  }
 0x317   : > { %v8080_v4 = vrot.slane %v8078_v18, 1  ;;  %v7715_v49 = vshrl.u32 %v15395_v47, 16  ;;  %v7892_v56 = vrot.slane %v15467_v40, 1  ;;  %v7893_v6 = vrot.slane %v15472_v7, 1  ;;  %v5853_v11 = vpop.f32.mrf.mxu1  ;;  %12517 = vmatprep.subr.bf16.mxu0 %v13416_v0 }
 0x318   : > { %v11943_v50 = vpack.c.bf16 %v6179_v43, %v6179_v43  ;;  %v6144_v34 = vadd.f32 %v15464_v16, %v6103_v48  ;;  %v7709_v37 = vor.u32 %v7708_v52, %v7704_v30  ;;  %v6028_v25 = vadd.f32 %v15430_v23, %v5850_v20  ;;  %v13418_v48 = vld [vmem:[#allocation8 + $0x238] sm:$0xff]  }
 0x319   : > { %v8081_v60 = vor.u32 %v8080_v4, %v8076_v8  ;;  %v8023_v41 = vshll.u32 %v7715_v49, 16  ;;  %v7718_v45 = vshrl.u32 %v15420_v22, 16  ;;  %v7894_v36 = vsel %vm6941_vm2, %v7892_v56, %v7893_v6  ;;  %12905 = vmatprep.subr.bf16.mxu1 %v13418_v48 }
 0x31a   : > { %v6356_v26 = vrot.slane %v11943_v50, 7  ;;  %v6180_v17 = vmax.f32 %v6144_v34, 0.0  ;;  %v7714_v47 = vsel %vm6716_vm4, %v7709_v37, %v7713_v29  ;;  %v6104_v1 = vadd.f32 %v6028_v25, %v15253_v51  ;;  %v5855_v51 = vpop.f32.mrf.mxu1 }
 0x31b   : > { %v8086_v27 = vsel %vm6716_vm4, %v8081_v60, %v8085_v12  ;;  %v8016_v30 = vshrl.u32 %v7714_v47, 16  ;;  %v8018_v59 = vshll.u32 %v7714_v47, 16  ;;  %v8025_v3 = vrot.slane %v8023_v41, 1  ;;  %v15491_v43 = vld [vmem:[#allocation3 + $0x90] sm:$0xff]  }
 0x31c   : > { %v6357_v55 = vrot.slane %v6356_v26, 4  ;;  %6480 = vst [vmem:[#allocation3 + $0xa0] sm:$0xe] %v6356_v26  ;;  %v11944_v23 = vpack.c.bf16 %v6180_v17, %v6180_v17  ;;  %12837 = vmatprep.mubr.bf16.mxu1 %v8086_v27  ;;  %v8100_v53 = vshrl.u32 %v7894_v36, 16  ;;  %v6145_v10 = vadd.f32 %v15464_v16, %v6104_v1  ;;  %v15487_v24 = vpop.f32.mrf.mxu0 }
 0x31d   : > { %v6031_v13 = vadd.f32 %v15448_v35, %v5853_v11  ;;  %v8020_v61 = vrot.slane %v8018_v59, 1  ;;  %v8102_v58 = vshll.u32 %v7894_v36, 16  ;;  %v8107_v21 = vshll.u32 %v7893_v6, 16  ;;  %v15494_v29 = vld [vmem:[#allocation3 + $0x98] ss:$0 sps:$4 sm:$0x33]  }
 0x31e   : > { %v6358_v31 = vrot.slane %v11944_v23, 7  ;;  %v7720_v8 = vshll.u32 %v15420_v22, 16  ;;  %v7725_v18 = vshll.u32 %v15425_v32, 16  ;;  %v6181_v12 = vmax.f32 %v6145_v10, 0.0  ;;  %v6035_v50 = vpop.f32.mrf.mxu0 }
 0x31f   : > { %v6105_v52 = vadd.f32 %v6031_v13, %v15263_v14  ;;  %v8021_v4 = vor.u32 %v8020_v61, %v8016_v30  ;;  %v8104_v35 = vrot.slane %v8102_v58, 1  ;;  %v8109_v34 = vrot.slane %v8107_v21, 1 }
 0x320   : > { %v6359_v49 = vsel %vm15208_vm14, %v6357_v55, %v6358_v31  ;;  %v6360_v56 = vrot.slane %v6358_v31, 4  ;;  %v7722_v22 = vrot.slane %v7720_v8, 1  ;;  %v11945_v20 = vpack.c.bf16 %v6181_v12, %v6181_v12  ;;  %v15502_v36 = vpop.f32.mrf.mxu0  ;;  %v5858_v11 = vpop.f32.mrf.mxu1 }
 0x321   : > { %6481 = vst [vmem:[#allocation3 + $0xa4] sm:$0xf] %v6359_v49  ;;  %v6146_v37 = vadd.f32 %v15464_v16, %v6105_v52  ;;  %v8026_v6 = vsel %vm6716_vm4, %v8021_v4, %v8025_v3  ;;  %v8105_v14 = vor.u32 %v8104_v35, %v8100_v53  ;;  %v7727_v60 = vrot.slane %v7725_v18, 1 }
 0x322   : > { %6482 = vst [vmem:[#allocation3 + $0xa8] sm:$0x1] %v6360_v56  ;;  %8608 = vmatprep.mubr.bf16.mxu0 %v8026_v6  ;;  %v7723_v25 = vor.u32 %v7722_v22, %v7718_v45  ;;  %v7729_v41 = vshrl.u32 %v15425_v32, 16  ;;  %v7895_v26 = vrot.slane %v15491_v43, 1  ;;  %v6361_v17 = vrot.slane %v11945_v20, 7  ;;  %v5860_v0 = vpop.f32.mrf.mxu1  ;;  %v6038_v31 = vpop.f32.mrf.mxu0 }
 0x323   : > { %v6182_v63 = vmax.f32 %v6146_v37, 0.0  ;;  %v8110_v1 = vsel %vm6716_vm4, %v8105_v14, %v8109_v34  ;;  %8609 = vmatmul.mubr.bf16.gmra.mxu0 %v7714_v47  ;;  %v7896_v27 = vrot.slane %v15494_v29, 1  ;;  %v7732_v45 = vshrl.u32 %v15436_v33, 16 }
 0x324   : > { %12838 = vmatmul.mubr.bf16.gmra.mxu1 %v8110_v1  ;;  %v7728_v30 = vsel %vm6716_vm4, %v7723_v25, %v7727_v60  ;;  %v8047_v59 = vshll.u32 %v7729_v41, 16  ;;  %v7734_v55 = vshll.u32 %v15436_v33, 16  ;;  %v6362_v32 = vrot.slane %v6361_v17, 4  ;;  %6483 = vst [vmem:[#allocation3 + $0xb0] sm:$0xe] %v6361_v17  ;;  %v5861_v49 = vpop.f32.mrf.mxu1 }
 0x325   : > { %v11946_v23 = vpack.c.bf16 %v6182_v63, %v6182_v63  ;;  %v8040_v3 = vshrl.u32 %v7728_v30, 16  ;;  %v8042_v53 = vshll.u32 %v7728_v30, 16  ;;  %v6036_v10 = vadd.f32 %v6035_v50, %v5858_v11 }
 0x326   : > { %v8049_v13 = vrot.slane %v8047_v59, 1  ;;  %v7897_v47 = vsel %vm6941_vm2, %v7895_v26, %v7896_v27  ;;  %v8131_v61 = vshll.u32 %v7896_v27, 16  ;;  %v7736_v48 = vrot.slane %v7734_v55, 1  ;;  %v5863_v6 = vpop.f32.mrf.mxu1 }
 0x327   : > { %v6363_v58 = vrot.slane %v11946_v23, 7  ;;  %v8044_v51 = vrot.slane %v8042_v53, 1  ;;  %v8124_v21 = vshrl.u32 %v7897_v47, 16  ;;  %v8126_v8 = vshll.u32 %v7897_v47, 16 }
 0x328   : > { %v6106_v18 = vadd.f32 %v6036_v10, %v15283_v38  ;;  %v8133_v33 = vrot.slane %v8131_v61, 1  ;;  %v7739_v12 = vshll.u32 %v15438_v28, 16  ;;  %v15512_v52 = vld [vmem:[#allocation3 + $0xa0] sm:$0xff]   ;;  %v6039_v22 = vadd.f32 %v6038_v31, %v5861_v49  ;;  %v5866_v27 = vpop.f32.mrf.mxu1 }
 0x329   : > { %v6364_v4 = vsel %vm15208_vm14, %v6362_v32, %v6363_v58  ;;  %v6365_v35 = vrot.slane %v6363_v58, 4  ;;  %v8045_v56 = vor.u32 %v8044_v51, %v8040_v3  ;;  %v8128_v50 = vrot.slane %v8126_v8, 1  ;;  %v15517_v38 = vld [vmem:[#allocation3 + $0xa8] ss:$0 sps:$4 sm:$0x33]  }
 0x32a   : > { %6484 = vst [vmem:[#allocation3 + $0xb4] sm:$0xf] %v6364_v4  ;;  %v6147_v34 = vadd.f32 %v15464_v16, %v6106_v18  ;;  %v7737_v20 = vor.u32 %v7736_v48, %v7732_v45  ;;  %v7741_v37 = vrot.slane %v7739_v12, 1  ;;  %v7743_v60 = vshrl.u32 %v15438_v28, 16  ;;  %v5868_v3 = vpop.f32.mrf.mxu1 }
 0x32b   : > { %6485 = vst [vmem:[#allocation3 + $0xb8] sm:$0x1] %v6365_v35  ;;  %v8050_v14 = vsel %vm6716_vm4, %v8045_v56, %v8049_v13  ;;  %v8129_v25 = vor.u32 %v8128_v50, %v8124_v21  ;;  %v7898_v41 = vrot.slane %v15512_v52, 1  ;;  %v6107_v17 = vadd.f32 %v6039_v22, %v15326_v57 }
 0x32c   : > { %v6183_v26 = vmax.f32 %v6147_v34, 0.0  ;;  %8616 = vmatprep.mubr.bf16.mxu0 %v8050_v14  ;;  %v7742_v63 = vsel %vm6716_vm4, %v7737_v20, %v7741_v37  ;;  %v7899_v1 = vrot.slane %v15517_v38, 1  ;;  %v8071_v32 = vshll.u32 %v7743_v60, 16  ;;  %v5869_v31 = vpop.f32.mrf.mxu1 }
 0x32d   : > { %v8134_v59 = vsel %vm6716_vm4, %v8129_v25, %v8133_v33  ;;  %8617 = vmatmul.mubr.bf16.gmra.mxu0 %v7728_v30  ;;  %v8064_v45 = vshrl.u32 %v7742_v63, 16  ;;  %v8066_v55 = vshll.u32 %v7742_v63, 16  ;;  %v6148_v28 = vadd.f32 %v15464_v16, %v6107_v17 }
 0x32e   : > { %v11947_v23 = vpack.c.bf16 %v6183_v26, %v6183_v26  ;;  %v6044_v11 = vadd.f32 %v15487_v24, %v5866_v27  ;;  %12841 = vmatprep.mubr.bf16.mxu1 %v8134_v59  ;;  %v7900_v57 = vsel %vm6941_vm2, %v7898_v41, %v7899_v1  ;;  %v8073_v10 = vrot.slane %v8071_v32, 1 }
 0x32f   : > { %v8068_v53 = vrot.slane %v8066_v55, 1  ;;  %v8148_v13 = vshrl.u32 %v7900_v57, 16  ;;  %v8150_v47 = vshll.u32 %v7900_v57, 16  ;;  %v6184_v58 = vmax.f32 %v6148_v28, 0.0 }
 0x330   : > { %v6366_v61 = vrot.slane %v11947_v23, 7  ;;  %v6108_v30 = vadd.f32 %v6044_v11, %v15277_v9  ;;  %v8155_v0 = vshll.u32 %v7899_v1, 16  ;;  %v7746_v8 = vshrl.u32 %v15467_v40, 16  ;;  %v5871_v9 = vpop.f32.mrf.mxu1  ;;  %v484_v11 = vld [vmem:[#allocation3 + $0x118] sm:$0x2] }
 0x331   : > { %v8069_v51 = vor.u32 %v8068_v53, %v8064_v45  ;;  %v8152_v21 = vrot.slane %v8150_v47, 1  ;;  %v7748_v24 = vshll.u32 %v15467_v40, 16  ;;  %v15532_v18 = vld [vmem:[#allocation3 + $0xb0] sm:$0xff]   ;;  %v11948_v48 = vpack.c.bf16 %v6184_v58, %v6184_v58 }
 0x332   : > { %v6367_v33 = vrot.slane %v6366_v61, 4  ;;  %6486 = vst [vmem:[#allocation3 + $0xc0] sm:$0xe] %v6366_v61  ;;  %v6149_v12 = vadd.f32 %v15464_v16, %v6108_v30  ;;  %v6047_v4 = vadd.f32 %v15502_v36, %v5869_v31  ;;  %v15536_v35 = vld [vmem:[#allocation3 + $0xb8] ss:$0 sps:$4 sm:$0x33]   ;;  %v15538_v49 = vpop.f32.mrf.mxu0 }
 0x333   : > { %v8074_v56 = vsel %vm6716_vm4, %v8069_v51, %v8073_v10  ;;  %v8153_v50 = vor.u32 %v8152_v21, %v8148_v13  ;;  %v8157_v34 = vrot.slane %v8155_v0, 1  ;;  %v7750_v22 = vrot.slane %v7748_v24, 1 }
 0x334   : > { %v6368_v40 = vrot.slane %v11948_v48, 7  ;;  %v6185_v20 = vmax.f32 %v6149_v12, 0.0  ;;  %v6109_v37 = vadd.f32 %v6047_v4, %v15287_v44  ;;  %8624 = vmatprep.mubr.bf16.mxu0 %v8074_v56  ;;  %v7753_v6 = vshll.u32 %v15472_v7, 16  ;;  %v6051_v14 = vpop.f32.mrf.mxu0 }
 0x335   : > { %v8158_v36 = vsel %vm6716_vm4, %v8153_v50, %v8157_v34  ;;  %8625 = vmatmul.mubr.bf16.gmra.mxu0 %v7742_v63  ;;  %v7751_v25 = vor.u32 %v7750_v22, %v7746_v8  ;;  %v7757_v60 = vshrl.u32 %v15472_v7, 16  ;;  %v7901_v41 = vrot.slane %v15532_v18, 1 }
 0x336   : > { %v6369_v26 = vsel %vm15208_vm14, %v6367_v33, %v6368_v40  ;;  %v6370_v17 = vrot.slane %v6368_v40, 4  ;;  %v11949_v1 = vpack.c.bf16 %v6185_v20, %v6185_v20  ;;  %v6150_v27 = vadd.f32 %v15464_v16, %v6109_v37  ;;  %12842 = vmatmul.mubr.bf16.gmra.mxu1 %v8158_v36  ;;  %v15551_v32 = vpop.f32.mrf.mxu0  ;;  %v5874_v61 = vpop.f32.mrf.mxu1 }
 0x337   : > { %6487 = vst [vmem:[#allocation3 + $0xc4] sm:$0xf] %v6369_v26  ;;  %v7755_v44 = vrot.slane %v7753_v6, 1  ;;  %v8095_v59 = vshll.u32 %v7757_v60, 16  ;;  %v7902_v45 = vrot.slane %v15536_v35, 1  ;;  %v7760_v63 = vshrl.u32 %v15491_v43, 16 }
 0x338   : > { %6488 = vst [vmem:[#allocation3 + $0xc8] sm:$0x1] %v6370_v17  ;;  %v6371_v55 = vrot.slane %v11949_v1, 7  ;;  %v6186_v7 = vmax.f32 %v6150_v27, 0.0  ;;  %v7762_v23 = vshll.u32 %v15491_v43, 16  ;;  %v7767_v28 = vshll.u32 %v15494_v29, 16  ;;  %v5876_v8 = vpop.f32.mrf.mxu1  ;;  %v6054_v24 = vpop.f32.mrf.mxu0 }
 0x339   : > { %v7756_v57 = vsel %vm6716_vm4, %v7751_v25, %v7755_v44  ;;  %v8097_v3 = vrot.slane %v8095_v59, 1  ;;  %v7903_v53 = vsel %vm6941_vm2, %v7901_v41, %v7902_v45  ;;  %v8179_v10 = vshll.u32 %v7902_v45, 16 }
 0x33a   : > { %v6372_v13 = vrot.slane %v6371_v55, 4  ;;  %6489 = vst [vmem:[#allocation3 + $0xd0] sm:$0xe] %v6371_v55  ;;  %v11950_v47 = vpack.c.bf16 %v6186_v7, %v6186_v7  ;;  %v8088_v58 = vshrl.u32 %v7756_v57, 16  ;;  %v8090_v30 = vshll.u32 %v7756_v57, 16  ;;  %v5877_v40 = vpop.f32.mrf.mxu1 }
 0x33b   : > { %v6052_v0 = vadd.f32 %v6051_v14, %v5874_v61  ;;  %v8172_v31 = vshrl.u32 %v7903_v53, 16  ;;  %v8174_v51 = vshll.u32 %v7903_v53, 16  ;;  %v8181_v21 = vrot.slane %v8179_v10, 1 }
 0x33c   : > { %v6373_v43 = vrot.slane %v11950_v47, 7  ;;  %v8092_v33 = vrot.slane %v8090_v30, 1  ;;  %v7764_v48 = vrot.slane %v7762_v23, 1  ;;  %v7769_v12 = vrot.slane %v7767_v28, 1  ;;  %v5879_v60 = vpop.f32.mrf.mxu1 }
 0x33d   : > { %v6110_v4 = vadd.f32 %v6052_v0, %v14951_v39  ;;  %v8176_v9 = vrot.slane %v8174_v51, 1  ;;  %v7771_v56 = vshrl.u32 %v15494_v29, 16  ;;  %v485_v50 = vsel %vm14908_vm12, 0, %v484_v11  ;;  %v17059_v0 = vld [vmem:[#allocation114_spill] sm:$0xff] }
 0x33e   : > { %v6374_v34 = vsel %vm15208_vm14, %v6372_v13, %v6373_v43  ;;  %v6375_v22 = vrot.slane %v6373_v43, 4  ;;  %v8093_v20 = vor.u32 %v8092_v33, %v8088_v58  ;;  %v7765_v37 = vor.u32 %v7764_v48, %v7760_v63  ;;  %v15563_v6 = vld [vmem:[#allocation3 + $0xc0] sm:$0xff]   ;;  %486 = vst [vmem:[#allocation3 + $0x118] sm:$0x2] %v485_v50  ;;  %v5882_v63 = vpop.f32.mrf.mxu1 }
 0x33f   : > { %6490 = vst [vmem:[#allocation3 + $0xd4] sm:$0xf] %v6374_v34  ;;  %v6151_v14 = vadd.f32 %v15464_v16, %v6110_v4  ;;  %v6055_v39 = vadd.f32 %v6054_v24, %v5877_v40  ;;  %v8177_v36 = vor.u32 %v8176_v9, %v8172_v31  ;;  %v8119_v25 = vshll.u32 %v7771_v56, 16  ;;  %v15566_v29 = vld [vmem:[#allocation3 + $0xc8] ss:$0 sps:$4 sm:$0x33]  }
 0x340   : > { %6491 = vst [vmem:[#allocation3 + $0xd8] sm:$0x1] %v6375_v22  ;;  %v8098_v41 = vsel %vm6716_vm4, %v8093_v20, %v8097_v3  ;;  %v7770_v26 = vsel %vm6716_vm4, %v7765_v37, %v7769_v12  ;;  %v7904_v17 = vrot.slane %v15563_v6, 1  ;;  %v7774_v1 = vshrl.u32 %v15512_v52, 16  ;;  %v5884_v10 = vpop.f32.mrf.mxu1 }
 0x341   : > { %v6187_v27 = vmax.f32 %v6151_v14, 0.0  ;;  %v6111_v44 = vadd.f32 %v6055_v39, %v15330_v19  ;;  %8632 = vmatprep.mubr.bf16.mxu0 %v8098_v41  ;;  %v8182_v59 = vsel %vm6716_vm4, %v8177_v36, %v8181_v21  ;;  %v8112_v45 = vshrl.u32 %v7770_v26, 16  ;;  %v17060_v39 = vld [vmem:[#allocation115_spill] sm:$0xff] }
 0x342   : > { %12845 = vmatprep.mubr.bf16.mxu1 %v8182_v59  ;;  %8633 = vmatmul.mubr.bf16.gmra.mxu0 %v7756_v57  ;;  %v8114_v55 = vshll.u32 %v7770_v26, 16  ;;  %v8121_v7 = vrot.slane %v8119_v25, 1  ;;  %v7905_v23 = vrot.slane %v15566_v29, 1  ;;  %v7776_v28 = vshll.u32 %v15512_v52, 16  ;;  %v5885_v21 = vpop.f32.mrf.mxu1 }
 0x343   : > { %v11951_v11 = vpack.c.bf16 %v6187_v27, %v6187_v27  ;;  %v6152_v3 = vadd.f32 %v15464_v16, %v6111_v44  ;;  %v6060_v53 = vadd.f32 %v15538_v49, %v5882_v63  ;;  %v7781_v19 = vshll.u32 %v15517_v38, 16 }
 0x344   : > { %v8116_v13 = vrot.slane %v8114_v55, 1  ;;  %v7906_v47 = vsel %vm6941_vm2, %v7904_v17, %v7905_v23  ;;  %v8203_v61 = vshll.u32 %v7905_v23, 16  ;;  %v7778_v58 = vrot.slane %v7776_v28, 1  ;;  %v5887_v56 = vpop.f32.mrf.mxu1 }
 0x345   : > { %v6376_v57 = vrot.slane %v11951_v11, 7  ;;  %v6188_v30 = vmax.f32 %v6152_v3, 0.0  ;;  %v6112_v31 = vadd.f32 %v6060_v53, %v17059_v0  ;;  %v8196_v51 = vshrl.u32 %v7906_v47, 16  ;;  %v475_v53 = vld [vmem:[#allocation3 + $0xe8] sm:$0x2] }
 0x346   : > { %v8117_v52 = vor.u32 %v8116_v13, %v8112_v45  ;;  %v8198_v43 = vshll.u32 %v7906_v47, 16  ;;  %v8205_v8 = vrot.slane %v8203_v61, 1  ;;  %v7779_v24 = vor.u32 %v7778_v58, %v7774_v1  ;;  %v15581_v33 = vld [vmem:[#allocation3 + $0xd0] sm:$0xff]   ;;  %v15587_v50 = vpop.f32.mrf.mxu0 }
 0x347   : > { %v6377_v49 = vrot.slane %v6376_v57, 4  ;;  %6492 = vst [vmem:[#allocation3 + $0xe0] sm:$0xe] %v6376_v57  ;;  %v11952_v48 = vpack.c.bf16 %v6188_v30, %v6188_v30  ;;  %v6153_v12 = vadd.f32 %v15464_v16, %v6112_v31  ;;  %v6063_v4 = vadd.f32 %v15551_v32, %v5885_v21  ;;  %v15585_v9 = vld [vmem:[#allocation3 + $0xd8] ss:$0 sps:$4 sm:$0x33]  }
 0x348   : > { %v8122_v34 = vsel %vm6716_vm4, %v8117_v52, %v8121_v7  ;;  %v8200_v22 = vrot.slane %v8198_v43, 1  ;;  %v7783_v40 = vrot.slane %v7781_v19, 1  ;;  %v7785_v20 = vshrl.u32 %v15517_v38, 16  ;;  %v6067_v60 = vpop.f32.mrf.mxu0 }
 0x349   : > { %v6378_v37 = vrot.slane %v11952_v48, 7  ;;  %v6189_v14 = vmax.f32 %v6153_v12, 0.0  ;;  %v6113_v36 = vadd.f32 %v6063_v4, %v17060_v39  ;;  %8640 = vmatprep.mubr.bf16.mxu0 %v8122_v34  ;;  %v7907_v25 = vrot.slane %v15581_v33, 1  ;;  %v17061_v4 = vld [vmem:[#allocation117_spill] sm:$0xff] }
 0x34a   : > { %v8201_v32 = vor.u32 %v8200_v22, %v8196_v51  ;;  %8641 = vmatmul.mubr.bf16.gmra.mxu0 %v7770_v26  ;;  %v7784_v41 = vsel %vm6716_vm4, %v7779_v24, %v7783_v40  ;;  %v8143_v17 = vshll.u32 %v7785_v20, 16  ;;  %v7908_v1 = vrot.slane %v15585_v9, 1  ;;  %v15599_v28 = vpop.f32.mrf.mxu0 }
 0x34b   : > { %v6379_v27 = vsel %vm15208_vm14, %v6377_v49, %v6378_v37  ;;  %v6380_v44 = vrot.slane %v6378_v37, 4  ;;  %v11953_v38 = vpack.c.bf16 %v6189_v14, %v6189_v14  ;;  %v6154_v59 = vadd.f32 %v15464_v16, %v6113_v36  ;;  %v5890_v57 = vpop.f32.mrf.mxu1 }
 0x34c   : > { %6493 = vst [vmem:[#allocation3 + $0xe4] sm:$0xf] %v6379_v27  ;;  %v8206_v45 = vsel %vm6716_vm4, %v8201_v32, %v8205_v8  ;;  %v8136_v63 = vshrl.u32 %v7784_v41, 16  ;;  %v8138_v55 = vshll.u32 %v7784_v41, 16  ;;  %v8145_v7 = vrot.slane %v8143_v17, 1  ;;  %v6070_v24 = vpop.f32.mrf.mxu0 }
 0x34d   : > { %6494 = vst [vmem:[#allocation3 + $0xe8] sm:$0x1] %v6380_v44  ;;  %v6381_v26 = vrot.slane %v11953_v38, 7  ;;  %v6190_v23 = vmax.f32 %v6154_v59, 0.0  ;;  %12846 = vmatmul.mubr.bf16.gmra.mxu1 %v8206_v45  ;;  %v7909_v11 = vsel %vm6941_vm2, %v7907_v25, %v7908_v1  ;;  %v8227_v3 = vshll.u32 %v7908_v1, 16  ;;  %v5892_v8 = vpop.f32.mrf.mxu1 }
 0x34e   : > { %v8140_v19 = vrot.slane %v8138_v55, 1  ;;  %v8220_v10 = vshrl.u32 %v7909_v11, 16  ;;  %v8222_v13 = vshll.u32 %v7909_v11, 16  ;;  %v7788_v47 = vshrl.u32 %v15532_v18, 16  ;;  %v421_v17 = vld [vmem:[#allocation3 + $0xf0] sm:$0x1] }
 0x34f   : > { %v6382_v61 = vrot.slane %v6381_v26, 4  ;;  %6495 = vst [vmem:[#allocation3 + $0xf0] sm:$0xe] %v6381_v26  ;;  %v11954_v58 = vpack.c.bf16 %v6190_v23, %v6190_v23  ;;  %v8229_v30 = vrot.slane %v8227_v3, 1  ;;  %v7790_v0 = vshll.u32 %v15532_v18, 16  ;;  %v5893_v37 = vpop.f32.mrf.mxu1 }
 0x350   : > { %v6068_v31 = vadd.f32 %v6067_v60, %v5890_v57  ;;  %v8141_v51 = vor.u32 %v8140_v19, %v8136_v63  ;;  %v8224_v21 = vrot.slane %v8222_v13, 1  ;;  %v7795_v52 = vshll.u32 %v15536_v35, 16  ;;  %v478_v26 = vld [vmem:[#allocation3 + $0xf8] sm:$0x2] }
 0x351   : > { %v6383_v43 = vrot.slane %v11954_v58, 7  ;;  %v7792_v49 = vrot.slane %v7790_v0, 1  ;;  %v7799_v48 = vshrl.u32 %v15536_v35, 16  ;;  %v476_v12 = vsel %vm14908_vm12, 0, %v475_v53  ;;  %v5895_v1 = vpop.f32.mrf.mxu1  ;;  %v17062_v0 = vld [vmem:[#allocation116_spill] sm:$0xff] }
 0x352   : > { %v6114_v56 = vadd.f32 %v6068_v31, %v17061_v4  ;;  %v8146_v34 = vsel %vm6716_vm4, %v8141_v51, %v8145_v7  ;;  %v8225_v22 = vor.u32 %v8224_v21, %v8220_v10  ;;  %v7797_v18 = vrot.slane %v7795_v52, 1  ;;  %477 = vst [vmem:[#allocation3 + $0xe8] sm:$0x2] %v476_v12 }
 0x353   : > { %v6384_v40 = vsel %vm15208_vm14, %v6382_v61, %v6383_v43  ;;  %v6385_v20 = vrot.slane %v6383_v43, 4  ;;  %8648 = vmatprep.mubr.bf16.mxu0 %v8146_v34  ;;  %v7793_v14 = vor.u32 %v7792_v49, %v7788_v47  ;;  %v8167_v39 = vshll.u32 %v7799_v48, 16  ;;  %v15612_v36 = vld [vmem:[#allocation3 + $0xe0] sm:$0xff]  }
 0x354   : > { %6496 = vst [vmem:[#allocation3 + $0xf4] sm:$0xf] %v6384_v40  ;;  %v6155_v35 = vadd.f32 %v15464_v16, %v6114_v56  ;;  %v6071_v25 = vadd.f32 %v6070_v24, %v5893_v37  ;;  %v8230_v60 = vsel %vm6716_vm4, %v8225_v22, %v8229_v30  ;;  %8649 = vmatmul.mubr.bf16.gmra.mxu0 %v7784_v41  ;;  %v7802_v32 = vshrl.u32 %v15563_v6, 16  ;;  %v5898_v41 = vpop.f32.mrf.mxu1  ;;  %v15627_v47 = vld [vmem:[#allocation3 + $0xe8] ss:$0 sps:$4 sm:$0x33]  }
 0x355   : > { %6497 = vst [vmem:[#allocation3 + $0xf8] sm:$0x1] %v6385_v20  ;;  %12849 = vmatprep.mubr.bf16.mxu1 %v8230_v60  ;;  %v7798_v27 = vsel %vm6716_vm4, %v7793_v14, %v7797_v18  ;;  %v8169_v44 = vrot.slane %v8167_v39, 1  ;;  %v7910_v38 = vrot.slane %v15612_v36, 1  ;;  %v7804_v59 = vshll.u32 %v15563_v6, 16  ;;  %v17063_v20 = vld [vmem:[#allocation118_spill] sm:$0xff] }
 0x356   : > { %v6191_v45 = vmax.f32 %v6155_v35, 0.0  ;;  %v6115_v63 = vadd.f32 %v6071_v25, %v15340_v2  ;;  %v8160_v55 = vshrl.u32 %v7798_v27, 16  ;;  %v8162_v7 = vshll.u32 %v7798_v27, 16  ;;  %v5900_v2 = vpop.f32.mrf.mxu1 }
 0x357   : > { %v7806_v23 = vrot.slane %v7804_v59, 1  ;;  %v7809_v11 = vshll.u32 %v15566_v29, 16  ;;  %v7813_v3 = vshrl.u32 %v15566_v29, 16  ;;  %v422_v53 = vsel %vm14888_vm9, 0, %v421_v17 }
 0x358   : > { %v11955_v19 = vpack.c.bf16 %v6191_v45, %v6191_v45  ;;  %v6156_v10 = vadd.f32 %v15464_v16, %v6115_v63  ;;  %v6076_v6 = vadd.f32 %v15587_v50, %v5898_v41  ;;  %v8164_v13 = vrot.slane %v8162_v7, 1  ;;  %423 = vst [vmem:[#allocation3 + $0xf0] sm:$0x1] %v422_v53  ;;  %v5901_v51 = vpop.f32.mrf.mxu1 }
 0x359   : > { %v7807_v61 = vor.u32 %v7806_v23, %v7802_v32  ;;  %v7811_v58 = vrot.slane %v7809_v11, 1  ;;  %v7911_v21 = vrot.slane %v15627_v47, 1  ;;  %v8191_v43 = vshll.u32 %v7813_v3, 16 }
 0x35a   : > { %v6386_v57 = vrot.slane %v11955_v19, 7  ;;  %v6192_v30 = vmax.f32 %v6156_v10, 0.0  ;;  %v6116_v31 = vadd.f32 %v6076_v6, %v17062_v0  ;;  %v8165_v29 = vor.u32 %v8164_v13, %v8160_v55  ;;  %v5903_v22 = vpop.f32.mrf.mxu1  ;;  %v15650_v55 = vld [vmem:[#allocation3] sm:$0xff]  }
 0x35b   : > { %v15632_v52 = vsel %vm6716_vm4, %v7807_v61, %v7811_v58  ;;  %v479_v50 = vsel %vm14908_vm12, 0, %v478_v26  ;;  %v6079_v48 = vadd.f32 %v15599_v28, %v5901_v51  ;;  %v7912_v4 = vsel %vm6941_vm2, %v7910_v38, %v7911_v21 }
 0x35c   : > { %v6387_v8 = vrot.slane %v6386_v57, 4  ;;  %6498 = vst [vmem:[#allocation3 + $0x100] sm:$0xe] %v6386_v57  ;;  %v11956_v24 = vpack.c.bf16 %v6192_v30, %v6192_v30  ;;  %v6157_v49 = vadd.f32 %v15464_v16, %v6116_v31  ;;  %480 = vst [vmem:[#allocation3 + $0xf8] sm:$0x2] %v479_v50  ;;  %v8170_v12 = vsel %vm6716_vm4, %v8165_v29, %v8169_v44 }
 0x35d   : > { %v8251_v56 = vshll.u32 %v7911_v21, 16  ;;  %v8184_v34 = vshrl.u32 %v15632_v52, 16  ;;  %v6117_v37 = vadd.f32 %v6079_v48, %v17063_v20  ;;  %8656 = vmatprep.mubr.bf16.mxu0 %v8170_v12  ;;  %v8244_v14 = vshrl.u32 %v7912_v4, 16  ;;  %v15654_v53 = vld [vmem:[#allocation3 + $0xf8] ss:$0 sps:$4 sm:$0x33]  }
 0x35e   : > { %v6388_v18 = vrot.slane %v11956_v24, 7  ;;  %v6193_v40 = vmax.f32 %v6157_v49, 0.0  ;;  %v8246_v39 = vshll.u32 %v7912_v4, 16  ;;  %8657 = vmatmul.mubr.bf16.gmra.mxu0 %v7798_v27  ;;  %v8186_v28 = vshll.u32 %v15632_v52, 16  ;;  %v424_v27 = vld [vmem:[#allocation3 + $0x100] sm:$0x1] }
 0x35f   : > { %v8253_v35 = vrot.slane %v8251_v56, 1  ;;  %v8193_v25 = vrot.slane %v8191_v43, 1  ;;  %v6158_v1 = vadd.f32 %v15464_v16, %v6117_v37  ;;  %v15646_v44 = vld [vmem:[#allocation3 + $0xf0] sm:$0xff]   ;;  %v7816_v45 = vshrl.u32 %v15581_v33, 16  ;;  %v481_v16 = vld [vmem:[#allocation3 + $0x108] sm:$0x2] }
 0x360   : > { %v6389_v60 = vsel %vm15208_vm14, %v6387_v8, %v6388_v18  ;;  %v6390_v32 = vrot.slane %v6388_v18, 4  ;;  %v11957_v17 = vpack.c.bf16 %v6193_v40, %v6193_v40  ;;  %v8248_v38 = vrot.slane %v8246_v39, 1  ;;  %v15660_v30 = vld [vmem:[#allocation3 + $0x8] ss:$0 sps:$4 sm:$0x33]   ;;  %v15672_v56 = vld [vmem:[#allocation3 + $0x10] sm:$0xff]  }
 0x361   : > { %6499 = vst [vmem:[#allocation3 + $0x104] sm:$0xf] %v6389_v60  ;;  %v8188_v59 = vrot.slane %v8186_v28, 1  ;;  %v7818_v63 = vshll.u32 %v15581_v33, 16  ;;  %v6194_v26 = vmax.f32 %v6158_v1, 0.0  ;;  %v7913_v41 = vrot.slane %v15646_v44, 1 }
 0x362   : > { %6500 = vst [vmem:[#allocation3 + $0x108] sm:$0x1] %v6390_v32  ;;  %v6391_v7 = vrot.slane %v11957_v17, 7  ;;  %v7823_v23 = vshll.u32 %v15585_v9, 16  ;;  %v8249_v11 = vor.u32 %v8248_v38, %v8244_v14  ;;  %v7827_v13 = vshrl.u32 %v15585_v9, 16 }
 0x363   : > { %v8189_v3 = vor.u32 %v8188_v59, %v8184_v34  ;;  %v7820_v19 = vrot.slane %v7818_v63, 1  ;;  %v11958_v6 = vpack.c.bf16 %v6194_v26, %v6194_v26  ;;  %v7914_v58 = vrot.slane %v15654_v53, 1 }
 0x364   : > { %v6392_v10 = vrot.slane %v6391_v7, 4  ;;  %6501 = vst [vmem:[#allocation3 + $0x110] sm:$0xe] %v6391_v7  ;;  %v7825_v33 = vrot.slane %v7823_v23, 1  ;;  %v8254_v2 = vsel %vm6716_vm4, %v8249_v11, %v8253_v35  ;;  %v8215_v31 = vshll.u32 %v7827_v13, 16 }
 0x365   : > { %v8194_v61 = vsel %vm6716_vm4, %v8189_v3, %v8193_v25  ;;  %v7821_v57 = vor.u32 %v7820_v19, %v7816_v45  ;;  %v6393_v0 = vrot.slane %v11958_v6, 7  ;;  %12850 = vmatmul.mubr.bf16.gmra.mxu1 %v8254_v2  ;;  %v425_v29 = vsel %vm14888_vm9, 0, %v424_v27 }
 0x366   : > { %8664 = vmatprep.mubr.bf16.mxu0 %v8194_v61  ;;  %v482_v51 = vsel %vm14908_vm12, 0, %v481_v16  ;;  %v7915_v9 = vsel %vm6941_vm2, %v7913_v41, %v7914_v58  ;;  %v8275_v21 = vshll.u32 %v7914_v58, 16  ;;  %426 = vst [vmem:[#allocation3 + $0x100] sm:$0x1] %v425_v29  ;;  %v6718_v50 = vshrl.u32 %v15650_v55, 16 }
 0x367   : > { %8665 = vmatmul.mubr.bf16.gmra.mxu0 %v15632_v52  ;;  %v7826_v43 = vsel %vm6716_vm4, %v7821_v57, %v7825_v33  ;;  %483 = vst [vmem:[#allocation3 + $0x108] sm:$0x2] %v482_v51  ;;  %v6394_v8 = vsel %vm15208_vm14, %v6392_v10, %v6393_v0  ;;  %v6395_v24 = vrot.slane %v6393_v0, 4  ;;  %v8268_v54 = vshrl.u32 %v7915_v9, 16 }
 0x368   : > { %v8270_v49 = vshll.u32 %v7915_v9, 16  ;;  %6502 = vst [vmem:[#allocation3 + $0x114] sm:$0xf] %v6394_v8  ;;  %v8277_v15 = vrot.slane %v8275_v21, 1  ;;  %v8208_v48 = vshrl.u32 %v7826_v43, 16  ;;  %v8210_v12 = vshll.u32 %v7826_v43, 16 }
 0x369   : > { %v8217_v4 = vrot.slane %v8215_v31, 1  ;;  %6503 = vst [vmem:[#allocation3 + $0x118] sm:$0x1] %v6395_v24  ;;  %6533 = vst [vmem:[#allocation3 + $0x114] sm:$0xf] %v17050_v5  ;;  %v6720_v34 = vshll.u32 %v15650_v55, 16 }
 0x36a   : > { %v8272_v52 = vrot.slane %v8270_v49, 1  ;;  %v6725_v22 = vshll.u32 %v15660_v30, 16  ;;  %v6729_v62 = vshrl.u32 %v15660_v30, 16  ;;  %v8212_v40 = vrot.slane %v8210_v12, 1 }
 0x36b   : > { %v6530_v18 = vld [vmem:[#allocation3 + $0x110] sm:$0xf]  ;;  %v7830_v20 = vshrl.u32 %v15612_v36, 16  ;;  %v7832_v37 = vshll.u32 %v15612_v36, 16  ;;  %v7837_v14 = vshll.u32 %v15627_v47, 16  ;;  %v6722_v5 = vrot.slane %v6720_v34, 1 }
 0x36c   : > { %v6531_v39 = vsel %vm15244_vm0, 0, %v6530_v18  ;;  %v8273_v35 = vor.u32 %v8272_v52, %v8268_v54  ;;  %v6727_v28 = vrot.slane %v6725_v22, 1  ;;  %v8213_v25 = vor.u32 %v8212_v40, %v8208_v48  ;;  %v15688_v46 = vld [vmem:[#allocation3 + $0x108] ss:$0 sps:$4 sm:$0x33]   ;;  %v15708_v48 = vld [vmem:[#allocation3 + $0x20] sm:$0xff]  }
 0x36d   : > { %6532 = vst [vmem:[#allocation3 + $0x110] sm:$0xf] %v6531_v39  ;;  %v6998_v60 = vshll.u32 %v6729_v62, 16  ;;  %v7834_v32 = vrot.slane %v7832_v37, 1  ;;  %v7839_v17 = vrot.slane %v7837_v14, 1  ;;  %v15684_v38 = vld [vmem:[#allocation3 + $0x100] sm:$0xff]   ;;  %v6723_v59 = vor.u32 %v6722_v5, %v6718_v50 }
 0x36e   : > { %v8278_v1 = vsel %vm6716_vm4, %v8273_v35, %v8277_v15  ;;  %v7841_v36 = vshrl.u32 %v15627_v47, 16  ;;  %v8218_v45 = vsel %vm6716_vm4, %v8213_v25, %v8217_v4  ;;  %v6732_v7 = vshrl.u32 %v15672_v56, 16  ;;  %v15695_v16 = vld [vmem:[#allocation3 + $0x18] ss:$0 sps:$4 sm:$0x33]  }
 0x36f   : > { %12853 = vmatprep.mubr.bf16.mxu1 %v8278_v1  ;;  %v7000_v63 = vrot.slane %v6998_v60, 1  ;;  %v7835_v27 = vor.u32 %v7834_v32, %v7830_v20  ;;  %8672 = vmatprep.mubr.bf16.mxu0 %v8218_v45  ;;  %v7916_v26 = vrot.slane %v15684_v38, 1  ;;  %v15693_v41 = vsel %vm6716_vm4, %v6723_v59, %v6727_v28  ;;  %v15713_v22 = vld [vmem:[#allocation3 + $0x28] ss:$0 sps:$4 sm:$0x33]  }
 0x370   : > { %v8239_v23 = vshll.u32 %v7841_v36, 16  ;;  %v6734_v47 = vshll.u32 %v15672_v56, 16  ;;  %v6537_v11 = vld [vmem:[#allocation3 + $0x118] sm:$0x3]  ;;  %v7917_v3 = vrot.slane %v15688_v46, 1  ;;  %v6991_v19 = vshrl.u32 %v15693_v41, 16  ;;  %8673 = vmatmul.mubr.bf16.gmra.mxu0 %v7826_v43 }
 0x371   : > { %v6993_v10 = vshll.u32 %v15693_v41, 16  ;;  %v7840_v6 = vsel %vm6716_vm4, %v7835_v27, %v7839_v17  ;;  %v6538_v33 = vsel %vm15291_vm3, 0, %v6537_v11  ;;  %v6739_v21 = vshll.u32 %v15695_v16, 16 }
 0x372   : > { %v8232_v13 = vshrl.u32 %v7840_v6, 16  ;;  %v8234_v2 = vshll.u32 %v7840_v6, 16  ;;  %v8241_v61 = vrot.slane %v8239_v23, 1  ;;  %6539 = vst [vmem:[#allocation3 + $0x118] sm:$0x3] %v6538_v33  ;;  %v7918_v58 = vsel %vm6941_vm2, %v7916_v26, %v7917_v3 }
 0x373   : > { %v8299_v57 = vshll.u32 %v7917_v3, 16  ;;  %v6995_v0 = vrot.slane %v6993_v10, 1  ;;  %v6736_v31 = vrot.slane %v6734_v47, 1  ;;  %v8292_v29 = vshrl.u32 %v7918_v58, 16 }
 0x374   : > { %v8294_v51 = vshll.u32 %v7918_v58, 16  ;;  %v8236_v9 = vrot.slane %v8234_v2, 1  ;;  %v6743_v42 = vshrl.u32 %v15695_v16, 16  ;;  %v6741_v49 = vrot.slane %v6739_v21, 1 }
 0x375   : > { %v8301_v43 = vrot.slane %v8299_v57, 1  ;;  %v6996_v50 = vor.u32 %v6995_v0, %v6991_v19  ;;  %v6737_v8 = vor.u32 %v6736_v31, %v6732_v7  ;;  %v7844_v15 = vshrl.u32 %v15646_v44, 16  ;;  %v15732_v47 = vld [vmem:[#allocation3 + $0x38] ss:$0 sps:$4 sm:$0x33]  }
 0x376   : > { %v8296_v24 = vrot.slane %v8294_v51, 1  ;;  %v8237_v54 = vor.u32 %v8236_v9, %v8232_v13  ;;  %v7022_v4 = vshll.u32 %v6743_v42, 16  ;;  %v7846_v52 = vshll.u32 %v15646_v44, 16  ;;  %v13427_v9 = vld [vmem:[#allocation8 + $0x230] sm:$0xff]  }
 0x377   : > { %v7001_v12 = vsel %vm6716_vm4, %v6996_v50, %v7000_v63  ;;  %v7851_v34 = vshll.u32 %v15654_v53, 16  ;;  %v15717_v40 = vsel %vm6716_vm4, %v6737_v8, %v6741_v49  ;;  %v7855_v20 = vshrl.u32 %v15654_v53, 16  ;;  %v15729_v63 = vld [vmem:[#allocation3 + $0x30] sm:$0xff]   ;;  %v15745_v8 = vld [vmem:[#allocation3 + $0x40] sm:$0xff]  }
 0x378   : > { %v8297_v62 = vor.u32 %v8296_v24, %v8292_v29  ;;  %v8242_v18 = vsel %vm6716_vm4, %v8237_v54, %v8241_v61  ;;  %v7015_v37 = vshrl.u32 %v15717_v40, 16  ;;  %v7017_v14 = vshll.u32 %v15717_v40, 16 }
 0x379   : > { %8680 = vmatprep.mubr.bf16.mxu0 %v8242_v18  ;;  %v7024_v39 = vrot.slane %v7022_v4, 1  ;;  %v7848_v35 = vrot.slane %v7846_v52, 1  ;;  %v7853_v5 = vrot.slane %v7851_v34, 1  ;;  %v8263_v28 = vshll.u32 %v7855_v20, 16 }
 0x37a   : > { %v8302_v44 = vsel %vm6716_vm4, %v8297_v62, %v8301_v43  ;;  %8681 = vmatmul.mubr.bf16.gmra.mxu0 %v7840_v6  ;;  %v6746_v25 = vshrl.u32 %v15708_v48, 16  ;;  %v7019_v60 = vrot.slane %v7017_v14, 1  ;;  %v6748_v17 = vshll.u32 %v15708_v48, 16  ;;  %v13517_v62 = vld [vmem:[#allocation8 + $0x238] sm:$0xff]   ;;  %v13440_v14 = vld [vmem:[#allocation8 + $0x228] sm:$0xff]  }
 0x37b   : > { %12854 = vmatmul.mubr.bf16.gmra.mxu1 %v8302_v44  ;;  %v7849_v32 = vor.u32 %v7848_v35, %v7844_v15  ;;  %v6753_v53 = vshll.u32 %v15713_v22, 16  ;;  %v8265_v1 = vrot.slane %v8263_v28, 1  ;;  %v6757_v59 = vshrl.u32 %v15713_v22, 16  ;;  %v15752_v15 = vld [vmem:[#allocation3 + $0x48] ss:$0 sps:$4 sm:$0x33]  }
 0x37c   : > { %9042 = vmatprep.mubr.bf16.mxu1 %v7001_v12  ;;  %v7858_v36 = vshrl.u32 %v15684_v38, 16  ;;  %v7860_v45 = vshll.u32 %v15684_v38, 16  ;;  %v7020_v27 = vor.u32 %v7019_v60, %v7015_v37  ;;  %v6750_v26 = vrot.slane %v6748_v17, 1 }
 0x37d   : > { %v7854_v7 = vsel %vm6716_vm4, %v7849_v32, %v7853_v5  ;;  %v6755_v23 = vrot.slane %v6753_v53, 1  ;;  %v7046_v19 = vshll.u32 %v6757_v59, 16  ;;  %v7865_v13 = vshll.u32 %v15688_v46, 16 }
 0x37e   : > { %v8256_v11 = vshrl.u32 %v7854_v7, 16  ;;  %v8258_v3 = vshll.u32 %v7854_v7, 16  ;;  %v7862_v10 = vrot.slane %v7860_v45, 1  ;;  %v7025_v6 = vsel %vm6716_vm4, %v7020_v27, %v7024_v39  ;;  %v15769_v27 = vld [vmem:[#allocation3 + $0x50] sm:$0xff]  }
 0x37f   : > { %v6751_v33 = vor.u32 %v6750_v26, %v6746_v25  ;;  %v7869_v38 = vshrl.u32 %v15688_v46, 16  ;;  %v7048_v61 = vrot.slane %v7046_v19, 1  ;;  %v6760_v57 = vshrl.u32 %v15729_v63, 16 }
 0x380   : > { %v8260_v2 = vrot.slane %v8258_v3, 1  ;;  %v7863_v58 = vor.u32 %v7862_v10, %v7858_v36  ;;  %v7867_v31 = vrot.slane %v7865_v13, 1  ;;  %v6762_v51 = vshll.u32 %v15729_v63, 16 }
 0x381   : > { %v15739_v0 = vsel %vm6716_vm4, %v6751_v33, %v6755_v23  ;;  %v8287_v29 = vshll.u32 %v7869_v38, 16  ;;  %v6767_v46 = vshll.u32 %v15732_v47, 16  ;;  %v6771_v49 = vshrl.u32 %v15732_v47, 16 }
 0x382   : > { %v8261_v21 = vor.u32 %v8260_v2, %v8256_v11  ;;  %v7039_v43 = vshrl.u32 %v15739_v0, 16  ;;  %v7041_v50 = vshll.u32 %v15739_v0, 16  ;;  %v15749_v42 = vsel %vm6716_vm4, %v7863_v58, %v7867_v31 }
 0x383   : > { %9043 = vmatmul.mubr.bf16.vlgmr.msra.gmra.mxu1 %v15693_v41  ;;  %v8289_v24 = vrot.slane %v8287_v29, 1  ;;  %v6764_v54 = vrot.slane %v6762_v51, 1  ;;  %v8280_v52 = vshrl.u32 %v15749_v42, 16  ;;  %v8282_v34 = vshll.u32 %v15749_v42, 16  ;;  %v13462_v29 = vld [vmem:[#allocation8 + $0x218] sm:$0xff]  }
 0x384   : > { %9050 = vmatprep.mubr.bf16.mxu1 %v7025_v6  ;;  %v8266_v12 = vsel %vm6716_vm4, %v8261_v21, %v8265_v1  ;;  %v7043_v4 = vrot.slane %v7041_v50, 1  ;;  %12906 = vmatpush3.bf16.msra.mxu1 %v13517_v62  ;;  %v6769_v18 = vrot.slane %v6767_v46, 1  ;;  %v7070_v20 = vshll.u32 %v6771_v49, 16 }
 0x385   : > { %8688 = vmatprep.mubr.bf16.mxu0 %v8266_v12  ;;  %v6765_v41 = vor.u32 %v6764_v54, %v6760_v57  ;;  %v6942_v37 = vrot.slane %v15650_v55, 1  ;;  %12907 = vmatprep.subr.bf16.mxu1 %v13427_v9  ;;  %v8284_v35 = vrot.slane %v8282_v34, 1  ;;  %v6943_v44 = vrot.slane %v15660_v30, 1  ;;  %v13467_v34 = vld [vmem:[#allocation8 + $0x210] sm:$0xff]  }
 0x386   : > { %v7044_v39 = vor.u32 %v7043_v4, %v7039_v43  ;;  %8689 = vmatmul.mubr.bf16.gmra.mxu0 %v7854_v7  ;;  %v6774_v5 = vshrl.u32 %v15745_v8, 16  ;;  %v7072_v25 = vrot.slane %v7070_v20, 1  ;;  %v6776_v60 = vshll.u32 %v15745_v8, 16  ;;  %v13453_v7 = vld [vmem:[#allocation8 + $0x220] sm:$0xff]  }
 0x387   : > { %v15761_v28 = vsel %vm6716_vm4, %v6765_v41, %v6769_v18  ;;  %v6781_v32 = vshll.u32 %v15752_v15, 16  ;;  %v8285_v55 = vor.u32 %v8284_v35, %v8280_v52  ;;  %v6944_v30 = vsel %vm6941_vm2, %v6942_v37, %v6943_v44  ;;  %v15793_v37 = vld [vmem:[#allocation3 + $0x60] sm:$0xff]  }
 0x388   : > { %v7049_v17 = vsel %vm6716_vm4, %v7044_v39, %v7048_v61  ;;  %v7063_v53 = vshrl.u32 %v15761_v28, 16  ;;  %v7065_v1 = vshll.u32 %v15761_v28, 16  ;;  %12908 = vmatpush3.bf16.msra.mxu1 %v13427_v9  ;;  %v7010_v59 = vshll.u32 %v6943_v44, 16  ;;  %v15786_v9 = vld [vmem:[#allocation3 + $0x58] ss:$0 sps:$4 sm:$0x33]  }
 0x389   : > { %v6778_v36 = vrot.slane %v6776_v60, 1  ;;  %v6783_v45 = vrot.slane %v6781_v32, 1  ;;  %12909 = vmatprep.subr.bf16.mxu1 %v13440_v14  ;;  %v8290_v26 = vsel %vm6716_vm4, %v8285_v55, %v8289_v24  ;;  %v7003_v11 = vshrl.u32 %v6944_v30, 16  ;;  %v13417_v60 = vld [vmem:[#allocation8 + $0x1b8] sm:$0xff]  }
 0x38a   : > { %v7067_v23 = vrot.slane %v7065_v1, 1  ;;  %v7005_v3 = vshll.u32 %v6944_v30, 16  ;;  %8696 = vmatprep.mubr.bf16.mxu0 %v8290_v26  ;;  %v7012_v19 = vrot.slane %v7010_v59, 1  ;;  %v6785_v6 = vshrl.u32 %v15752_v15, 16 }
 0x38b   : > { %9051 = vmatmul.mubr.bf16.gmra.mxu1 %v15717_v40  ;;  %v6779_v10 = vor.u32 %v6778_v36, %v6774_v5  ;;  %v6945_v33 = vrot.slane %v15672_v56, 1  ;;  %v6946_v2 = vrot.slane %v15695_v16, 1  ;;  %v6948_v61 = vrot.slane %v15708_v48, 1 }
 0x38c   : > { %9058 = vmatprep.mubr.bf16.mxu1 %v7049_v17  ;;  %v7068_v13 = vor.u32 %v7067_v23, %v7063_v53  ;;  %v7007_v38 = vrot.slane %v7005_v3, 1  ;;  %12910 = vmatpush3.bf16.msra.mxu1 %v13440_v14  ;;  %v7094_v57 = vshll.u32 %v6785_v6, 16  ;;  %v6949_v40 = vrot.slane %v15713_v22, 1  ;;  %v15809_v3 = vld [vmem:[#allocation3 + $0x68] ss:$0 sps:$4 sm:$0x33]  }
 0x38d   : > { %v15778_v58 = vsel %vm6716_vm4, %v6779_v10, %v6783_v45  ;;  %v6788_v31 = vshrl.u32 %v15769_v27, 16  ;;  %12911 = vmatprep.subr.bf16.mxu1 %v13453_v7  ;;  %v6947_v43 = vsel %vm6941_vm2, %v6945_v33, %v6946_v2  ;;  %v7034_v50 = vshll.u32 %v6946_v2, 16  ;;  %v13422_v6 = vld [vmem:[#allocation8 + $0x1b0] sm:$0xff]  }
 0x38e   : > { %v7073_v56 = vsel %vm6716_vm4, %v7068_v13, %v7072_v25  ;;  %8697 = vmatmul.mubr.bf16.gmra.mxu0 %v15749_v42  ;;  %v7008_v51 = vor.u32 %v7007_v38, %v7003_v11  ;;  %v7087_v16 = vshrl.u32 %v15778_v58, 16  ;;  %v7089_v48 = vshll.u32 %v15778_v58, 16 }
 0x38f   : > { %v7096_v21 = vrot.slane %v7094_v57, 1  ;;  %v6950_v22 = vsel %vm6941_vm2, %v6948_v61, %v6949_v40  ;;  %v7027_v54 = vshrl.u32 %v6947_v43, 16  ;;  %v7029_v49 = vshll.u32 %v6947_v43, 16  ;;  %v13425_v61 = vld [vmem:[#allocation8 + $0x1e8] sm:$0xff]  }
 0x390   : > { %v7013_v46 = vsel %vm6716_vm4, %v7008_v51, %v7012_v19  ;;  %v7091_v24 = vrot.slane %v7089_v48, 1  ;;  %12912 = vmatpush3.bf16.msra.mxu1 %v13453_v7  ;;  %v7036_v42 = vrot.slane %v7034_v50, 1  ;;  %v7051_v12 = vshrl.u32 %v6950_v22, 16  ;;  %v13470_v7 = vld [vmem:[#allocation8 + $0x208] sm:$0xff]  }
 0x391   : > { %12873 = vmatprep.mubr.bf16.mxu0 %v7013_v46  ;;  %v7053_v4 = vshll.u32 %v6950_v22, 16  ;;  %v7058_v52 = vshll.u32 %v6949_v40, 16  ;;  %12913 = vmatprep.subr.bf16.mxu1 %v13462_v29  ;;  %v7031_v41 = vrot.slane %v7029_v49, 1  ;;  %v6790_v18 = vshll.u32 %v15769_v27, 16 }
 0x392   : > { %v7092_v62 = vor.u32 %v7091_v24, %v7087_v16  ;;  %v6795_v20 = vshll.u32 %v15786_v9, 16  ;;  %v6799_v35 = vshrl.u32 %v15786_v9, 16  ;;  %v6951_v44 = vrot.slane %v15729_v63, 1  ;;  %v13426_v24 = vld [vmem:[#allocation8 + $0x1a8] sm:$0xff]  }
 0x393   : > { %9059 = vmatmul.mubr.bf16.gmra.mxu1 %v15739_v0  ;;  %v7055_v14 = vrot.slane %v7053_v4, 1  ;;  %v7060_v39 = vrot.slane %v7058_v52, 1  ;;  %v7032_v25 = vor.u32 %v7031_v41, %v7027_v54  ;;  %v6792_v32 = vrot.slane %v6790_v18, 1  ;;  %v13421_v0 = vld [vmem:[#allocation8 + $0x1f0] sm:$0xff]  }
 0x394   : > { %9066 = vmatprep.mubr.bf16.mxu1 %v7073_v56  ;;  %v7097_v5 = vsel %vm6716_vm4, %v7092_v62, %v7096_v21  ;;  %v6797_v17 = vrot.slane %v6795_v20, 1  ;;  %12914 = vmatpush3.bf16.msra.mxu1 %v13462_v29  ;;  %v15799_v53 = vshll.u32 %v6799_v35, 16  ;;  %v6952_v1 = vrot.slane %v15732_v47, 1  ;;  %v13471_v56 = vld [vmem:[#allocation8 + $0x200] sm:$0xff]   ;;  %v15825_v62 = vld [vmem:[#allocation3 + $0x70] sm:$0xff]  }
 0x395   : > { %v7056_v55 = vor.u32 %v7055_v14, %v7051_v12  ;;  %v6954_v30 = vrot.slane %v15745_v8, 1  ;;  %12915 = vmatprep.subr.bf16.mxu1 %v13467_v34  ;;  %v7037_v59 = vsel %vm6716_vm4, %v7032_v25, %v7036_v42  ;;  %v6793_v63 = vor.u32 %v6792_v32, %v6788_v31  ;;  %v15827_v41 = vld [vmem:[#allocation3 + $0x78] ss:$0 sps:$4 sm:$0x33]  }
 0x396   : > { %v6955_v36 = vrot.slane %v15752_v15, 1  ;;  %v6802_v45 = vshrl.u32 %v15793_v37, 16  ;;  %12874 = vmatmul.mubr.bf16.vlgmr.msra.gmra.mxu0 %v7037_v59  ;;  %v7120_v23 = vrot.slane %v15799_v53, 1  ;;  %v6953_v11 = vsel %vm6941_vm2, %v6951_v44, %v6952_v1  ;;  %v15841_v59 = vld [vmem:[#allocation3 + $0x80] sm:$0xff]  }
 0x397   : > { %v7061_v26 = vsel %vm6716_vm4, %v7056_v55, %v7060_v39  ;;  %v7082_v47 = vshll.u32 %v6952_v1, 16  ;;  %12518 = vmatpush3.bf16.msra.mxu0 %v13417_v60  ;;  %v15812_v8 = vsel %vm6716_vm4, %v6793_v63, %v6797_v17  ;;  %v7075_v19 = vshrl.u32 %v6953_v11, 16  ;;  %v13436_v55 = vld [vmem:[#allocation8 + $0x1d8] sm:$0xff]  }
 0x398   : > { %12877 = vmatprep.mubr.bf16.mxu0 %v7061_v26  ;;  %v7077_v15 = vshll.u32 %v6953_v11, 16  ;;  %v6956_v10 = vsel %vm6941_vm2, %v6954_v30, %v6955_v36  ;;  %v7111_v33 = vshrl.u32 %v15812_v8, 16  ;;  %v7113_v13 = vshll.u32 %v15812_v8, 16  ;;  %12519 = vmatprep.subr.bf16.mxu0 %v13421_v0  ;;  %v15846_v26 = vld [vmem:[#allocation3 + $0x88] ss:$0 sps:$4 sm:$0x33]  }
 0x399   : > { %v7084_v38 = vrot.slane %v7082_v47, 1  ;;  %v7099_v2 = vshrl.u32 %v6956_v10, 16  ;;  %12916 = vmatpush3.bf16.msra.mxu1 %v13467_v34  ;;  %v7101_v40 = vshll.u32 %v6956_v10, 16  ;;  %v7106_v31 = vshll.u32 %v6955_v36, 16 }
 0x39a   : > { %v7079_v57 = vrot.slane %v7077_v15, 1  ;;  %v6804_v29 = vshll.u32 %v15793_v37, 16  ;;  %12917 = vmatprep.subr.bf16.mxu1 %v13470_v7  ;;  %v7115_v51 = vrot.slane %v7113_v13, 1  ;;  %v6809_v16 = vshll.u32 %v15809_v3, 16 }
 0x39b   : > { %9067 = vmatmul.mubr.bf16.gmra.mxu1 %v15761_v28  ;;  %v6813_v48 = vshrl.u32 %v15809_v3, 16  ;;  %v6957_v21 = vrot.slane %v15769_v27, 1  ;;  %v7103_v50 = vrot.slane %v7101_v40, 1  ;;  %v7108_v22 = vrot.slane %v7106_v31, 1  ;;  %12520 = vmatpush3.bf16.msra.mxu0 %v13422_v6  ;;  %v13430_v28 = vld [vmem:[#allocation8 + $0x1e0] sm:$0xff]  }
 0x39c   : > { %9074 = vmatprep.mubr.bf16.mxu1 %v7097_v5  ;;  %v7080_v43 = vor.u32 %v7079_v57, %v7075_v19  ;;  %v6806_v46 = vrot.slane %v6804_v29, 1  ;;  %v7116_v54 = vor.u32 %v7115_v51, %v7111_v33  ;;  %v6811_v49 = vrot.slane %v6809_v16, 1  ;;  %12521 = vmatprep.subr.bf16.mxu0 %v13425_v61  ;;  %v13439_v19 = vld [vmem:[#allocation8 + $0x198] sm:$0xff]  }
 0x39d   : > { %v7142_v42 = vshll.u32 %v6813_v48, 16  ;;  %v6958_v12 = vrot.slane %v15786_v9, 1  ;;  %12918 = vmatpush3.bf16.msra.mxu1 %v13470_v7  ;;  %v7104_v52 = vor.u32 %v7103_v50, %v7099_v2  ;;  %v6960_v27 = vrot.slane %v15793_v37, 1  ;;  %v13433_v37 = vld [vmem:[#allocation8 + $0x1a0] sm:$0xff]  }
 0x39e   : > { %v7085_v4 = vsel %vm6716_vm4, %v7080_v43, %v7084_v38  ;;  %v6807_v34 = vor.u32 %v6806_v46, %v6802_v45  ;;  %12919 = vmatprep.subr.bf16.mxu1 %v13471_v56  ;;  %v7121_v18 = vsel %vm6716_vm4, %v7116_v54, %v7120_v23  ;;  %v6961_v17 = vrot.slane %v15809_v3, 1  ;;  %v15863_v54 = vld [vmem:[#allocation3 + $0x98] ss:$0 sps:$4 sm:$0x33]  }
 0x39f   : > { %12878 = vmatmul.mubr.bf16.gmra.mxu0 %v7085_v4  ;;  %v7144_v20 = vrot.slane %v7142_v42, 1  ;;  %v6959_v9 = vsel %vm6941_vm2, %v6957_v21, %v6958_v12  ;;  %v7130_v14 = vshll.u32 %v6958_v12, 16  ;;  %v7109_v39 = vsel %vm6716_vm4, %v7104_v52, %v7108_v22  ;;  %v13446_v21 = vld [vmem:[#allocation8 + $0x190] sm:$0xff]   ;;  %v15867_v52 = vld [vmem:[#allocation3 + $0xa8] ss:$0 sps:$4 sm:$0x33]  }
 0x3a0   : > { %v15833_v35 = vsel %vm6716_vm4, %v6807_v34, %v6811_v49  ;;  %v7123_v44 = vshrl.u32 %v6959_v9, 16  ;;  %v7125_v5 = vshll.u32 %v6959_v9, 16  ;;  %12522 = vmatpush3.bf16.msra.mxu0 %v13426_v24  ;;  %12881 = vmatprep.mubr.bf16.mxu0 %v7109_v39  ;;  %v6816_v1 = vshrl.u32 %v15825_v62, 16  ;;  %v15861_v24 = vld [vmem:[#allocation3 + $0x90] sm:$0xff]   ;;  %v13449_v49 = vld [vmem:[#allocation8 + $0x1c8] sm:$0xff]   ;;  %v15872_v39 = vld [vmem:[#allocation3 + $0xa0] sm:$0xff]  }
 0x3a1   : > { %v7135_v25 = vshrl.u32 %v15833_v35, 16  ;;  %v7137_v60 = vshll.u32 %v15833_v35, 16  ;;  %v7132_v32 = vrot.slane %v7130_v14, 1  ;;  %12523 = vmatprep.subr.bf16.mxu0 %v13430_v28  ;;  %v6818_v0 = vshll.u32 %v15825_v62, 16  ;;  %12920 = vmatpush3.bf16.msra.mxu1 %v13471_v56 }
 0x3a2   : > { %v7127_v53 = vrot.slane %v7125_v5, 1  ;;  %v6823_v30 = vshll.u32 %v15827_v41, 16  ;;  %v6962_v36 = vsel %vm6941_vm2, %v6960_v27, %v6961_v17  ;;  %v7154_v45 = vshll.u32 %v6961_v17, 16 }
 0x3a3   : > { %9075 = vmatmul.mubr.bf16.gmra.mxu1 %v15778_v58  ;;  %v7139_v63 = vrot.slane %v7137_v60, 1  ;;  %v6827_v7 = vshrl.u32 %v15827_v41, 16  ;;  %v7147_v11 = vshrl.u32 %v6962_v36, 16  ;;  %v7149_v47 = vshll.u32 %v6962_v36, 16  ;;  %v13443_v58 = vld [vmem:[#allocation8 + $0x1d0] sm:$0xff]   ;;  %v13456_v60 = vld [vmem:[#allocation8 + $0x1c0] sm:$0xff]  }
 0x3a4   : > { %9082 = vmatprep.mubr.bf16.mxu1 %v7121_v18  ;;  %v7128_v23 = vor.u32 %v7127_v53, %v7123_v44  ;;  %v6820_v3 = vrot.slane %v6818_v0, 1  ;;  %12524 = vmatpush3.bf16.msra.mxu0 %v13433_v37  ;;  %v7156_v10 = vrot.slane %v7154_v45, 1  ;;  %v6825_v6 = vrot.slane %v6823_v30, 1  ;;  %v13452_v44 = vld [vmem:[#allocation8 + $0x188] sm:$0xff]  }
 0x3a5   : > { %v7140_v15 = vor.u32 %v7139_v63, %v7135_v25  ;;  %v7166_v33 = vshll.u32 %v6827_v7, 16  ;;  %12525 = vmatprep.subr.bf16.mxu0 %v13436_v55  ;;  %v7151_v38 = vrot.slane %v7149_v47, 1  ;;  %v6963_v61 = vrot.slane %v15825_v62, 1 }
 0x3a6   : > { %v7133_v13 = vsel %vm6716_vm4, %v7128_v23, %v7132_v32  ;;  %v6821_v2 = vor.u32 %v6820_v3, %v6816_v1  ;;  %v6964_v31 = vrot.slane %v15827_v41, 1  ;;  %v6966_v29 = vrot.slane %v15841_v59, 1 }
 0x3a7   : > { %v7145_v57 = vsel %vm6716_vm4, %v7140_v15, %v7144_v20  ;;  %12882 = vmatmul.mubr.bf16.gmra.mxu0 %v7133_v13  ;;  %v7168_v40 = vrot.slane %v7166_v33, 1  ;;  %v7152_v56 = vor.u32 %v7151_v38, %v7147_v11  ;;  %v6967_v16 = vrot.slane %v15846_v26, 1  ;;  %v15887_v33 = vld [vmem:[#allocation3 + $0xb0] sm:$0xff]  }
 0x3a8   : > { %v15854_v51 = vsel %vm6716_vm4, %v6821_v2, %v6825_v6  ;;  %v6830_v48 = vshrl.u32 %v15841_v59, 16  ;;  %12526 = vmatpush3.bf16.msra.mxu0 %v13439_v19  ;;  %v6965_v22 = vsel %vm6941_vm2, %v6963_v61, %v6964_v31  ;;  %v7178_v46 = vshll.u32 %v6964_v31, 16 }
 0x3a9   : > { %v7159_v43 = vshrl.u32 %v15854_v51, 16  ;;  %v7161_v50 = vshll.u32 %v15854_v51, 16  ;;  %12527 = vmatprep.subr.bf16.mxu0 %v13443_v58  ;;  %v7157_v42 = vsel %vm6716_vm4, %v7152_v56, %v7156_v10  ;;  %v7171_v12 = vshrl.u32 %v6965_v22, 16  ;;  %v15889_v58 = vld [vmem:[#allocation3 + $0xb8] ss:$0 sps:$4 sm:$0x33]  }
 0x3aa   : > { %v7173_v28 = vshll.u32 %v6965_v22, 16  ;;  %v6968_v4 = vsel %vm6941_vm2, %v6966_v29, %v6967_v16  ;;  %12885 = vmatprep.mubr.bf16.mxu0 %v7157_v42  ;;  %v7180_v27 = vrot.slane %v7178_v46, 1  ;;  %v7202_v20 = vshll.u32 %v6967_v16, 16  ;;  %v15897_v16 = vld [vmem:[#allocation3 + $0xc0] sm:$0xff]  }
 0x3ab   : > { %9083 = vmatmul.mubr.bf16.gmra.mxu1 %v15812_v8  ;;  %v7163_v34 = vrot.slane %v7161_v50, 1  ;;  %v7195_v62 = vshrl.u32 %v6968_v4, 16  ;;  %v7197_v41 = vshll.u32 %v6968_v4, 16  ;;  %v6832_v9 = vshll.u32 %v15841_v59, 16 }
 0x3ac   : > { %9090 = vmatprep.mubr.bf16.mxu1 %v7145_v57  ;;  %v7175_v18 = vrot.slane %v7173_v28, 1  ;;  %v6837_v14 = vshll.u32 %v15846_v26, 16  ;;  %12528 = vmatpush3.bf16.msra.mxu0 %v13446_v21  ;;  %v6841_v8 = vshrl.u32 %v15846_v26, 16  ;;  %v6969_v25 = vrot.slane %v15861_v24, 1  ;;  %v13457_v26 = vld [vmem:[#allocation8 + $0x180] sm:$0xff]  }
 0x3ad   : > { %v7164_v5 = vor.u32 %v7163_v34, %v7159_v43  ;;  %v7199_v37 = vrot.slane %v7197_v41, 1  ;;  %12529 = vmatprep.subr.bf16.mxu0 %v13449_v49  ;;  %v7204_v17 = vrot.slane %v7202_v20, 1  ;;  %v6834_v55 = vrot.slane %v6832_v9, 1  ;;  %v15894_v57 = vld [vmem:[#allocation3 + $0xc8] ss:$0 sps:$4 sm:$0x33]  }
 0x3ae   : > { %v7176_v32 = vor.u32 %v7175_v18, %v7171_v12  ;;  %v6839_v53 = vrot.slane %v6837_v14, 1  ;;  %v7190_v30 = vshll.u32 %v6841_v8, 16  ;;  %v6970_v59 = vrot.slane %v15863_v54, 1  ;;  %v15913_v8 = vld [vmem:[#allocation3 + $0xd0] sm:$0xff]  }
 0x3af   : > { %v7169_v1 = vsel %vm6716_vm4, %v7164_v5, %v7168_v40  ;;  %v7200_v0 = vor.u32 %v7199_v37, %v7195_v62  ;;  %v6835_v36 = vor.u32 %v6834_v55, %v6830_v48  ;;  %v6972_v45 = vrot.slane %v15872_v39, 1 }
 0x3b0   : > { %v7181_v63 = vsel %vm6716_vm4, %v7176_v32, %v7180_v27  ;;  %v6973_v7 = vrot.slane %v15867_v52, 1  ;;  %12530 = vmatpush3.bf16.msra.mxu0 %v13452_v44  ;;  %v7192_v11 = vrot.slane %v7190_v30, 1  ;;  %v6971_v47 = vsel %vm6941_vm2, %v6969_v25, %v6970_v59  ;;  %v15903_v42 = vpop.f32.mrf.mxu0 }
 0x3b1   : > { %12886 = vmatmul.mubr.bf16.gmra.mxu0 %v7181_v63  ;;  %v7205_v23 = vsel %vm6716_vm4, %v7200_v0, %v7204_v17  ;;  %v7226_v3 = vshll.u32 %v6970_v59, 16  ;;  %12531 = vmatprep.subr.bf16.mxu0 %v13456_v60  ;;  %v15884_v19 = vsel %vm6716_vm4, %v6835_v36, %v6839_v53  ;;  %v7219_v15 = vshrl.u32 %v6971_v47, 16  ;;  %v15922_v53 = vld [vmem:[#allocation3 + $0xd8] ss:$0 sps:$4 sm:$0x33]  }
 0x3b2   : > { %12889 = vmatprep.mubr.bf16.mxu0 %v7205_v23  ;;  %v7221_v10 = vshll.u32 %v6971_v47, 16  ;;  %v6974_v6 = vsel %vm6941_vm2, %v6972_v45, %v6973_v7  ;;  %v7183_v13 = vshrl.u32 %v15884_v19, 16  ;;  %v7185_v38 = vshll.u32 %v15884_v19, 16  ;;  %v15915_v25 = vpop.f32.mrf.mxu0 }
 0x3b3   : > { %9091 = vmatmul.mubr.bf16.gmra.mxu1 %v15833_v35  ;;  %v7228_v2 = vrot.slane %v7226_v3, 1  ;;  %v7243_v61 = vshrl.u32 %v6974_v6, 16  ;;  %v7245_v31 = vshll.u32 %v6974_v6, 16  ;;  %v7250_v29 = vshll.u32 %v6973_v7, 16  ;;  %v15927_v7 = vld [vmem:[#allocation3 + $0xe0] sm:$0xff]  }
 0x3b4   : > { %9098 = vmatprep.mubr.bf16.mxu1 %v7169_v1  ;;  %v7223_v40 = vrot.slane %v7221_v10, 1  ;;  %v6844_v56 = vshrl.u32 %v15861_v24, 16  ;;  %12532 = vmatpush3.bf16.msra.mxu0 %v13457_v26  ;;  %v7187_v48 = vrot.slane %v7185_v38, 1  ;;  %v6846_v35 = vshll.u32 %v15861_v24, 16  ;;  %v15932_v3 = vpop.f32.mrf.mxu0 }
 0x3b5   : > { %v6851_v21 = vshll.u32 %v15863_v54, 16  ;;  %v6855_v43 = vshrl.u32 %v15863_v54, 16  ;;  %v7247_v22 = vrot.slane %v7245_v31, 1  ;;  %v7252_v46 = vrot.slane %v7250_v29, 1 }
 0x3b6   : > { %v7224_v50 = vor.u32 %v7223_v40, %v7219_v15  ;;  %v6975_v49 = vrot.slane %v15887_v33, 1  ;;  %v7188_v12 = vor.u32 %v7187_v48, %v7183_v13  ;;  %v6848_v28 = vrot.slane %v6846_v35, 1  ;;  %v15935_v40 = vld [vmem:[#allocation3 + $0xe8] ss:$0 sps:$4 sm:$0x33]  }
 0x3b7   : > { %v6853_v4 = vrot.slane %v6851_v21, 1  ;;  %v7214_v34 = vshll.u32 %v6855_v43, 16  ;;  %v7248_v62 = vor.u32 %v7247_v22, %v7243_v61  ;;  %v6976_v24 = vrot.slane %v15889_v58, 1 }
 0x3b8   : > { %v7229_v27 = vsel %vm6716_vm4, %v7224_v50, %v7228_v2  ;;  %v6978_v41 = vrot.slane %v15897_v16, 1  ;;  %v7193_v54 = vsel %vm6716_vm4, %v7188_v12, %v7192_v11  ;;  %v6849_v18 = vor.u32 %v6848_v28, %v6844_v56  ;;  %v15941_v50 = vpop.f32.mrf.mxu0 }
 0x3b9   : > { %12890 = vmatmul.mubr.bf16.gmra.mxu0 %v7229_v27  ;;  %v7216_v20 = vrot.slane %v7214_v34, 1  ;;  %v6979_v9 = vrot.slane %v15894_v57, 1  ;;  %v7253_v14 = vsel %vm6716_vm4, %v7248_v62, %v7252_v46  ;;  %v6977_v44 = vsel %vm6941_vm2, %v6975_v49, %v6976_v24 }
 0x3ba   : > { %v7274_v5 = vshll.u32 %v6976_v24, 16  ;;  %v6858_v37 = vshrl.u32 %v15872_v39, 16  ;;  %12893 = vmatprep.mubr.bf16.mxu0 %v7253_v14  ;;  %v15919_v60 = vsel %vm6716_vm4, %v6849_v18, %v6853_v4  ;;  %v7267_v32 = vshrl.u32 %v6977_v44, 16  ;;  %v15956_v18 = vld [vmem:[#allocation3 + $0xf0] sm:$0xff]  }
 0x3bb   : > { %9099 = vmatmul.mubr.bf16.gmra.mxu1 %v15854_v51  ;;  %v7269_v17 = vshll.u32 %v6977_v44, 16  ;;  %v6980_v55 = vsel %vm6941_vm2, %v6978_v41, %v6979_v9  ;;  %v7207_v1 = vshrl.u32 %v15919_v60, 16  ;;  %v7209_v0 = vshll.u32 %v15919_v60, 16 }
 0x3bc   : > { %9106 = vmatprep.mubr.bf16.mxu1 %v7193_v54  ;;  %v7276_v30 = vrot.slane %v7274_v5, 1  ;;  %v7291_v59 = vshrl.u32 %v6980_v55, 16  ;;  %v7293_v36 = vshll.u32 %v6980_v55, 16  ;;  %v7298_v51 = vshll.u32 %v6979_v9, 16 }
 0x3bd   : > { %v7271_v63 = vrot.slane %v7269_v17, 1  ;;  %v6860_v45 = vshll.u32 %v15872_v39, 16  ;;  %v7211_v26 = vrot.slane %v7209_v0, 1  ;;  %v6865_v23 = vshll.u32 %v15867_v52, 16 }
 0x3be   : > { %v6869_v11 = vshrl.u32 %v15867_v52, 16  ;;  %v6981_v47 = vrot.slane %v15913_v8, 1  ;;  %v7295_v10 = vrot.slane %v7293_v36, 1  ;;  %v7300_v6 = vrot.slane %v7298_v51, 1 }
 0x3bf   : > { %v7272_v15 = vor.u32 %v7271_v63, %v7267_v32  ;;  %v6862_v13 = vrot.slane %v6860_v45, 1  ;;  %v7212_v38 = vor.u32 %v7211_v26, %v7207_v1  ;;  %v6867_v2 = vrot.slane %v6865_v23, 1  ;;  %v15966_v0 = vld [vmem:[#allocation3 + $0x28] ss:$0 sps:$4 sm:$0x33]  }
 0x3c0   : > { %v7238_v61 = vshll.u32 %v6869_v11, 16  ;;  %v6982_v39 = vrot.slane %v15922_v53, 1  ;;  %v7296_v29 = vor.u32 %v7295_v10, %v7291_v59  ;;  %v6984_v52 = vrot.slane %v15927_v7, 1 }
 0x3c1   : > { %v7277_v31 = vsel %vm6716_vm4, %v7272_v15, %v7276_v30  ;;  %v6863_v56 = vor.u32 %v6862_v13, %v6858_v37  ;;  %v7217_v48 = vsel %vm6716_vm4, %v7212_v38, %v7216_v20  ;;  %v6985_v27 = vrot.slane %v15935_v40, 1  ;;  %v15958_v20 = vld [vmem:[#allocation3 + $0x20] sm:$0xff]   ;;  %v15962_v37 = vld [vmem:[#allocation3 + $0xf8] ss:$0 sps:$4 sm:$0x33]  }
 0x3c2   : > { %12894 = vmatmul.mubr.bf16.gmra.mxu0 %v7277_v31  ;;  %v7240_v35 = vrot.slane %v7238_v61, 1  ;;  %v6983_v21 = vsel %vm6941_vm2, %v6981_v47, %v6982_v39  ;;  %v7322_v43 = vshll.u32 %v6982_v39, 16  ;;  %v7301_v22 = vsel %vm6716_vm4, %v7296_v29, %v7300_v6 }
 0x3c3   : > { %9107 = vmatmul.mubr.bf16.gmra.mxu1 %v15884_v19  ;;  %v15946_v46 = vsel %vm6716_vm4, %v6863_v56, %v6867_v2  ;;  %v7315_v49 = vshrl.u32 %v6983_v21, 16  ;;  %v7317_v12 = vshll.u32 %v6983_v21, 16  ;;  %12897 = vmatprep.mubr.bf16.mxu0 %v7301_v22  ;;  %v6872_v19 = vshrl.u32 %v15887_v33, 16 }
 0x3c4   : > { %9114 = vmatprep.mubr.bf16.mxu1 %v7217_v48  ;;  %v7231_v28 = vshrl.u32 %v15946_v46, 16  ;;  %v7233_v4 = vshll.u32 %v15946_v46, 16  ;;  %v7324_v34 = vrot.slane %v7322_v43, 1  ;;  %v15951_v62 = vpop.f32.mrf.mxu0  ;;  %v6874_v41 = vshll.u32 %v15887_v33, 16 }
 0x3c5   : > { %v7319_v24 = vrot.slane %v7317_v12, 1  ;;  %v6879_v54 = vshll.u32 %v15889_v58, 16  ;;  %v6986_v14 = vsel %vm6941_vm2, %v6984_v52, %v6985_v27  ;;  %v7346_v44 = vshll.u32 %v6985_v27, 16 }
 0x3c6   : > { %v7235_v9 = vrot.slane %v7233_v4, 1  ;;  %v6883_v5 = vshrl.u32 %v15889_v58, 16  ;;  %v15964_v32 = vpop.f32.mrf.mxu0  ;;  %v7339_v55 = vshrl.u32 %v6986_v14, 16  ;;  %v7341_v1 = vshll.u32 %v6986_v14, 16 }
 0x3c7   : > { %v7320_v17 = vor.u32 %v7319_v24, %v7315_v49  ;;  %v6876_v33 = vrot.slane %v6874_v41, 1  ;;  %v7348_v59 = vrot.slane %v7346_v44, 1  ;;  %v6881_v63 = vrot.slane %v6879_v54, 1  ;;  %v15998_v44 = vld [vmem:[#allocation3 + $0x38] ss:$0 sps:$4 sm:$0x33]  }
 0x3c8   : > { %v7236_v30 = vor.u32 %v7235_v9, %v7231_v28  ;;  %v7262_v36 = vshll.u32 %v6883_v5, 16  ;;  %v15968_v51 = vpop.f32.mrf.mxu0  ;;  %v7343_v26 = vrot.slane %v7341_v1, 1  ;;  %v6987_v23 = vrot.slane %v15956_v18, 1 }
 0x3c9   : > { %v7325_v45 = vsel %vm6716_vm4, %v7320_v17, %v7324_v34  ;;  %v6877_v58 = vor.u32 %v6876_v33, %v6872_v19  ;;  %v6988_v15 = vrot.slane %v15962_v37, 1  ;;  %v9510_v10 = vshrl.u32 %v15958_v20, 16  ;;  %v15994_v19 = vld [vmem:[#allocation3 + $0x30] sm:$0xff]  }
 0x3ca   : > { %v7241_v11 = vsel %vm6716_vm4, %v7236_v30, %v7240_v35  ;;  %12898 = vmatmul.mubr.bf16.gmra.mxu0 %v7325_v45  ;;  %v7264_v47 = vrot.slane %v7262_v36, 1  ;;  %v15975_v6 = vpop.f32.mrf.mxu0  ;;  %v7344_v13 = vor.u32 %v7343_v26, %v7339_v55  ;;  %v9512_v2 = vshll.u32 %v15958_v20, 16 }
 0x3cb   : > { %9115 = vmatmul.mubr.bf16.gmra.mxu1 %v15919_v60  ;;  %v15979_v38 = vsel %vm6716_vm4, %v6877_v58, %v6881_v63  ;;  %v9517_v61 = vshll.u32 %v15966_v0, 16  ;;  %v6989_v29 = vsel %vm6941_vm2, %v6987_v23, %v6988_v15  ;;  %v7370_v56 = vshll.u32 %v6988_v15, 16 }
 0x3cc   : > { %9122 = vmatprep.mubr.bf16.mxu1 %v7241_v11  ;;  %v7255_v39 = vshrl.u32 %v15979_v38, 16  ;;  %v7257_v31 = vshll.u32 %v15979_v38, 16  ;;  %v15986_v52 = vpop.f32.mrf.mxu0  ;;  %v7349_v60 = vsel %vm6716_vm4, %v7344_v13, %v7348_v59  ;;  %v7363_v48 = vshrl.u32 %v6989_v29, 16  ;;  %v16006_v59 = vpop.f32.mrf.mxu1 }
 0x3cd   : > { %v7365_v35 = vshll.u32 %v6989_v29, 16  ;;  %v9514_v21 = vrot.slane %v9512_v2, 1  ;;  %12901 = vmatprep.mubr.bf16.mxu0 %v7349_v60  ;;  %v7372_v22 = vrot.slane %v7370_v56, 1  ;;  %v9519_v49 = vrot.slane %v9517_v61, 1 }
 0x3ce   : > { %v7259_v43 = vrot.slane %v7257_v31, 1  ;;  %v9521_v12 = vshrl.u32 %v15966_v0, 16  ;;  %v15990_v28 = vpop.f32.mrf.mxu0  ;;  %v6886_v27 = vshrl.u32 %v15897_v16, 16  ;;  %v6888_v24 = vshll.u32 %v15897_v16, 16 }
 0x3cf   : > { %v7367_v4 = vrot.slane %v7365_v35, 1  ;;  %v9515_v34 = vor.u32 %v9514_v21, %v9510_v10  ;;  %v6893_v9 = vshll.u32 %v15894_v57, 16  ;;  %v6897_v14 = vshrl.u32 %v15894_v57, 16 }
 0x3d0   : > { %v7260_v41 = vor.u32 %v7259_v43, %v7255_v39  ;;  %v9789_v54 = vshll.u32 %v9521_v12, 16  ;;  %v16000_v5 = vpop.f32.mrf.mxu0  ;;  %v6890_v1 = vrot.slane %v6888_v24, 1  ;;  %v12263_v33 = vadd.f32 %v15915_v25, %v15903_v42  ;;  %v8739_v39 = vpop.f32.mrf.mxu1  ;;  %v16030_v43 = vld [vmem:[#allocation3 + $0x40] sm:$0xff]  }
 0x3d1   : > { %v7368_v17 = vor.u32 %v7367_v4, %v7363_v48  ;;  %v9520_v55 = vsel %vm6716_vm4, %v9515_v34, %v9519_v49  ;;  %v6895_v45 = vrot.slane %v6893_v9, 1  ;;  %v9526_v42 = vshll.u32 %v15994_v19, 16 }
 0x3d2   : > { %v7265_v16 = vsel %vm6716_vm4, %v7260_v41, %v7264_v47  ;;  %v9784_v30 = vshll.u32 %v9520_v55, 16  ;;  %v9782_v63 = vshrl.u32 %v9520_v55, 16  ;;  %v6891_v36 = vor.u32 %v6890_v1, %v6886_v27  ;;  %v16010_v26 = vpop.f32.mrf.mxu0 }
 0x3d3   : > { %9123 = vmatmul.mubr.bf16.gmra.mxu1 %v15946_v46  ;;  %v7373_v57 = vsel %vm6716_vm4, %v7368_v17, %v7372_v22  ;;  %v9791_v23 = vrot.slane %v9789_v54, 1  ;;  %v9531_v25 = vshll.u32 %v15998_v44, 16  ;;  %v7286_v47 = vshll.u32 %v6897_v14, 16  ;;  %v16032_v22 = vld [vmem:[#allocation3 + $0x48] ss:$0 sps:$4 sm:$0x33]  }
 0x3d4   : > { %9130 = vmatprep.mubr.bf16.mxu1 %v7265_v16  ;;  %12902 = vmatmul.mubr.bf16.gmra.mxu0 %v7373_v57  ;;  %v9786_v58 = vrot.slane %v9784_v30, 1  ;;  %v16015_v11 = vsel %vm6716_vm4, %v6891_v36, %v6895_v45  ;;  %v9535_v46 = vshrl.u32 %v15998_v44, 16  ;;  %v16020_v15 = vadd.f32 %v15941_v50, %v15932_v3  ;;  %v12828_v30 = vpop.f32.mrf.mxu1 }
 0x3d5   : > { %v7281_v13 = vshll.u32 %v16015_v11, 16  ;;  %v9524_v2 = vshrl.u32 %v15994_v19, 16  ;;  %v9528_v61 = vrot.slane %v9526_v42, 1  ;;  %v7279_v31 = vshrl.u32 %v16015_v11, 16 }
 0x3d6   : > { %v9787_v10 = vor.u32 %v9786_v58, %v9782_v63  ;;  %v9533_v29 = vrot.slane %v9531_v25, 1  ;;  %v9813_v56 = vshll.u32 %v9535_v46, 16  ;;  %v6902_v60 = vshll.u32 %v15913_v8, 16  ;;  %v16026_v48 = vpop.f32.mrf.mxu0 }
 0x3d7   : > { %v7283_v21 = vrot.slane %v7281_v13, 1  ;;  %v9529_v3 = vor.u32 %v9528_v61, %v9524_v2  ;;  %v6907_v50 = vshll.u32 %v15922_v53, 16  ;;  %v6900_v49 = vshrl.u32 %v15913_v8, 16  ;;  %v16058_v2 = vpop.f32.mrf.mxu1 }
 0x3d8   : > { %v9792_v35 = vsel %vm6716_vm4, %v9787_v10, %v9791_v23  ;;  %v6904_v12 = vrot.slane %v6902_v60, 1  ;;  %v6911_v4 = vshrl.u32 %v15922_v53, 16  ;;  %v16036_v34 = vadd.f32 %v12263_v33, %v8739_v39  ;;  %v16038_v27 = vpop.f32.mrf.mxu0 }
 0x3d9   : > { %10438 = vmatprep.mubr.bf16.mxu0 %v9792_v35  ;;  %v7284_v24 = vor.u32 %v7283_v21, %v7279_v31  ;;  %v7288_v41 = vrot.slane %v7286_v47, 1  ;;  %v9534_v54 = vsel %vm6716_vm4, %v9529_v3, %v9533_v29  ;;  %v6909_v9 = vrot.slane %v6907_v50, 1  ;;  %v16064_v29 = vld [vmem:[#allocation3 + $0x50] sm:$0xff]   ;;  %v16070_v21 = vld [vmem:[#allocation3 + $0x58] ss:$0 sps:$4 sm:$0x33]  }
 0x3da   : > { %v9808_v14 = vshll.u32 %v9534_v54, 16  ;;  %v9815_v17 = vrot.slane %v9813_v56, 1  ;;  %v6905_v1 = vor.u32 %v6904_v12, %v6900_v49  ;;  %v7310_v16 = vshll.u32 %v6911_v4, 16  ;;  %v16042_v8 = vpop.f32.mrf.mxu0 }
 0x3db   : > { %9131 = vmatmul.mubr.bf16.gmra.mxu1 %v15979_v38  ;;  %v7289_v53 = vsel %vm6716_vm4, %v7284_v24, %v7288_v41  ;;  %v9540_v33 = vshll.u32 %v16030_v43, 16  ;;  %v9545_v57 = vshll.u32 %v16032_v22, 16  ;;  %v9549_v63 = vshrl.u32 %v16032_v22, 16  ;;  %v16076_v41 = vpop.f32.mrf.mxu1 }
 0x3dc   : > { %10439 = vmatmul.mubr.bf16.vlgmr.msra.gmra.mxu0 %v9520_v55  ;;  %9138 = vmatprep.mubr.bf16.mxu1 %v7289_v53  ;;  %v9806_v36 = vshrl.u32 %v9534_v54, 16  ;;  %v9810_v45 = vrot.slane %v9808_v14, 1  ;;  %v16049_v38 = vsel %vm6716_vm4, %v6905_v1, %v6909_v9  ;;  %v12269_v58 = vadd.f32 %v15964_v32, %v15951_v62  ;;  %v16060_v61 = vpop.f32.mrf.mxu0 }
 0x3dd   : > { %v7305_v23 = vshll.u32 %v16049_v38, 16  ;;  %v9538_v42 = vshrl.u32 %v16030_v43, 16  ;;  %v9542_v55 = vrot.slane %v9540_v33, 1  ;;  %v9547_v25 = vrot.slane %v9545_v57, 1 }
 0x3de   : > { %v9811_v47 = vor.u32 %v9810_v45, %v9806_v36  ;;  %v7312_v46 = vrot.slane %v7310_v16, 1  ;;  %v9837_v10 = vshll.u32 %v9549_v63, 16  ;;  %v16056_v13 = vadd.f32 %v16006_v59, %v12269_v58 }
 0x3df   : > { %v7303_v39 = vshrl.u32 %v16049_v38, 16  ;;  %v7307_v31 = vrot.slane %v7305_v23, 1  ;;  %v9543_v62 = vor.u32 %v9542_v55, %v9538_v42  ;;  %v6916_v32 = vshll.u32 %v15927_v7, 16  ;;  %v8755_v23 = vpop.f32.mrf.mxu1 }
 0x3e0   : > { %v9816_v56 = vsel %vm6716_vm4, %v9811_v47, %v9815_v17  ;;  %v6914_v60 = vshrl.u32 %v15927_v7, 16  ;;  %v6921_v35 = vshll.u32 %v15935_v40, 16  ;;  %v6925_v59 = vshrl.u32 %v15935_v40, 16 }
 0x3e1   : > { %10446 = vmatprep.mubr.bf16.mxu0 %v9816_v56  ;;  %v7308_v3 = vor.u32 %v7307_v31, %v7303_v39  ;;  %v9548_v50 = vsel %vm6716_vm4, %v9543_v62, %v9547_v25  ;;  %v6918_v49 = vrot.slane %v6916_v32, 1  ;;  %v12272_v12 = vadd.f32 %v15975_v6, %v15968_v51  ;;  %v16101_v39 = vld [vmem:[#allocation3 + $0x60] sm:$0xff]   ;;  %v16105_v32 = vld [vmem:[#allocation3 + $0x68] ss:$0 sps:$4 sm:$0x33]  }
 0x3e2   : > { %v9832_v4 = vshll.u32 %v9548_v50, 16  ;;  %v9839_v24 = vrot.slane %v9837_v10, 1  ;;  %v6923_v7 = vrot.slane %v6921_v35, 1  ;;  %v7334_v9 = vshll.u32 %v6925_v59, 16 }
 0x3e3   : > { %9139 = vmatmul.mubr.bf16.gmra.mxu1 %v16015_v11  ;;  %v16078_v14 = vpop.f32.mrf.mxu0  ;;  %v7313_v40 = vsel %vm6716_vm4, %v7308_v3, %v7312_v46  ;;  %v9830_v17 = vshrl.u32 %v9548_v50, 16  ;;  %v6919_v1 = vor.u32 %v6918_v49, %v6914_v60  ;;  %v16081_v16 = vadd.f32 %v12828_v30, %v12272_v12  ;;  %v12832_v12 = vpop.f32.mrf.mxu1 }
 0x3e4   : > { %10447 = vmatmul.mubr.bf16.gmra.mxu0 %v9534_v54  ;;  %9146 = vmatprep.mubr.bf16.mxu1 %v7313_v40  ;;  %v9834_v53 = vrot.slane %v9832_v4, 1  ;;  %v9552_v51 = vshrl.u32 %v16064_v29, 16  ;;  %v9554_v6 = vshll.u32 %v16064_v29, 16  ;;  %v9559_v11 = vshll.u32 %v16070_v21, 16 }
 0x3e5   : > { %v16086_v33 = vpop.f32.mrf.mxu0  ;;  %v16089_v57 = vsel %vm6716_vm4, %v6919_v1, %v6923_v7  ;;  %v7336_v63 = vrot.slane %v7334_v9, 1  ;;  %v9563_v54 = vshrl.u32 %v16070_v21, 16  ;;  %v12275_v30 = vadd.f32 %v15990_v28, %v15986_v52 }
 0x3e6   : > { %v9835_v36 = vor.u32 %v9834_v53, %v9830_v17  ;;  %v7327_v45 = vshrl.u32 %v16089_v57, 16  ;;  %v7329_v58 = vshll.u32 %v16089_v57, 16  ;;  %v9556_v42 = vrot.slane %v9554_v6, 1 }
 0x3e7   : > { %v16096_v55 = vpop.f32.mrf.mxu0  ;;  %v9561_v25 = vrot.slane %v9559_v11, 1  ;;  %v9861_v47 = vshll.u32 %v9563_v54, 16  ;;  %v16098_v46 = vadd.f32 %v12275_v30, %v8755_v23  ;;  %v6930_v10 = vshll.u32 %v15956_v18, 16  ;;  %v16127_v11 = vld [vmem:[#allocation3 + $0x70] sm:$0xff]   ;;  %v16129_v54 = vpop.f32.mrf.mxu1 }
 0x3e8   : > { %v9840_v31 = vsel %vm6716_vm4, %v9835_v36, %v9839_v24  ;;  %v7331_v52 = vrot.slane %v7329_v58, 1  ;;  %v9557_v28 = vor.u32 %v9556_v42, %v9552_v51  ;;  %v6935_v62 = vshll.u32 %v15962_v37, 16 }
 0x3e9   : > { %v16107_v56 = vpop.f32.mrf.mxu0  ;;  %10454 = vmatprep.mubr.bf16.mxu0 %v9840_v31  ;;  %v6928_v60 = vshrl.u32 %v15956_v18, 16  ;;  %v6932_v35 = vrot.slane %v6930_v10, 1  ;;  %v6939_v59 = vshrl.u32 %v15962_v37, 16  ;;  %v16113_v3 = vadd.f32 %v16010_v26, %v16000_v5 }
 0x3ea   : > { %v7332_v49 = vor.u32 %v7331_v52, %v7327_v45  ;;  %v9562_v4 = vsel %vm6716_vm4, %v9557_v28, %v9561_v25  ;;  %v9863_v24 = vrot.slane %v9861_v47, 1  ;;  %v6937_v7 = vrot.slane %v6935_v62, 1 }
 0x3eb   : > { %9147 = vmatmul.mubr.bf16.gmra.mxu1 %v16049_v38  ;;  %v9856_v9 = vshll.u32 %v9562_v4, 16  ;;  %v6933_v40 = vor.u32 %v6932_v35, %v6928_v60  ;;  %v7358_v17 = vshll.u32 %v6939_v59, 16  ;;  %v9566_v18 = vshrl.u32 %v16101_v39, 16 }
 0x3ec   : > { %10455 = vmatmul.mubr.bf16.gmra.mxu0 %v9548_v50  ;;  %v7337_v37 = vsel %vm6716_vm4, %v7332_v49, %v7336_v63  ;;  %v9854_v1 = vshrl.u32 %v9562_v4, 16  ;;  %v9568_v5 = vshll.u32 %v16101_v39, 16  ;;  %v9573_v26 = vshll.u32 %v16105_v32, 16  ;;  %v16147_v49 = vld [vmem:[#allocation3 + $0x78] ss:$0 sps:$4 sm:$0x33]  }
 0x3ed   : > { %v16121_v38 = vpop.f32.mrf.mxu0  ;;  %9154 = vmatprep.mubr.bf16.mxu1 %v7337_v37  ;;  %v9858_v53 = vrot.slane %v9856_v9, 1  ;;  %v16124_v51 = vsel %vm6716_vm4, %v6933_v40, %v6937_v7  ;;  %v7360_v50 = vrot.slane %v7358_v17, 1  ;;  %v9577_v6 = vshrl.u32 %v16105_v32, 16 }
 0x3ee   : > { %v7351_v63 = vshrl.u32 %v16124_v51, 16  ;;  %v7353_v30 = vshll.u32 %v16124_v51, 16  ;;  %v9570_v36 = vrot.slane %v9568_v5, 1  ;;  %v9575_v45 = vrot.slane %v9573_v26, 1 }
 0x3ef   : > { %v16133_v58 = vpop.f32.mrf.mxu0  ;;  %v9859_v23 = vor.u32 %v9858_v53, %v9854_v1  ;;  %v9885_v42 = vshll.u32 %v9577_v6, 16  ;;  %v12281_v25 = vadd.f32 %v16038_v27, %v16026_v48  ;;  %v9733_v47 = vrot.slane %v15958_v20, 1  ;;  %v16151_v20 = vpop.f32.mrf.mxu1 }
 0x3f0   : > { %v7355_v10 = vrot.slane %v7353_v30, 1  ;;  %v9571_v31 = vor.u32 %v9570_v36, %v9566_v18  ;;  %v9734_v52 = vrot.slane %v15966_v0, 1  ;;  %v12284_v28 = vadd.f32 %v16060_v61, %v16042_v8 }
 0x3f1   : > { %v16141_v62 = vpop.f32.mrf.mxu0  ;;  %v9864_v60 = vsel %vm6716_vm4, %v9859_v23, %v9863_v24  ;;  %v9887_v35 = vrot.slane %v9885_v42, 1  ;;  %v16145_v59 = vadd.f32 %v16076_v41, %v12281_v25  ;;  %v9580_v48 = vshrl.u32 %v16127_v11, 16  ;;  %v8771_v6 = vpop.f32.mrf.mxu1 }
 0x3f2   : > { %10462 = vmatprep.mubr.bf16.mxu0 %v9864_v60  ;;  %v7356_v0 = vor.u32 %v7355_v10, %v7351_v63  ;;  %v9576_v27 = vsel %vm6716_vm4, %v9571_v31, %v9575_v45  ;;  %v9735_v8 = vsel %vm6941_vm2, %v9733_v47, %v9734_v52  ;;  %v9801_v61 = vshll.u32 %v9734_v52, 16  ;;  %v16176_v60 = vld [vmem:[#allocation3 + $0x88] ss:$0 sps:$4 sm:$0x33]  }
 0x3f3   : > { %9155 = vmatmul.mubr.bf16.gmra.mxu1 %v16089_v57  ;;  %v16155_v24 = vpop.f32.mrf.mxu0  ;;  %v9878_v41 = vshrl.u32 %v9576_v27, 16  ;;  %v9880_v7 = vshll.u32 %v9576_v27, 16  ;;  %v9794_v9 = vshrl.u32 %v9735_v8, 16  ;;  %v9796_v40 = vshll.u32 %v9735_v8, 16 }
 0x3f4   : > { %10463 = vmatmul.mubr.bf16.gmra.mxu0 %v9562_v4  ;;  %v7361_v17 = vsel %vm6716_vm4, %v7356_v0, %v7360_v50  ;;  %v9803_v18 = vrot.slane %v9801_v61, 1  ;;  %v16158_v37 = vadd.f32 %v12832_v12, %v12284_v28  ;;  %v9582_v57 = vshll.u32 %v16127_v11, 16  ;;  %v16174_v28 = vld [vmem:[#allocation3 + $0x80] sm:$0xff]   ;;  %v16182_v0 = vpop.f32.mrf.mxu1 }
 0x3f5   : > { %v16161_v1 = vpop.f32.mrf.mxu0  ;;  %9162 = vmatprep.mubr.bf16.mxu1 %v7361_v17  ;;  %v9882_v5 = vrot.slane %v9880_v7, 1  ;;  %v9798_v26 = vrot.slane %v9796_v40, 1  ;;  %v9587_v53 = vshll.u32 %v16147_v49, 16  ;;  %v9591_v4 = vshrl.u32 %v16147_v49, 16 }
 0x3f6   : > { %v9584_v63 = vrot.slane %v9582_v57, 1  ;;  %v12287_v30 = vadd.f32 %v16086_v33, %v16078_v14  ;;  %v9736_v50 = vrot.slane %v15994_v19, 1  ;;  %v9737_v12 = vrot.slane %v15998_v44, 1 }
 0x3f7   : > { %v16169_v36 = vpop.f32.mrf.mxu0  ;;  %v9883_v45 = vor.u32 %v9882_v5, %v9878_v41  ;;  %v9799_v23 = vor.u32 %v9798_v26, %v9794_v9  ;;  %v9589_v42 = vrot.slane %v9587_v53, 1  ;;  %v9909_v25 = vshll.u32 %v9591_v4, 16  ;;  %v16198_v4 = vpop.f32.mrf.mxu1 }
 0x3f8   : > { %v9585_v47 = vor.u32 %v9584_v63, %v9580_v48  ;;  %v16171_v10 = vadd.f32 %v12287_v30, %v8771_v6  ;;  %v9738_v31 = vsel %vm6941_vm2, %v9736_v50, %v9737_v12  ;;  %v9825_v52 = vshll.u32 %v9737_v12, 16 }
 0x3f9   : > { %v9888_v19 = vsel %vm6716_vm4, %v9883_v45, %v9887_v35  ;;  %v9804_v44 = vsel %vm6716_vm4, %v9799_v23, %v9803_v18  ;;  %v9911_v14 = vrot.slane %v9909_v25, 1  ;;  %v16180_v33 = vpop.f32.mrf.mxu0  ;;  %v9818_v8 = vshrl.u32 %v9738_v31, 16 }
 0x3fa   : > { %10470 = vmatprep.mubr.bf16.mxu0 %v9888_v19  ;;  %v9590_v48 = vsel %vm6716_vm4, %v9585_v47, %v9589_v42  ;;  %v9820_v61 = vshll.u32 %v9738_v31, 16  ;;  %v9739_v41 = vrot.slane %v16030_v43, 1  ;;  %v9827_v35 = vrot.slane %v9825_v52, 1 }
 0x3fb   : > { %9163 = vmatmul.mubr.bf16.gmra.mxu1 %v16124_v51  ;;  %v9904_v7 = vshll.u32 %v9590_v48, 16  ;;  %v9740_v9 = vrot.slane %v16032_v22, 1  ;;  %v16190_v40 = vadd.f32 %v16107_v56, %v16096_v55  ;;  %v9902_v17 = vshrl.u32 %v9590_v48, 16  ;;  %v16196_v53 = vpop.f32.mrf.mxu0 }
 0x3fc   : > { %12921 = vmatprep.mubr.bf16.mxu1 %v9804_v44  ;;  %10471 = vmatmul.mubr.bf16.gmra.mxu0 %v9576_v27  ;;  %v9822_v18 = vrot.slane %v9820_v61, 1  ;;  %v9596_v51 = vshll.u32 %v16174_v28, 16  ;;  %v9601_v57 = vshll.u32 %v16176_v60, 16  ;;  %v9594_v27 = vshrl.u32 %v16174_v28, 16  ;;  %v16207_v44 = vld [vmem:[#allocation3 + $0x90] sm:$0xff]   ;;  %v16211_v61 = vpop.f32.mrf.mxu1 }
 0x3fd   : > { %v9906_v5 = vrot.slane %v9904_v7, 1  ;;  %v9741_v26 = vsel %vm6941_vm2, %v9739_v41, %v9740_v9  ;;  %v9849_v43 = vshll.u32 %v9740_v9, 16  ;;  %v9605_v12 = vshrl.u32 %v16176_v60, 16 }
 0x3fe   : > { %v9823_v22 = vor.u32 %v9822_v18, %v9818_v8  ;;  %v9842_v6 = vshrl.u32 %v9741_v26, 16  ;;  %v9844_v55 = vshll.u32 %v9741_v26, 16  ;;  %v9598_v56 = vrot.slane %v9596_v51, 1 }
 0x3ff   : > { %v9907_v63 = vor.u32 %v9906_v5, %v9902_v17  ;;  %v9851_v30 = vrot.slane %v9849_v43, 1  ;;  %v9603_v50 = vrot.slane %v9601_v57, 1  ;;  %v12293_v25 = vadd.f32 %v16133_v58, %v16121_v38 }
 0x400   : > { %v9828_v45 = vsel %vm6716_vm4, %v9823_v22, %v9827_v35  ;;  %v9846_v23 = vrot.slane %v9844_v55, 1  ;;  %v9599_v42 = vor.u32 %v9598_v56, %v9594_v27  ;;  %v9933_v31 = vshll.u32 %v9605_v12, 16  ;;  %v8787_v27 = vpop.f32.mrf.mxu1 }
 0x401   : > { %v9912_v47 = vsel %vm6716_vm4, %v9907_v63, %v9911_v14  ;;  %v9742_v52 = vrot.slane %v16064_v29, 1  ;;  %v9743_v19 = vrot.slane %v16070_v21, 1  ;;  %v16215_v38 = vadd.f32 %v16151_v20, %v12293_v25  ;;  %v16218_v14 = vld [vmem:[#allocation3 + $0x98] ss:$0 sps:$4 sm:$0x33]  }
 0x402   : > { %v16209_v8 = vpop.f32.mrf.mxu0  ;;  %10478 = vmatprep.mubr.bf16.mxu0 %v9912_v47  ;;  %v9847_v41 = vor.u32 %v9846_v23, %v9842_v6  ;;  %v9604_v7 = vsel %vm6716_vm4, %v9599_v42, %v9603_v50  ;;  %v9745_v58 = vrot.slane %v16101_v39, 1  ;;  %v9935_v35 = vrot.slane %v9933_v31, 1 }
 0x403   : > { %12922 = vmatmul.mubr.bf16.vlgmr.msra.gmra.mxu1 %v9828_v45  ;;  %v9926_v29 = vshrl.u32 %v9604_v7, 16  ;;  %v9928_v21 = vshll.u32 %v9604_v7, 16  ;;  %v9744_v9 = vsel %vm6941_vm2, %v9742_v52, %v9743_v19  ;;  %v9873_v5 = vshll.u32 %v9743_v19, 16  ;;  %v16242_v19 = vpop.f32.mrf.mxu1 }
 0x404   : > { %10479 = vmatmul.mubr.bf16.gmra.mxu0 %v9590_v48  ;;  %v16221_v17 = vpop.f32.mrf.mxu0  ;;  %v9852_v18 = vsel %vm6716_vm4, %v9847_v41, %v9851_v30  ;;  %v9866_v51 = vshrl.u32 %v9744_v9, 16  ;;  %v9868_v57 = vshll.u32 %v9744_v9, 16  ;;  %v9746_v26 = vrot.slane %v16105_v32, 1 }
 0x405   : > { %12925 = vmatprep.mubr.bf16.mxu1 %v9852_v18  ;;  %v9930_v20 = vrot.slane %v9928_v21, 1  ;;  %v12296_v39 = vadd.f32 %v16155_v24, %v16141_v62  ;;  %v9608_v48 = vshrl.u32 %v16207_v44, 16  ;;  %v9875_v6 = vrot.slane %v9873_v5, 1 }
 0x406   : > { %v16228_v43 = vpop.f32.mrf.mxu0  ;;  %v9870_v22 = vrot.slane %v9868_v57, 1  ;;  %v9610_v55 = vshll.u32 %v16207_v44, 16  ;;  %v9615_v56 = vshll.u32 %v16218_v14, 16  ;;  %v9747_v30 = vsel %vm6941_vm2, %v9745_v58, %v9746_v26 }
 0x407   : > { %v9931_v63 = vor.u32 %v9930_v20, %v9926_v29  ;;  %v9897_v50 = vshll.u32 %v9746_v26, 16  ;;  %v16234_v32 = vadd.f32 %v16182_v0, %v12296_v39  ;;  %v9890_v24 = vshrl.u32 %v9747_v30, 16 }
 0x408   : > { %v16236_v12 = vpop.f32.mrf.mxu0  ;;  %v9871_v62 = vor.u32 %v9870_v22, %v9866_v51  ;;  %v9892_v45 = vshll.u32 %v9747_v30, 16  ;;  %v9612_v23 = vrot.slane %v9610_v55, 1  ;;  %v9617_v47 = vrot.slane %v9615_v56, 1  ;;  %v13479_v55 = vld [vmem:[#allocation3 + $0xa8] ss:$0 sps:$4 sm:$0x33]  }
 0x409   : > { %v9936_v42 = vsel %vm6716_vm4, %v9931_v63, %v9935_v35  ;;  %v9899_v25 = vrot.slane %v9897_v50, 1  ;;  %v9619_v31 = vshrl.u32 %v16218_v14, 16  ;;  %v12299_v29 = vadd.f32 %v16169_v36, %v16161_v1 }
 0x40a   : > { %v16240_v52 = vpop.f32.mrf.mxu0  ;;  %10486 = vmatprep.mubr.bf16.mxu0 %v9936_v42  ;;  %v9876_v0 = vsel %vm6716_vm4, %v9871_v62, %v9875_v6  ;;  %v9894_v41 = vrot.slane %v9892_v45, 1  ;;  %v9613_v58 = vor.u32 %v9612_v23, %v9608_v48  ;;  %v9748_v35 = vrot.slane %v16127_v11, 1 }
 0x40b   : > { %12926 = vmatmul.mubr.bf16.gmra.mxu1 %v9876_v0  ;;  %v9957_v21 = vshll.u32 %v9619_v31, 16  ;;  %v9749_v9 = vrot.slane %v16147_v49, 1  ;;  %v9751_v18 = vrot.slane %v16174_v28, 1  ;;  %v16253_v20 = vadd.f32 %v12299_v29, %v8787_v27  ;;  %v16261_v49 = vpop.f32.mrf.mxu1 }
 0x40c   : > { %10487 = vmatmul.mubr.bf16.gmra.mxu0 %v9604_v7  ;;  %v16250_v51 = vpop.f32.mrf.mxu0  ;;  %v9895_v57 = vor.u32 %v9894_v41, %v9890_v24  ;;  %v9618_v5 = vsel %vm6716_vm4, %v9613_v58, %v9617_v47  ;;  %v9752_v26 = vrot.slane %v16176_v60, 1  ;;  %v16257_v7 = vld [vmem:[#allocation3 + $0xa0] sm:$0xff]   ;;  %v16267_v63 = vadd.f32 %v16196_v53, %v16180_v33 }
 0x40d   : > { %v9950_v39 = vshrl.u32 %v9618_v5, 16  ;;  %v9952_v1 = vshll.u32 %v9618_v5, 16  ;;  %v9750_v36 = vsel %vm6941_vm2, %v9748_v35, %v9749_v9  ;;  %v9959_v48 = vrot.slane %v9957_v21, 1  ;;  %v16271_v50 = vpop.f32.mrf.mxu1 }
 0x40e   : > { %v16259_v11 = vpop.f32.mrf.mxu0  ;;  %v9900_v28 = vsel %vm6716_vm4, %v9895_v57, %v9899_v25  ;;  %v9916_v22 = vshll.u32 %v9750_v36, 16  ;;  %v9921_v6 = vshll.u32 %v9749_v9, 16  ;;  %v9753_v60 = vsel %vm6941_vm2, %v9751_v18, %v9752_v26  ;;  %v16279_v9 = vld [vmem:[#allocation3 + $0xb0] sm:$0xff]  }
 0x40f   : > { %12929 = vmatprep.mubr.bf16.mxu1 %v9900_v28  ;;  %v9954_v27 = vrot.slane %v9952_v1, 1  ;;  %v9945_v56 = vshll.u32 %v9752_v26, 16  ;;  %v9914_v62 = vshrl.u32 %v9750_v36, 16  ;;  %v9940_v23 = vshll.u32 %v9753_v60, 16  ;;  %v8803_v57 = vpop.f32.mrf.mxu1 }
 0x410   : > { %v16269_v30 = vpop.f32.mrf.mxu0  ;;  %v9918_v24 = vrot.slane %v9916_v22, 1  ;;  %v9923_v45 = vrot.slane %v9921_v6, 1  ;;  %v9938_v25 = vshrl.u32 %v9753_v60, 16  ;;  %v9622_v31 = vshrl.u32 %v16257_v7, 16 }
 0x411   : > { %v9955_v42 = vor.u32 %v9954_v27, %v9950_v39  ;;  %v9947_v47 = vrot.slane %v9945_v56, 1  ;;  %v9942_v41 = vrot.slane %v9940_v23, 1  ;;  %v9624_v58 = vshll.u32 %v16257_v7, 16 }
 0x412   : > { %v9919_v0 = vor.u32 %v9918_v24, %v9914_v62  ;;  %v9629_v29 = vshll.u32 %v13479_v55, 16  ;;  %v9633_v53 = vshrl.u32 %v13479_v55, 16  ;;  %v12305_v21 = vadd.f32 %v16221_v17, %v16209_v8 }
 0x413   : > { %v9960_v33 = vsel %vm6716_vm4, %v9955_v42, %v9959_v48  ;;  %v9754_v35 = vrot.slane %v16207_v44, 1  ;;  %v9943_v39 = vor.u32 %v9942_v41, %v9938_v25  ;;  %v9626_v1 = vrot.slane %v9624_v58, 1 }
 0x414   : > { %v16281_v18 = vpop.f32.mrf.mxu0  ;;  %10494 = vmatprep.mubr.bf16.mxu0 %v9960_v33  ;;  %v9924_v26 = vsel %vm6716_vm4, %v9919_v0, %v9923_v45  ;;  %v9631_v36 = vrot.slane %v9629_v29, 1  ;;  %v9981_v28 = vshll.u32 %v9633_v53, 16  ;;  %v16285_v48 = vadd.f32 %v16211_v61, %v12305_v21  ;;  %v13481_v61 = vld [vmem:[#allocation3 + $0xb8] ss:$0 sps:$4 sm:$0x33]  }
 0x415   : > { %12930 = vmatmul.mubr.bf16.gmra.mxu1 %v9924_v26  ;;  %10495 = vmatmul.mubr.bf16.gmra.mxu0 %v9618_v5  ;;  %v9755_v8 = vrot.slane %v16218_v14, 1  ;;  %v9757_v44 = vrot.slane %v16257_v7, 1  ;;  %v9948_v22 = vsel %vm6716_vm4, %v9943_v39, %v9947_v47  ;;  %v9627_v6 = vor.u32 %v9626_v1, %v9622_v31  ;;  %v16298_v7 = vpop.f32.mrf.mxu1 }
 0x416   : > { %17064 = vst [vmem:[#allocation17_spill] sm:$0xff] %v16285_v48  ;;  %v16289_v17 = vpop.f32.mrf.mxu0  ;;  %v9758_v27 = vrot.slane %v13479_v55, 1  ;;  %v12308_v60 = vadd.f32 %v16236_v12, %v16228_v43  ;;  %12933 = vmatprep.mubr.bf16.mxu1 %v9948_v22  ;;  %v9983_v56 = vrot.slane %v9981_v28, 1  ;;  %v9636_v24 = vshrl.u32 %v16279_v9, 16 }
 0x417   : > { %v9756_v5 = vsel %vm6941_vm2, %v9754_v35, %v9755_v8  ;;  %v9969_v62 = vshll.u32 %v9755_v8, 16  ;;  %v9632_v45 = vsel %vm6716_vm4, %v9627_v6, %v9631_v36  ;;  %v9638_v53 = vshll.u32 %v16279_v9, 16  ;;  %v8806_v26 = vpop.f32.mrf.mxu1  ;;  %v16310_v8 = vld [vmem:[#allocation3 + $0xc0] sm:$0xff]  }
 0x418   : > { %v16296_v14 = vpop.f32.mrf.mxu0  ;;  %v9962_v23 = vshrl.u32 %v9756_v5, 16  ;;  %v9964_v42 = vshll.u32 %v9756_v5, 16  ;;  %v9759_v55 = vsel %vm6941_vm2, %v9757_v44, %v9758_v27  ;;  %v9974_v25 = vshrl.u32 %v9632_v45, 16  ;;  %v13483_v44 = vld [vmem:[#allocation3 + $0xc8] ss:$0 sps:$4 sm:$0x33]  }
 0x419   : > { %v9976_v43 = vshll.u32 %v9632_v45, 16  ;;  %v9971_v12 = vrot.slane %v9969_v62, 1  ;;  %v9986_v47 = vshrl.u32 %v9759_v55, 16  ;;  %v9988_v0 = vshll.u32 %v9759_v55, 16 }
 0x41a   : > { %v9966_v31 = vrot.slane %v9964_v42, 1  ;;  %v9993_v41 = vshll.u32 %v9758_v27, 16  ;;  %v16303_v58 = vadd.f32 %v16242_v19, %v12308_v60  ;;  %v16305_v29 = vpop.f32.mrf.mxu0  ;;  %v9643_v21 = vshll.u32 %v13481_v61, 16  ;;  %v16312_v60 = vpop.f32.mrf.mxu1 }
 0x41b   : > { %v9978_v33 = vrot.slane %v9976_v43, 1  ;;  %v9647_v35 = vshrl.u32 %v13481_v61, 16  ;;  %v9990_v1 = vrot.slane %v9988_v0, 1  ;;  %v12311_v28 = vadd.f32 %v16250_v51, %v16240_v52 }
 0x41c   : > { %17065 = vst [vmem:[#allocation37_spill] sm:$0xff] %v16303_v58  ;;  %v9967_v39 = vor.u32 %v9966_v31, %v9962_v23  ;;  %v9995_v36 = vrot.slane %v9993_v41, 1  ;;  %v9640_v19 = vrot.slane %v9638_v53, 1  ;;  %v9645_v6 = vrot.slane %v9643_v21, 1 }
 0x41d   : > { %v9979_v22 = vor.u32 %v9978_v33, %v9974_v25  ;;  %v10005_v27 = vshll.u32 %v9647_v35, 16  ;;  %v9991_v62 = vor.u32 %v9990_v1, %v9986_v47  ;;  %v16315_v42 = vadd.f32 %v12311_v28, %v8803_v57  ;;  %v16330_v47 = vpop.f32.mrf.mxu1  ;;  %v16339_v28 = vld [vmem:[#allocation3 + $0xd8] ss:$0 sps:$4 sm:$0x33]  }
 0x41e   : > { %v9972_v5 = vsel %vm6716_vm4, %v9967_v39, %v9971_v12  ;;  %v9760_v23 = vrot.slane %v16279_v9, 1  ;;  %v16318_v55 = vpop.f32.mrf.mxu0  ;;  %v9641_v51 = vor.u32 %v9640_v19, %v9636_v24  ;;  %v9761_v25 = vrot.slane %v13481_v61, 1 }
 0x41f   : > { %17066 = vst [vmem:[#allocation19_spill] sm:$0xff] %v16315_v42  ;;  %v9984_v52 = vsel %vm6716_vm4, %v9979_v22, %v9983_v56  ;;  %12934 = vmatmul.mubr.bf16.gmra.mxu1 %v9972_v5  ;;  %v10007_v43 = vrot.slane %v10005_v27, 1  ;;  %v9996_v31 = vsel %vm6716_vm4, %v9991_v62, %v9995_v36  ;;  %v9763_v0 = vrot.slane %v16310_v8, 1  ;;  %v16337_v36 = vld [vmem:[#allocation3 + $0xd0] sm:$0xff]  }
 0x420   : > { %10502 = vmatprep.mubr.bf16.mxu0 %v9984_v52  ;;  %v9764_v41 = vrot.slane %v13483_v44, 1  ;;  %v12314_v57 = vadd.f32 %v16269_v30, %v16259_v11  ;;  %v16325_v12 = vpop.f32.mrf.mxu0  ;;  %12937 = vmatprep.mubr.bf16.mxu1 %v9996_v31  ;;  %v9646_v9 = vsel %vm6716_vm4, %v9641_v51, %v9645_v6  ;;  %v9762_v56 = vsel %vm6941_vm2, %v9760_v23, %v9761_v25  ;;  %v16346_v31 = vpop.f32.mrf.mxu1 }
 0x421   : > { %10503 = vmatmul.mubr.bf16.gmra.mxu0 %v9632_v45  ;;  %v10017_v24 = vshll.u32 %v9761_v25, 16  ;;  %v9650_v61 = vshrl.u32 %v16310_v8, 16  ;;  %v9998_v33 = vshrl.u32 %v9646_v9, 16  ;;  %v10000_v53 = vshll.u32 %v9646_v9, 16  ;;  %v16344_v25 = vld [vmem:[#allocation3 + $0xe0] sm:$0xff]  }
 0x422   : > { %v10010_v21 = vshrl.u32 %v9762_v56, 16  ;;  %v10012_v35 = vshll.u32 %v9762_v56, 16  ;;  %v16332_v39 = vpop.f32.mrf.mxu0  ;;  %v9765_v30 = vsel %vm6941_vm2, %v9763_v0, %v9764_v41  ;;  %v10041_v1 = vshll.u32 %v9764_v41, 16  ;;  %v16350_v56 = vld [vmem:[#allocation3 + $0xe8] ss:$0 sps:$4 sm:$0x33]  }
 0x423   : > { %v10019_v11 = vrot.slane %v10017_v24, 1  ;;  %v16335_v45 = vadd.f32 %v12314_v57, %v8806_v26  ;;  %v10002_v22 = vrot.slane %v10000_v53, 1  ;;  %v10034_v6 = vshrl.u32 %v9765_v30, 16 }
 0x424   : > { %v10014_v19 = vrot.slane %v10012_v35, 1  ;;  %v10036_v27 = vshll.u32 %v9765_v30, 16  ;;  %v16341_v5 = vpop.f32.mrf.mxu0  ;;  %v10043_v62 = vrot.slane %v10041_v1, 1  ;;  %v9652_v23 = vshll.u32 %v16310_v8, 16 }
 0x425   : > { %17067 = vst [vmem:[#allocation38_spill] sm:$0xff] %v16335_v45  ;;  %v9657_v52 = vshll.u32 %v13483_v44, 16  ;;  %v9661_v51 = vshrl.u32 %v13483_v44, 16  ;;  %v10003_v26 = vor.u32 %v10002_v22, %v9998_v33  ;;  %v12317_v57 = vadd.f32 %v16289_v17, %v16281_v18 }
 0x426   : > { %v10015_v0 = vor.u32 %v10014_v19, %v10010_v21  ;;  %v10038_v41 = vrot.slane %v10036_v27, 1  ;;  %v9654_v53 = vrot.slane %v9652_v23, 1  ;;  %v9766_v8 = vrot.slane %v16337_v36, 1  ;;  %v16364_v27 = vpop.f32.mrf.mxu1 }
 0x427   : > { %v16352_v24 = vpop.f32.mrf.mxu0  ;;  %v9659_v35 = vrot.slane %v9657_v52, 1  ;;  %v10029_v30 = vshll.u32 %v9661_v51, 16  ;;  %v10008_v44 = vsel %vm6716_vm4, %v10003_v26, %v10007_v43  ;;  %v16358_v33 = vadd.f32 %v16271_v50, %v12317_v57 }
 0x428   : > { %v10020_v1 = vsel %vm6716_vm4, %v10015_v0, %v10019_v11  ;;  %v10039_v45 = vor.u32 %v10038_v41, %v10034_v6  ;;  %10510 = vmatprep.mubr.bf16.mxu0 %v10008_v44  ;;  %v9655_v18 = vor.u32 %v9654_v53, %v9650_v61  ;;  %v9767_v22 = vrot.slane %v16339_v28, 1 }
 0x429   : > { %17068 = vst [vmem:[#allocation16_spill] sm:$0xff] %v16358_v33  ;;  %v16360_v21 = vpop.f32.mrf.mxu0  ;;  %12938 = vmatmul.mubr.bf16.gmra.mxu1 %v10020_v1  ;;  %v10031_v17 = vrot.slane %v10029_v30, 1  ;;  %v9769_v19 = vrot.slane %v16344_v25, 1  ;;  %10511 = vmatmul.mubr.bf16.gmra.mxu0 %v9646_v9  ;;  %v9770_v11 = vrot.slane %v16350_v56, 1  ;;  %v12320_v50 = vadd.f32 %v16305_v29, %v16296_v14  ;;  %v16376_v9 = vpop.f32.mrf.mxu1  ;;  %v16390_v33 = vld [vmem:[#allocation3 + $0x100] sm:$0xff]  }
 0x42a   : > { %v10044_v43 = vsel %vm6716_vm4, %v10039_v45, %v10043_v62  ;;  %v9664_v6 = vshrl.u32 %v16337_v36, 16  ;;  %v9660_v61 = vsel %vm6716_vm4, %v9655_v18, %v9659_v35  ;;  %v9768_v52 = vsel %vm6941_vm2, %v9766_v8, %v9767_v22  ;;  %v16384_v35 = vld [vmem:[#allocation3 + $0xf0] sm:$0xff]   ;;  %v16386_v8 = vld [vmem:[#allocation3 + $0xf8] ss:$0 sps:$4 sm:$0x33]  }
 0x42b   : > { %v16371_v23 = vpop.f32.mrf.mxu0  ;;  %12941 = vmatprep.mubr.bf16.mxu1 %v10044_v43  ;;  %v10065_v51 = vshll.u32 %v9767_v22, 16  ;;  %v9666_v26 = vshll.u32 %v16337_v36, 16  ;;  %v10022_v0 = vshrl.u32 %v9660_v61, 16  ;;  %v10024_v45 = vshll.u32 %v9660_v61, 16 }
 0x42c   : > { %v10058_v62 = vshrl.u32 %v9768_v52, 16  ;;  %v10060_v41 = vshll.u32 %v9768_v52, 16  ;;  %v9771_v29 = vsel %vm6941_vm2, %v9769_v19, %v9770_v11  ;;  %v10089_v53 = vshll.u32 %v9770_v11, 16 }
 0x42d   : > { %v16378_v57 = vpop.f32.mrf.mxu0  ;;  %v10067_v14 = vrot.slane %v10065_v51, 1  ;;  %v16382_v30 = vadd.f32 %v16298_v7, %v12320_v50  ;;  %v10026_v36 = vrot.slane %v10024_v45, 1  ;;  %v10082_v1 = vshrl.u32 %v9771_v29, 16  ;;  %v16392_v50 = vpop.f32.mrf.mxu1  ;;  %v16396_v45 = vld [vmem:[#allocation3 + $0x108] ss:$0 sps:$4 sm:$0x33]  }
 0x42e   : > { %v10062_v44 = vrot.slane %v10060_v41, 1  ;;  %v10084_v18 = vshll.u32 %v9771_v29, 16  ;;  %v10091_v22 = vrot.slane %v10089_v53, 1  ;;  %v9668_v43 = vrot.slane %v9666_v26, 1 }
 0x42f   : > { %17069 = vst [vmem:[#allocation41_spill] sm:$0xff] %v16382_v30  ;;  %v9671_v52 = vshll.u32 %v16339_v28, 16  ;;  %v9675_v51 = vshrl.u32 %v16339_v28, 16  ;;  %v10027_v19 = vor.u32 %v10026_v36, %v10022_v0  ;;  %v12323_v30 = vadd.f32 %v16325_v12, %v16318_v55 }
 0x430   : > { %v10063_v11 = vor.u32 %v10062_v44, %v10058_v62  ;;  %v10086_v7 = vrot.slane %v10084_v18, 1  ;;  %v16398_v41 = vpop.f32.mrf.mxu0  ;;  %v9669_v29 = vor.u32 %v9668_v43, %v9664_v6  ;;  %v9772_v42 = vrot.slane %v16384_v35, 1 }
 0x431   : > { %v9673_v26 = vrot.slane %v9671_v52, 1  ;;  %v10053_v53 = vshll.u32 %v9675_v51, 16  ;;  %v10032_v28 = vsel %vm6716_vm4, %v10027_v19, %v10031_v17  ;;  %v16404_v36 = vadd.f32 %v12323_v30, %v16330_v47  ;;  %v16412_v17 = vpop.f32.mrf.mxu1 }
 0x432   : > { %v10068_v0 = vsel %vm6716_vm4, %v10063_v11, %v10067_v14  ;;  %v10087_v62 = vor.u32 %v10086_v7, %v10082_v1  ;;  %v16406_v44 = vpop.f32.mrf.mxu0  ;;  %10518 = vmatprep.mubr.bf16.mxu0 %v10032_v28  ;;  %v9773_v6 = vrot.slane %v16386_v8, 1  ;;  %v9775_v18 = vrot.slane %v16390_v33, 1 }
 0x433   : > { %17070 = vst [vmem:[#allocation39_spill] sm:$0xff] %v16404_v36  ;;  %12942 = vmatmul.mubr.bf16.gmra.mxu1 %v10068_v0  ;;  %v9674_v55 = vsel %vm6716_vm4, %v9669_v29, %v9673_v26  ;;  %v10055_v12 = vrot.slane %v10053_v53, 1  ;;  %10519 = vmatmul.mubr.bf16.gmra.mxu0 %v9660_v61  ;;  %v9776_v47 = vrot.slane %v16396_v45, 1  ;;  %v12326_v19 = vadd.f32 %v16341_v5, %v16332_v39 }
 0x434   : > { %v10092_v43 = vsel %vm6716_vm4, %v10087_v62, %v10091_v22  ;;  %v10046_v14 = vshrl.u32 %v9674_v55, 16  ;;  %v10048_v1 = vshll.u32 %v9674_v55, 16  ;;  %v16415_v30 = vpop.f32.mrf.mxu0  ;;  %v9774_v52 = vsel %vm6941_vm2, %v9772_v42, %v9773_v6  ;;  %v16426_v42 = vpop.f32.mrf.mxu1 }
 0x435   : > { %12945 = vmatprep.mubr.bf16.mxu1 %v10092_v43  ;;  %v10113_v51 = vshll.u32 %v9773_v6, 16  ;;  %v9678_v11 = vshrl.u32 %v16344_v25, 16  ;;  %v10106_v22 = vshrl.u32 %v9774_v52, 16  ;;  %v10108_v29 = vshll.u32 %v9774_v52, 16  ;;  %v16424_v43 = vld [vmem:[#allocation3 + $0x110] sm:$0xff]  }
 0x436   : > { %v10050_v7 = vrot.slane %v10048_v1, 1  ;;  %v9777_v61 = vsel %vm6941_vm2, %v9775_v18, %v9776_v47  ;;  %v16422_v26 = vpop.f32.mrf.mxu0  ;;  %v10137_v62 = vshll.u32 %v9776_v47, 16  ;;  %v16429_v39 = vadd.f32 %v12326_v19, %v16364_v27  ;;  %v16432_v1 = vld [vmem:[#allocation3 + $0x118] ss:$0 sps:$4 sm:$0x33]  }
 0x437   : > { %v10115_v53 = vrot.slane %v10113_v51, 1  ;;  %v10130_v28 = vshrl.u32 %v9777_v61, 16  ;;  %v10132_v0 = vshll.u32 %v9777_v61, 16  ;;  %v10110_v36 = vrot.slane %v10108_v29, 1 }
 0x438   : > { %v10051_v6 = vor.u32 %v10050_v7, %v10046_v14  ;;  %17071 = vst [vmem:[#allocation18_spill] sm:$0xff] %v16429_v39  ;;  %v9680_v5 = vshll.u32 %v16344_v25, 16  ;;  %v10139_v52 = vrot.slane %v10137_v62, 1  ;;  %v9685_v51 = vshll.u32 %v16350_v56, 16 }
 0x439   : > { %v10134_v18 = vrot.slane %v10132_v0, 1  ;;  %v9689_v61 = vshrl.u32 %v16350_v56, 16  ;;  %v10111_v48 = vor.u32 %v10110_v36, %v10106_v22  ;;  %v12329_v27 = vadd.f32 %v16360_v21, %v16352_v24 }
 0x43a   : > { %v16436_v47 = vpop.f32.mrf.mxu0  ;;  %v10056_v58 = vsel %vm6716_vm4, %v10051_v6, %v10055_v12  ;;  %v9682_v14 = vrot.slane %v9680_v5, 1  ;;  %v9687_v7 = vrot.slane %v9685_v51, 1  ;;  %v9778_v0 = vrot.slane %v16424_v43, 1 }
 0x43b   : > { %v16441_v19 = vpop.f32.mrf.mxu1  ;;  %10526 = vmatprep.mubr.bf16.mxu0 %v10056_v58  ;;  %v10135_v25 = vor.u32 %v10134_v18, %v10130_v28  ;;  %v10077_v29 = vshll.u32 %v9689_v61, 16  ;;  %v10116_v56 = vsel %vm6716_vm4, %v10111_v48, %v10115_v53  ;;  %v16446_v12 = vadd.f32 %v16312_v60, %v12329_v27 }
 0x43c   : > { %v12340_v62 = vpop.f32.mrf.mxu0  ;;  %10527 = vmatmul.mubr.bf16.gmra.mxu0 %v9674_v55  ;;  %v9683_v39 = vor.u32 %v9682_v14, %v9678_v11  ;;  %v9779_v36 = vrot.slane %v16432_v1, 1  ;;  %v16453_v58 = vadd.f32 %v16020_v15, %v16058_v2  ;;  %12946 = vmatmul.mubr.bf16.gmra.mxu1 %v10116_v56  ;;  %v12332_v48 = vadd.f32 %v16378_v57, %v16371_v23 }
 0x43d   : > { %v16449_v22 = vpop.f32.mrf.mxu1  ;;  %v10140_v24 = vsel %vm6716_vm4, %v10135_v25, %v10139_v52  ;;  %v10079_v21 = vrot.slane %v10077_v29, 1  ;;  %v9694_v6 = vshll.u32 %v16384_v35, 16  ;;  %v9692_v18 = vshrl.u32 %v16384_v35, 16 }
 0x43e   : > { %v12342_v55 = vpop.f32.mrf.mxu0  ;;  %12949 = vmatprep.mubr.bf16.mxu1 %v10140_v24  ;;  %v9688_v60 = vsel %vm6716_vm4, %v9683_v39, %v9687_v7  ;;  %v9780_v11 = vsel %vm6941_vm2, %v9778_v0, %v9779_v36  ;;  %v10161_v53 = vshll.u32 %v9779_v36, 16  ;;  %v16465_v51 = vadd.f32 %v16346_v31, %v12332_v48 }
 0x43f   : > { %v16460_v28 = vpop.f32.mrf.mxu1  ;;  %v10070_v15 = vshrl.u32 %v9688_v60, 16  ;;  %v10072_v2 = vshll.u32 %v9688_v60, 16  ;;  %v10156_v5 = vshll.u32 %v9780_v11, 16  ;;  %v10154_v52 = vshrl.u32 %v9780_v11, 16 }
 0x440   : > { %v9696_v57 = vrot.slane %v9694_v6, 1  ;;  %v9699_v39 = vshll.u32 %v16386_v8, 16  ;;  %v9703_v27 = vshrl.u32 %v16386_v8, 16  ;;  %v12335_v25 = vadd.f32 %v16406_v44, %v16398_v41  ;;  %v12343_v7 = vpop.f32.mrf.mxu0 }
 0x441   : > { %v16467_v23 = vpop.f32.mrf.mxu1  ;;  %v10074_v61 = vrot.slane %v10072_v2, 1  ;;  %v10158_v14 = vrot.slane %v10156_v5, 1  ;;  %v10163_v29 = vrot.slane %v10161_v53, 1  ;;  %v12338_v31 = vadd.f32 %v16422_v26, %v16415_v30 }
 0x442   : > { %v9697_v0 = vor.u32 %v9696_v57, %v9692_v18  ;;  %v9701_v35 = vrot.slane %v9699_v39, 1  ;;  %v10101_v48 = vshll.u32 %v9703_v27, 16  ;;  %v16476_v11 = vadd.f32 %v12335_v25, %v16392_v50 }
 0x443   : > { %v12397_v56 = vpop.f32.mrf.mxu1  ;;  %v10075_v36 = vor.u32 %v10074_v61, %v10070_v15  ;;  %v10159_v24 = vor.u32 %v10158_v14, %v10154_v52  ;;  %v16480_v2 = vadd.f32 %v12338_v31, %v16426_v42  ;;  %v9708_v41 = vshll.u32 %v16390_v33, 16 }
 0x444   : > { %v9702_v6 = vsel %vm6716_vm4, %v9697_v0, %v9701_v35  ;;  %v9713_v44 = vshll.u32 %v16396_v45, 16  ;;  %v9706_v15 = vshrl.u32 %v16390_v33, 16  ;;  %v9717_v61 = vshrl.u32 %v16396_v45, 16 }
 0x445   : > { %v12398_v8 = vpop.f32.mrf.mxu1  ;;  %v10080_v53 = vsel %vm6716_vm4, %v10075_v36, %v10079_v21  ;;  %v10164_v30 = vsel %vm6716_vm4, %v10159_v24, %v10163_v29  ;;  %v10096_v26 = vshll.u32 %v9702_v6, 16  ;;  %v10094_v50 = vshrl.u32 %v9702_v6, 16 }
 0x446   : > { %v12345_v5 = vpop.f32.mrf.mxu0  ;;  %10534 = vmatprep.mubr.bf16.mxu0 %v10080_v53  ;;  %12950 = vmatmul.mubr.bf16.gmra.mxu1 %v10164_v30  ;;  %v12399_v18 = vadd.f32 %v12398_v8, %v12397_v56  ;;  %v9710_v57 = vrot.slane %v9708_v41, 1  ;;  %v9715_v42 = vrot.slane %v9713_v44, 1  ;;  %v12341_v14 = vadd.f32 %v12340_v62, %v16436_v47 }
 0x447   : > { %v12400_v52 = vpop.f32.mrf.mxu1  ;;  %10535 = vmatmul.mubr.bf16.gmra.mxu0 %v9688_v60  ;;  %v10098_v39 = vrot.slane %v10096_v26, 1  ;;  %v12344_v21 = vadd.f32 %v12343_v7, %v12342_v55  ;;  %v10103_v25 = vrot.slane %v10101_v48, 1  ;;  %v9722_v33 = vshll.u32 %v16424_v43, 16 }
 0x448   : > { %v12346_v27 = vpop.f32.mrf.mxu0  ;;  %v9711_v0 = vor.u32 %v9710_v57, %v9706_v15  ;;  %v9727_v35 = vshll.u32 %v16432_v1, 16  ;;  %v16492_v36 = vadd.f32 %v16376_v9, %v12341_v14  ;;  %v9720_v60 = vshrl.u32 %v16424_v43, 16 }
 0x449   : > { %v12401_v29 = vpop.f32.mrf.mxu1  ;;  %v10099_v31 = vor.u32 %v10098_v39, %v10094_v50  ;;  %v16497_v62 = vadd.f32 %v16412_v17, %v12344_v21  ;;  %v9724_v55 = vrot.slane %v9722_v33, 1  ;;  %v10125_v44 = vshll.u32 %v9717_v61, 16 }
 0x44a   : > { %v12402_v56 = vadd.f32 %v12401_v29, %v12400_v52  ;;  %v12348_v24 = vpop.f32.mrf.mxu0  ;;  %v9716_v45 = vsel %vm6716_vm4, %v9711_v0, %v9715_v42  ;;  %v9729_v7 = vrot.slane %v9727_v35, 1  ;;  %v9731_v43 = vshrl.u32 %v16432_v1, 16 }
 0x44b   : > { %v12403_v47 = vpop.f32.mrf.mxu1  ;;  %v10104_v48 = vsel %vm6716_vm4, %v10099_v31, %v10103_v25  ;;  %v10118_v8 = vshrl.u32 %v9716_v45, 16  ;;  %v10120_v41 = vshll.u32 %v9716_v45, 16  ;;  %v9725_v30 = vor.u32 %v9724_v55, %v9720_v60 }
 0x44c   : > { %v12349_v53 = vpop.f32.mrf.mxu0  ;;  %10542 = vmatprep.mubr.bf16.mxu0 %v10104_v48  ;;  %v12347_v26 = vadd.f32 %v12346_v27, %v12345_v5  ;;  %v9045_v17 = vadd.f32 %v12399_v18, %v16036_v34  ;;  %v9048_v42 = vadd.f32 %v12402_v56, %v16453_v58  ;;  %v10127_v5 = vrot.slane %v10125_v44, 1 }
 0x44d   : > { %v12404_v9 = vpop.f32.mrf.mxu1  ;;  %v12350_v15 = vadd.f32 %v12349_v53, %v12348_v24  ;;  %v10122_v50 = vrot.slane %v10120_v41, 1  ;;  %v9730_v14 = vsel %vm6716_vm4, %v9725_v30, %v9729_v7  ;;  %v10149_v34 = vshll.u32 %v9731_v43, 16 }
 0x44e   : > { %v12405_v52 = vadd.f32 %v12404_v9, %v12403_v47  ;;  %v12351_v57 = vpop.f32.mrf.mxu0  ;;  %v16505_v61 = vadd.f32 %v12347_v26, %v16449_v22  ;;  %v10144_v27 = vshll.u32 %v9730_v14, 16  ;;  %v10142_v35 = vshrl.u32 %v9730_v14, 16 }
 0x44f   : > { %v12406_v39 = vpop.f32.mrf.mxu1  ;;  %v16508_v21 = vadd.f32 %v12350_v15, %v16467_v23  ;;  %10543 = vmatmul.mubr.bf16.gmra.mxu0 %v9702_v6  ;;  %v10123_v1 = vor.u32 %v10122_v50, %v10118_v8  ;;  %v10151_v55 = vrot.slane %v10149_v34, 1 }
 0x450   : > { %v12352_v25 = vpop.f32.mrf.mxu0  ;;  %v9053_v29 = vadd.f32 %v12405_v52, %v16056_v13  ;;  %v10146_v31 = vrot.slane %v10144_v27, 1 }
 0x451   : > { %v12407_v0 = vpop.f32.mrf.mxu1  ;;  %v12353_v18 = vadd.f32 %v12352_v25, %v12351_v57  ;;  %v10128_v58 = vsel %vm6716_vm4, %v10123_v1, %v10127_v5 }
 0x452   : > { %v12408_v33 = vadd.f32 %v12407_v0, %v12406_v39  ;;  %v12354_v22 = vpop.f32.mrf.mxu0  ;;  %10550 = vmatprep.mubr.bf16.mxu0 %v10128_v58  ;;  %v10147_v6 = vor.u32 %v10146_v31, %v10142_v35 }
 0x453   : > { %v12409_v56 = vpop.f32.mrf.mxu1  ;;  %v16513_v23 = vadd.f32 %v16441_v19, %v12353_v18 }
 0x454   : > { %v12355_v60 = vpop.f32.mrf.mxu0  ;;  %v9056_v24 = vadd.f32 %v12408_v33, %v16081_v16  ;;  %v10152_v44 = vsel %vm6716_vm4, %v10147_v6, %v10151_v55  ;;  %v8759_v16 = vadd.f32 %v16113_v3, %v16129_v54 }
 0x455   : > { %v12410_v47 = vpop.f32.mrf.mxu1  ;;  %v12356_v13 = vadd.f32 %v12355_v60, %v12354_v22  ;;  %v8775_v60 = vadd.f32 %v16190_v40, %v16198_v4 }
 0x456   : > { %v12411_v7 = vadd.f32 %v12410_v47, %v12409_v56  ;;  %v12875_v41 = vpop.f32.mrf.mxu0 }
 0x457   : > { %v12412_v48 = vpop.f32.mrf.mxu1  ;;  %v16517_v8 = vadd.f32 %v16460_v28, %v12356_v13  ;;  %10551 = vmatmul.mubr.bf16.gmra.mxu0 %v9716_v45  ;;  %v16520_v53 = vadd.f32 %v12875_v41, %v9053_v29 }
 0x458   : > { %v9061_v19 = vadd.f32 %v12411_v7, %v16098_v46  ;;  %10558 = vmatprep.mubr.bf16.mxu0 %v10152_v44  ;;  %v9205_v30 = vpop.f32.mrf.mxu0 }
 0x459   : > { %v12413_v9 = vpop.f32.mrf.mxu1  ;;  %v16525_v26 = vadd.f32 %v9205_v30, %v9045_v17 }
 0x45a   : > { %v12414_v43 = vadd.f32 %v12413_v9, %v12412_v48  ;;  %v12876_v28 = vpop.f32.mrf.mxu0 }
 0x45b   : > { %v12415_v15 = vpop.f32.mrf.mxu1  ;;  %v16527_v50 = vadd.f32 %v12876_v28, %v9056_v24 }
 0x45c   : > { %v9064_v45 = vadd.f32 %v12414_v43, %v8759_v16  ;;  %v9208_v57 = vpop.f32.mrf.mxu0 }
 0x45d   : > { %v12416_v52 = vpop.f32.mrf.mxu1  ;;  %v16529_v1 = vadd.f32 %v9208_v57, %v9048_v42 }
 0x45e   : > { %v12417_v39 = vadd.f32 %v12416_v52, %v12415_v15 }
 0x45f   : > { %v12418_v46 = vpop.f32.mrf.mxu1  ;;  %v12879_v5 = vpop.f32.mrf.mxu0  ;;  %10559 = vmatmul.mubr.bf16.gmra.mxu0 %v9730_v14 }
 0x460   : > { %v9069_v27 = vadd.f32 %v12417_v39, %v16145_v59 }
 0x461   : > { %v12419_v25 = vpop.f32.mrf.mxu1  ;;  %v9221_v3 = vpop.f32.mrf.mxu0 }
 0x462   : > { %v12420_v54 = vadd.f32 %v12419_v25, %v12418_v46  ;;  %v16532_v17 = vadd.f32 %v12879_v5, %v9069_v27  ;;  %v16534_v29 = vadd.f32 %v9221_v3, %v9061_v19  ;;  %v8791_v25 = vadd.f32 %v16267_v63, %v16261_v49  ;;  %v17073_v63 = vld [vmem:[#allocation37_spill] sm:$0xff] }
 0x463   : > { %v12421_v0 = vpop.f32.mrf.mxu1  ;;  %v12880_v34 = vpop.f32.mrf.mxu0 }
 0x464   : > { %v9072_v18 = vadd.f32 %v12420_v54, %v16158_v37 }
 0x465   : > { %v12422_v58 = vpop.f32.mrf.mxu1  ;;  %v9224_v33 = vpop.f32.mrf.mxu0 }
 0x466   : > { %v12423_v42 = vadd.f32 %v12422_v58, %v12421_v0  ;;  %v16537_v35 = vadd.f32 %v12880_v34, %v9072_v18  ;;  %v16539_v31 = vadd.f32 %v9224_v33, %v9064_v45 }
 0x467   : > { %v12424_v14 = vpop.f32.mrf.mxu1  ;;  %v12883_v59 = vpop.f32.mrf.mxu0 }
 0x468   : > { %v9077_v22 = vadd.f32 %v12423_v42, %v16171_v10 }
 0x469   : > { %v12425_v56 = vpop.f32.mrf.mxu1  ;;  %v9237_v6 = vpop.f32.mrf.mxu0 }
 0x46a   : > { %v12426_v24 = vadd.f32 %v12425_v56, %v12424_v14  ;;  %v16544_v47 = vadd.f32 %v9237_v6, %v9077_v22  ;;  %v17072_v22 = vld [vmem:[#allocation17_spill] sm:$0xff] }
 0x46b   : > { %v12427_v37 = vpop.f32.mrf.mxu1  ;;  %v12884_v13 = vpop.f32.mrf.mxu0 }
 0x46c   : > { %v9080_v55 = vadd.f32 %v12426_v24, %v8775_v60 }
 0x46d   : > { %v12428_v7 = vpop.f32.mrf.mxu1  ;;  %v9240_v48 = vpop.f32.mrf.mxu0 }
 0x46e   : > { %v12429_v41 = vadd.f32 %v12428_v7, %v12427_v37  ;;  %v16546_v44 = vadd.f32 %v9240_v48, %v9080_v55 }
 0x46f   : > { %v12430_v19 = vpop.f32.mrf.mxu1 }
 0x470   : > { %v9085_v9 = vadd.f32 %v12429_v41, %v16215_v38 }
 0x471   : > { %v12431_v10 = vpop.f32.mrf.mxu1  ;;  %v12887_v30 = vpop.f32.mrf.mxu0 }
 0x472   : > { %v16549_v16 = vadd.f32 %v12883_v59, %v9085_v9  ;;  %v12432_v43 = vadd.f32 %v12431_v10, %v12430_v19  ;;  %v17074_v9 = vld [vmem:[#allocation19_spill] sm:$0xff] }
 0x473   : > { %v12433_v40 = vpop.f32.mrf.mxu1  ;;  %v9253_v4 = vpop.f32.mrf.mxu0 }
 0x474   : > { %v9088_v15 = vadd.f32 %v12432_v43, %v16234_v32 }
 0x475   : > { %v12434_v28 = vpop.f32.mrf.mxu1  ;;  %v12888_v45 = vpop.f32.mrf.mxu0 }
 0x476   : > { %v16552_v52 = vadd.f32 %v12884_v13, %v9088_v15  ;;  %v12435_v57 = vadd.f32 %v12434_v28, %v12433_v40 }
 0x477   : > { %v12436_v39 = vpop.f32.mrf.mxu1  ;;  %v9256_v46 = vpop.f32.mrf.mxu0 }
 0x478   : > { %v9093_v5 = vadd.f32 %v12435_v57, %v16253_v20  ;;  %v17075_v57 = vld [vmem:[#allocation38_spill] sm:$0xff] }
 0x479   : > { %v12437_v27 = vpop.f32.mrf.mxu1  ;;  %v12891_v38 = vpop.f32.mrf.mxu0 }
 0x47a   : > { %v12438_v3 = vadd.f32 %v12437_v27, %v12436_v39  ;;  %v16557_v54 = vadd.f32 %v9253_v4, %v9093_v5 }
 0x47b   : > { %v12439_v0 = vpop.f32.mrf.mxu1  ;;  %v9269_v34 = vpop.f32.mrf.mxu0 }
 0x47c   : > { %v9096_v32 = vadd.f32 %v12438_v3, %v8791_v25 }
 0x47d   : > { %v12440_v18 = vpop.f32.mrf.mxu1  ;;  %v12892_v58 = vpop.f32.mrf.mxu0 }
 0x47e   : > { %v12441_v33 = vadd.f32 %v12440_v18, %v12439_v0  ;;  %v16559_v42 = vadd.f32 %v9256_v46, %v9096_v32  ;;  %v17076_v0 = vld [vmem:[#allocation16_spill] sm:$0xff] }
 0x47f   : > { %v12442_v14 = vpop.f32.mrf.mxu1  ;;  %v9272_v59 = vpop.f32.mrf.mxu0 }
 0x480   : > { %v9101_v20 = vadd.f32 %v12441_v33, %v17072_v22 }
 0x481   : > { %v12443_v56 = vpop.f32.mrf.mxu1 }
 0x482   : > { %v12444_v6 = vadd.f32 %v12443_v56, %v12442_v14  ;;  %v12895_v60 = vpop.f32.mrf.mxu0  ;;  %v16562_v24 = vadd.f32 %v12887_v30, %v9101_v20  ;;  %v17077_v20 = vld [vmem:[#allocation41_spill] sm:$0xff] }
 0x483   : > { %v12445_v49 = vpop.f32.mrf.mxu1 }
 0x484   : > { %v9104_v37 = vadd.f32 %v12444_v6, %v17073_v63  ;;  %v9285_v13 = vpop.f32.mrf.mxu0 }
 0x485   : > { %v12446_v55 = vpop.f32.mrf.mxu1 }
 0x486   : > { %v12447_v7 = vadd.f32 %v12446_v55, %v12445_v49  ;;  %v12896_v48 = vpop.f32.mrf.mxu0  ;;  %v16565_v41 = vadd.f32 %v12888_v45, %v9104_v37 }
 0x487   : > { %v12448_v19 = vpop.f32.mrf.mxu1 }
 0x488   : > { %v9109_v10 = vadd.f32 %v12447_v7, %v17074_v9  ;;  %v9288_v43 = vpop.f32.mrf.mxu0  ;;  %v17078_v7 = vld [vmem:[#allocation39_spill] sm:$0xff] }
 0x489   : > { %v12449_v40 = vpop.f32.mrf.mxu1 }
 0x48a   : > { %v12450_v4 = vadd.f32 %v12449_v40, %v12448_v19  ;;  %v16568_v15 = vpop.f32.mrf.mxu0  ;;  %v16570_v28 = vadd.f32 %v9269_v34, %v9109_v10 }
 0x48b   : > { %v12451_v30 = vpop.f32.mrf.mxu1 }
 0x48c   : > { %v9112_v39 = vadd.f32 %v12450_v4, %v17075_v57  ;;  %v9301_v46 = vpop.f32.mrf.mxu0  ;;  %v17079_v57 = vld [vmem:[#allocation18_spill] sm:$0xff] }
 0x48d   : > { %v12452_v5 = vpop.f32.mrf.mxu1 }
 0x48e   : > { %v12453_v27 = vadd.f32 %v12452_v5, %v12451_v30  ;;  %v16573_v25 = vpop.f32.mrf.mxu0  ;;  %v16575_v45 = vadd.f32 %v9272_v59, %v9112_v39 }
 0x48f   : > { %v12454_v3 = vpop.f32.mrf.mxu1 }
 0x490   : > { %v9117_v32 = vadd.f32 %v12453_v27, %v17076_v0  ;;  %v9304_v18 = vpop.f32.mrf.mxu0 }
 0x491   : > { %v12455_v33 = vpop.f32.mrf.mxu1 }
 0x492   : > { %v16578_v14 = vadd.f32 %v12891_v38, %v9117_v32  ;;  %v12456_v22 = vadd.f32 %v12455_v33, %v12454_v3 }
 0x493   : > { %v12457_v34 = vpop.f32.mrf.mxu1 }
 0x494   : > { %v9120_v56 = vadd.f32 %v12456_v22, %v17077_v20  ;;  %v16581_v6 = vpop.f32.mrf.mxu0 }
 0x495   : > { %v12458_v49 = vpop.f32.mrf.mxu1 }
 0x496   : > { %v16583_v63 = vadd.f32 %v12892_v58, %v9120_v56  ;;  %v12459_v37 = vadd.f32 %v12458_v49, %v12457_v34  ;;  %v9317_v55 = vpop.f32.mrf.mxu0 }
 0x497   : > { %v12460_v59 = vpop.f32.mrf.mxu1 }
 0x498   : > { %v9125_v19 = vadd.f32 %v12459_v37, %v17078_v7  ;;  %v16586_v9 = vpop.f32.mrf.mxu0 }
 0x499   : > { %v12461_v10 = vpop.f32.mrf.mxu1 }
 0x49a   : > { %v16588_v40 = vadd.f32 %v9285_v13, %v9125_v19  ;;  %v12462_v38 = vadd.f32 %v12461_v10, %v12460_v59  ;;  %v9320_v4 = vpop.f32.mrf.mxu0 }
 0x49b   : > { %v12463_v30 = vpop.f32.mrf.mxu1 }
 0x49c   : > { %v9128_v39 = vadd.f32 %v12462_v38, %v17079_v57  ;;  %v16591_v5 = vpop.f32.mrf.mxu0 }
 0x49d   : > { %v12464_v27 = vpop.f32.mrf.mxu1 }
 0x49e   : > { %v16593_v58 = vadd.f32 %v9288_v43, %v9128_v39  ;;  %v12465_v3 = vadd.f32 %v12464_v27, %v12463_v30  ;;  %v16595_v0 = vpop.f32.mrf.mxu0 }
 0x49f   : > { %v12466_v32 = vpop.f32.mrf.mxu1 }
 0x4a0   : > { %v9133_v33 = vadd.f32 %v12465_v3, %v16446_v12  ;;  %v16598_v22 = vpop.f32.mrf.mxu0 }
 0x4a1   : > { %v12467_v13 = vpop.f32.mrf.mxu1 }
 0x4a2   : > { %v16600_v34 = vadd.f32 %v12895_v60, %v9133_v33  ;;  %v12468_v20 = vadd.f32 %v12467_v13, %v12466_v32  ;;  %v16602_v56 = vpop.f32.mrf.mxu0 }
 0x4a3   : > { %v12469_v49 = vpop.f32.mrf.mxu1 }
 0x4a4   : > { %v9136_v37 = vadd.f32 %v12468_v20, %v16465_v51  ;;  %v12539_v59 = vpop.f32.mrf.mxu0 }
 0x4a5   : > { %v12470_v43 = vpop.f32.mrf.mxu1 }
 0x4a6   : > { %v16605_v7 = vadd.f32 %v12896_v48, %v9136_v37  ;;  %v12471_v19 = vadd.f32 %v12470_v43, %v12469_v49  ;;  %v12540_v10 = vpop.f32.mrf.mxu0 }
 0x4a7   : > { %v12472_v38 = vpop.f32.mrf.mxu1 }
 0x4a8   : > { %v9141_v12 = vadd.f32 %v12471_v19, %v16476_v11  ;;  %v12542_v30 = vpop.f32.mrf.mxu0 }
 0x4a9   : > { %v12473_v57 = vpop.f32.mrf.mxu1 }
 0x4aa   : > { %v16608_v39 = vadd.f32 %v9301_v46, %v9141_v12  ;;  %v12474_v60 = vadd.f32 %v12473_v57, %v12472_v38  ;;  %v12543_v27 = vpop.f32.mrf.mxu0 }
 0x4ab   : > { %v12475_v3 = vpop.f32.mrf.mxu1 }
 0x4ac   : > { %v9144_v32 = vadd.f32 %v12474_v60, %v16480_v2  ;;  %v16611_v33 = vpop.f32.mrf.mxu0 }
 0x4ad   : > { %v12476_v51 = vpop.f32.mrf.mxu1 }
 0x4ae   : > { %v16613_v13 = vadd.f32 %v9304_v18, %v9144_v32  ;;  %v12477_v48 = vadd.f32 %v12476_v51, %v12475_v3  ;;  %v16615_v20 = vpop.f32.mrf.mxu0 }
 0x4af   : > { %v12478_v49 = vpop.f32.mrf.mxu1 }
 0x4b0   : > { %17080 = vst [vmem:[#allocation42_spill] sm:$0xff] %v16613_v13  ;;  %v9149_v11 = vadd.f32 %v12477_v48, %v16492_v36  ;;  %v16618_v37 = vpop.f32.mrf.mxu0 }
 0x4b1   : > { %v12479_v46 = vpop.f32.mrf.mxu1 }
 0x4b2   : > { %v16621_v43 = vadd.f32 %v16568_v15, %v9149_v11  ;;  %v12480_v19 = vadd.f32 %v12479_v46, %v12478_v49  ;;  %v16623_v38 = vpop.f32.mrf.mxu0 }
 0x4b3   : > { %v12481_v2 = vpop.f32.mrf.mxu1 }
 0x4b4   : > { %17081 = vst [vmem:[#allocation43_spill] sm:$0xff] %v16621_v43  ;;  %v9152_v12 = vadd.f32 %v12480_v19, %v16497_v62  ;;  %v12551_v18 = vpop.f32.mrf.mxu0 }
 0x4b5   : > { %v12482_v57 = vpop.f32.mrf.mxu1 }
 0x4b6   : > { %v16627_v60 = vadd.f32 %v16573_v25, %v9152_v12  ;;  %v12483_v3 = vadd.f32 %v12482_v57, %v12481_v2  ;;  %v12552_v32 = vpop.f32.mrf.mxu0 }
 0x4b7   : > { %v12484_v36 = vpop.f32.mrf.mxu1 }
 0x4b8   : > { %v9157_v51 = vadd.f32 %v12483_v3, %v16505_v61  ;;  %v16630_v48 = vpop.f32.mrf.mxu0 }
 0x4b9   : > { %v12485_v15 = vpop.f32.mrf.mxu1 }
 0x4ba   : > { %v16632_v11 = vadd.f32 %v9317_v55, %v9157_v51  ;;  %v12486_v49 = vadd.f32 %v12485_v15, %v12484_v36  ;;  %v12555_v46 = vpop.f32.mrf.mxu0  ;;  %v12541_v51 = vadd.f32 %v12540_v10, %v12539_v59  ;;  %v12544_v59 = vadd.f32 %v12543_v27, %v12542_v30 }
 0x4bb   : > { %v12487_v43 = vpop.f32.mrf.mxu1 }
 0x4bc   : > { %v9160_v62 = vadd.f32 %v12486_v49, %v16508_v21  ;;  %v16635_v19 = vpop.f32.mrf.mxu0 }
 0x4bd   : > { %v12488_v13 = vpop.f32.mrf.mxu1 }
 0x4be   : > { %v16637_v25 = vadd.f32 %v9320_v4, %v9160_v62  ;;  %v12489_v2 = vadd.f32 %v12488_v13, %v12487_v43  ;;  %v16639_v12 = vpop.f32.mrf.mxu0  ;;  %v12535_v4 = vadd.f32 %v16595_v0, %v16591_v5  ;;  %v12137_v62 = vld [vmem:[#allocation2 + $0x50] sm:$0xff]   ;;  %v12136_v5 = vld [vmem:[#allocation2 + $0x38] sm:$0xff]  }
 0x4bf   : > { %v12490_v57 = vpop.f32.mrf.mxu1  ;;  %v11994_v30 = vunpack.c.l.bf16 %v12136_v5 }
 0x4c0   : > { %17082 = vst [vmem:[#allocation21_spill] sm:$0xff] %v16637_v25  ;;  %v9165_v61 = vadd.f32 %v12489_v2, %v16513_v23  ;;  %v16642_v3 = vpop.f32.mrf.mxu0  ;;  %v16657_v23 = vld [vmem:[%s16832_s3 + $0x1] ss:$0 sm:$0xff] }
 0x4c1   : > { %v12491_v55 = vpop.f32.mrf.mxu1 }
 0x4c2   : > { %v16645_v36 = vadd.f32 %v16581_v6, %v9165_v61  ;;  %v12492_v15 = vadd.f32 %v12491_v55, %v12490_v57  ;;  %v16647_v21 = vpop.f32.mrf.mxu0  ;;  %v12538_v55 = vadd.f32 %v16602_v56, %v16598_v22 }
 0x4c3   : > { %v12923_v49 = vpop.f32.mrf.mxu1 }
 0x4c4   : > { %17083 = vst [vmem:[#allocation45_spill] sm:$0xff] %v16645_v36  ;;  %v9168_v13 = vadd.f32 %v12492_v15, %v16517_v8  ;;  %v10610_v43 = vadd.f32 %v12923_v49, %v12541_v51  ;;  %v16652_v25 = vpop.f32.mrf.mxu0  ;;  %v11998_v8 = vunpack.c.l.bf16 %v12137_v62 }
 0x4c5   : > { %v10601_v6 = vpop.f32.mrf.mxu1 }
 0x4c6   : > { %v16660_v10 = vadd.f32 %v16586_v9, %v9168_v13  ;;  %v10730_v2 = vadd.f32 %v10610_v43, %v16520_v53  ;;  %v10602_v57 = vadd.f32 %v12535_v4, %v10601_v6  ;;  %v12564_v0 = vpop.f32.mrf.mxu0  ;;  %v11999_v4 = vunpack.c.h.bf16 %v12137_v62 }
 0x4c7   : > { %v12924_v61 = vpop.f32.mrf.mxu1  ;;  %v12553_v6 = vadd.f32 %v12552_v32, %v12551_v18  ;;  %v12556_v32 = vadd.f32 %v12555_v46, %v16630_v48 }
 0x4c8   : > { %17084 = vst [vmem:[#allocation44_spill] sm:$0xff] %v16660_v10  ;;  %v10767_v51 = vadd.f32 %v16657_v23, %v10730_v2  ;;  %v10728_v15 = vadd.f32 %v10602_v57, %v16525_v26  ;;  %v10613_v49 = vadd.f32 %v12924_v61, %v12544_v59  ;;  %v16667_v36 = vpop.f32.mrf.mxu0  ;;  %v11995_v26 = vunpack.c.h.bf16 %v12136_v5 }
 0x4c9   : > { %v10604_v9 = vpop.f32.mrf.mxu1  ;;  %v12547_v57 = vadd.f32 %v16615_v20, %v16611_v33 }
 0x4ca   : > { %v10765_v27 = vadd.f32 %v16657_v23, %v10728_v15  ;;  %v10731_v53 = vadd.f32 %v10613_v49, %v16527_v50  ;;  %v10605_v13 = vadd.f32 %v12538_v55, %v10604_v9  ;;  %v16671_v43 = vpop.f32.mrf.mxu0  ;;  %v10863_v10 = vadd.f32 %v11998_v8, %v10767_v51  ;;  %v12139_v15 = vld [vmem:[#allocation2 + $0x80] sm:$0xff]   ;;  %v12138_v8 = vld [vmem:[#allocation2 + $0x68] sm:$0xff]  }
 0x4cb   : > { %v12927_v59 = vpop.f32.mrf.mxu1 }
 0x4cc   : > { %v10768_v22 = vadd.f32 %v16657_v23, %v10731_v53  ;;  %v10729_v56 = vadd.f32 %v10605_v13, %v16529_v1  ;;  %v16675_v2 = vpop.f32.mrf.mxu0  ;;  %v10626_v61 = vadd.f32 %v12927_v59, %v12553_v6  ;;  %v10861_v50 = vadd.f32 %v11994_v30, %v10765_v27 }
 0x4cd   : > { %v10617_v49 = vpop.f32.mrf.mxu1  ;;  %v10895_v51 = vmax.f32 %v10863_v10, 0.0  ;;  %v12006_v13 = vunpack.c.l.bf16 %v12139_v15  ;;  %v12550_v30 = vadd.f32 %v16623_v38, %v16618_v37  ;;  %v12002_v10 = vunpack.c.l.bf16 %v12138_v8 }
 0x4ce   : > { %v10864_v62 = vadd.f32 %v11999_v4, %v10768_v22  ;;  %v10766_v55 = vadd.f32 %v16657_v23, %v10729_v56  ;;  %v16680_v18 = vpop.f32.mrf.mxu0  ;;  %v10734_v1 = vadd.f32 %v10626_v61, %v16532_v17  ;;  %v10618_v5 = vadd.f32 %v12547_v57, %v10617_v49 }
 0x4cf   : > { %v12928_v33 = vpop.f32.mrf.mxu1  ;;  %v10893_v46 = vmax.f32 %v10861_v50, 0.0  ;;  %v12007_v57 = vunpack.c.h.bf16 %v12139_v15  ;;  %v12559_v49 = vadd.f32 %v16639_v12, %v16635_v19  ;;  %v12562_v19 = vadd.f32 %v16647_v21, %v16642_v3 }
 0x4d0   : > { %v10896_v9 = vmax.f32 %v10864_v62, 0.0  ;;  %v10862_v53 = vadd.f32 %v11995_v26, %v10766_v55  ;;  %v16684_v20 = vpop.f32.mrf.mxu0  ;;  %v10771_v27 = vadd.f32 %v16657_v23, %v10734_v1  ;;  %v10732_v4 = vadd.f32 %v10618_v5, %v16534_v29 }
 0x4d1   : > { %v10629_v48 = vadd.f32 %v12928_v33, %v12556_v32  ;;  %v10620_v22 = vpop.f32.mrf.mxu1  ;;  %v12565_v29 = vadd.f32 %v12564_v0, %v16652_v25  ;;  %v12003_v55 = vunpack.c.h.bf16 %v12138_v8  ;;  %v12568_v12 = vadd.f32 %v16671_v43, %v16667_v36 }
 0x4d2   : > { %v12064_v17 = vpack.c.bf16 %v10896_v9, %v10895_v51  ;;  %v10894_v6 = vmax.f32 %v10862_v53, 0.0  ;;  %v16690_v56 = vpop.f32.mrf.mxu0  ;;  %v10769_v26 = vadd.f32 %v16657_v23, %v10732_v4  ;;  %v10621_v61 = vadd.f32 %v12550_v30, %v10620_v22  ;;  %v12140_v30 = vld [vmem:[#allocation2 + $0x98] sm:$0xff]  }
 0x4d3   : > { %v10735_v59 = vadd.f32 %v10629_v48, %v16537_v35  ;;  %v10867_v38 = vadd.f32 %v12006_v13, %v10771_v27  ;;  %v12010_v22 = vunpack.c.l.bf16 %v12140_v30 }
 0x4d4   : > { %12152 = vst [vmem:[%s13963_s12 + $0x8] sm:$0xff] %v12064_v17   ;;  %v12059_v37 = vpack.c.bf16 %v10894_v6, %v10893_v46  ;;  %v10733_v62 = vadd.f32 %v10621_v61, %v16539_v31  ;;  %v10865_v5 = vadd.f32 %v12002_v10, %v10769_v26  ;;  %v12141_v31 = vld [vmem:[#allocation2 + $0xb0] sm:$0xff]  }
 0x4d5   : > { %v10772_v50 = vadd.f32 %v16657_v23, %v10735_v59  ;;  %v12931_v32 = vpop.f32.mrf.mxu1  ;;  %v12575_v1 = vpop.f32.mrf.mxu0  ;;  %v10899_v9 = vmax.f32 %v10867_v38, 0.0  ;;  %v12014_v10 = vunpack.c.l.bf16 %v12141_v31  ;;  %v12015_v61 = vunpack.c.h.bf16 %v12141_v31 }
 0x4d6   : > { %12060 = vst [vmem:[%s13963_s12] sm:$0xff] %v12059_v37   ;;  %v10770_v15 = vadd.f32 %v16657_v23, %v10733_v62  ;;  %v10642_v51 = vadd.f32 %v12931_v32, %v12565_v29  ;;  %v10897_v48 = vmax.f32 %v10865_v5, 0.0 }
 0x4d7   : > { %v10868_v35 = vadd.f32 %v12007_v57, %v10772_v50  ;;  %v10633_v53 = vpop.f32.mrf.mxu1  ;;  %v12576_v13 = vpop.f32.mrf.mxu0 }
 0x4d8   : > { %v10866_v0 = vadd.f32 %v12003_v55, %v10770_v15  ;;  %v10738_v33 = vadd.f32 %v10642_v51, %v16549_v16  ;;  %v10634_v8 = vadd.f32 %v12559_v49, %v10633_v53  ;;  %v12577_v36 = vadd.f32 %v12576_v13, %v12575_v1  ;;  %v12143_v1 = vld [vmem:[#allocation2 + $0xe0] sm:$0xff]  }
 0x4d9   : > { %v10900_v25 = vmax.f32 %v10868_v35, 0.0  ;;  %v12932_v27 = vpop.f32.mrf.mxu1  ;;  %v12578_v4 = vpop.f32.mrf.mxu0  ;;  %v12571_v49 = vadd.f32 %v16680_v18, %v16675_v2 }
 0x4da   : > { %v10898_v17 = vmax.f32 %v10866_v0, 0.0  ;;  %v10736_v6 = vadd.f32 %v10634_v8, %v16544_v47  ;;  %v10775_v16 = vadd.f32 %v16657_v23, %v10738_v33  ;;  %v10645_v26 = vadd.f32 %v12932_v27, %v12568_v12 }
 0x4db   : > { %v12074_v46 = vpack.c.bf16 %v10900_v25, %v10899_v9  ;;  %v10636_v59 = vpop.f32.mrf.mxu1  ;;  %v12579_v37 = vpop.f32.mrf.mxu0  ;;  %v12011_v47 = vunpack.c.h.bf16 %v12140_v30  ;;  %v12022_v33 = vunpack.c.l.bf16 %v12143_v1  ;;  %v12574_v27 = vadd.f32 %v16690_v56, %v16684_v20 }
 0x4dc   : > { %v12069_v57 = vpack.c.bf16 %v10898_v17, %v10897_v48  ;;  %v10773_v3 = vadd.f32 %v16657_v23, %v10736_v6  ;;  %v10637_v21 = vadd.f32 %v12562_v19, %v10636_v59  ;;  %v10739_v43 = vadd.f32 %v10645_v26, %v16552_v52  ;;  %v12142_v19 = vld [vmem:[#allocation2 + $0xc8] sm:$0xff]  }
 0x4dd   : > { %12154 = vst [vmem:[%s13963_s12 + $0x18] sm:$0xff] %v12074_v46   ;;  %v10871_v29 = vadd.f32 %v12014_v10, %v10775_v16  ;;  %v12580_v35 = vadd.f32 %v12579_v37, %v12578_v4  ;;  %v12023_v6 = vunpack.c.h.bf16 %v12143_v1  ;;  %v12018_v10 = vunpack.c.l.bf16 %v12142_v19 }
 0x4de   : > { %12153 = vst [vmem:[%s13963_s12 + $0x10] sm:$0xff] %v12069_v57   ;;  %v10737_v38 = vadd.f32 %v10637_v21, %v16546_v44  ;;  %v10869_v50 = vadd.f32 %v12010_v22, %v10773_v3  ;;  %v10776_v62 = vadd.f32 %v16657_v23, %v10739_v43  ;;  %v12019_v56 = vunpack.c.h.bf16 %v12142_v19 }
 0x4df   : > { %v12935_v55 = vpop.f32.mrf.mxu1  ;;  %v10903_v13 = vmax.f32 %v10871_v29, 0.0 }
 0x4e0   : > { %v10774_v32 = vadd.f32 %v16657_v23, %v10737_v38  ;;  %v10658_v5 = vadd.f32 %v12935_v55, %v12577_v36  ;;  %v10872_v52 = vadd.f32 %v12015_v61, %v10776_v62  ;;  %v10901_v25 = vmax.f32 %v10869_v50, 0.0  ;;  %v12144_v55 = vld [vmem:[#allocation2 + $0xf8] sm:$0xff]  }
 0x4e1   : > { %v10649_v15 = vpop.f32.mrf.mxu1  ;;  %v12581_v51 = vpop.f32.mrf.mxu0 }
 0x4e2   : > { %v10870_v9 = vadd.f32 %v12011_v47, %v10774_v32  ;;  %v10742_v44 = vadd.f32 %v10658_v5, %v16562_v24  ;;  %v10650_v53 = vadd.f32 %v12571_v49, %v10649_v15  ;;  %v10904_v0 = vmax.f32 %v10872_v52, 0.0 }
 0x4e3   : > { %v12936_v31 = vpop.f32.mrf.mxu1  ;;  %v12582_v8 = vpop.f32.mrf.mxu0 }
 0x4e4   : > { %v10902_v2 = vmax.f32 %v10870_v9, 0.0  ;;  %v10779_v18 = vadd.f32 %v16657_v23, %v10742_v44  ;;  %v10740_v30 = vadd.f32 %v10650_v53, %v16557_v54  ;;  %v10661_v12 = vadd.f32 %v12936_v31, %v12580_v35 }
 0x4e5   : > { %v12084_v24 = vpack.c.bf16 %v10904_v0, %v10903_v13  ;;  %v10652_v4 = vpop.f32.mrf.mxu1  ;;  %v12584_v48 = vpop.f32.mrf.mxu0  ;;  %v12583_v57 = vadd.f32 %v12582_v8, %v12581_v51  ;;  %v12026_v44 = vunpack.c.l.bf16 %v12144_v55  ;;  %v12145_v13 = vld [vmem:[#allocation2 + $0x110] sm:$0xff]  }
 0x4e6   : > { %v12079_v46 = vpack.c.bf16 %v10902_v2, %v10901_v25  ;;  %v10743_v17 = vadd.f32 %v10661_v12, %v16565_v41  ;;  %v10777_v16 = vadd.f32 %v16657_v23, %v10740_v30  ;;  %v10653_v22 = vadd.f32 %v12574_v27, %v10652_v4 }
 0x4e7   : > { %12156 = vst [vmem:[%s13963_s12 + $0x28] sm:$0xff] %v12084_v24   ;;  %v12585_v26 = vpop.f32.mrf.mxu0  ;;  %v10875_v54 = vadd.f32 %v12022_v33, %v10779_v18  ;;  %v12030_v18 = vunpack.c.l.bf16 %v12145_v13 }
 0x4e8   : > { %12155 = vst [vmem:[%s13963_s12 + $0x20] sm:$0xff] %v12079_v46   ;;  %v10780_v59 = vadd.f32 %v16657_v23, %v10743_v17  ;;  %v10741_v20 = vadd.f32 %v10653_v22, %v16559_v42  ;;  %v10873_v43 = vadd.f32 %v12018_v10, %v10777_v16  ;;  %v12586_v29 = vadd.f32 %v12585_v26, %v12584_v48 }
 0x4e9   : > { %v12939_v3 = vpop.f32.mrf.mxu1  ;;  %v12587_v36 = vpop.f32.mrf.mxu0  ;;  %v10907_v37 = vmax.f32 %v10875_v54, 0.0  ;;  %v12031_v46 = vunpack.c.h.bf16 %v12145_v13 }
 0x4ea   : > { %v10876_v21 = vadd.f32 %v12023_v6, %v10780_v59  ;;  %v10778_v41 = vadd.f32 %v16657_v23, %v10741_v20  ;;  %v10905_v35 = vmax.f32 %v10873_v43, 0.0 }
 0x4eb   : > { %v10665_v61 = vpop.f32.mrf.mxu1  ;;  %v12588_v50 = vpop.f32.mrf.mxu0 }
 0x4ec   : > { %v10908_v38 = vmax.f32 %v10876_v21, 0.0  ;;  %v10666_v47 = vadd.f32 %v12583_v57, %v10665_v61  ;;  %v10874_v62 = vadd.f32 %v12019_v56, %v10778_v41  ;;  %v12589_v32 = vadd.f32 %v12588_v50, %v12587_v36  ;;  %v12146_v56 = vld [vmem:[#allocation2 + $0x128] sm:$0xff]  }
 0x4ed   : > { %v12940_v49 = vpop.f32.mrf.mxu1  ;;  %v12590_v1 = vpop.f32.mrf.mxu0 }
 0x4ee   : > { %v12094_v5 = vpack.c.bf16 %v10908_v38, %v10907_v37  ;;  %v10744_v42 = vadd.f32 %v10666_v47, %v16570_v28  ;;  %v10906_v52 = vmax.f32 %v10874_v62, 0.0  ;;  %v10674_v51 = vadd.f32 %v12939_v3, %v12589_v32 }
 0x4ef   : > { %v10668_v15 = vpop.f32.mrf.mxu1  ;;  %v12591_v25 = vpop.f32.mrf.mxu0  ;;  %v12027_v28 = vunpack.c.h.bf16 %v12144_v55  ;;  %v12034_v47 = vunpack.c.l.bf16 %v12146_v56  ;;  %v12035_v55 = vunpack.c.h.bf16 %v12146_v56 }
 0x4f0   : > { %12158 = vst [vmem:[%s13963_s12 + $0x38] sm:$0xff] %v12094_v5   ;;  %v10781_v9 = vadd.f32 %v16657_v23, %v10744_v42  ;;  %v10669_v53 = vadd.f32 %v12586_v29, %v10668_v15  ;;  %v12089_v0 = vpack.c.bf16 %v10906_v52, %v10905_v35  ;;  %v10746_v33 = vadd.f32 %v10674_v51, %v16578_v14 }
 0x4f1   : > { %v12592_v31 = vadd.f32 %v12591_v25, %v12590_v1  ;;  %v12147_v1 = vld [vmem:[#allocation2 + $0x140] sm:$0xff]  }
 0x4f2   : > { %v10745_v8 = vadd.f32 %v10669_v53, %v16575_v45  ;;  %12157 = vst [vmem:[%s13963_s12 + $0x30] sm:$0xff] %v12089_v0   ;;  %v10783_v2 = vadd.f32 %v16657_v23, %v10746_v33  ;;  %v10877_v12 = vadd.f32 %v12026_v44, %v10781_v9  ;;  %v12038_v44 = vunpack.c.l.bf16 %v12147_v1 }
 0x4f3   : > { %v12943_v30 = vpop.f32.mrf.mxu1  ;;  %v10677_v19 = vadd.f32 %v12940_v49, %v12592_v31  ;;  %v12593_v24 = vpop.f32.mrf.mxu0 }
 0x4f4   : > { %v10782_v27 = vadd.f32 %v16657_v23, %v10745_v8  ;;  %v10879_v6 = vadd.f32 %v12030_v18, %v10783_v2  ;;  %v10909_v10 = vmax.f32 %v10877_v12, 0.0  ;;  %v12039_v8 = vunpack.c.h.bf16 %v12147_v1 }
 0x4f5   : > { %v10681_v4 = vpop.f32.mrf.mxu1  ;;  %v10747_v48 = vadd.f32 %v10677_v19, %v16583_v63  ;;  %v12594_v14 = vpop.f32.mrf.mxu0 }
 0x4f6   : > { %v10878_v17 = vadd.f32 %v12027_v28, %v10782_v27  ;;  %v12595_v16 = vadd.f32 %v12594_v14, %v12593_v24  ;;  %v10911_v21 = vmax.f32 %v10879_v6, 0.0 }
 0x4f7   : > { %v10784_v45 = vadd.f32 %v16657_v23, %v10747_v48  ;;  %v12944_v26 = vpop.f32.mrf.mxu1  ;;  %v12596_v54 = vpop.f32.mrf.mxu0 }
 0x4f8   : > { %v10910_v22 = vmax.f32 %v10878_v17, 0.0  ;;  %v10682_v57 = vadd.f32 %v12595_v16, %v10681_v4 }
 0x4f9   : > { %v10880_v59 = vadd.f32 %v12031_v46, %v10784_v45  ;;  %v12597_v3 = vpop.f32.mrf.mxu0  ;;  %v10684_v41 = vpop.f32.mrf.mxu1  ;;  %v12148_v46 = vld [vmem:[#allocation2 + $0x158] sm:$0xff]  }
 0x4fa   : > { %v12099_v20 = vpack.c.bf16 %v10910_v22, %v10909_v10  ;;  %v10748_v36 = vadd.f32 %v10682_v57, %v16588_v40  ;;  %v12598_v43 = vadd.f32 %v12597_v3, %v12596_v54  ;;  %v12042_v22 = vunpack.c.l.bf16 %v12148_v46 }
 0x4fb   : > { %v10912_v63 = vmax.f32 %v10880_v59, 0.0  ;;  %v17085_v59 = vld [vmem:[#allocation42_spill] sm:$0xff] }
 0x4fc   : > { %12159 = vst [vmem:[%s13963_s12 + $0x40] sm:$0xff] %v12099_v20   ;;  %v12599_v61 = vpop.f32.mrf.mxu0  ;;  %v10785_v38 = vadd.f32 %v16657_v23, %v10748_v36  ;;  %v10685_v29 = vadd.f32 %v12598_v43, %v10684_v41  ;;  %v12947_v52 = vpop.f32.mrf.mxu1  ;;  %v12043_v20 = vunpack.c.h.bf16 %v12148_v46  ;;  %v12149_v43 = vld [vmem:[#allocation2 + $0x170] sm:$0xff]  }
 0x4fd   : > { %v12104_v37 = vpack.c.bf16 %v10912_v63, %v10911_v21 }
 0x4fe   : > { %v12600_v50 = vpop.f32.mrf.mxu0  ;;  %v10749_v62 = vadd.f32 %v10685_v29, %v16593_v58  ;;  %v10881_v5 = vadd.f32 %v12034_v47, %v10785_v38  ;;  %v10697_v0 = vpop.f32.mrf.mxu1 }
 0x4ff   : > { %12160 = vst [vmem:[%s13963_s12 + $0x48] sm:$0xff] %v12104_v37   ;;  %v12601_v49 = vadd.f32 %v12600_v50, %v12599_v61  ;;  %v17086_v37 = vld [vmem:[#allocation43_spill] sm:$0xff]  ;;  %v12046_v50 = vunpack.c.l.bf16 %v12149_v43 }
 0x500   : > { %v12602_v32 = vpop.f32.mrf.mxu0  ;;  %v10786_v42 = vadd.f32 %v16657_v23, %v10749_v62  ;;  %v10913_v53 = vmax.f32 %v10881_v5, 0.0 }
 0x501   : > { %v10690_v40 = vadd.f32 %v12943_v30, %v12601_v49 }
 0x502   : > { %v12603_v35 = vpop.f32.mrf.mxu0  ;;  %v10882_v15 = vadd.f32 %v12035_v55, %v10786_v42 }
 0x503   : > { %v10750_v51 = vadd.f32 %v10690_v40, %v16600_v34  ;;  %v12604_v9 = vadd.f32 %v12603_v35, %v12602_v32  ;;  %v12948_v34 = vpop.f32.mrf.mxu1  ;;  %v12047_v35 = vunpack.c.h.bf16 %v12149_v43 }
 0x504   : > { %v10914_v13 = vmax.f32 %v10882_v15, 0.0 }
 0x505   : > { %v10787_v58 = vadd.f32 %v16657_v23, %v10750_v51  ;;  %v10693_v25 = vadd.f32 %v12944_v26, %v12604_v9  ;;  %v10700_v6 = vpop.f32.mrf.mxu1 }
 0x506   : > { %v12109_v33 = vpack.c.bf16 %v10914_v13, %v10913_v53  ;;  %v12150_v13 = vld [vmem:[#allocation2 + $0x188] sm:$0xff]  }
 0x507   : > { %v10751_v31 = vadd.f32 %v10693_v25, %v16605_v7  ;;  %v12605_v28 = vpop.f32.mrf.mxu0  ;;  %v10883_v2 = vadd.f32 %v12038_v44, %v10787_v58  ;;  %v12951_v3 = vpop.f32.mrf.mxu1 }
 0x508   : > { %12161 = vst [vmem:[%s13963_s12 + $0x50] sm:$0xff] %v12109_v33  }
 0x509   : > { %v10788_v18 = vadd.f32 %v16657_v23, %v10751_v31  ;;  %v12606_v30 = vpop.f32.mrf.mxu0  ;;  %v10915_v4 = vmax.f32 %v10883_v2, 0.0  ;;  %v10713_v29 = vpop.f32.mrf.mxu1 }
 0x50a   : > { %v12607_v19 = vadd.f32 %v12606_v30, %v12605_v28 }
 0x50b   : > { %v10884_v12 = vadd.f32 %v12039_v8, %v10788_v18  ;;  %v12608_v27 = vpop.f32.mrf.mxu0  ;;  %v12952_v15 = vpop.f32.mrf.mxu1  ;;  %v12050_v8 = vunpack.c.l.bf16 %v12150_v13 }
 0x50c   : > { %v10698_v24 = vadd.f32 %v12607_v19, %v10697_v0 }
 0x50d   : > { %v10916_v48 = vmax.f32 %v10884_v12, 0.0  ;;  %v12609_v17 = vpop.f32.mrf.mxu0  ;;  %v10716_v31 = vpop.f32.mrf.mxu1  ;;  %v17087_v12 = vld [vmem:[#allocation21_spill] sm:$0xff] }
 0x50e   : > { %v10752_v14 = vadd.f32 %v10698_v24, %v16608_v39  ;;  %v12610_v7 = vadd.f32 %v12609_v17, %v12608_v27  ;;  %v12051_v24 = vunpack.c.h.bf16 %v12150_v13 }
 0x50f   : > { %v12114_v45 = vpack.c.bf16 %v10916_v48, %v10915_v4  ;;  %v12611_v16 = vpop.f32.mrf.mxu0 }
 0x510   : > { %v10789_v10 = vadd.f32 %v16657_v23, %v10752_v14  ;;  %v10701_v26 = vadd.f32 %v12610_v7, %v10700_v6  ;;  %v12151_v14 = vld [vmem:[#allocation2 + $0x1a0] sm:$0xff]  }
 0x511   : > { %12162 = vst [vmem:[%s13963_s12 + $0x58] sm:$0xff] %v12114_v45   ;;  %v12612_v54 = vpop.f32.mrf.mxu0  ;;  %v17088_v45 = vld [vmem:[#allocation45_spill] sm:$0xff] }
 0x512   : > { %v10753_v57 = vadd.f32 %v10701_v26, %v17085_v59  ;;  %v12613_v56 = vadd.f32 %v12612_v54, %v12611_v16  ;;  %v10885_v63 = vadd.f32 %v12042_v22, %v10789_v10  ;;  %v12054_v22 = vunpack.c.l.bf16 %v12151_v14 }
 0x513   : > { %v12614_v21 = vpop.f32.mrf.mxu0 }
 0x514   : > { %v10790_v36 = vadd.f32 %v16657_v23, %v10753_v57  ;;  %v10706_v39 = vadd.f32 %v12947_v52, %v12613_v56  ;;  %v10917_v55 = vmax.f32 %v10885_v63, 0.0  ;;  %v17089_v56 = vld [vmem:[#allocation44_spill] sm:$0xff] }
 0x515   : > { %v12615_v41 = vpop.f32.mrf.mxu0 }
 0x516   : > { %v10886_v61 = vadd.f32 %v12043_v20, %v10790_v36  ;;  %v10754_v38 = vadd.f32 %v10706_v39, %v17086_v37  ;;  %v12616_v47 = vadd.f32 %v12615_v41, %v12614_v21 }
 0x517   : > { %v12617_v62 = vpop.f32.mrf.mxu0 }
 0x518   : > { %v10918_v49 = vmax.f32 %v10886_v61, 0.0  ;;  %v10791_v32 = vadd.f32 %v16657_v23, %v10754_v38  ;;  %v10709_v5 = vadd.f32 %v12948_v34, %v12616_v47 }
 0x519   : > { %v12618_v42 = vpop.f32.mrf.mxu0 }
 0x51a   : > { %v12119_v40 = vpack.c.bf16 %v10918_v49, %v10917_v55  ;;  %v10755_v1 = vadd.f32 %v10709_v5, %v16627_v60  ;;  %v12619_v52 = vadd.f32 %v12618_v42, %v12617_v62  ;;  %v10887_v9 = vadd.f32 %v12046_v50, %v10791_v32 }
 0x51b   : > { %v12620_v51 = vpop.f32.mrf.mxu0 }
 0x51c   : > { %12163 = vst [vmem:[%s13963_s12 + $0x60] sm:$0xff] %v12119_v40   ;;  %v10792_v44 = vadd.f32 %v16657_v23, %v10755_v1  ;;  %v10714_v53 = vadd.f32 %v12619_v52, %v10713_v29  ;;  %v10919_v60 = vmax.f32 %v10887_v9, 0.0 }
 0x51d   : > { %v12621_v58 = vpop.f32.mrf.mxu0 }
 0x51e   : > { %v10888_v25 = vadd.f32 %v12047_v35, %v10792_v44  ;;  %v10756_v0 = vadd.f32 %v10714_v53, %v16632_v11  ;;  %v12622_v33 = vadd.f32 %v12621_v58, %v12620_v51 }
 0x51f   : > { %v12623_v28 = vpop.f32.mrf.mxu0 }
 0x520   : > { %v10920_v2 = vmax.f32 %v10888_v25, 0.0  ;;  %v10793_v18 = vadd.f32 %v16657_v23, %v10756_v0  ;;  %v10717_v30 = vadd.f32 %v12622_v33, %v10716_v31 }
 0x521   : > { %v12624_v19 = vpop.f32.mrf.mxu0 }
 0x522   : > { %v12124_v34 = vpack.c.bf16 %v10920_v2, %v10919_v60  ;;  %v10757_v27 = vadd.f32 %v10717_v30, %v17087_v12  ;;  %v12625_v4 = vadd.f32 %v12624_v19, %v12623_v28  ;;  %v10889_v46 = vadd.f32 %v12050_v8, %v10793_v18 }
 0x523   : > { %v12626_v48 = vpop.f32.mrf.mxu0 }
 0x524   : > { %12164 = vst [vmem:[%s13963_s12 + $0x68] sm:$0xff] %v12124_v34   ;;  %v10794_v11 = vadd.f32 %v16657_v23, %v10757_v27  ;;  %v10722_v17 = vadd.f32 %v12951_v3, %v12625_v4  ;;  %v10921_v26 = vmax.f32 %v10889_v46, 0.0  ;;  %v12055_v3 = vunpack.c.h.bf16 %v12151_v14 }
 0x525   : > { %v12627_v7 = vpop.f32.mrf.mxu0 }
 0x526   : > { %v10890_v6 = vadd.f32 %v12051_v24, %v10794_v11  ;;  %v10758_v16 = vadd.f32 %v10722_v17, %v17088_v45  ;;  %v12628_v10 = vadd.f32 %v12627_v7, %v12626_v48 }
 0x528   : > { %v10922_v54 = vmax.f32 %v10890_v6, 0.0  ;;  %v10795_v59 = vadd.f32 %v16657_v23, %v10758_v16  ;;  %v10725_v57 = vadd.f32 %v12952_v15, %v12628_v10 }
 0x52a   : > { %v12129_v20 = vpack.c.bf16 %v10922_v54, %v10921_v26  ;;  %v10759_v21 = vadd.f32 %v10725_v57, %v17089_v56  ;;  %v10891_v63 = vadd.f32 %v12054_v22, %v10795_v59 }
 0x52c   : > { %12165 = vst [vmem:[%s13963_s12 + $0x70] sm:$0xff] %v12129_v20   ;;  %v10796_v36 = vadd.f32 %v16657_v23, %v10759_v21  ;;  %v10923_v43 = vmax.f32 %v10891_v63, 0.0 }
 0x52e   : > { %v10892_v39 = vadd.f32 %v12055_v3, %v10796_v36 }
 0x530   : > { %v10924_v41 = vmax.f32 %v10892_v39, 0.0 }
 0x532   : > { %v12134_v61 = vpack.c.bf16 %v10924_v41, %v10923_v43 }
 0x534   : > { %12166 = vst [vmem:[%s13963_s12 + $0x78] sm:$0xff] %v12134_v61  }
 0x535   : > { %13605 = shalt.err (!%p13602_p11)
}
 0x536   : > { %s13606_s26 = scalar_lea.hbm %s16777_s7, 2048  ;;  %s13610_s6 = scalar_lea.hbm %s16833_s4, 4096 }
 0x537   : > { %p13607_p13 = scmp.ne.s32.totalorder %s16777_s7, %s13606_s26  ;;  %p13611_p7 = scmp.lt.s32.totalorder %s16777_s7, %s16833_s4 }
 0x538   : > { %p13612_p9 = scmp.lt.s32.totalorder %s13610_s6, %s13606_s26 }
 0x539   : > { %p13608_p0 = pnand %p13607_p13, %p17090_p2 }
 0x53a   : > { %p13613_p12 = por %p13612_p9, %p13611_p7 }
 0x53b   : > { %p13609_p6 = pneg %p13608_p0 }
 0x53d   : > { %p13614_p1 = pnand %p13613_p12, %p13609_p6 }
 0x53f   : > { %13617 = shalt.err (!%p13614_p1)
}
 0x540   : > { %s13691_s14 = smov 64   ;;  %s13692_s21 = smov 4  }
 0x541   : > { %12961 = dma.vmem_to_hbm [thread:$0]  (%p17090_p2), %s16779_s22, 2048, %s16777_s7, %s16784_s8, %s13691_s14, %s13691_s14, %s13692_s21  }
 0x542 PF: > { %p12978_p5 = scmp.ge.s32.totalorder %s13678_s20, 2  ;;  %s11117_s24 = sand.u32 1, %s13658_s15  }
 0x543   : > { %p17091_p3 = scmp.ne.s32.totalorder %s16839_s27, 0  ;;  %s11118_s30 = scalar_lea.sflag [#allocation7], %s11117_s24 }
 0x545   : > { %p12971_p4 = pnand %p12978_p5, %p17091_p3 }
 0x547   : > { %p12972_p8 = pneg %p12971_p4 }
 0x549   : > { %13653 = dma.done.wait (%p12972_p8), %s11118_s30, 2048  }
 0x54a   : > { %13655 = vsyncadd (%p12972_p8), %s11118_s30, 4294965248  ;;  %s19_s20 = sadd.s32 1, %s13678_s20   ;;  %s17092_s15 = smov %s13662_s16 }
 0x54b   : > { %p16_p10 = scmp.ge.s32.totalorder %s19_s20, 4   ;;  %s17093_s16 = smov %s13666_s17 }
 0x54c   : > { %s17094_s17 = smov %s13771_s28  ;;  %s17095_s18 = smov %s13674_s19 }
 0x54d   : > { %s17096_s19 = smov %s17098_s23  ;;  %18 = sbr.rel (!%p16_p10) target bundleno = 6 (0x6), region = 98 }
 0x552   :  { %11123 = vsyncpa [#allocation6], 1 }
 0x553   :  { %11125 = vsyncpa [#allocation6 + $0x1], 1 }
 0x554   :  { %11126 = vsyncpa [#allocation9], 1 }
 0x555   :  { %11127 = vsyncpa [#allocation7], 1 }
 0x556   :  { %11129 = vsyncpa [#allocation7 + $0x1], 1 }
 0x557   :  { %11130 = vsyncmov [#allocation4] }
 0x55a   :  { %s11131_s25 = vpop.sfrf %11130 }
 0x55b   :  { %p11921_p2 = scmp.ne.s32.totalorder %s11131_s25, 0 }
 0x55d   :  { %11135 = shalt.err (%p11921_p2)  }

</bundles_post_ra>
